<compile_context>
chip_gen: v6e
topology: v6e:2x2x1
jax: 0.10.0
libtpu: 0.0.40
codegen_flags: <defaults>
</compile_context>

<pallas_src>
import jax
import jax.numpy as jnp
from jax.experimental import pallas as pl
from jax.experimental.pallas import tpu as pltpu


def attention_agg_kernel(x_ref, neibs_ref, w1_ref, w2sq_ref, wx_ref, wn_ref, out_ref):
    # x_ref:     (TB, D)      f32  batch tile of node features
    # neibs_ref: (TB*N, D)    bf16 batch tile of neighbor features (row order b*N+n)
    # w1_ref:    (D, H) bf16  w2sq_ref: (H, H) bf16 (= w2 @ w2.T)
    # wx_ref/wn_ref: (D, Do) bf16
    # out_ref:   (TB, 2*Do)   f32
    tb = x_ref.shape[0]
    nrows = neibs_ref.shape[0]          # TB * N
    n = nrows // tb
    d = x_ref.shape[1]
    h_dim = w1_ref.shape[1]

    x_f32 = x_ref[...]                                  # (TB, D) f32
    x_bf16 = x_f32.astype(jnp.bfloat16)                 # cast once, reused twice
    neibs_bf16 = neibs_ref[...]                         # (TB*N, D) bf16

    # ---- first attention layer: two plain 2-D dots on the MXU, f32 accum ----
    h_n = jnp.tanh(jnp.dot(neibs_bf16, w1_ref[...],
                           preferred_element_type=jnp.float32))      # (TB*N, H)
    h_x = jnp.tanh(jnp.dot(x_bf16, w1_ref[...],
                           preferred_element_type=jnp.float32))      # (TB, H)

    # ---- folded second layer: x_proj = h_x @ (W2 W2^T) ----------------------
    x_proj = jnp.dot(h_x.astype(jnp.bfloat16), w2sq_ref[...],
                     preferred_element_type=jnp.float32)             # (TB, H)

    # ---- scores + softmax over the neighbor axis (f32, VPU/EUP) -------------
    scores = jnp.sum(h_n.reshape(tb, n, h_dim) * x_proj[:, None, :],
                     axis=-1)                                        # (TB, N)
    m = jnp.max(scores, axis=-1, keepdims=True)
    e = jnp.exp(scores - m)
    ws = e / jnp.sum(e, axis=-1, keepdims=True)                      # (TB, N)

    # ---- weighted neighbor sum: broadcast multiply + sublane reduce ---------
    neibs3 = neibs_bf16.reshape(tb, n, d).astype(jnp.float32)        # (TB, N, D)
    agg = jnp.sum(neibs3 * ws[:, :, None], axis=1)                   # (TB, D) f32

    # ---- output projections + ReLU, single lane-dense store -----------------
    out_x = jnp.dot(x_bf16, wx_ref[...],
                    preferred_element_type=jnp.float32)              # (TB, Do)
    out_n = jnp.dot(agg.astype(jnp.bfloat16), wn_ref[...],
                    preferred_element_type=jnp.float32)              # (TB, Do)
    out = jnp.concatenate([jnp.maximum(out_x, 0.0),
                           jnp.maximum(out_n, 0.0)], axis=1)         # (TB, 2*Do)
    out_ref[...] = out.astype(out_ref.dtype)


def attention_aggregator(x, neibs, w1, w2, wx, wn, *, batch_tile=None):
    B, D = x.shape
    BN, D2 = neibs.shape
    assert D2 == D
    N = BN // B
    H = w1.shape[1]
    Do = wx.shape[1]

    if batch_tile is None:
        # Aim for >=4 grid steps (>=2 per TensorCore on v7x) while keeping
        # tiles large (up to 512 rows) to amortize per-step overhead.
        batch_tile = max(8, min(512, B // 4)) if B >= 32 else B
    TB = min(batch_tile, B)
    assert B % TB == 0, "batch must be divisible by batch_tile"
    assert TB == B or TB % 8 == 0, "batch_tile must be a multiple of 8"
    grid = (B // TB,)

    # Weight / operand precasts (MXU-native bf16 path; f32 accumulation in-kernel).
    w1b = w1.astype(jnp.bfloat16)
    w2sq = (w2 @ w2.T).astype(jnp.bfloat16)        # folded second attention layer
    wxb = wx.astype(jnp.bfloat16)
    wnb = wn.astype(jnp.bfloat16)
    neibs_bf16 = neibs.astype(jnp.bfloat16)        # ~89% of input bytes -> halve DMA

    return pl.pallas_call(
        attention_agg_kernel,
        out_shape=jax.ShapeDtypeStruct((B, 2 * Do), jnp.float32),
        grid_spec=pltpu.PrefetchScalarGridSpec(
            num_scalar_prefetch=0,
            grid=grid,
            in_specs=[
                pl.BlockSpec((TB, D), lambda i: (i, 0)),        # x tile (f32)
                pl.BlockSpec((TB * N, D), lambda i: (i, 0)),    # flat neighbor tile (bf16)
                pl.BlockSpec((D, H), lambda i: (0, 0)),         # w1 (replicated)
                pl.BlockSpec((H, H), lambda i: (0, 0)),         # w2 @ w2.T
                pl.BlockSpec((D, Do), lambda i: (0, 0)),        # wx
                pl.BlockSpec((D, Do), lambda i: (0, 0)),        # wn
            ],
            out_specs=pl.BlockSpec((TB, 2 * Do), lambda i: (i, 0)),
        ),
        compiler_params=pltpu.CompilerParams(
            dimension_semantics=("parallel",)),
    )(x, neibs_bf16, w1b, w2sq, wxb, wnb)


def reference(x, neibs, w1, w2, wx, wn):
    """Pure-JAX (f32) replica of the PyTorch forward (activation = ReLU)."""
    B, D = x.shape
    att = lambda t: jnp.tanh(t @ w1) @ w2
    neib_att = att(neibs).reshape(B, -1, w2.shape[1])
    x_att = att(x)
    scores = jnp.einsum("bnh,bh->bn", neib_att, x_att)
    ws = jax.nn.softmax(scores, axis=1)
    agg = jnp.sum(neibs.reshape(B, -1, D) * ws[..., None], axis=1)
    out = jnp.concatenate([x @ wx, agg @ wn], axis=1)
    return jnp.maximum(out, 0.0)


if __name__ == "__main__":
    # Shapes consistent with the module: N neighbors per node, input_dim=32,
    # hidden_dim=32, output_dim=16.  B=512 with the default tile gives TB=128
    # and a grid of 4 (>=2 steps per TensorCore on v7x).
    B, N, D_IN, HID, D_OUT = 512, 8, 32, 32, 16

    key = jax.random.PRNGKey(0)
    kx, kn, k1, k2, k3, k4 = jax.random.split(key, 6)

    x = jax.random.normal(kx, (B, D_IN), dtype=jnp.float32)
    neibs = jax.random.normal(kn, (B * N, D_IN), dtype=jnp.float32)

    # nn.Linear weights (no bias), stored pre-transposed as [in, out].
    w1 = 0.1 * jax.random.normal(k1, (D_IN, HID), dtype=jnp.float32)    # att[0]
    w2 = 0.1 * jax.random.normal(k2, (HID, HID), dtype=jnp.float32)     # att[2]
    wx = 0.1 * jax.random.normal(k3, (D_IN, D_OUT), dtype=jnp.float32)  # fc_x
    wn = 0.1 * jax.random.normal(k4, (D_IN, D_OUT), dtype=jnp.float32)  # fc_neib

    out = attention_aggregator(x, neibs, w1, w2, wx, wn)
    out = jax.block_until_ready(out)

    ref = reference(x, neibs, w1, w2, wx, wn)
    assert out.shape == (B, 2 * D_OUT)
    # bf16 MXU operands / bf16 neighbors in HBM with f32 accumulation ->
    # tolerance loosened vs the pure-f32 reference.
    max_err = float(jnp.max(jnp.abs(out - ref)))
    assert jnp.allclose(out, ref, atol=5e-2, rtol=5e-2), f"mismatch, max_err={max_err}"

    print("KERNEL_OK")
</pallas_src>

<mosaic_0001>
module attributes {stable_mosaic.version = 11 : i64} {
  func.func @attention_agg_kernel(%arg0: i32, %arg1: memref<128x32xf32, #tpu.memory_space<vmem>>, %arg2: memref<1024x32xbf16, #tpu.memory_space<vmem>>, %arg3: memref<32x32xbf16, #tpu.memory_space<vmem>>, %arg4: memref<32x32xbf16, #tpu.memory_space<vmem>>, %arg5: memref<32x16xbf16, #tpu.memory_space<vmem>>, %arg6: memref<32x16xbf16, #tpu.memory_space<vmem>>, %arg7: memref<128x32xf32, #tpu.memory_space<vmem>>) attributes {dimension_semantics = [#tpu.dimension_semantics<parallel>], iteration_bounds = array<i64: 4>, scalar_prefetch = 0 : i64, scratch_operands = 0 : i64, tpu.core_type = #tpu.core_type<tc>, window_params = [{transform_indices = @transform_0, window_bounds = array<i64: 128, 32>}, {transform_indices = @transform_1, window_bounds = array<i64: 1024, 32>}, {pipeline_mode = #tpu.pipeline_mode<synchronous>, transform_indices = @transform_2, window_bounds = array<i64: 32, 32>}, {pipeline_mode = #tpu.pipeline_mode<synchronous>, transform_indices = @transform_3, window_bounds = array<i64: 32, 32>}, {pipeline_mode = #tpu.pipeline_mode<synchronous>, transform_indices = @transform_4, window_bounds = array<i64: 32, 16>}, {pipeline_mode = #tpu.pipeline_mode<synchronous>, transform_indices = @transform_5, window_bounds = array<i64: 32, 16>}, {transform_indices = @transform_6, window_bounds = array<i64: 128, 32>}]} {
    %c0 = arith.constant 0 : index
    %c0_0 = arith.constant 0 : index
    %0 = vector.load %arg1[%c0, %c0_0] : memref<128x32xf32, #tpu.memory_space<vmem>>, vector<128x32xf32>
    %1 = arith.truncf %0 : vector<128x32xf32> to vector<128x32xbf16>
    %c0_1 = arith.constant 0 : index
    %c0_2 = arith.constant 0 : index
    %2 = vector.load %arg2[%c0_1, %c0_2] : memref<1024x32xbf16, #tpu.memory_space<vmem>>, vector<1024x32xbf16>
    %c0_3 = arith.constant 0 : index
    %c0_4 = arith.constant 0 : index
    %3 = vector.load %arg3[%c0_3, %c0_4] : memref<32x32xbf16, #tpu.memory_space<vmem>>, vector<32x32xbf16>
    %cst = arith.constant dense<0.000000e+00> : vector<1024x32xf32>
    %4 = tpu.matmul %2, %3, %cst {dimension_numbers = #tpu.dot_dimension_numbers<[1], [0], [0], [1], [0, 0, 1, 1], [], []>} : vector<1024x32xbf16>, vector<32x32xbf16>, vector<1024x32xf32> -> vector<1024x32xf32>
    %5 = math.tanh %4 : vector<1024x32xf32>
    %c0_5 = arith.constant 0 : index
    %c0_6 = arith.constant 0 : index
    %6 = vector.load %arg3[%c0_5, %c0_6] : memref<32x32xbf16, #tpu.memory_space<vmem>>, vector<32x32xbf16>
    %cst_7 = arith.constant dense<0.000000e+00> : vector<128x32xf32>
    %7 = tpu.matmul %1, %6, %cst_7 {dimension_numbers = #tpu.dot_dimension_numbers<[1], [0], [0], [1], [0, 0, 1, 1], [], []>} : vector<128x32xbf16>, vector<32x32xbf16>, vector<128x32xf32> -> vector<128x32xf32>
    %8 = math.tanh %7 : vector<128x32xf32>
    %9 = arith.truncf %8 : vector<128x32xf32> to vector<128x32xbf16>
    %c0_8 = arith.constant 0 : index
    %c0_9 = arith.constant 0 : index
    %10 = vector.load %arg4[%c0_8, %c0_9] : memref<32x32xbf16, #tpu.memory_space<vmem>>, vector<32x32xbf16>
    %cst_10 = arith.constant dense<0.000000e+00> : vector<128x32xf32>
    %11 = tpu.matmul %9, %10, %cst_10 {dimension_numbers = #tpu.dot_dimension_numbers<[1], [0], [0], [1], [0, 0, 1, 1], [], []>} : vector<128x32xbf16>, vector<32x32xbf16>, vector<128x32xf32> -> vector<128x32xf32>
    %12 = vector.shape_cast %5 : vector<1024x32xf32> to vector<128x8x32xf32>
    %13 = vector.shape_cast %11 : vector<128x32xf32> to vector<128x1x32xf32>
    %14 = vector.broadcast %13 : vector<128x1x32xf32> to vector<128x8x32xf32>
    %15 = arith.mulf %12, %14 : vector<128x8x32xf32>
    %cst_11 = arith.constant dense<0.000000e+00> : vector<128x8xf32>
    %16 = vector.multi_reduction <add>, %15, %cst_11 [2] : vector<128x8x32xf32> to vector<128x8xf32>
    %cst_12 = arith.constant dense<0xFF800000> : vector<128xf32>
    %17 = vector.multi_reduction <maximumf>, %16, %cst_12 [1] : vector<128x8xf32> to vector<128xf32>
    %18 = vector.shape_cast %17 : vector<128xf32> to vector<128x1xf32>
    %19 = vector.broadcast %18 : vector<128x1xf32> to vector<128x8xf32>
    %20 = arith.subf %16, %19 : vector<128x8xf32>
    %21 = math.exp %20 : vector<128x8xf32>
    %cst_13 = arith.constant dense<0.000000e+00> : vector<128xf32>
    %22 = vector.multi_reduction <add>, %21, %cst_13 [1] : vector<128x8xf32> to vector<128xf32>
    %23 = vector.shape_cast %22 : vector<128xf32> to vector<128x1xf32>
    %24 = vector.broadcast %23 : vector<128x1xf32> to vector<128x8xf32>
    %25 = arith.divf %21, %24 : vector<128x8xf32>
    %26 = vector.shape_cast %2 : vector<1024x32xbf16> to vector<128x8x32xbf16>
    %27 = arith.extf %26 : vector<128x8x32xbf16> to vector<128x8x32xf32>
    %28 = vector.shape_cast %25 : vector<128x8xf32> to vector<128x8x1xf32>
    %29 = vector.broadcast %28 : vector<128x8x1xf32> to vector<128x8x32xf32>
    %30 = arith.mulf %27, %29 : vector<128x8x32xf32>
    %cst_14 = arith.constant dense<0.000000e+00> : vector<128x32xf32>
    %31 = vector.multi_reduction <add>, %30, %cst_14 [1] : vector<128x8x32xf32> to vector<128x32xf32>
    %c0_15 = arith.constant 0 : index
    %c0_16 = arith.constant 0 : index
    %32 = vector.load %arg5[%c0_15, %c0_16] : memref<32x16xbf16, #tpu.memory_space<vmem>>, vector<32x16xbf16>
    %cst_17 = arith.constant dense<0.000000e+00> : vector<128x16xf32>
    %33 = tpu.matmul %1, %32, %cst_17 {dimension_numbers = #tpu.dot_dimension_numbers<[1], [0], [0], [1], [0, 0, 1, 1], [], []>} : vector<128x32xbf16>, vector<32x16xbf16>, vector<128x16xf32> -> vector<128x16xf32>
    %34 = arith.truncf %31 : vector<128x32xf32> to vector<128x32xbf16>
    %c0_18 = arith.constant 0 : index
    %c0_19 = arith.constant 0 : index
    %35 = vector.load %arg6[%c0_18, %c0_19] : memref<32x16xbf16, #tpu.memory_space<vmem>>, vector<32x16xbf16>
    %cst_20 = arith.constant dense<0.000000e+00> : vector<128x16xf32>
    %36 = tpu.matmul %34, %35, %cst_20 {dimension_numbers = #tpu.dot_dimension_numbers<[1], [0], [0], [1], [0, 0, 1, 1], [], []>} : vector<128x32xbf16>, vector<32x16xbf16>, vector<128x16xf32> -> vector<128x16xf32>
    %cst_21 = arith.constant 0.000000e+00 : f32
    %37 = vector.broadcast %cst_21 : f32 to vector<128x16xf32>
    %38 = arith.maximumf %33, %37 : vector<128x16xf32>
    %cst_22 = arith.constant 0.000000e+00 : f32
    %39 = vector.broadcast %cst_22 : f32 to vector<128x16xf32>
    %40 = arith.maximumf %36, %39 : vector<128x16xf32>
    %41 = tpu.concatenate %38, %40 in 1 : vector<128x16xf32>, vector<128x16xf32> -> vector<128x32xf32>
    %c0_23 = arith.constant 0 : index
    %c0_24 = arith.constant 0 : index
    %42 = vector.load %arg7[%c0_23, %c0_24] : memref<128x32xf32, #tpu.memory_space<vmem>>, vector<128x32xf32>
    tpu.vector_store %arg7[%c0_23, %c0_24], %41 {strides = array<i32>} : memref<128x32xf32, #tpu.memory_space<vmem>>, vector<128x32xf32>,
    return
  }
  func.func @transform_0(%arg0: i32) -> (i32, i32) {
    %c0_i32 = arith.constant 0 : i32
    %c0_i32_0 = arith.constant 0 : i32
    return %arg0, %c0_i32 : i32, i32
  }
  func.func @transform_1(%arg0: i32) -> (i32, i32) {
    %c0_i32 = arith.constant 0 : i32
    %c0_i32_0 = arith.constant 0 : i32
    return %arg0, %c0_i32 : i32, i32
  }
  func.func @transform_2(%arg0: i32) -> (i32, i32) {
    %c0_i32 = arith.constant 0 : i32
    %c0_i32_0 = arith.constant 0 : i32
    %c0_i32_1 = arith.constant 0 : i32
    return %c0_i32, %c0_i32_0 : i32, i32
  }
  func.func @transform_3(%arg0: i32) -> (i32, i32) {
    %c0_i32 = arith.constant 0 : i32
    %c0_i32_0 = arith.constant 0 : i32
    %c0_i32_1 = arith.constant 0 : i32
    return %c0_i32, %c0_i32_0 : i32, i32
  }
  func.func @transform_4(%arg0: i32) -> (i32, i32) {
    %c0_i32 = arith.constant 0 : i32
    %c0_i32_0 = arith.constant 0 : i32
    %c0_i32_1 = arith.constant 0 : i32
    return %c0_i32, %c0_i32_0 : i32, i32
  }
  func.func @transform_5(%arg0: i32) -> (i32, i32) {
    %c0_i32 = arith.constant 0 : i32
    %c0_i32_0 = arith.constant 0 : i32
    %c0_i32_1 = arith.constant 0 : i32
    return %c0_i32, %c0_i32_0 : i32, i32
  }
  func.func @transform_6(%arg0: i32) -> (i32, i32) {
    %c0_i32 = arith.constant 0 : i32
    %c0_i32_0 = arith.constant 0 : i32
    return %arg0, %c0_i32 : i32, i32
  }
}

</mosaic_0001>

<bundles_post_ra>
// kernel: tpu_custom_call.1
= control target key start
LH: loop header
LB: loop body
LE: loop exit
PB: predicated region body
PF: predicated region fallthrough
CT: control target
= control target key end

     0   :  { %s12149_s21 = smov 0   ;;  %s17237_s0 = inlined_call_operand.vmem [shape: f32[512,32], index: 0, kind: input, shape index: {}]   ;;  %s17238_s1 = inlined_call_operand.vmem [shape: bf16[4096,32], index: 1, kind: input, shape index: {}]   ;;  %s17239_s2 = inlined_call_operand.vmem [shape: bf16[32,32], index: 2, kind: input, shape index: {}]   ;;  %s17240_s3 = inlined_call_operand.vmem [shape: bf16[32,32], index: 3, kind: input, shape index: {}]   ;;  %s17241_s4 = inlined_call_operand.vmem [shape: bf16[32,16], index: 4, kind: input, shape index: {}]   ;;  %s17242_s5 = inlined_call_operand.vmem [shape: bf16[32,16], index: 5, kind: input, shape index: {}]   ;;  %s17243_s6 = inlined_call_operand.vmem [shape: f32[512,32], index: 6, kind: output, shape index: {}]  }
   0x1 LB: > { %s10587_s22 = sadd.s32 4294967295, %s12109_s21   ;;  %p10591_p0 = scmp.ge.s32.totalorder %s12109_s21, 1  ;;  %s12109_s21 = sphi %s12149_s21, %s16_s21  }
   0x2   : > { %p224_p1 = scmp.lt.s32.totalorder %s12109_s21, 5 }
   0x4   : > { %p225_p2 = pnand %p10591_p0, %p224_p1 }
   0x6   : > { %228 = sbr.rel (%p225_p2) target bundleno = 2195 (0x893), region = 44 }
   0xb   : > { %v11103_v0 = vld [vmem:[%s17239_s2 + $0x8] sm:$0xff]   ;;  %s10594_s25 = sshll.u32 %s10587_s22, 7  ;;  %v11104_v1 = vld [vmem:[%s17239_s2] sm:$0xff]   ;;  %vm766_vm0 = vcmask 261120   ;;  %s10592_s8 = sshll.u32 %s10587_s22, 4  ;;  %vm4508_vm1 = vcmask 1041409  }
   0xc   : > { %p266_p3 = scmp.lt.s32.totalorder %s10594_s25, 511  ;;  %11086 = vmatprep.subr.bf16.mxu1 %v11103_v0  ;;  %10874 = vmatprep.subr.bf16.mxu0 %v11103_v0  ;;  %p260_p4 = scmp.lt.s32.totalorder %s10592_s8, 63  ;;  %v11133_v56 = vld [vmem:[%s17240_s3 + $0x8] sm:$0xff]   ;;  %v11138_v63 = vld [vmem:[%s17240_s3] sm:$0xff]   ;;  %vm4510_vm2 = vcmask 1042434   ;;  %vm4512_vm3 = vcmask 1043459  }
   0xd   : > { %11088 = vmatpush3.bf16.msra.mxu1 %v11103_v0  ;;  %10875 = vmatpush3.bf16.msra.mxu0 %v11103_v0  ;;  %vm4514_vm4 = vcmask 1044484   ;;  %vm4516_vm5 = vcmask 1045509   ;;  %vm4518_vm6 = vcmask 1046534   ;;  %vm4520_vm7 = vcmask 1047559   ;;  %s12113_s26 = smov 16  }
   0xe   : > { %s18280_s25 = smov (!%p266_p3, %s10594_s25), 511  ;;  %11087 = vmatprep.subr.bf16.mxu1 %v11104_v1  ;;  %10876 = vmatprep.subr.bf16.mxu0 %v11104_v1  ;;  %s18282_s8 = smov (!%p260_p4, %s10592_s8), 63  ;;  %vm4643_vm8 = vcmask 64512   ;;  %vm10486_vm9 = vcmask 130048  }
   0xf   : > { %s10595_s28 = sshll.u32 %s18280_s25, 2  ;;  %s10593_s9 = sshll.u32 %s18282_s8, 3 }
  0x10   : > { %s12168_s7 = scalar_lea.vmem %s17238_s1, %s10595_s28  ;;  %s12208_s12 = scalar_lea.vmem %s17237_s0, %s10593_s9 }
  0x11   : > { %11089 = vmatpush3.bf16.msra.mxu1 %v11104_v1  ;;  %v398_v2 = vld [vmem:[%s12168_s7 + $0x180] sm:$0xff]   ;;  %v400_v3 = vld [vmem:[%s12168_s7 + $0x188] sm:$0xff]   ;;  %v402_v4 = vld [vmem:[%s12168_s7 + $0x190] sm:$0xff]   ;;  %10877 = vmatpush3.bf16.msra.mxu0 %v11104_v1  ;;  %s17161_s29 = scalar_lea.vmem %s17243_s6, %s10593_s9 }
  0x12   : > { %11006 = vmatprep.subr.bf16.mxu1 %v11103_v0  ;;  %10974 = vmatprep.mubr.msk.bf16.mxu1 %vm766_vm0, %v398_v2  ;;  %v404_v5 = vld [vmem:[%s12168_s7 + $0x198] sm:$0xff]   ;;  %v406_v6 = vld [vmem:[%s12168_s7 + $0x1a0] sm:$0xff]   ;;  %v408_v7 = vld [vmem:[%s12168_s7 + $0x1a8] sm:$0xff]  }
  0x13   : > { %v410_v8 = vld [vmem:[%s12168_s7 + $0x1b0] sm:$0xff]   ;;  %v412_v9 = vld [vmem:[%s12168_s7 + $0x1b8] sm:$0xff]   ;;  %v414_v10 = vld [vmem:[%s12168_s7 + $0x1c0] sm:$0xff]  }
  0x14   : > { %10975 = vmatmul.mubr.msk.bf16.vlgmr.msra.gmra.mxu1 %vm766_vm0, %v400_v3  ;;  %v416_v11 = vld [vmem:[%s12168_s7 + $0x1c8] sm:$0xff]   ;;  %v418_v12 = vld [vmem:[%s12168_s7 + $0x1d0] sm:$0xff]   ;;  %v420_v13 = vld [vmem:[%s12168_s7 + $0x1d8] sm:$0xff]  }
  0x15   : > { %11007 = vmatpush3.bf16.msra.mxu1 %v11103_v0  ;;  %10978 = vmatprep.mubr.msk.bf16.mxu1 %vm766_vm0, %v402_v4  ;;  %v422_v14 = vld [vmem:[%s12168_s7 + $0x1e0] sm:$0xff]   ;;  %v424_v15 = vld [vmem:[%s12168_s7 + $0x1e8] sm:$0xff]   ;;  %v426_v16 = vld [vmem:[%s12168_s7 + $0x1f0] sm:$0xff]  }
  0x16   : > { %11008 = vmatprep.subr.bf16.mxu1 %v11104_v1  ;;  %v428_v17 = vld [vmem:[%s12168_s7 + $0x1f8] sm:$0xff]   ;;  %v278_v18 = vld [vmem:[%s12208_s12] sm:$0xff]  ;;  %v279_v19 = vld [vmem:[%s12208_s12 + $0x8] sm:$0xff] }
  0x17   : > { %v12215_v20 = vpack.c.bf16 %v279_v19, %v278_v18  ;;  %v280_v21 = vld [vmem:[%s12208_s12 + $0x10] sm:$0xff]  ;;  %v281_v22 = vld [vmem:[%s12208_s12 + $0x18] sm:$0xff]  ;;  %v282_v23 = vld [vmem:[%s12208_s12 + $0x20] sm:$0xff] }
  0x18   : > { %v283_v24 = vld [vmem:[%s12208_s12 + $0x28] sm:$0xff]  ;;  %v12224_v25 = vpack.c.bf16 %v281_v22, %v280_v21  ;;  %v284_v27 = vld [vmem:[%s12208_s12 + $0x30] sm:$0xff]  ;;  %v285_v28 = vld [vmem:[%s12208_s12 + $0x38] sm:$0xff] }
  0x19   : > { %11009 = vmatpush3.bf16.msra.mxu1 %v11104_v1  ;;  %v12226_v26 = vpack.c.bf16 %v283_v24, %v282_v23  ;;  %v286_v29 = vld [vmem:[%s12208_s12 + $0x40] sm:$0xff]  ;;  %v287_v30 = vld [vmem:[%s12208_s12 + $0x48] sm:$0xff]  ;;  %v12236_v31 = vpack.c.bf16 %v285_v28, %v284_v27  ;;  %v288_v35 = vld [vmem:[%s12208_s12 + $0x50] sm:$0xff] }
  0x1a   : > { %17519 = vst [vmem:[#allocation2_spill] sm:$0xff] %v12224_v25  ;;  %v12238_v32 = vpack.c.bf16 %v287_v30, %v286_v29  ;;  %v302_v33 = vld [vmem:[%s12168_s7] sm:$0xff]   ;;  %v304_v34 = vld [vmem:[%s12168_s7 + $0x8] sm:$0xff]   ;;  %v289_v36 = vld [vmem:[%s12208_s12 + $0x58] sm:$0xff]  ;;  %11026 = vmatprep.subr.bf16.mxu1 %v11133_v56 }
  0x1b   : > { %17520 = vst [vmem:[#allocation3_spill] sm:$0xff] %v12226_v26  ;;  %17521 = vst [vmem:[#allocation4_spill] sm:$0xff] %v12236_v31  ;;  %v290_v37 = vld [vmem:[%s12208_s12 + $0x60] sm:$0xff]  ;;  %v291_v38 = vld [vmem:[%s12208_s12 + $0x68] sm:$0xff]  ;;  %10878 = vmatprep.mubr.msk.bf16.mxu0 %vm766_vm0, %v302_v33  ;;  %v12252_v39 = vpack.c.bf16 %v289_v36, %v288_v35 }
  0x1c   : > { %10979 = vmatmul.mubr.msk.bf16.gmra.mxu1 %vm766_vm0, %v404_v5  ;;  %17522 = vst [vmem:[#allocation5_spill] sm:$0xff] %v12238_v32  ;;  %10879 = vmatmul.mubr.msk.bf16.vlgmr.msra.gmra.mxu0 %vm766_vm0, %v304_v34  ;;  %v12254_v40 = vpack.c.bf16 %v291_v38, %v290_v37  ;;  %v306_v41 = vld [vmem:[%s12168_s7 + $0x10] sm:$0xff]   ;;  %v308_v42 = vld [vmem:[%s12168_s7 + $0x18] sm:$0xff]   ;;  %v310_v46 = vld [vmem:[%s12168_s7 + $0x20] sm:$0xff]  }
  0x1d   : > { %10982 = vmatprep.mubr.msk.bf16.mxu1 %vm766_vm0, %v406_v6  ;;  %17523 = vst [vmem:[#allocation6_spill] sm:$0xff] %v12252_v39  ;;  %v292_v43 = vld [vmem:[%s12208_s12 + $0x70] sm:$0xff]  ;;  %v293_v44 = vld [vmem:[%s12208_s12 + $0x78] sm:$0xff]  ;;  %10882 = vmatprep.mubr.msk.bf16.mxu0 %vm766_vm0, %v306_v41  ;;  %v312_v47 = vld [vmem:[%s12168_s7 + $0x28] sm:$0xff]  }
  0x1e   : > { %17524 = vst [vmem:[#allocation7_spill] sm:$0xff] %v12254_v40  ;;  %v12266_v45 = vpack.c.bf16 %v293_v44, %v292_v43  ;;  %v314_v48 = vld [vmem:[%s12168_s7 + $0x30] sm:$0xff]   ;;  %v316_v49 = vld [vmem:[%s12168_s7 + $0x38] sm:$0xff]   ;;  %v318_v50 = vld [vmem:[%s12168_s7 + $0x40] sm:$0xff]  }
  0x1f   : > { %v320_v51 = vld [vmem:[%s12168_s7 + $0x48] sm:$0xff]   ;;  %v322_v52 = vld [vmem:[%s12168_s7 + $0x50] sm:$0xff]   ;;  %v324_v53 = vld [vmem:[%s12168_s7 + $0x58] sm:$0xff]  }
  0x20   : > { %17525 = vst [vmem:[#allocation8_spill] sm:$0xff] %v12266_v45  ;;  %v326_v54 = vld [vmem:[%s12168_s7 + $0x60] sm:$0xff]   ;;  %v328_v55 = vld [vmem:[%s12168_s7 + $0x68] sm:$0xff]   ;;  %v330_v57 = vld [vmem:[%s12168_s7 + $0x70] sm:$0xff]  }
  0x21   : > { %v332_v58 = vld [vmem:[%s12168_s7 + $0x78] sm:$0xff]   ;;  %v334_v59 = vld [vmem:[%s12168_s7 + $0x80] sm:$0xff]   ;;  %v336_v60 = vld [vmem:[%s12168_s7 + $0x88] sm:$0xff]  }
  0x22   : > { %v338_v61 = vld [vmem:[%s12168_s7 + $0x90] sm:$0xff]   ;;  %v340_v62 = vld [vmem:[%s12168_s7 + $0x98] sm:$0xff]   ;;  %v342_v0 = vld [vmem:[%s12168_s7 + $0xa0] sm:$0xff]  }
  0x23   : > { %v344_v1 = vld [vmem:[%s12168_s7 + $0xa8] sm:$0xff]   ;;  %v346_v2 = vld [vmem:[%s12168_s7 + $0xb0] sm:$0xff]   ;;  %v348_v3 = vld [vmem:[%s12168_s7 + $0xb8] sm:$0xff]  }
  0x24   : > { %10983 = vmatmul.mubr.msk.bf16.gmra.mxu1 %vm766_vm0, %v408_v7  ;;  %10883 = vmatmul.mubr.msk.bf16.gmra.mxu0 %vm766_vm0, %v308_v42  ;;  %v350_v4 = vld [vmem:[%s12168_s7 + $0xc0] sm:$0xff]   ;;  %v352_v5 = vld [vmem:[%s12168_s7 + $0xc8] sm:$0xff]   ;;  %v354_v6 = vld [vmem:[%s12168_s7 + $0xd0] sm:$0xff]  }
  0x25   : > { %10986 = vmatprep.mubr.msk.bf16.mxu1 %vm766_vm0, %v410_v8  ;;  %10886 = vmatprep.mubr.msk.bf16.mxu0 %vm766_vm0, %v310_v46  ;;  %v356_v7 = vld [vmem:[%s12168_s7 + $0xd8] sm:$0xff]   ;;  %v358_v8 = vld [vmem:[%s12168_s7 + $0xe0] sm:$0xff]   ;;  %v376_v33 = vld [vmem:[%s12168_s7 + $0x128] sm:$0xff]  }
  0x26   : > { %v372_v23 = vld [vmem:[%s12168_s7 + $0x118] sm:$0xff]   ;;  %v374_v24 = vld [vmem:[%s12168_s7 + $0x120] sm:$0xff]   ;;  %v378_v34 = vld [vmem:[%s12168_s7 + $0x130] sm:$0xff]  }
  0x27   : > { %v380_v41 = vld [vmem:[%s12168_s7 + $0x138] sm:$0xff]   ;;  %v382_v42 = vld [vmem:[%s12168_s7 + $0x140] sm:$0xff]  }
  0x2c   : > { %10987 = vmatmul.mubr.msk.bf16.gmra.mxu1 %vm766_vm0, %v412_v9  ;;  %10887 = vmatmul.mubr.msk.bf16.gmra.mxu0 %vm766_vm0, %v312_v47  ;;  %v360_v9 = vld [vmem:[%s12168_s7 + $0xe8] sm:$0xff]  }
  0x2d   : > { %10990 = vmatprep.mubr.msk.bf16.mxu1 %vm766_vm0, %v414_v10  ;;  %10890 = vmatprep.mubr.msk.bf16.mxu0 %vm766_vm0, %v314_v48  ;;  %v362_v10 = vld [vmem:[%s12168_s7 + $0xf0] sm:$0xff]   ;;  %v384_v48 = vld [vmem:[%s12168_s7 + $0x148] sm:$0xff]  }
  0x34   : > { %10991 = vmatmul.mubr.msk.bf16.gmra.mxu1 %vm766_vm0, %v416_v11  ;;  %10891 = vmatmul.mubr.msk.bf16.gmra.mxu0 %vm766_vm0, %v316_v49  ;;  %v364_v11 = vld [vmem:[%s12168_s7 + $0xf8] sm:$0xff]   ;;  %v386_v49 = vld [vmem:[%s12168_s7 + $0x150] sm:$0xff]  }
  0x35   : > { %10994 = vmatprep.mubr.msk.bf16.mxu1 %vm766_vm0, %v418_v12  ;;  %10894 = vmatprep.mubr.msk.bf16.mxu0 %vm766_vm0, %v318_v50  ;;  %v366_v12 = vld [vmem:[%s12168_s7 + $0x100] sm:$0xff]  }
  0x3c   : > { %10995 = vmatmul.mubr.msk.bf16.gmra.mxu1 %vm766_vm0, %v420_v13  ;;  %10895 = vmatmul.mubr.msk.bf16.gmra.mxu0 %vm766_vm0, %v320_v51 }
  0x3d   : > { %10998 = vmatprep.mubr.msk.bf16.mxu1 %vm766_vm0, %v422_v14  ;;  %10898 = vmatprep.mubr.msk.bf16.mxu0 %vm766_vm0, %v322_v52 }
  0x44   : > { %10999 = vmatmul.mubr.msk.bf16.gmra.mxu1 %vm766_vm0, %v424_v15  ;;  %10899 = vmatmul.mubr.msk.bf16.gmra.mxu0 %vm766_vm0, %v324_v53 }
  0x45   : > { %11002 = vmatprep.mubr.msk.bf16.mxu1 %vm766_vm0, %v426_v16  ;;  %10902 = vmatprep.mubr.msk.bf16.mxu0 %vm766_vm0, %v326_v54  ;;  %v368_v16 = vld [vmem:[%s12168_s7 + $0x108] sm:$0xff]   ;;  %v388_v54 = vld [vmem:[%s12168_s7 + $0x158] sm:$0xff]  }
  0x4c   : > { %11003 = vmatmul.mubr.msk.bf16.gmra.mxu1 %vm766_vm0, %v428_v17  ;;  %10903 = vmatmul.mubr.msk.bf16.gmra.mxu0 %vm766_vm0, %v328_v55  ;;  %v370_v17 = vld [vmem:[%s12168_s7 + $0x110] sm:$0xff]   ;;  %v390_v55 = vld [vmem:[%s12168_s7 + $0x160] sm:$0xff]  }
  0x4d   : > { %11010 = vmatprep.mubr.msk.bf16.mxu1 %vm766_vm0, %v12215_v20  ;;  %10906 = vmatprep.mubr.msk.bf16.mxu0 %vm766_vm0, %v330_v57 }
  0x54   : > { %11011 = vmatmul.mubr.msk.bf16.vlgmr.msra.gmra.mxu1 %vm766_vm0, %v12224_v25  ;;  %10907 = vmatmul.mubr.msk.bf16.gmra.mxu0 %vm766_vm0, %v332_v58 }
  0x55   : > { %11014 = vmatprep.mubr.msk.bf16.mxu1 %vm766_vm0, %v12226_v26  ;;  %11027 = vmatpush3.bf16.msra.mxu1 %v11133_v56 }
  0x56   : > { %10910 = vmatprep.mubr.msk.bf16.mxu0 %vm766_vm0, %v334_v59  ;;  %11028 = vmatprep.subr.bf16.mxu1 %v11138_v63 }
  0x59   : > { %11029 = vmatpush3.bf16.msra.mxu1 %v11138_v63 }
  0x5c   : > { %11015 = vmatmul.mubr.msk.bf16.gmra.mxu1 %vm766_vm0, %v12236_v31  ;;  %10911 = vmatmul.mubr.msk.bf16.gmra.mxu0 %vm766_vm0, %v336_v60  ;;  %v392_v60 = vld [vmem:[%s12168_s7 + $0x168] sm:$0xff]  }
  0x5d   : > { %11018 = vmatprep.mubr.msk.bf16.mxu1 %vm766_vm0, %v12238_v32  ;;  %10914 = vmatprep.mubr.msk.bf16.mxu0 %vm766_vm0, %v338_v61  ;;  %v394_v61 = vld [vmem:[%s12168_s7 + $0x170] sm:$0xff]  }
  0x64   : > { %11019 = vmatmul.mubr.msk.bf16.gmra.mxu1 %vm766_vm0, %v12252_v39  ;;  %10915 = vmatmul.mubr.msk.bf16.gmra.mxu0 %vm766_vm0, %v340_v62 }
  0x65   : > { %11022 = vmatprep.mubr.msk.bf16.mxu1 %vm766_vm0, %v12254_v40  ;;  %10918 = vmatprep.mubr.msk.bf16.mxu0 %vm766_vm0, %v342_v0 }
  0x6c   : > { %11023 = vmatmul.mubr.msk.bf16.gmra.mxu1 %vm766_vm0, %v12266_v45  ;;  %10919 = vmatmul.mubr.msk.bf16.gmra.mxu0 %vm766_vm0, %v344_v1 }
  0x6d   : > { %10922 = vmatprep.mubr.msk.bf16.mxu0 %vm766_vm0, %v346_v2  ;;  %v396_v2 = vld [vmem:[%s12168_s7 + $0x178] sm:$0xff]  }
  0x74   : > { %10923 = vmatmul.mubr.msk.bf16.gmra.mxu0 %vm766_vm0, %v348_v3 }
  0x75   : > { %10926 = vmatprep.mubr.msk.bf16.mxu0 %vm766_vm0, %v350_v4 }
  0x7c   : > { %10927 = vmatmul.mubr.msk.bf16.gmra.mxu0 %vm766_vm0, %v352_v5 }
  0x7d   : > { %10930 = vmatprep.mubr.msk.bf16.mxu0 %vm766_vm0, %v354_v6 }
  0x84   : > { %10931 = vmatmul.mubr.msk.bf16.gmra.mxu0 %vm766_vm0, %v356_v7 }
  0x85   : > { %10934 = vmatprep.mubr.msk.bf16.mxu0 %vm766_vm0, %v358_v8 }
  0x8c   : > { %10935 = vmatmul.mubr.msk.bf16.gmra.mxu0 %vm766_vm0, %v360_v9 }
  0x8d   : > { %10938 = vmatprep.mubr.msk.bf16.mxu0 %vm766_vm0, %v362_v10 }
  0x94   : > { %10939 = vmatmul.mubr.msk.bf16.gmra.mxu0 %vm766_vm0, %v364_v11 }
  0x95   : > { %10942 = vmatprep.mubr.msk.bf16.mxu0 %vm766_vm0, %v366_v12 }
  0x9c   : > { %10943 = vmatmul.mubr.msk.bf16.gmra.mxu0 %vm766_vm0, %v368_v16 }
  0x9d   : > { %10946 = vmatprep.mubr.msk.bf16.mxu0 %vm766_vm0, %v370_v17 }
  0xa4   : > { %10947 = vmatmul.mubr.msk.bf16.gmra.mxu0 %vm766_vm0, %v372_v23 }
  0xa5   : > { %10950 = vmatprep.mubr.msk.bf16.mxu0 %vm766_vm0, %v374_v24 }
  0xac   : > { %10951 = vmatmul.mubr.msk.bf16.gmra.mxu0 %vm766_vm0, %v376_v33 }
  0xad   : > { %10954 = vmatprep.mubr.msk.bf16.mxu0 %vm766_vm0, %v378_v34 }
  0xb4   : > { %10955 = vmatmul.mubr.msk.bf16.gmra.mxu0 %vm766_vm0, %v380_v41 }
  0xb5   : > { %10958 = vmatprep.mubr.msk.bf16.mxu0 %vm766_vm0, %v382_v42 }
  0xbc   : > { %10959 = vmatmul.mubr.msk.bf16.gmra.mxu0 %vm766_vm0, %v384_v48 }
  0xbd   : > { %10962 = vmatprep.mubr.msk.bf16.mxu0 %vm766_vm0, %v386_v49 }
  0xc4   : > { %10963 = vmatmul.mubr.msk.bf16.gmra.mxu0 %vm766_vm0, %v388_v54 }
  0xc5   : > { %10966 = vmatprep.mubr.msk.bf16.mxu0 %vm766_vm0, %v390_v55 }
  0xcc   : > { %10967 = vmatmul.mubr.msk.bf16.gmra.mxu0 %vm766_vm0, %v392_v60 }
  0xcd   : > { %10970 = vmatprep.mubr.msk.bf16.mxu0 %vm766_vm0, %v394_v61 }
  0xd4   : > { %v12332_v13 = vpop.f32.mrf.mxu1  ;;  %10971 = vmatmul.mubr.msk.bf16.gmra.mxu0 %vm766_vm0, %v396_v2 }
  0xd6   : > { %v12334_v14 = vpop.f32.mrf.mxu1 }
  0xd8   : > { %v12337_v15 = vpop.f32.mrf.mxu1 }
  0xda   : > { %v12342_v18 = vpop.f32.mrf.mxu1 }
  0xdc   : > { %v12344_v19 = vpop.f32.mrf.mxu1  ;;  %v12428_v16 = vpop.f32.mrf.mxu0 }
  0xdd   : > { %17526 = vst [vmem:[#allocation9_spill] sm:$0xff] %v12344_v19 }
  0xde   : > { %v12346_v21 = vpop.f32.mrf.mxu1  ;;  %v12430_v48 = vpop.f32.mrf.mxu0 }
  0xdf   : > { %17527 = vst [vmem:[#allocation10_spill] sm:$0xff] %v12346_v21 }
  0xe0   : > { %v12349_v22 = vpop.f32.mrf.mxu1  ;;  %v12434_v2 = vpop.f32.mrf.mxu0 }
  0xe1   : > { %17528 = vst [vmem:[#allocation11_spill] sm:$0xff] %v12349_v22 }
  0xe2   : > { %v12354_v27 = vpop.f32.mrf.mxu1 }
  0xe3   : > { %17529 = vst [vmem:[#allocation12_spill] sm:$0xff] %v12354_v27 }
  0xe4   : > { %v12356_v28 = vpop.f32.mrf.mxu1 }
  0xe5   : > { %17530 = vst [vmem:[#allocation13_spill] sm:$0xff] %v12356_v28 }
  0xe6   : > { %v12358_v29 = vpop.f32.mrf.mxu1 }
  0xe7   : > { %17531 = vst [vmem:[#allocation14_spill] sm:$0xff] %v12358_v29 }
  0xe8   : > { %v12361_v30 = vpop.f32.mrf.mxu1 }
  0xe9   : > { %17532 = vst [vmem:[#allocation15_spill] sm:$0xff] %v12361_v30 }
  0xea   : > { %v12366_v35 = vpop.f32.mrf.mxu1 }
  0xeb   : > { %17533 = vst [vmem:[#allocation16_spill] sm:$0xff] %v12366_v35  ;;  %v17251_v35 = vlaneseq }
  0xec   : > { %v12368_v36 = vpop.f32.mrf.mxu1 }
  0xed   : > { %17534 = vst [vmem:[#allocation17_spill] sm:$0xff] %v12368_v36 }
  0xee   : > { %v12370_v37 = vpop.f32.mrf.mxu1 }
  0xef   : > { %17535 = vst [vmem:[#allocation18_spill] sm:$0xff] %v12370_v37 }
  0xf0   : > { %v12373_v38 = vpop.f32.mrf.mxu1 }
  0xf1   : > { %17536 = vst [vmem:[#allocation19_spill] sm:$0xff] %v12373_v38 }
  0xf2   : > { %v12378_v43 = vpop.f32.mrf.mxu1 }
  0xf3   : > { %17537 = vst [vmem:[#allocation20_spill] sm:$0xff] %v12378_v43 }
  0xf4   : > { %v12380_v44 = vpop.f32.mrf.mxu1 }
  0xf5   : > { %17538 = vst [vmem:[#allocation21_spill] sm:$0xff] %v12380_v44 }
  0xf6   : > { %v12382_v46 = vpop.f32.mrf.mxu1 }
  0xf7   : > { %17539 = vst [vmem:[#allocation22_spill] sm:$0xff] %v12382_v46 }
  0xf8   : > { %v12385_v47 = vpop.f32.mrf.mxu1 }
  0xf9   : > { %17540 = vst [vmem:[#allocation23_spill] sm:$0xff] %v12385_v47  ;;  %v12111_v47 = vmov 1966171168  }
  0xfa   : > { %v12390_v50 = vpop.f32.mrf.mxu1  ;;  %v1932_v44 = vunpack.c.l.s4 %v12111_v47 }
  0xfb   : > { %17541 = vst [vmem:[#allocation24_spill] sm:$0xff] %v12390_v50  ;;  %v12529_v50 = vshrl.u32 %v17251_v35, 7 }
  0xfc   : > { %v12392_v51 = vpop.f32.mrf.mxu1  ;;  %v1933_v29 = vunpack.c.0.s8 %v1932_v44 }
  0xfd   : > { %17542 = vst [vmem:[#allocation25_spill] sm:$0xff] %v12392_v51  ;;  %17564 = vst [vmem:[#allocation47_spill] sm:$0xff] %v12529_v50 }
  0xfe   : > { %v12394_v52 = vpop.f32.mrf.mxu1  ;;  %v12534_v28 = vsub.s32 %v1933_v29, %v12529_v50 }
  0xff   : > { %17543 = vst [vmem:[#allocation26_spill] sm:$0xff] %v12394_v52 }
 0x100   : > { %v12397_v53 = vpop.f32.mrf.mxu1 }
 0x101   : > { %17544 = vst [vmem:[#allocation27_spill] sm:$0xff] %v12397_v53 }
 0x102   : > { %v12402_v56 = vpop.f32.mrf.mxu1 }
 0x103   : > { %17545 = vst [vmem:[#allocation28_spill] sm:$0xff] %v12402_v56 }
 0x104   : > { %v12404_v57 = vpop.f32.mrf.mxu1 }
 0x105   : > { %17546 = vst [vmem:[#allocation29_spill] sm:$0xff] %v12404_v57 }
 0x106   : > { %v12406_v58 = vpop.f32.mrf.mxu1 }
 0x107   : > { %17547 = vst [vmem:[#allocation30_spill] sm:$0xff] %v12406_v58 }
 0x108   : > { %v12409_v59 = vpop.f32.mrf.mxu1 }
 0x109   : > { %17548 = vst [vmem:[#allocation31_spill] sm:$0xff] %v12409_v59 }
 0x10a   : > { %v12414_v62 = vpop.f32.mrf.mxu1 }
 0x10b   : > { %17549 = vst [vmem:[#allocation32_spill] sm:$0xff] %v12414_v62 }
 0x10c   : > { %v12416_v63 = vpop.f32.mrf.mxu1 }
 0x10d   : > { %17550 = vst [vmem:[#allocation33_spill] sm:$0xff] %v12416_v63 }
 0x10e   : > { %v12418_v0 = vpop.f32.mrf.mxu1 }
 0x10f   : > { %17551 = vst [vmem:[#allocation34_spill] sm:$0xff] %v12418_v0 }
 0x110   : > { %v12421_v1 = vpop.f32.mrf.mxu1 }
 0x111   : > { %17552 = vst [vmem:[#allocation35_spill] sm:$0xff] %v12421_v1 }
 0x112   : > { %v12425_v3 = vpop.f32.mrf.mxu1 }
 0x113   : > { %17553 = vst [vmem:[#allocation36_spill] sm:$0xff] %v12425_v3 }
 0x114   : > { %v11012_v4 = vpop.f32.mrf.mxu1 }
 0x116   : > { %v1690_v5 = vpop.f32.mrf.mxu1 }
 0x117   : > { %11239 = vtanh.f32 %v1690_v5 }
 0x118   : > { %v11013_v6 = vpop.f32.mrf.mxu1 }
 0x119   : > { %11241 = vtanh.f32 %v11013_v6 }
 0x11a   : > { %v1693_v7 = vpop.f32.mrf.mxu1 }
 0x11b   : > { %11243 = vtanh.f32 %v1693_v7 }
 0x11c   : > { %11245 = vtanh.f32 %v11012_v4  ;;  %v11016_v8 = vpop.f32.mrf.mxu1 }
 0x11d   : > { %11247 = vtanh.f32 %v11016_v8 }
 0x11e   : > { %v1706_v9 = vpop.f32.mrf.mxu1 }
 0x11f   : > { %11249 = vtanh.f32 %v1706_v9 }
 0x120   : > { %v11017_v10 = vpop.f32.mrf.mxu1 }
 0x121   : > { %11251 = vtanh.f32 %v11017_v10  ;;  %v12436_v10 = vpop.f32.mrf.mxu0 }
 0x122   : > { %v1709_v11 = vpop.f32.mrf.mxu1 }
 0x123   : > { %11253 = vtanh.f32 %v1709_v11 }
 0x124   : > { %v11020_v12 = vpop.f32.mrf.mxu1  ;;  %v11240_v17 = vpop.eup %11239 }
 0x125   : > { %11255 = vtanh.f32 %v11020_v12 }
 0x126   : > { %v1722_v23 = vpop.f32.mrf.mxu1  ;;  %v11242_v24 = vpop.eup %11241 }
 0x127   : > { %11257 = vtanh.f32 %v1722_v23  ;;  %v12440_v23 = vpop.f32.mrf.mxu0 }
 0x128   : > { %v11244_v33 = vpop.eup %11243  ;;  %v11021_v34 = vpop.f32.mrf.mxu1 }
 0x129   : > { %v11246_v41 = vpop.eup %11245  ;;  %11259 = vtanh.f32 %v11021_v34  ;;  %v1769_v42 = vpack.c.bf16 %v11244_v33, %v11240_v17 }
 0x12a   : > { %v1770_v49 = vpack.c.bf16 %v11242_v24, %v11246_v41  ;;  %v1725_v54 = vpop.f32.mrf.mxu1  ;;  %v11248_v55 = vpop.eup %11247 }
 0x12b   : > { %11261 = vtanh.f32 %v1725_v54  ;;  %11030 = vmatprep.mubr.msk.bf16.mxu1 %vm766_vm0, %v1769_v42  ;;  %v12442_v42 = vpop.f32.mrf.mxu0 }
 0x12c   : > { %v11024_v60 = vpop.f32.mrf.mxu1  ;;  %11031 = vmatmul.mubr.msk.bf16.vlgmr.msra.gmra.mxu1 %vm766_vm0, %v1770_v49  ;;  %v11250_v61 = vpop.eup %11249 }
 0x12d   : > { %11263 = vtanh.f32 %v11024_v60 }
 0x12e   : > { %v11252_v4 = vpop.eup %11251  ;;  %v1738_v5 = vpop.f32.mrf.mxu1 }
 0x12f   : > { %11265 = vtanh.f32 %v1738_v5  ;;  %v1772_v8 = vpack.c.bf16 %v11252_v4, %v11248_v55  ;;  %v12446_v55 = vpop.f32.mrf.mxu0 }
 0x130   : > { %v11254_v6 = vpop.eup %11253  ;;  %v11025_v7 = vpop.f32.mrf.mxu1 }
 0x131   : > { %11267 = vtanh.f32 %v11025_v7  ;;  %v1771_v9 = vpack.c.bf16 %v11254_v6, %v11250_v61  ;;  %v12448_v6 = vpop.f32.mrf.mxu0 }
 0x132   : > { %v1741_v11 = vpop.f32.mrf.mxu1  ;;  %v11256_v12 = vpop.eup %11255 }
 0x133   : > { %11269 = vtanh.f32 %v1741_v11  ;;  %11034 = vmatprep.mubr.msk.bf16.mxu1 %vm766_vm0, %v1771_v9  ;;  %v12452_v7 = vpop.f32.mrf.mxu0 }
 0x134   : > { %11035 = vmatmul.mubr.msk.bf16.gmra.mxu1 %vm766_vm0, %v1772_v8  ;;  %v11258_v17 = vpop.eup %11257 }
 0x135   : > { %v12456_v8 = vpop.f32.mrf.mxu0 }
 0x136   : > { %v11260_v24 = vpop.eup %11259 }
 0x137   : > { %v1774_v34 = vpack.c.bf16 %v11260_v24, %v11256_v12  ;;  %v12458_v9 = vpop.f32.mrf.mxu0 }
 0x138   : > { %v11262_v33 = vpop.eup %11261 }
 0x139   : > { %v1773_v41 = vpack.c.bf16 %v11262_v33, %v11258_v17  ;;  %v12460_v11 = vpop.f32.mrf.mxu0 }
 0x13a   : > { %v11264_v49 = vpop.eup %11263 }
 0x13b   : > { %11038 = vmatprep.mubr.msk.bf16.mxu1 %vm766_vm0, %v1773_v41  ;;  %v12462_v12 = vpop.f32.mrf.mxu0 }
 0x13c   : > { %11039 = vmatmul.mubr.msk.bf16.gmra.mxu1 %vm766_vm0, %v1774_v34  ;;  %v11266_v54 = vpop.eup %11265 }
 0x13d   : > { %v12464_v17 = vpop.f32.mrf.mxu0 }
 0x13e   : > { %v11268_v60 = vpop.eup %11267 }
 0x13f   : > { %v1776_v4 = vpack.c.bf16 %v11268_v60, %v11264_v49  ;;  %v12466_v24 = vpop.f32.mrf.mxu0 }
 0x140   : > { %v11270_v61 = vpop.eup %11269 }
 0x141   : > { %v1775_v5 = vpack.c.bf16 %v11270_v61, %v11266_v54  ;;  %v12468_v33 = vpop.f32.mrf.mxu0 }
 0x143   : > { %11042 = vmatprep.mubr.msk.bf16.mxu1 %vm766_vm0, %v1775_v5  ;;  %v10896_v34 = vpop.f32.mrf.mxu0 }
 0x144   : > { %11043 = vmatmul.mubr.msk.bf16.gmra.mxu1 %vm766_vm0, %v1776_v4 }
 0x145   : > { %11050 = vmatprep.mubr.msk.bf16.mxu1 %vm766_vm0, %v12215_v20  ;;  %v1057_v41 = vpop.f32.mrf.mxu0 }
 0x146   : > { %11271 = vtanh.f32 %v1057_v41 }
 0x147   : > { %v12470_v49 = vpop.f32.mrf.mxu0 }
 0x149   : > { %v1060_v54 = vpop.f32.mrf.mxu0 }
 0x14a   : > { %11273 = vtanh.f32 %v1060_v54 }
 0x14b   : > { %v12472_v20 = vpop.f32.mrf.mxu0  ;;  %11275 = vtanh.f32 %v12430_v48 }
 0x14c   : > { %11277 = vtanh.f32 %v12428_v16 }
 0x14d   : > { %v1073_v60 = vpop.f32.mrf.mxu0  ;;  %11279 = vtanh.f32 %v10896_v34 }
 0x14e   : > { %11281 = vtanh.f32 %v1073_v60 }
 0x14f   : > { %v12474_v61 = vpop.f32.mrf.mxu0  ;;  %11283 = vtanh.f32 %v12470_v49 }
 0x151   : > { %v12476_v4 = vpop.f32.mrf.mxu0 }
 0x152   : > { %11285 = vtanh.f32 %v12476_v4 }
 0x153   : > { %v12478_v5 = vpop.f32.mrf.mxu0  ;;  %11287 = vtanh.f32 %v12436_v10 }
 0x154   : > { %11289 = vtanh.f32 %v12434_v2 }
 0x155   : > { %v12480_v45 = vpop.f32.mrf.mxu0  ;;  %11291 = vtanh.f32 %v12442_v42 }
 0x156   : > { %11293 = vtanh.f32 %v12448_v6 }
 0x157   : > { %v12482_v40 = vpop.f32.mrf.mxu0  ;;  %11295 = vtanh.f32 %v12472_v20 }
 0x158   : > { %11297 = vtanh.f32 %v12480_v45 }
 0x159   : > { %v12484_v39 = vpop.f32.mrf.mxu0  ;;  %11299 = vtanh.f32 %v12474_v61 }
 0x15a   : > { %11301 = vtanh.f32 %v12484_v39 }
 0x15b   : > { %v12486_v32 = vpop.f32.mrf.mxu0 }
 0x15d   : > { %v12488_v31 = vpop.f32.mrf.mxu0 }
 0x15f   : > { %v12490_v26 = vpop.f32.mrf.mxu0 }
 0x161   : > { %v12492_v25 = vpop.f32.mrf.mxu0 }
 0x163   : > { %v12494_v38 = vpop.f32.mrf.mxu0 }
 0x165   : > { %v12496_v1 = vpop.f32.mrf.mxu0 }
 0x167   : > { %v12498_v3 = vpop.f32.mrf.mxu0 }
 0x169   : > { %v12500_v0 = vpop.f32.mrf.mxu0 }
 0x16b   : > { %v12502_v63 = vpop.f32.mrf.mxu0 }
 0x16c   : > { %17554 = vst [vmem:[#allocation37_spill] sm:$0xff] %v12502_v63 }
 0x16d   : > { %v12504_v59 = vpop.f32.mrf.mxu0 }
 0x16f   : > { %v12506_v62 = vpop.f32.mrf.mxu0 }
 0x170   : > { %17555 = vst [vmem:[#allocation38_spill] sm:$0xff] %v12506_v62 }
 0x171   : > { %v12508_v58 = vpop.f32.mrf.mxu0 }
 0x173   : > { %v12510_v57 = vpop.f32.mrf.mxu0 }
 0x174   : > { %17556 = vst [vmem:[#allocation39_spill] sm:$0xff] %v12510_v57 }
 0x175   : > { %v12512_v53 = vpop.f32.mrf.mxu0 }
 0x176   : > { %17557 = vst [vmem:[#allocation40_spill] sm:$0xff] %v12512_v53 }
 0x177   : > { %v12514_v51 = vpop.f32.mrf.mxu0 }
 0x178   : > { %17558 = vst [vmem:[#allocation41_spill] sm:$0xff] %v12514_v51 }
 0x179   : > { %v12516_v43 = vpop.f32.mrf.mxu0 }
 0x17a   : > { %17559 = vst [vmem:[#allocation42_spill] sm:$0xff] %v12516_v43 }
 0x17b   : > { %v12518_v37 = vpop.f32.mrf.mxu0 }
 0x17c   : > { %17560 = vst [vmem:[#allocation43_spill] sm:$0xff] %v12518_v37  ;;  %v12546_v37 = vsub.s32 0, %v12529_v50 }
 0x17d   : > { %v12520_v36 = vpop.f32.mrf.mxu0 }
 0x17e   : > { %17561 = vst [vmem:[#allocation44_spill] sm:$0xff] %v12520_v36  ;;  %17565 = vst [vmem:[#allocation48_spill] sm:$0xff] %v12546_v37  ;;  %v11272_v36 = vpop.eup %11271  ;;  %11303 = vtanh.f32 %v12332_v13 }
 0x17f   : > { %v12522_v56 = vpop.f32.mrf.mxu0  ;;  %v11274_v57 = vpop.eup %11273  ;;  %11305 = vtanh.f32 %v12334_v14 }
 0x180   : > { %17562 = vst [vmem:[#allocation45_spill] sm:$0xff] %v12522_v56  ;;  %v11276_v63 = vpop.eup %11275  ;;  %11307 = vtanh.f32 %v12337_v15 }
 0x181   : > { %v12524_v52 = vpop.f32.mrf.mxu0  ;;  %v11278_v60 = vpop.eup %11277  ;;  %11309 = vtanh.f32 %v12440_v23 }
 0x182   : > { %17563 = vst [vmem:[#allocation46_spill] sm:$0xff] %v12524_v52 }
 0x183   : > { %v12526_v30 = vpop.f32.mrf.mxu0 }
 0x185   : > { %v12531_v46 = vpop.f32.mrf.mxu0 }
 0x187   : > { %v12536_v22 = vpop.f32.mrf.mxu0 }
 0x189   : > { %v12539_v47 = vpop.f32.mrf.mxu0 }
 0x18b   : > { %v12548_v21 = vpop.f32.mrf.mxu0 }
 0x18c   : > { %17566 = vst [vmem:[#allocation49_spill] sm:$0xff] %v12548_v21 }
 0x18d   : > { %v12555_v52 = vpop.f32.mrf.mxu0 }
 0x18f   : > { %v12560_v43 = vpop.f32.mrf.mxu0 }
 0x190   : > { %17567 = vst [vmem:[#allocation50_spill] sm:$0xff] %v12560_v43 }
 0x191   : > { %v12565_v21 = vpop.f32.mrf.mxu0 }
 0x1ec   : > { %v11032_v27 = vpop.f32.mrf.mxu1 }
 0x1ed   : > { %v2035_v56 = vrot.slane %v11032_v27, %v12534_v28 }
 0x1ee   : > { %v12542_v44 = vpop.f32.mrf.mxu1 }
 0x1ef   : > { %v2051_v35 = vrot.slane %v2035_v56, %v12534_v28  ;;  %v2043_v29 = vcombine.high %v2035_v56, %v2035_v56  ;;  %v1937_v41 = vrot.slane %v12542_v44, %v12534_v28 }
 0x1f1   : > { %v2781_v54 = vrot.slane %v2051_v35, %v12546_v37  ;;  %v2065_v48 = vrot.slane %v2043_v29, %v12534_v28  ;;  %v1953_v51 = vrot.slane %v1937_v41, %v12534_v28  ;;  %v2028_v29 = vcombine.high %v11032_v27, %v11032_v27 }
 0x1f3   : > { %v3370_v50 = vmul.f32 %v11272_v36, %v2781_v54  ;;  %v2785_v56 = vrot.slane %v2065_v48, %v12546_v37  ;;  %v1975_v53 = vcombine.high %v1953_v51, %v1953_v51  ;;  %v2717_v62 = vrot.slane %v1953_v51, %v12546_v37 }
 0x1f4   : > { %v2073_v36 = vcombine.high %v2051_v35, %v2051_v35  ;;  %v2042_v43 = vrot.slane %v2028_v29, %v12534_v28  ;;  %v12573_v35 = vpop.f32.mrf.mxu0 }
 0x1f5   : > { %v3530_v16 = vsel %vm766_vm0, %v3370_v50, 0.0  ;;  %v3371_v34 = vmul.f32 %v11274_v57, %v2785_v56  ;;  %v3354_v54 = vmul.f32 %v11276_v63, %v2717_v62  ;;  %v2725_v50 = vrot.slane %v1975_v53, %v12546_v37 }
 0x1f6   : > { %3531 = vadd.xlane.f32.xlu0 %v3530_v16  ;;  %v2789_v51 = vrot.slane %v2073_v36, %v12546_v37  ;;  %v12577_v53 = vrot.slane %v2042_v43, %v12534_v28  ;;  %v2075_v63 = vcombine.high %v2065_v48, %v2065_v48  ;;  %v1945_v56 = vcombine.high %v1937_v41, %v1937_v41  ;;  %v12580_v16 = vpop.f32.mrf.mxu0 }
 0x1f7   : > { %v3533_v19 = vsel %vm766_vm0, %v3371_v34, 0.0  ;;  %v3482_v49 = vsel %vm766_vm0, %v3354_v54, 0.0  ;;  %v3356_v27 = vmul.f32 %v11278_v60, %v2725_v50  ;;  %v2044_v10 = vcombine.high %v2042_v43, %v2042_v43 }
 0x1f8   : > { %3534 = vadd.xlane.f32.xlu1 %v3533_v19  ;;  %v11280_v19 = vpop.eup %11279  ;;  %v2793_v29 = vrot.slane %v2075_v63, %v12546_v37  ;;  %v1930_v54 = vcombine.high %v12542_v44, %v12542_v44  ;;  %v2797_v41 = vrot.slane %v12577_v53, %v12546_v37  ;;  %v1967_v50 = vrot.slane %v1945_v56, %v12534_v28 }
 0x1f9   : > { %v3488_v57 = vsel %vm766_vm0, %v3356_v27, 0.0  ;;  %v3372_v62 = vmul.f32 %v11280_v19, %v2789_v51  ;;  %v11282_v34 = vpop.eup %11281  ;;  %v12594_v2 = vrot.slane %v2044_v10, %v12534_v28  ;;  %v12602_v19 = vpop.f32.mrf.mxu1  ;;  %11311 = vtanh.f32 %v12342_v18 }
 0x1fa   : > { %3483 = vadd.xlane.f32.xlu0 %v3482_v49  ;;  %v11284_v36 = vpop.eup %11283  ;;  %v3374_v60 = vmul.f32 %v11282_v34, %v2797_v41  ;;  %v12590_v49 = vpop.f32.mrf.mxu0  ;;  %v1944_v27 = vrot.slane %v1930_v54, %v12534_v28  ;;  %v2084_v10 = vrot.slane %v12602_v19, %v12534_v28  ;;  %11313 = vtanh.f32 %v12446_v55 }
 0x1fb   : > { %v3536_v4 = vsel %vm766_vm0, %v3372_v62, 0.0  ;;  %v3373_v48 = vmul.f32 %v11284_v36, %v2793_v29  ;;  %v2801_v44 = vrot.slane %v12594_v2, %v12546_v37  ;;  %v11286_v51 = vpop.eup %11285  ;;  %11315 = vtanh.f32 %v12456_v8 }
 0x1fc   : > { %3489 = vadd.xlane.f32.xlu1 %v3488_v57  ;;  %v3542_v42 = vsel %vm766_vm0, %v3374_v60, 0.0  ;;  %v2721_v57 = vrot.slane %v1967_v50, %v12546_v37  ;;  %v12605_v62 = vpop.f32.mrf.mxu0  ;;  %v11288_v63 = vpop.eup %11287  ;;  %v12610_v6 = vrot.slane %v1944_v27, %v12534_v28  ;;  %v1946_v20 = vcombine.high %v1944_v27, %v1944_v27 }
 0x1fd   : > { %v3539_v43 = vsel %vm766_vm0, %v3373_v48, 0.0  ;;  %v3375_v56 = vmul.f32 %v11286_v51, %v2801_v44  ;;  %v11290_v54 = vpop.eup %11289  ;;  %v2092_v13 = vcombine.high %v2084_v10, %v2084_v10  ;;  %v12626_v48 = vpop.f32.mrf.mxu1  ;;  %v12634_v15 = vrot.slane %v2084_v10, %v12534_v28 }
 0x1fe   : > { %3537 = vadd.xlane.f32.xlu0 %v3536_v4  ;;  %v1977_v4 = vcombine.high %v1967_v50, %v1967_v50  ;;  %v3355_v34 = vmul.f32 %v11288_v63, %v2721_v57  ;;  %v12618_v36 = vpop.f32.mrf.mxu0  ;;  %v2733_v39 = vrot.slane %v12610_v6, %v12546_v37  ;;  %v11292_v41 = vpop.eup %11291  ;;  %v1974_v60 = vrot.slane %v1946_v20, %v12534_v28 }
 0x1ff   : > { %v3545_v29 = vsel %vm766_vm0, %v3375_v56, 0.0  ;;  %v1986_v23 = vrot.slane %v12626_v48, %v12534_v28  ;;  %11317 = vtanh.f32 %v12460_v11  ;;  %v12643_v18 = vrot.slane %v2092_v13, %v12534_v28  ;;  %v11294_v51 = vpop.eup %11293 }
 0x200   : > { %3540 = vadd.xlane.f32.xlu1 %v3539_v43  ;;  %v3485_v45 = vsel %vm766_vm0, %v3355_v34, 0.0  ;;  %v2729_v61 = vrot.slane %v1977_v4, %v12546_v37  ;;  %v3358_v14 = vmul.f32 %v11292_v41, %v2733_v39  ;;  %v12630_v43 = vpop.f32.mrf.mxu0  ;;  %v2737_v55 = vrot.slane %v1974_v60, %v12546_v37  ;;  %v11296_v63 = vpop.eup %11295 }
 0x201   : > { %v2074_v44 = vcombine.high %v12577_v53, %v12577_v53  ;;  %11319 = vtanh.f32 %v12478_v5  ;;  %v2076_v8 = vcombine.high %v12594_v2, %v12594_v2  ;;  %v2813_v4 = vrot.slane %v12634_v15, %v12546_v37  ;;  %v11298_v20 = vpop.eup %11297 }
 0x202   : > { %3543 = vadd.xlane.f32.xlu0 %v3542_v42  ;;  %v3357_v50 = vmul.f32 %v11290_v54, %v2729_v61  ;;  %v3494_v42 = vsel %vm766_vm0, %v3358_v14, 0.0  ;;  %v12651_v57 = vpop.f32.mrf.mxu0  ;;  %v3359_v56 = vmul.f32 %v11294_v51, %v2737_v55  ;;  %v1976_v34 = vcombine.high %v12610_v6, %v12610_v6  ;;  %v11300_v10 = vpop.eup %11299 }
 0x203   : > { %v2805_v11 = vrot.slane %v2074_v44, %v12546_v37  ;;  %11321 = vtanh.f32 %v12482_v40  ;;  %v2077_v5 = vcombine.high %v12602_v19, %v12602_v19  ;;  %v1994_v53 = vcombine.high %v1986_v23, %v1986_v23  ;;  %v11302_v39 = vpop.eup %11301 }
 0x204   : > { %3546 = vadd.xlane.f32.xlu1 %v3545_v29  ;;  %v3491_v27 = vsel %vm766_vm0, %v3357_v50, 0.0  ;;  %v2809_v2 = vrot.slane %v2076_v8, %v12546_v37  ;;  %v3497_v29 = vsel %vm766_vm0, %v3359_v56, 0.0  ;;  %v2817_v61 = vrot.slane %v12643_v18, %v12546_v37  ;;  %v12666_v40 = vpop.f32.mrf.mxu0  ;;  %v12668_v41 = vpop.eup %11303 }
 0x205   : > { %v1978_v54 = vcombine.high %v1974_v60, %v1974_v60  ;;  %11323 = vtanh.f32 %v12488_v31  ;;  %v12671_v19 = vrot.slane %v1986_v23, %v12534_v28  ;;  %v3378_v50 = vmul.f32 %v11298_v20, %v2813_v4 }
 0x206   : > { %3486 = vadd.xlane.f32.xlu0 %v3485_v45  ;;  %v3376_v45 = vmul.f32 %v11296_v63, %v2805_v11  ;;  %v3377_v6 = vmul.f32 %v11300_v10, %v2809_v2  ;;  %v2741_v14 = vrot.slane %v1976_v34, %v12546_v37  ;;  %11325 = vtanh.f32 %v12492_v25  ;;  %v12687_v8 = vpop.f32.mrf.mxu0 }
 0x207   : > { %v2091_v31 = vrot.slane %v2077_v5, %v12534_v28  ;;  %v3379_v55 = vmul.f32 %v11302_v39, %v2817_v61  ;;  %v2745_v44 = vrot.slane %v1978_v54, %v12546_v37  ;;  %11327 = vtanh.f32 %v12452_v7 }
 0x208   : > { %3492 = vadd.xlane.f32.xlu1 %v3491_v27  ;;  %v3548_v13 = vsel %vm766_vm0, %v3376_v45, 0.0  ;;  %v12675_v27 = vpop.eup %11305  ;;  %v3551_v23 = vsel %vm766_vm0, %v3377_v6, 0.0  ;;  %v2122_v63 = vcombine.high %v12634_v15, %v12634_v15  ;;  %v3554_v56 = vsel %vm766_vm0, %v3378_v50, 0.0 }
 0x209   : > { %v12679_v60 = vpop.eup %11307  ;;  %v2749_v4 = vrot.slane %v12671_v19, %v12546_v37  ;;  %11329 = vtanh.f32 %v12458_v9  ;;  %v2093_v20 = vcombine.high %v2091_v31, %v2091_v31  ;;  %v1979_v7 = vcombine.high %v12626_v48, %v12626_v48  ;;  %v12705_v9 = vpop.f32.mrf.mxu0 }
 0x20a   : > { %3495 = vadd.xlane.f32.xlu0 %v3494_v42  ;;  %v12682_v42 = vrot.slane %v1994_v53, %v12534_v28  ;;  %v11310_v51 = vpop.eup %11309  ;;  %v3557_v53 = vsel %vm766_vm0, %v3379_v55, 0.0  ;;  %v2124_v10 = vcombine.high %v12643_v18, %v12643_v18  ;;  %11331 = vtanh.f32 %v12464_v17 }
 0x20b   : > { %v12689_v25 = vpop.eup %11311  ;;  %v3360_v11 = vmul.f32 %v11310_v51, %v2741_v14  ;;  %v12708_v48 = vrot.slane %v2091_v31, %v12534_v28  ;;  %v2821_v39 = vrot.slane %v2122_v63, %v12546_v37  ;;  %11333 = vtanh.f32 %v12468_v33  ;;  %v12720_v31 = vpop.f32.mrf.mxu0 }
 0x20c   : > { %3498 = vadd.xlane.f32.xlu1 %v3497_v29  ;;  %v11314_v34 = vpop.eup %11313  ;;  %v2753_v15 = vrot.slane %v12682_v42, %v12546_v37  ;;  %v1993_v6 = vrot.slane %v1979_v7, %v12534_v28  ;;  %v2825_v50 = vrot.slane %v2124_v10, %v12546_v37  ;;  %v12717_v14 = vrot.slane %v2093_v20, %v12534_v28  ;;  %v12739_v7 = vpop.f32.mrf.mxu1 }
 0x20d   : > { %v11316_v5 = vpop.eup %11315  ;;  %v3361_v2 = vmul.f32 %v11314_v34, %v2745_v44  ;;  %v3500_v61 = vsel %vm766_vm0, %v3360_v11, 0.0  ;;  %11335 = vtanh.f32 %v12486_v32  ;;  %v2024_v33 = vcombine.high %v12671_v19, %v12671_v19  ;;  %v12734_v34 = vpop.f32.mrf.mxu0 }
 0x20e   : > { %3549 = vadd.xlane.f32.xlu0 %v3548_v13  ;;  %v11318_v29 = vpop.eup %11317  ;;  %v3362_v54 = vmul.f32 %v11316_v5, %v2749_v4  ;;  %v2829_v51 = vrot.slane %v12708_v48, %v12546_v37  ;;  %11337 = vtanh.f32 %v12490_v26  ;;  %v1995_v63 = vcombine.high %v1993_v6, %v1993_v6 }
 0x20f   : > { %v11320_v45 = vpop.eup %11319  ;;  %v3503_v17 = vsel %vm766_vm0, %v3361_v2, 0.0  ;;  %v3363_v13 = vmul.f32 %v11318_v29, %v2753_v15  ;;  %v2833_v4 = vrot.slane %v12717_v14, %v12546_v37  ;;  %v2026_v19 = vcombine.high %v12682_v42, %v12682_v42 }
 0x210   : > { %3552 = vadd.xlane.f32.xlu1 %v3551_v23  ;;  %v11322_v18 = vpop.eup %11321  ;;  %v3506_v55 = vsel %vm766_vm0, %v3362_v54, 0.0  ;;  %v3380_v44 = vmul.f32 %v11320_v45, %v2821_v39  ;;  %11339 = vtanh.f32 %v12531_v46  ;;  %v12737_v26 = vrot.slane %v1993_v6, %v12534_v28 }
 0x211   : > { %v3509_v32 = vsel %vm766_vm0, %v3363_v13, 0.0  ;;  %v3381_v11 = vmul.f32 %v11322_v18, %v2825_v50  ;;  %v2757_v2 = vrot.slane %v2024_v33, %v12546_v37  ;;  %v2231_v15 = vrot.slane %v12739_v7, %v12534_v28 }
 0x212   : > { %3555 = vadd.xlane.f32.xlu0 %v3554_v56  ;;  %v11324_v23 = vpop.eup %11323  ;;  %v3560_v5 = vsel %vm766_vm0, %v3380_v44, 0.0  ;;  %11341 = vtanh.f32 %v12539_v47  ;;  %v2761_v29 = vrot.slane %v2026_v19, %v12546_v37  ;;  %v12749_v45 = vrot.slane %v1995_v63, %v12534_v28 }
 0x213   : > { %v11326_v56 = vpop.eup %11325  ;;  %v3563_v42 = vsel %vm766_vm0, %v3381_v11, 0.0  ;;  %11343 = vtanh.f32 %v12462_v12  ;;  %v2765_v47 = vrot.slane %v12737_v26, %v12546_v37  ;;  %v2123_v18 = vcombine.high %v12708_v48, %v12708_v48 }
 0x214   : > { %3558 = vadd.xlane.f32.xlu1 %v3557_v53  ;;  %v11328_v20 = vpop.eup %11327  ;;  %v3382_v53 = vmul.f32 %v11324_v23, %v2829_v51  ;;  %v3383_v10 = vmul.f32 %v11326_v56, %v2833_v4  ;;  %11345 = vtanh.f32 %v12466_v24  ;;  %v2769_v23 = vrot.slane %v12749_v45, %v12546_v37 }
 0x215   : > { %v3364_v6 = vmul.f32 %v11328_v20, %v2757_v2  ;;  %v2125_v33 = vcombine.high %v12717_v14, %v12717_v14  ;;  %11347 = vtanh.f32 %v12496_v1  ;;  %v12769_v24 = vrot.slane %v2231_v15, %v12534_v28  ;;  %v12777_v1 = vpop.f32.mrf.mxu1 }
 0x216   : > { %3501 = vadd.xlane.f32.xlu0 %v3500_v61  ;;  %v11330_v46 = vpop.eup %11329  ;;  %v12752_v61 = vpop.f32.mrf.mxu0  ;;  %v3566_v39 = vsel %vm766_vm0, %v3382_v53, 0.0  ;;  %v3569_v12 = vsel %vm766_vm0, %v3383_v10, 0.0  ;;  %v2837_v63 = vrot.slane %v2123_v18, %v12546_v37  ;;  %11349 = vtanh.f32 %v12500_v0 }
 0x217   : > { %v11332_v54 = vpop.eup %11331  ;;  %v3365_v50 = vmul.f32 %v11330_v46, %v2761_v29  ;;  %v3512_v44 = vsel %vm766_vm0, %v3364_v6, 0.0  ;;  %v2841_v4 = vrot.slane %v2125_v33, %v12546_v37  ;;  %v2133_v19 = vrot.slane %v12777_v1, %v12534_v28 }
 0x218   : > { %3504 = vadd.xlane.f32.xlu1 %v3503_v17  ;;  %v2239_v17 = vcombine.high %v2231_v15, %v2231_v15  ;;  %v11334_v13 = vpop.eup %11333  ;;  %v3366_v51 = vmul.f32 %v11332_v54, %v2765_v47  ;;  %11351 = vtanh.f32 %v12526_v30  ;;  %v2909_v2 = vrot.slane %v12769_v24, %v12546_v37 }
 0x219   : > { %v3367_v11 = vmul.f32 %v11334_v13, %v2769_v23  ;;  %v2025_v15 = vcombine.high %v12737_v26, %v12737_v26  ;;  %v2224_v46 = vcombine.high %v12739_v7, %v12739_v7  ;;  %11353 = vtanh.f32 %v12536_v22 }
 0x21a   : > { %3507 = vadd.xlane.f32.xlu0 %v3506_v55  ;;  %v12766_v55 = vpop.f32.mrf.mxu0  ;;  %v11336_v48 = vpop.eup %11335  ;;  %v12775_v14 = vrot.slane %v2239_v17, %v12534_v28  ;;  %v2027_v54 = vcombine.high %v12749_v45, %v12749_v45  ;;  %11355 = vtanh.f32 %v12555_v52  ;;  %v2141_v7 = vcombine.high %v2133_v19, %v2133_v19 }
 0x21b   : > { %v11338_v56 = vpop.eup %11337  ;;  %v3384_v53 = vmul.f32 %v11336_v48, %v2837_v63  ;;  %v2773_v47 = vrot.slane %v2025_v15, %v12546_v37  ;;  %v2238_v18 = vrot.slane %v2224_v46, %v12534_v28  ;;  %11357 = vtanh.f32 %v12565_v21 }
 0x21c   : > { %3510 = vadd.xlane.f32.xlu1 %v3509_v32  ;;  %v3515_v32 = vsel %vm766_vm0, %v3365_v50, 0.0  ;;  %v12784_v20 = vpop.f32.mrf.mxu0  ;;  %v3385_v10 = vmul.f32 %v11338_v56, %v2841_v4  ;;  %v2913_v29 = vrot.slane %v12775_v14, %v12546_v37  ;;  %v2149_v45 = vrot.slane %v2133_v19, %v12534_v28 }
 0x21d   : > { %v11340_v0 = vpop.eup %11339  ;;  %v3572_v22 = vsel %vm766_vm0, %v3384_v53, 0.0  ;;  %11359 = vtanh.f32 %v12494_v38  ;;  %v2269_v50 = vcombine.high %v12769_v24, %v12769_v24  ;;  %v2163_v21 = vrot.slane %v2141_v7, %v12534_v28 }
 0x21e   : > { %3561 = vadd.xlane.f32.xlu0 %v3560_v5  ;;  %v3518_v5 = vsel %vm766_vm0, %v3366_v51, 0.0  ;;  %v12800_v26 = vpop.f32.mrf.mxu0  ;;  %v3402_v6 = vmul.f32 %v11340_v0, %v2909_v2  ;;  %v3575_v52 = vsel %vm766_vm0, %v3385_v10, 0.0  ;;  %v2845_v51 = vrot.slane %v2149_v45, %v12546_v37 }
 0x21f   : > { %v11342_v30 = vpop.eup %11341  ;;  %11361 = vtanh.f32 %v12498_v3  ;;  %v2240_v63 = vcombine.high %v2238_v18, %v2238_v18  ;;  %v2849_v24 = vrot.slane %v2163_v21, %v12546_v37  ;;  %v2126_v4 = vcombine.high %v12777_v1, %v12777_v1 }
 0x220   : > { %3564 = vadd.xlane.f32.xlu1 %v3563_v42  ;;  %v3521_v42 = vsel %vm766_vm0, %v3367_v11, 0.0  ;;  %v3403_v13 = vmul.f32 %v11342_v30, %v2913_v29  ;;  %v12812_v23 = vpop.f32.mrf.mxu0  ;;  %v3626_v48 = vsel %vm766_vm0, %v3402_v6, 0.0  ;;  %v2271_v11 = vcombine.high %v12775_v14, %v12775_v14 }
 0x221   : > { %11363 = vtanh.f32 %v12504_v59  ;;  %v12828_v0 = vrot.slane %v2238_v18, %v12534_v28  ;;  %v2917_v2 = vrot.slane %v2269_v50, %v12546_v37  ;;  %v12836_v46 = vrot.slane %v2240_v63, %v12534_v28  ;;  %v12852_v50 = vpop.f32.mrf.mxu1 }
 0x222   : > { %3567 = vadd.xlane.f32.xlu0 %v3566_v39  ;;  %v11344_v39 = vpop.eup %11343  ;;  %v3629_v38 = vsel %vm766_vm0, %v3403_v13, 0.0  ;;  %v12825_v19 = vpop.f32.mrf.mxu0  ;;  %11365 = vtanh.f32 %v12508_v58  ;;  %v2921_v1 = vrot.slane %v2271_v11, %v12546_v37  ;;  %v2140_v30 = vrot.slane %v2126_v4, %v12534_v28 }
 0x223   : > { %v11346_v17 = vpop.eup %11345  ;;  %v2925_v7 = vrot.slane %v12828_v0, %v12546_v37 }
 0x224   : > { %3570 = vadd.xlane.f32.xlu1 %v3569_v12  ;;  %v2777_v12 = vrot.slane %v2027_v54, %v12546_v37  ;;  %v11348_v33 = vpop.eup %11347  ;;  %v12840_v10 = vpop.f32.mrf.mxu0  ;;  %v2171_v54 = vcombine.high %v2149_v45, %v2149_v45  ;;  %v12858_v63 = vrot.slane %v2140_v30, %v12534_v28 }
 0x225   : > { %v11350_v56 = vpop.eup %11349  ;;  %v3386_v53 = vmul.f32 %v11348_v33, %v2845_v51  ;;  %v17570_v51 = vld [vmem:[#allocation9_spill] sm:$0xff] }
 0x226   : > { %3513 = vadd.xlane.f32.xlu0 %v3512_v44  ;;  %v3368_v44 = vmul.f32 %v11344_v39, %v2773_v47  ;;  %v11352_v3 = vpop.eup %11351  ;;  %v3387_v15 = vmul.f32 %v11350_v56, %v2849_v24  ;;  %v12850_v45 = vpop.f32.mrf.mxu0  ;;  %v17571_v24 = vld [vmem:[#allocation37_spill] sm:$0xff]  ;;  %v2861_v4 = vrot.slane %v12858_v63, %v12546_v37 }
 0x227   : > { %v11354_v14 = vpop.eup %11353  ;;  %v3578_v58 = vsel %vm766_vm0, %v3386_v53, 0.0  ;;  %v3404_v39 = vmul.f32 %v11352_v3, %v2917_v2 }
 0x228   : > { %3516 = vadd.xlane.f32.xlu1 %v3515_v32  ;;  %v3369_v32 = vmul.f32 %v11346_v17, %v2777_v12  ;;  %v11356_v29 = vpop.eup %11355  ;;  %v3581_v47 = vsel %vm766_vm0, %v3387_v15, 0.0  ;;  %v3405_v18 = vmul.f32 %v11354_v14, %v2921_v1  ;;  %v2929_v17 = vrot.slane %v12836_v46, %v12546_v37  ;;  %v12866_v11 = vpop.f32.mrf.mxu0  ;;  %v17572_v14 = vld [vmem:[#allocation38_spill] sm:$0xff] }
 0x229   : > { %v11358_v6 = vpop.eup %11357  ;;  %v2142_v12 = vcombine.high %v2140_v30, %v2140_v30  ;;  %v3632_v33 = vsel %vm766_vm0, %v3404_v39, 0.0 }
 0x22a   : > { %3519 = vadd.xlane.f32.xlu0 %v3518_v5  ;;  %v3524_v5 = vsel %vm766_vm0, %v3368_v44, 0.0  ;;  %v3527_v59 = vsel %vm766_vm0, %v3369_v32, 0.0  ;;  %v11360_v13 = vpop.eup %11359  ;;  %v2853_v44 = vrot.slane %v2171_v54, %v12546_v37  ;;  %v3635_v56 = vsel %vm766_vm0, %v3405_v18, 0.0  ;;  %v17573_v54 = vld [vmem:[#allocation40_spill] sm:$0xff] }
 0x22b   : > { %v2170_v2 = vrot.slane %v2142_v12, %v12534_v28 }
 0x22c   : > { %3522 = vadd.xlane.f32.xlu1 %v3521_v42  ;;  %v17568_v42 = vld [vmem:[#allocation49_spill] sm:$0xff]  ;;  %v3388_v53 = vmul.f32 %v11360_v13, %v2853_v44 }
 0x22d   : > { %11367 = vtanh.f32 %v17568_v42  ;;  %v2865_v42 = vrot.slane %v2170_v2, %v12546_v37 }
 0x22e   : > { %3573 = vadd.xlane.f32.xlu0 %v3572_v22  ;;  %v17569_v22 = vld [vmem:[#allocation50_spill] sm:$0xff] }
 0x22f   : > { %11369 = vtanh.f32 %v17569_v22 }
 0x230   : > { %3576 = vadd.xlane.f32.xlu1 %v3575_v52  ;;  %v2173_v52 = vcombine.high %v2163_v21, %v2163_v21  ;;  %11371 = vtanh.f32 %v12580_v16  ;;  %v2280_v16 = vrot.slane %v12852_v50, %v12534_v28  ;;  %v11362_v21 = vpop.eup %11361 }
 0x231   : > { %11373 = vtanh.f32 %v17570_v51  ;;  %v11364_v3 = vpop.eup %11363 }
 0x232   : > { %3627 = vadd.xlane.f32.xlu0 %v3626_v48  ;;  %v3406_v48 = vmul.f32 %v11356_v29, %v2925_v7  ;;  %11375 = vtanh.f32 %v12605_v62  ;;  %v2857_v32 = vrot.slane %v2173_v52, %v12546_v37  ;;  %v2270_v62 = vcombine.high %v12828_v0, %v12828_v0  ;;  %v11366_v15 = vpop.eup %11365 }
 0x233   : > { %11377 = vtanh.f32 %v17571_v24  ;;  %v2272_v29 = vcombine.high %v12836_v46, %v12836_v46  ;;  %v12883_v0 = vrot.slane %v2280_v16, %v12534_v28  ;;  %v3584_v7 = vsel %vm766_vm0, %v3388_v53, 0.0 }
 0x234   : > { %3630 = vadd.xlane.f32.xlu1 %v3629_v38  ;;  %v3407_v38 = vmul.f32 %v11358_v6, %v2929_v17  ;;  %11379 = vtanh.f32 %v17572_v14  ;;  %v3389_v30 = vmul.f32 %v11362_v21, %v2857_v32  ;;  %v3390_v22 = vmul.f32 %v11364_v3, %v2861_v4  ;;  %v12891_v17 = vpop.f32.mrf.mxu1 }
 0x235   : > { %11381 = vtanh.f32 %v17573_v54  ;;  %v2933_v6 = vrot.slane %v2270_v62, %v12546_v37  ;;  %v3391_v13 = vmul.f32 %v11366_v15, %v2865_v42  ;;  %v2937_v12 = vrot.slane %v2272_v29, %v12546_v37  ;;  %v17575_v42 = vld [vmem:[#allocation39_spill] sm:$0xff] }
 0x236   : > { %3525 = vadd.xlane.f32.xlu0 %v3524_v5  ;;  %v3638_v5 = vsel %vm766_vm0, %v3406_v48, 0.0  ;;  %v3641_v1 = vsel %vm766_vm0, %v3407_v38, 0.0  ;;  %v3587_v52 = vsel %vm766_vm0, %v3389_v30, 0.0  ;;  %v3590_v51 = vsel %vm766_vm0, %v3390_v22, 0.0 }
 0x237   : > { %v2941_v21 = vrot.slane %v12883_v0, %v12546_v37  ;;  %v2273_v38 = vcombine.high %v12852_v50, %v12852_v50  ;;  %v3593_v32 = vsel %vm766_vm0, %v3391_v13, 0.0  ;;  %v2174_v3 = vcombine.high %v2170_v2, %v2170_v2 }
 0x238   : > { %3528 = vadd.xlane.f32.xlu1 %v3527_v59  ;;  %v2288_v59 = vcombine.high %v2280_v16, %v2280_v16  ;;  %v2318_v29 = vcombine.high %v12883_v0, %v12883_v0 }
 0x239   : > { %v2873_v30 = vrot.slane %v2174_v3, %v12546_v37 }
 0x23a   : > { %3579 = vadd.xlane.f32.xlu0 %v3578_v58  ;;  %v12880_v58 = vpop.f32.mrf.mxu0  ;;  %v11368_v39 = vpop.eup %11367  ;;  %v12889_v46 = vrot.slane %v2288_v59, %v12534_v28  ;;  %v2287_v59 = vrot.slane %v2273_v38, %v12534_v28 }
 0x23b   : > { %v3408_v16 = vmul.f32 %v11368_v39, %v2933_v6 }
 0x23c   : > { %3582 = vadd.xlane.f32.xlu1 %v3581_v47  ;;  %v17574_v47 = vld [vmem:[#allocation42_spill] sm:$0xff]  ;;  %v11370_v18 = vpop.eup %11369  ;;  %v12898_v48 = vpop.f32.mrf.mxu0  ;;  %v2945_v4 = vrot.slane %v12889_v46, %v12546_v37 }
 0x23d   : > { %11383 = vtanh.f32 %v17574_v47  ;;  %v11372_v44 = vpop.eup %11371  ;;  %v3409_v24 = vmul.f32 %v11370_v18, %v2937_v12  ;;  %v17576_v47 = vld [vmem:[#allocation41_spill] sm:$0xff]  ;;  %v2289_v18 = vcombine.high %v2287_v59, %v2287_v59 }
 0x23e   : > { %3633 = vadd.xlane.f32.xlu0 %v3632_v33  ;;  %v2182_v33 = vrot.slane %v12891_v17, %v12534_v28  ;;  %11385 = vtanh.f32 %v12573_v35  ;;  %v12908_v35 = vpop.eup %11373  ;;  %v12914_v53 = vpop.f32.mrf.mxu0  ;;  %v3410_v62 = vmul.f32 %v11372_v44, %v2941_v21  ;;  %v17577_v44 = vld [vmem:[#allocation44_spill] sm:$0xff] }
 0x23f   : > { %11387 = vtanh.f32 %v12590_v49  ;;  %v3644_v49 = vsel %vm766_vm0, %v3408_v16, 0.0 }
 0x240   : > { %3636 = vadd.xlane.f32.xlu1 %v3635_v56  ;;  %v2172_v56 = vcombine.high %v12858_v63, %v12858_v63  ;;  %11389 = vtanh.f32 %v12630_v43  ;;  %v2190_v50 = vcombine.high %v2182_v33, %v2182_v33  ;;  %v2198_v2 = vrot.slane %v2182_v33, %v12534_v28  ;;  %v12926_v54 = vpop.f32.mrf.mxu0 }
 0x241   : > { %11391 = vtanh.f32 %v12666_v40  ;;  %v3647_v43 = vsel %vm766_vm0, %v3409_v24, 0.0  ;;  %v2320_v33 = vcombine.high %v12889_v46, %v12889_v46  ;;  %v2949_v24 = vrot.slane %v2318_v29, %v12546_v37 }
 0x242   : > { %3639 = vadd.xlane.f32.xlu0 %v3638_v5  ;;  %v11376_v5 = vpop.eup %11375  ;;  %v2869_v14 = vrot.slane %v2172_v56, %v12546_v37  ;;  %11393 = vtanh.f32 %v17575_v42  ;;  %v2212_v40 = vrot.slane %v2190_v50, %v12534_v28  ;;  %v2877_v6 = vrot.slane %v2198_v2, %v12546_v37  ;;  %v1313_v16 = vpop.f32.mrf.mxu0 }
 0x243   : > { %v11378_v63 = vpop.eup %11377  ;;  %11395 = vtanh.f32 %v17576_v47  ;;  %v12940_v56 = vrot.slane %v2287_v59, %v12534_v28 }
 0x244   : > { %3642 = vadd.xlane.f32.xlu1 %v3641_v1  ;;  %v11380_v15 = vpop.eup %11379  ;;  %v3411_v1 = vmul.f32 %v11376_v5, %v2945_v4  ;;  %v3392_v22 = vmul.f32 %v11378_v63, %v2869_v14  ;;  %v2881_v0 = vrot.slane %v2212_v40, %v12546_v37  ;;  %11397 = vtanh.f32 %v17577_v44  ;;  %v17578_v4 = vld [vmem:[#allocation46_spill] sm:$0xff]  ;;  %v17580_v44 = vld [vmem:[#allocation43_spill] sm:$0xff] }
 0x245   : > { %v11382_v39 = vpop.eup %11381  ;;  %v3393_v12 = vmul.f32 %v11380_v15, %v2873_v30  ;;  %11399 = vtanh.f32 %v17578_v4  ;;  %v12948_v63 = vrot.slane %v2289_v18, %v12534_v28  ;;  %v2220_v14 = vcombine.high %v2198_v2, %v2198_v2  ;;  %v17579_v18 = vld [vmem:[#allocation10_spill] sm:$0xff] }
 0x246   : > { %3585 = vadd.xlane.f32.xlu0 %v3584_v7  ;;  %v3650_v7 = vsel %vm766_vm0, %v3410_v62, 0.0  ;;  %v3653_v13 = vsel %vm766_vm0, %v3411_v1, 0.0  ;;  %v3596_v38 = vsel %vm766_vm0, %v3392_v22, 0.0  ;;  %11401 = vtanh.f32 %v12618_v36  ;;  %v12961_v22 = vpop.f32.mrf.mxu1 }
 0x247   : > { %v3599_v3 = vsel %vm766_vm0, %v3393_v12, 0.0  ;;  %11403 = vtanh.f32 %v12651_v57  ;;  %v2961_v36 = vrot.slane %v12948_v63, %v12546_v37  ;;  %v2222_v29 = vcombine.high %v2212_v40, %v2212_v40 }
 0x248   : > { %3588 = vadd.xlane.f32.xlu1 %v3587_v52  ;;  %11405 = vtanh.f32 %v1313_v16  ;;  %v2885_v57 = vrot.slane %v2220_v14, %v12546_v37  ;;  %v2427_v40 = vrot.slane %v12961_v22, %v12534_v28  ;;  %v2319_v4 = vcombine.high %v12940_v56, %v12940_v56 }
 0x249   : > { %11407 = vtanh.f32 %v17579_v18  ;;  %v2321_v14 = vcombine.high %v12948_v63, %v12948_v63  ;;  %v12997_v63 = vpop.f32.mrf.mxu1 }
 0x24a   : > { %3591 = vadd.xlane.f32.xlu0 %v3590_v51  ;;  %v11384_v52 = vpop.eup %11383  ;;  %v2175_v51 = vcombine.high %v12891_v17, %v12891_v17  ;;  %v2953_v17 = vrot.slane %v2320_v33, %v12546_v37  ;;  %v2889_v33 = vrot.slane %v2222_v29, %v12546_v37 }
 0x24b   : > { %v11386_v21 = vpop.eup %11385  ;;  %v3395_v5 = vmul.f32 %v11384_v52, %v2881_v0 }
 0x24c   : > { %3594 = vadd.xlane.f32.xlu1 %v3593_v32  ;;  %v3394_v32 = vmul.f32 %v11382_v39, %v2877_v6  ;;  %v11388_v46 = vpop.eup %11387  ;;  %v2189_v50 = vrot.slane %v2175_v51, %v12534_v28  ;;  %v3412_v15 = vmul.f32 %v11386_v21, %v2949_v24 }
 0x24d   : > { %v11390_v62 = vpop.eup %11389  ;;  %v3605_v30 = vsel %vm766_vm0, %v3395_v5, 0.0  ;;  %v3413_v42 = vmul.f32 %v11388_v46, %v2953_v17  ;;  %v17581_v46 = vld [vmem:[#allocation45_spill] sm:$0xff] }
 0x24e   : > { %3645 = vadd.xlane.f32.xlu0 %v3644_v49  ;;  %v12952_v49 = vpop.f32.mrf.mxu0  ;;  %v3602_v59 = vsel %vm766_vm0, %v3394_v32, 0.0  ;;  %v11392_v1 = vpop.eup %11391  ;;  %v3656_v6 = vsel %vm766_vm0, %v3412_v15, 0.0  ;;  %v12967_v52 = vrot.slane %v2189_v50, %v12534_v28 }
 0x24f   : > { %v11394_v2 = vpop.eup %11393  ;;  %v3659_v12 = vsel %vm766_vm0, %v3413_v42, 0.0  ;;  %v3415_v0 = vmul.f32 %v11392_v1, %v2961_v36 }
 0x250   : > { %3648 = vadd.xlane.f32.xlu1 %v3647_v43  ;;  %v2957_v43 = vrot.slane %v12940_v56, %v12546_v37  ;;  %v1316_v39 = vpop.f32.mrf.mxu0  ;;  %v2893_v16 = vrot.slane %v12967_v52, %v12546_v37  ;;  %v3396_v32 = vmul.f32 %v11394_v2, %v2885_v57  ;;  %v12989_v56 = vrot.slane %v2427_v40, %v12534_v28 }
 0x251   : > { %11409 = vtanh.f32 %v1316_v39  ;;  %v3665_v17 = vsel %vm766_vm0, %v3415_v0, 0.0  ;;  %v2969_v39 = vrot.slane %v2321_v14, %v12546_v37  ;;  %v2329_v2 = vrot.slane %v12997_v63, %v12534_v28 }
 0x252   : > { %3651 = vadd.xlane.f32.xlu0 %v3650_v7  ;;  %v2191_v7 = vcombine.high %v2189_v50, %v2189_v50  ;;  %v3414_v47 = vmul.f32 %v11390_v62, %v2957_v43  ;;  %11411 = vtanh.f32 %v17580_v44  ;;  %v12974_v51 = vpop.f32.mrf.mxu0  ;;  %v3608_v43 = vsel %vm766_vm0, %v3396_v32, 0.0 }
 0x253   : > { %11413 = vtanh.f32 %v17581_v46  ;;  %v3037_v57 = vrot.slane %v12989_v56, %v12546_v37  ;;  %v2221_v18 = vcombine.high %v12967_v52, %v12967_v52  ;;  %v13023_v46 = vrot.slane %v2329_v2, %v12534_v28 }
 0x254   : > { %3654 = vadd.xlane.f32.xlu1 %v3653_v13  ;;  %v11396_v13 = vpop.eup %11395  ;;  %v2219_v24 = vrot.slane %v2191_v7, %v12534_v28  ;;  %11415 = vtanh.f32 %v12705_v9 }
 0x255   : > { %v11398_v21 = vpop.eup %11397  ;;  %v3397_v50 = vmul.f32 %v11396_v13, %v2889_v33  ;;  %11417 = vtanh.f32 %v12734_v34 }
 0x256   : > { %3597 = vadd.xlane.f32.xlu0 %v3596_v38  ;;  %v3662_v38 = vsel %vm766_vm0, %v3414_v47, 0.0  ;;  %v11400_v5 = vpop.eup %11399  ;;  %v2897_v62 = vrot.slane %v2219_v24, %v12546_v37  ;;  %v3398_v1 = vmul.f32 %v11398_v21, %v2893_v16  ;;  %11419 = vtanh.f32 %v12926_v54 }
 0x257   : > { %v11402_v15 = vpop.eup %11401  ;;  %v3611_v9 = vsel %vm766_vm0, %v3397_v50, 0.0  ;;  %11421 = vtanh.f32 %v12952_v49  ;;  %v2223_v33 = vcombine.high %v2219_v24, %v2219_v24  ;;  %v2337_v21 = vcombine.high %v2329_v2, %v2329_v2 }
 0x258   : > { %3600 = vadd.xlane.f32.xlu1 %v3599_v3  ;;  %v2435_v3 = vcombine.high %v2427_v40, %v2427_v40  ;;  %v11404_v42 = vpop.eup %11403  ;;  %v3399_v29 = vmul.f32 %v11400_v5, %v2897_v62  ;;  %v2420_v40 = vcombine.high %v12961_v22, %v12961_v22  ;;  %v2901_v49 = vrot.slane %v2221_v18, %v12546_v37 }
 0x259   : > { %v11406_v34 = vpop.eup %11405  ;;  %v2905_v5 = vrot.slane %v2223_v33, %v12546_v37  ;;  %v13033_v14 = vrot.slane %v2337_v21, %v12534_v28 }
 0x25a   : > { %3603 = vadd.xlane.f32.xlu0 %v3602_v59  ;;  %v1329_v59 = vpop.f32.mrf.mxu0  ;;  %v12995_v36 = vrot.slane %v2435_v3, %v12534_v28  ;;  %v13014_v54 = vpop.eup %11407  ;;  %v3617_v13 = vsel %vm766_vm0, %v3399_v29, 0.0  ;;  %v2434_v32 = vrot.slane %v2420_v40, %v12534_v28 }
 0x25b   : > { %11423 = vtanh.f32 %v1329_v59 }
 0x25c   : > { %3606 = vadd.xlane.f32.xlu1 %v3605_v30  ;;  %v2965_v30 = vrot.slane %v2319_v4, %v12546_v37  ;;  %v13004_v7 = vpop.f32.mrf.mxu0  ;;  %v3041_v0 = vrot.slane %v12995_v36, %v12546_v37  ;;  %v2467_v29 = vcombine.high %v12995_v36, %v12995_v36 }
 0x25e   : > { %3657 = vadd.xlane.f32.xlu0 %v3656_v6  ;;  %v3614_v6 = vsel %vm766_vm0, %v3398_v1, 0.0  ;;  %v3416_v47 = vmul.f32 %v11402_v15, %v2965_v30  ;;  %v11410_v44 = vpop.eup %11409  ;;  %v1332_v16 = vpop.f32.mrf.mxu0  ;;  %v2436_v1 = vcombine.high %v2434_v32, %v2434_v32 }
 0x25f   : > { %v11412_v52 = vpop.eup %11411  ;;  %11425 = vtanh.f32 %v1332_v16  ;;  %v3435_v3 = vmul.f32 %v11410_v44, %v3041_v0  ;;  %v2367_v44 = vcombine.high %v13023_v46, %v13023_v46 }
 0x260   : > { %3660 = vadd.xlane.f32.xlu1 %v3659_v12  ;;  %v3417_v12 = vmul.f32 %v11404_v42, %v2969_v39  ;;  %v3668_v22 = vsel %vm766_vm0, %v3416_v47, 0.0  ;;  %v11414_v4 = vpop.eup %11413  ;;  %11427 = vtanh.f32 %v12687_v8  ;;  %v13030_v50 = vpop.f32.mrf.mxu0  ;;  %v3400_v15 = vmul.f32 %v11412_v52, %v2901_v49 }
 0x261   : > { %v11416_v62 = vpop.eup %11415  ;;  %11429 = vtanh.f32 %v12720_v31  ;;  %v3725_v8 = vsel %vm766_vm0, %v3435_v3, 0.0  ;;  %v3401_v30 = vmul.f32 %v11414_v4, %v2905_v5  ;;  %v2977_v42 = vrot.slane %v13033_v14, %v12546_v37  ;;  %v17582_v4 = vld [vmem:[#allocation11_spill] sm:$0xff] }
 0x262   : > { %3663 = vadd.xlane.f32.xlu0 %v3662_v38  ;;  %v3434_v38 = vmul.f32 %v11406_v34, %v3037_v57  ;;  %v3671_v24 = vsel %vm766_vm0, %v3417_v12, 0.0  ;;  %v13047_v39 = vrot.slane %v2434_v32, %v12534_v28  ;;  %11431 = vtanh.f32 %v12766_v55  ;;  %v1345_v2 = vpop.f32.mrf.mxu0 }
 0x263   : > { %v2322_v34 = vcombine.high %v12997_v63, %v12997_v63  ;;  %11433 = vtanh.f32 %v12800_v26  ;;  %v3623_v18 = vsel %vm766_vm0, %v3401_v30, 0.0  ;;  %v3049_v55 = vrot.slane %v2467_v29, %v12546_v37 }
 0x264   : > { %3666 = vadd.xlane.f32.xlu1 %v3665_v17  ;;  %v2465_v17 = vcombine.high %v12989_v56, %v12989_v56  ;;  %v3722_v59 = vsel %vm766_vm0, %v3434_v38, 0.0  ;;  %v11418_v56 = vpop.eup %11417  ;;  %v13060_v12 = vrot.slane %v2436_v1, %v12534_v28  ;;  %11435 = vtanh.f32 %v12974_v51  ;;  %v13063_v63 = vpop.f32.mrf.mxu0 }
 0x265   : > { %v11420_v31 = vpop.eup %11419  ;;  %v3419_v40 = vmul.f32 %v11418_v56, %v2977_v42  ;;  %v3053_v26 = vrot.slane %v13047_v39, %v12546_v37  ;;  %v2336_v33 = vrot.slane %v2322_v34, %v12534_v28  ;;  %11437 = vtanh.f32 %v13004_v7 }
 0x266   : > { %3609 = vadd.xlane.f32.xlu0 %v3608_v43  ;;  %v2973_v43 = vrot.slane %v13023_v46, %v12546_v37  ;;  %v3045_v57 = vrot.slane %v2465_v17, %v12546_v37  ;;  %v11422_v36 = vpop.eup %11421  ;;  %v3057_v49 = vrot.slane %v13060_v12, %v12546_v37  ;;  %v2369_v32 = vcombine.high %v13033_v14, %v13033_v14  ;;  %v1348_v46 = vpop.f32.mrf.mxu0 }
 0x267   : > { %v3437_v38 = vmul.f32 %v11422_v36, %v3049_v55  ;;  %11439 = vtanh.f32 %v17582_v4  ;;  %v2338_v5 = vcombine.high %v2336_v33, %v2336_v33  ;;  %v13080_v17 = vpop.f32.mrf.mxu1 }
 0x268   : > { %3612 = vadd.xlane.f32.xlu1 %v3611_v9  ;;  %v3418_v47 = vmul.f32 %v11416_v62, %v2973_v43  ;;  %v11424_v0 = vpop.eup %11423  ;;  %v3436_v52 = vmul.f32 %v11420_v31, %v3045_v57  ;;  %11441 = vtanh.f32 %v1345_v2  ;;  %v13089_v43 = vrot.slane %v2336_v33, %v12534_v28  ;;  %v13096_v42 = vpop.f32.mrf.mxu0 }
 0x269   : > { %11443 = vtanh.f32 %v1348_v46  ;;  %v3731_v1 = vsel %vm766_vm0, %v3437_v38, 0.0  ;;  %v2985_v30 = vrot.slane %v2369_v32, %v12546_v37 }
 0x26a   : > { %3615 = vadd.xlane.f32.xlu0 %v3614_v6  ;;  %v3620_v6 = vsel %vm766_vm0, %v3400_v15, 0.0  ;;  %v3674_v16 = vsel %vm766_vm0, %v3418_v47, 0.0  ;;  %v3728_v7 = vsel %vm766_vm0, %v3436_v52, 0.0  ;;  %v2476_v15 = vrot.slane %v13080_v17, %v12534_v28 }
 0x26b   : > { %11445 = vtanh.f32 %v12752_v61  ;;  %v2989_v34 = vrot.slane %v13089_v43, %v12546_v37  ;;  %v2466_v47 = vcombine.high %v13047_v39, %v13047_v39 }
 0x26c   : > { %3618 = vadd.xlane.f32.xlu1 %v3617_v13  ;;  %v11426_v51 = vpop.eup %11425  ;;  %v2484_v57 = vcombine.high %v2476_v15, %v2476_v15  ;;  %11447 = vtanh.f32 %v12784_v20  ;;  %v13116_v20 = vrot.slane %v2476_v15, %v12534_v28 }
 0x26d   : > { %v11428_v3 = vpop.eup %11427  ;;  %v3439_v56 = vmul.f32 %v11426_v51, %v3057_v49  ;;  %11449 = vtanh.f32 %v12825_v19  ;;  %v3061_v52 = vrot.slane %v2466_v47, %v12546_v37  ;;  %v13126_v19 = vpop.f32.mrf.mxu1  ;;  %v17583_v47 = vld [vmem:[#allocation12_spill] sm:$0xff] }
 0x26e   : > { %3669 = vadd.xlane.f32.xlu0 %v3668_v22  ;;  %v3677_v22 = vsel %vm766_vm0, %v3419_v40, 0.0  ;;  %v11430_v14 = vpop.eup %11429  ;;  %11451 = vtanh.f32 %v12850_v45  ;;  %v2378_v32 = vrot.slane %v13126_v19, %v12534_v28 }
 0x26f   : > { %v11432_v2 = vpop.eup %11431  ;;  %v3737_v36 = vsel %vm766_vm0, %v3439_v56, 0.0  ;;  %11453 = vtanh.f32 %v13030_v50  ;;  %v2469_v50 = vcombine.high %v13080_v17, %v13080_v17 }
 0x270   : > { %3672 = vadd.xlane.f32.xlu1 %v3671_v24  ;;  %v3438_v24 = vmul.f32 %v11424_v0, %v3053_v26  ;;  %v11434_v61 = vpop.eup %11433  ;;  %v2468_v26 = vcombine.high %v13060_v12, %v13060_v12  ;;  %v1361_v0 = vpop.f32.mrf.mxu0  ;;  %v13124_v12 = vrot.slane %v2484_v57, %v12534_v28  ;;  %11455 = vtanh.f32 %v13063_v63 }
 0x271   : > { %v11436_v39 = vpop.eup %11435  ;;  %11457 = vtanh.f32 %v1361_v0  ;;  %v2386_v17 = vcombine.high %v2378_v32, %v2378_v32  ;;  %v2483_v57 = vrot.slane %v2469_v50, %v12534_v28  ;;  %v2514_v0 = vcombine.high %v13116_v20, %v13116_v20 }
 0x272   : > { %3723 = vadd.xlane.f32.xlu0 %v3722_v59  ;;  %v2981_v59 = vrot.slane %v2367_v44, %v12546_v37  ;;  %v3734_v29 = vsel %vm766_vm0, %v3438_v24, 0.0  ;;  %v3422_v44 = vmul.f32 %v11432_v2, %v2989_v34  ;;  %v11438_v51 = vpop.eup %11437  ;;  %v3065_v49 = vrot.slane %v2468_v26, %v12546_v37  ;;  %v13133_v4 = vpop.f32.mrf.mxu0 }
 0x273   : > { %11459 = vtanh.f32 %v17583_v47 }
 0x274   : > { %3726 = vadd.xlane.f32.xlu1 %v3725_v8  ;;  %v3420_v31 = vmul.f32 %v11428_v3, %v2981_v59  ;;  %v13135_v45 = vpop.eup %11439  ;;  %v3686_v46 = vsel %vm766_vm0, %v3422_v44, 0.0  ;;  %v3440_v3 = vmul.f32 %v11436_v39, %v3061_v52  ;;  %v3441_v56 = vmul.f32 %v11438_v51, %v3065_v49 }
 0x275   : > { %v11442_v59 = vpop.eup %11441 }
 0x276   : > { %3621 = vadd.xlane.f32.xlu0 %v3620_v6  ;;  %v13102_v6 = vrot.slane %v2338_v5, %v12534_v28  ;;  %v3680_v33 = vsel %vm766_vm0, %v3420_v31, 0.0  ;;  %v3069_v5 = vrot.slane %v13116_v20, %v12546_v37  ;;  %v11444_v15 = vpop.eup %11443  ;;  %v3740_v63 = vsel %vm766_vm0, %v3440_v3, 0.0 }
 0x277   : > { %v13183_v3 = vrot.slane %v2483_v57, %v12534_v28 }
 0x278   : > { %3624 = vadd.xlane.f32.xlu1 %v3623_v18  ;;  %v3421_v18 = vmul.f32 %v11430_v14, %v2985_v30  ;;  %v2993_v55 = vrot.slane %v13102_v6, %v12546_v37  ;;  %v3073_v30 = vrot.slane %v13124_v12, %v12546_v37  ;;  %v11446_v2 = vpop.eup %11445  ;;  %v3442_v31 = vmul.f32 %v11442_v59, %v3069_v5 }
 0x27a   : > { %3675 = vadd.xlane.f32.xlu0 %v3674_v16  ;;  %v3423_v38 = vmul.f32 %v11434_v61, %v2993_v55  ;;  %v13159_v61 = vrot.slane %v2378_v32, %v12534_v28  ;;  %v3443_v55 = vmul.f32 %v11444_v15, %v3073_v30  ;;  %v3746_v44 = vsel %vm766_vm0, %v3442_v31, 0.0 }
 0x27b   : > { %v3077_v15 = vrot.slane %v2514_v0, %v12546_v37 }
 0x27c   : > { %3678 = vadd.xlane.f32.xlu1 %v3677_v22  ;;  %v3683_v22 = vsel %vm766_vm0, %v3421_v18, 0.0  ;;  %v3689_v14 = vsel %vm766_vm0, %v3423_v38, 0.0  ;;  %v2485_v38 = vcombine.high %v2483_v57, %v2483_v57 }
 0x27e   : > { %3729 = vadd.xlane.f32.xlu0 %v3728_v7  ;;  %v2368_v7 = vcombine.high %v13089_v43, %v13089_v43  ;;  %v1364_v43 = vpop.f32.mrf.mxu0 }
 0x27f   : > { %v13042_v9 = vpop.xlane.xlu0 %3531  ;;  %11461 = vtanh.f32 %v1364_v43 }
 0x280   : > { %3732 = vadd.xlane.f32.xlu1 %v3731_v1  ;;  %v2997_v34 = vrot.slane %v2368_v7, %v12546_v37  ;;  %11463 = vtanh.f32 %v12812_v23  ;;  %v3749_v23 = vsel %vm766_vm0, %v3443_v55, 0.0 }
 0x281   : > { %v13057_v13 = vpop.xlane.xlu1 %3534  ;;  %11465 = vtanh.f32 %v12840_v10  ;;  %v2371_v10 = vcombine.high %v13126_v19, %v13126_v19  ;;  %v13198_v19 = vrot.slane %v2485_v38, %v12534_v28 }
 0x282   : > { %3735 = vadd.xlane.f32.xlu0 %v3734_v29  ;;  %v2370_v29 = vcombine.high %v13102_v6, %v13102_v6  ;;  %v3743_v6 = vsel %vm766_vm0, %v3441_v56, 0.0  ;;  %v3424_v51 = vmul.f32 %v11446_v2, %v2997_v34  ;;  %11467 = vtanh.f32 %v12880_v58 }
 0x283   : > { %v13071_v21 = vpop.xlane.xlu0 %3483  ;;  %11469 = vtanh.f32 %v12914_v53  ;;  %v2385_v53 = vrot.slane %v2371_v10, %v12534_v28  ;;  %v2416_v2 = vcombine.high %v13159_v61, %v13159_v61 }
 0x284   : > { %3738 = vadd.xlane.f32.xlu1 %v3737_v36  ;;  %v11448_v36 = vpop.eup %11447  ;;  %v3001_v26 = vrot.slane %v2370_v29, %v12546_v37  ;;  %v3692_v59 = vsel %vm766_vm0, %v3424_v51, 0.0  ;;  %11471 = vtanh.f32 %v13096_v42  ;;  %v3085_v29 = vrot.slane %v13183_v3, %v12546_v37  ;;  %v13212_v42 = vpop.f32.mrf.mxu1 }
 0x285   : > { %v13083_v62 = vpop.xlane.xlu1 %3489  ;;  %v11450_v39 = vpop.eup %11449  ;;  %11473 = vtanh.f32 %v13133_v4  ;;  %v3013_v38 = vrot.slane %v2416_v2, %v12546_v37 }
 0x286   : > { %3681 = vadd.xlane.f32.xlu0 %v3680_v33  ;;  %v13169_v33 = vrot.slane %v2386_v17, %v12534_v28  ;;  %v11452_v20 = vpop.eup %11451  ;;  %v3425_v49 = vmul.f32 %v11448_v36, %v3001_v26  ;;  %v17587_v26 = vld [vmem:[#allocation13_spill] sm:$0xff] }
 0x287   : > { %v13092_v8 = vpop.xlane.xlu0 %3537  ;;  %v11454_v5 = vpop.eup %11453  ;;  %11475 = vtanh.f32 %v17587_v26 }
 0x288   : > { %3684 = vadd.xlane.f32.xlu1 %v3683_v22  ;;  %v3005_v22 = vrot.slane %v13159_v61, %v12546_v37  ;;  %v3009_v32 = vrot.slane %v13169_v33, %v12546_v37  ;;  %v3695_v58 = vsel %vm766_vm0, %v3425_v49, 0.0  ;;  %v3444_v31 = vmul.f32 %v11454_v5, %v3077_v15 }
 0x289   : > { %v13108_v40 = vpop.xlane.xlu1 %3540  ;;  %v3089_v61 = vrot.slane %v13198_v19, %v12546_v37  ;;  %v13231_v49 = vrot.slane %v2385_v53, %v12534_v28 }
 0x28a   : > { %3687 = vadd.xlane.f32.xlu0 %v3686_v46  ;;  %v2516_v46 = vcombine.high %v13124_v12, %v13124_v12  ;;  %v3426_v50 = vmul.f32 %v11450_v39, %v3005_v22  ;;  %v11456_v12 = vpop.eup %11455  ;;  %v3427_v56 = vmul.f32 %v11452_v20, %v3009_v32  ;;  %v17588_v39 = vld [vmem:[#allocation22_spill] sm:$0xff]  ;;  %v3752_v22 = vsel %vm766_vm0, %v3444_v31, 0.0  ;;  %v17589_v20 = vld [vmem:[#allocation24_spill] sm:$0xff] }
 0x28b   : > { %v13119_v16 = vpop.xlane.xlu0 %3543  ;;  %v11458_v43 = vpop.eup %11457  ;;  %11477 = vtanh.f32 %v17588_v39 }
 0x28c   : > { %3690 = vadd.xlane.f32.xlu1 %v3689_v14  ;;  %v3081_v30 = vrot.slane %v2516_v46, %v12546_v37  ;;  %v13210_v34 = vpop.eup %11459  ;;  %v3701_v57 = vsel %vm766_vm0, %v3427_v56, 0.0  ;;  %v3446_v4 = vmul.f32 %v11458_v43, %v3085_v29  ;;  %11479 = vtanh.f32 %v17589_v20  ;;  %v13249_v43 = vpop.f32.mrf.mxu1 }
 0x28d   : > { %v13138_v24 = vpop.xlane.xlu1 %3546  ;;  %v11462_v55 = vpop.eup %11461  ;;  %11481 = vtanh.f32 %v12866_v11 }
 0x28e   : > { %3741 = vadd.xlane.f32.xlu0 %v3740_v63  ;;  %v3698_v63 = vsel %vm766_vm0, %v3426_v50, 0.0  ;;  %v3445_v36 = vmul.f32 %v11456_v12, %v3081_v30  ;;  %v11464_v0 = vpop.eup %11463  ;;  %v3447_v5 = vmul.f32 %v11462_v55, %v3089_v61  ;;  %v2515_v30 = vcombine.high %v13183_v3, %v13183_v3 }
 0x28f   : > { %v13148_v1 = vpop.xlane.xlu0 %3486  ;;  %v3428_v12 = vmul.f32 %v11464_v0, %v3013_v38  ;;  %11483 = vtanh.f32 %v12898_v48  ;;  %v2525_v0 = vrot.slane %v13249_v43, %v12534_v28 }
 0x290   : > { %3744 = vadd.xlane.f32.xlu1 %v3743_v6  ;;  %v2418_v6 = vcombine.high %v13169_v33, %v13169_v33  ;;  %v2623_v33 = vrot.slane %v13212_v42, %v12534_v28  ;;  %v3755_v46 = vsel %vm766_vm0, %v3445_v36, 0.0  ;;  %v3761_v2 = vsel %vm766_vm0, %v3447_v5, 0.0  ;;  %v17593_v36 = vld [vmem:[#allocation14_spill] sm:$0xff] }
 0x291   : > { %v13162_v18 = vpop.xlane.xlu1 %3492  ;;  %11485 = vtanh.f32 %v17593_v36  ;;  %v3093_v26 = vrot.slane %v2515_v30, %v12546_v37  ;;  %v2616_v30 = vcombine.high %v13212_v42, %v13212_v42  ;;  %v17599_v36 = vld [vmem:[#allocation23_spill] sm:$0xff]  ;;  %v13298_v42 = vrot.slane %v2525_v0, %v12534_v28 }
 0x292   : > { %3747 = vadd.xlane.f32.xlu0 %v3746_v44  ;;  %v2387_v44 = vcombine.high %v2385_v53, %v2385_v53  ;;  %v3017_v10 = vrot.slane %v2418_v6, %v12546_v37  ;;  %v2631_v29 = vcombine.high %v2623_v33, %v2623_v33  ;;  %v13260_v48 = vrot.slane %v2623_v33, %v12534_v28  ;;  %v17596_v33 = vld [vmem:[#allocation16_spill] sm:$0xff] }
 0x293   : > { %v13172_v52 = vpop.xlane.xlu0 %3495  ;;  %v3704_v6 = vsel %vm766_vm0, %v3428_v12, 0.0 }
 0x294   : > { %3750 = vadd.xlane.f32.xlu1 %v3749_v23  ;;  %v11466_v23 = vpop.eup %11465  ;;  %v13244_v56 = vrot.slane %v2387_v44, %v12534_v28  ;;  %v13270_v39 = vrot.slane %v2631_v29, %v12534_v28  ;;  %v2533_v29 = vcombine.high %v2525_v0, %v2525_v0 }
 0x295   : > { %v13188_v7 = vpop.xlane.xlu1 %3498  ;;  %v11468_v50 = vpop.eup %11467 }
 0x296   : > { %17584 = vst [vmem:[#allocation49_spill] sm:$0xff] %v13188_v7  ;;  %3693 = vadd.xlane.f32.xlu0 %v3692_v59  ;;  %v3758_v59 = vsel %vm766_vm0, %v3446_v4, 0.0  ;;  %v11470_v11 = vpop.eup %11469  ;;  %v3025_v31 = vrot.slane %v13244_v56, %v12546_v37  ;;  %v17594_v4 = vld [vmem:[#allocation15_spill] sm:$0xff] }
 0x297   : > { %v13193_v14 = vpop.xlane.xlu0 %3549  ;;  %v11472_v3 = vpop.eup %11471  ;;  %11487 = vtanh.f32 %v17594_v4 }
 0x298   : > { %3696 = vadd.xlane.f32.xlu1 %v3695_v58  ;;  %v3021_v58 = vrot.slane %v13231_v49, %v12546_v37  ;;  %v3431_v38 = vmul.f32 %v11470_v11, %v3025_v31  ;;  %11489 = vtanh.f32 %v17596_v33 }
 0x299   : > { %v13206_v17 = vpop.xlane.xlu1 %3552 }
 0x29a   : > { %17585 = vst [vmem:[#allocation50_spill] sm:$0xff] %v13206_v17  ;;  %3699 = vadd.xlane.f32.xlu0 %v3698_v63  ;;  %v3429_v63 = vmul.f32 %v11466_v23, %v3017_v10  ;;  %v3430_v55 = vmul.f32 %v11468_v50, %v3021_v58  ;;  %v3448_v10 = vmul.f32 %v11472_v3, %v3093_v26  ;;  %v17597_v58 = vld [vmem:[#allocation21_spill] sm:$0xff] }
 0x29b   : > { %v13214_v47 = vpop.xlane.xlu0 %3555  ;;  %v2417_v50 = vcombine.high %v13231_v49, %v13231_v49  ;;  %11491 = vtanh.f32 %v17597_v58  ;;  %v2419_v49 = vcombine.high %v13244_v56, %v13244_v56 }
 0x29c   : > { %17586 = vst [vmem:[#allocation9_spill] sm:$0xff] %v13214_v47  ;;  %3702 = vadd.xlane.f32.xlu1 %v3701_v57  ;;  %v2517_v57 = vcombine.high %v13198_v19, %v13198_v19  ;;  %v11474_v19 = vpop.eup %11473  ;;  %v3710_v5 = vsel %vm766_vm0, %v3430_v55, 0.0  ;;  %11493 = vtanh.f32 %v17599_v36  ;;  %v3764_v55 = vsel %vm766_vm0, %v3448_v10, 0.0  ;;  %v17603_v10 = vld [vmem:[#allocation28_spill] sm:$0xff] }
 0x29d   : > { %v13223_v51 = vpop.xlane.xlu1 %3558  ;;  %v13277_v23 = vpop.eup %11475  ;;  %v3029_v4 = vrot.slane %v2417_v50, %v12546_v37  ;;  %v2661_v50 = vcombine.high %v13260_v48, %v13260_v48 }
 0x29e   : > { %3753 = vadd.xlane.f32.xlu0 %v3752_v22  ;;  %v3707_v22 = vsel %vm766_vm0, %v3429_v63, 0.0  ;;  %v3097_v20 = vrot.slane %v2517_v57, %v12546_v37  ;;  %v11478_v12 = vpop.eup %11477  ;;  %v3713_v63 = vsel %vm766_vm0, %v3431_v38, 0.0  ;;  %v3169_v57 = vrot.slane %v13270_v39, %v12546_v37 }
 0x29f   : > { %v13233_v32 = vpop.xlane.xlu0 %3501  ;;  %v11480_v11 = vpop.eup %11479  ;;  %v13307_v38 = vrot.slane %v2533_v29, %v12534_v28  ;;  %v3101_v29 = vrot.slane %v13298_v42, %v12546_v37 }
 0x2a0   : > { %17590 = vst [vmem:[#allocation37_spill] sm:$0xff] %v13233_v32  ;;  %3756 = vadd.xlane.f32.xlu1 %v3755_v46  ;;  %v3449_v31 = vmul.f32 %v11474_v19, %v3097_v20  ;;  %v11482_v3 = vpop.eup %11481  ;;  %v17601_v19 = vld [vmem:[#allocation26_spill] sm:$0xff]  ;;  %v3467_v33 = vmul.f32 %v11480_v11, %v3169_v57 }
 0x2a1   : > { %v13239_v15 = vpop.xlane.xlu1 %3504  ;;  %11495 = vtanh.f32 %v17601_v19  ;;  %v11484_v56 = vpop.eup %11483 }
 0x2a2   : > { %17591 = vst [vmem:[#allocation38_spill] sm:$0xff] %v13239_v15  ;;  %3759 = vadd.xlane.f32.xlu0 %v3758_v59  ;;  %v3165_v59 = vrot.slane %v13260_v48, %v12546_v37  ;;  %v3767_v0 = vsel %vm766_vm0, %v3449_v31, 0.0  ;;  %11497 = vtanh.f32 %v17603_v10  ;;  %v2518_v31 = vcombine.high %v13249_v43, %v13249_v43 }
 0x2a3   : > { %v13251_v53 = vpop.xlane.xlu0 %3507  ;;  %v3821_v48 = vsel %vm766_vm0, %v3467_v33, 0.0  ;;  %v3173_v33 = vrot.slane %v2661_v50, %v12546_v37 }
 0x2a4   : > { %17592 = vst [vmem:[#allocation40_spill] sm:$0xff] %v13251_v53  ;;  %3762 = vadd.xlane.f32.xlu1 %v3761_v2  ;;  %v3466_v26 = vmul.f32 %v11478_v12, %v3165_v59  ;;  %v13314_v59 = vpop.eup %11485 }
 0x2a5   : > { %v13262_v61 = vpop.xlane.xlu1 %3510  ;;  %v13326_v57 = vpop.eup %11487 }
 0x2a6   : > { %3705 = vadd.xlane.f32.xlu0 %v3704_v6  ;;  %v3818_v58 = vsel %vm766_vm0, %v3466_v26, 0.0  ;;  %v17606_v26 = vld [vmem:[#allocation18_spill] sm:$0xff] }
 0x2a7   : > { %v13272_v44 = vpop.xlane.xlu0 %3561 }
 0x2a8   : > { %17595 = vst [vmem:[#allocation42_spill] sm:$0xff] %v13272_v44  ;;  %3708 = vadd.xlane.f32.xlu1 %v3707_v22  ;;  %v2630_v22 = vrot.slane %v2616_v30, %v12534_v28  ;;  %v3432_v30 = vmul.f32 %v11482_v3, %v3029_v4  ;;  %v3105_v3 = vrot.slane %v13307_v38, %v12546_v37  ;;  %v13336_v4 = vpop.eup %11489 }
 0x2a9   : > { %v13279_v46 = vpop.xlane.xlu1 %3564  ;;  %v11492_v10 = vpop.eup %11491 }
 0x2aa   : > { %3711 = vadd.xlane.f32.xlu0 %v3710_v5  ;;  %v3033_v5 = vrot.slane %v2419_v49, %v12546_v37  ;;  %v2632_v11 = vcombine.high %v2630_v22, %v2630_v22  ;;  %v13339_v43 = vrot.slane %v2630_v22, %v12534_v28  ;;  %v3451_v22 = vmul.f32 %v12689_v25, %v3105_v3  ;;  %v11494_v50 = vpop.eup %11493 }
 0x2ab   : > { %v13289_v2 = vpop.xlane.xlu0 %3567 }
 0x2ac   : > { %17598 = vst [vmem:[#allocation39_spill] sm:$0xff] %v13289_v2  ;;  %3714 = vadd.xlane.f32.xlu1 %v3713_v63  ;;  %v17604_v63 = vld [vmem:[#allocation17_spill] sm:$0xff]  ;;  %v3433_v36 = vmul.f32 %v11484_v56, %v3033_v5  ;;  %v3450_v56 = vmul.f32 %v12675_v27, %v3101_v29  ;;  %v17608_v5 = vld [vmem:[#allocation20_spill] sm:$0xff]  ;;  %v2563_v29 = vcombine.high %v13298_v42, %v13298_v42 }
 0x2ad   : > { %v13300_v6 = vpop.xlane.xlu1 %3570  ;;  %11499 = vtanh.f32 %v17604_v63  ;;  %v17610_v27 = vld [vmem:[#allocation25_spill] sm:$0xff]  ;;  %v3181_v25 = vrot.slane %v13339_v43, %v12546_v37 }
 0x2ae   : > { %17600 = vst [vmem:[#allocation41_spill] sm:$0xff] %v13300_v6  ;;  %3765 = vadd.xlane.f32.xlu0 %v3764_v55  ;;  %v2663_v55 = vcombine.high %v13270_v39, %v13270_v39  ;;  %11501 = vtanh.f32 %v17606_v26  ;;  %v2532_v39 = vrot.slane %v2518_v31, %v12534_v28  ;;  %v3719_v63 = vsel %vm766_vm0, %v3433_v36, 0.0  ;;  %v17612_v36 = vld [vmem:[#allocation27_spill] sm:$0xff] }
 0x2af   : > { %v13309_v20 = vpop.xlane.xlu0 %3513  ;;  %11503 = vtanh.f32 %v17608_v5  ;;  %v3770_v26 = vsel %vm766_vm0, %v3450_v56, 0.0  ;;  %v2565_v56 = vcombine.high %v13307_v38, %v13307_v38 }
 0x2b0   : > { %17602 = vst [vmem:[#allocation44_spill] sm:$0xff] %v13309_v20  ;;  %3768 = vadd.xlane.f32.xlu1 %v3767_v0  ;;  %v3716_v0 = vsel %vm766_vm0, %v3432_v30, 0.0  ;;  %v13354_v30 = vrot.slane %v2632_v11, %v12534_v28  ;;  %11505 = vtanh.f32 %v17610_v27  ;;  %v2534_v3 = vcombine.high %v2532_v39, %v2532_v39  ;;  %v11496_v11 = vpop.eup %11495 }
 0x2b1   : > { %v13318_v12 = vpop.xlane.xlu1 %3516  ;;  %11507 = vtanh.f32 %v17612_v36  ;;  %v13374_v36 = vrot.slane %v2532_v39, %v12534_v28  ;;  %v3113_v32 = vrot.slane %v2565_v56, %v12546_v37  ;;  %v17620_v56 = vld [vmem:[#allocation31_spill] sm:$0xff] }
 0x2b2   : > { %3819 = vadd.xlane.f32.xlu0 %v3818_v58  ;;  %v3185_v42 = vrot.slane %v13354_v30, %v12546_v37 }
 0x2b3   : > { %v13328_v49 = vpop.xlane.xlu0 %3519 }
 0x2b4   : > { %17605 = vst [vmem:[#allocation46_spill] sm:$0xff] %v13328_v49  ;;  %3822 = vadd.xlane.f32.xlu1 %v3821_v48  ;;  %v3177_v48 = vrot.slane %v2663_v55, %v12546_v37  ;;  %v11045_v55 = vpop.f32.mrf.mxu1 }
 0x2b5   : > { %v13341_v19 = vpop.xlane.xlu1 %3522 }
 0x2b6   : > { %17607 = vst [vmem:[#allocation10_spill] sm:$0xff] %v13341_v19  ;;  %3717 = vadd.xlane.f32.xlu0 %v3716_v0  ;;  %v3468_v0 = vmul.f32 %v11492_v10, %v3173_v33  ;;  %v3469_v27 = vmul.f32 %v11494_v50, %v3177_v48  ;;  %v17614_v33 = vld [vmem:[#allocation29_spill] sm:$0xff]  ;;  %v11498_v10 = vpop.eup %11497  ;;  %v17616_v48 = vld [vmem:[#allocation30_spill] sm:$0xff]  ;;  %v2672_v50 = vrot.slane %v11045_v55, %v12534_v28 }
 0x2b7   : > { %v13348_v58 = vpop.xlane.xlu0 %3573  ;;  %11509 = vtanh.f32 %v17614_v33  ;;  %v1902_v33 = vpop.f32.mrf.mxu1  ;;  %v3471_v19 = vmul.f32 %v11498_v10, %v3185_v42  ;;  %v2662_v42 = vcombine.high %v13339_v43, %v13339_v43  ;;  %v2664_v43 = vcombine.high %v13354_v30, %v13354_v30 }
 0x2b8   : > { %17609 = vst [vmem:[#allocation43_spill] sm:$0xff] %v13348_v58  ;;  %3720 = vadd.xlane.f32.xlu1 %v3719_v63  ;;  %v3773_v63 = vsel %vm766_vm0, %v3451_v22, 0.0  ;;  %v3824_v15 = vsel %vm766_vm0, %v3468_v0, 0.0  ;;  %v3109_v22 = vrot.slane %v2563_v29, %v12546_v37  ;;  %11511 = vtanh.f32 %v17616_v48 }
 0x2b9   : > { %v13359_v31 = vpop.xlane.xlu1 %3576  ;;  %v3827_v39 = vsel %vm766_vm0, %v3469_v27, 0.0  ;;  %v13389_v0 = vrot.slane %v2534_v3, %v12534_v28  ;;  %v3117_v27 = vrot.slane %v13374_v36, %v12546_v37  ;;  %v2665_v3 = vcombine.high %v11045_v55, %v11045_v55 }
 0x2ba   : > { %17611 = vst [vmem:[#allocation45_spill] sm:$0xff] %v13359_v31  ;;  %3771 = vadd.xlane.f32.xlu0 %v3770_v26  ;;  %v3470_v31 = vmul.f32 %v11496_v11, %v3181_v25  ;;  %v13382_v38 = vpop.eup %11499  ;;  %v17618_v25 = vld [vmem:[#allocation32_spill] sm:$0xff]  ;;  %v3452_v48 = vmul.f32 %v12668_v41, %v3109_v22  ;;  %v2680_v10 = vcombine.high %v2672_v50, %v2672_v50 }
 0x2bb   : > { %v13365_v5 = vpop.xlane.xlu0 %3627  ;;  %11513 = vtanh.f32 %v17618_v25  ;;  %v13392_v29 = vpop.eup %11501  ;;  %v3453_v41 = vmul.f32 %v12679_v60, %v3113_v32  ;;  %v3121_v22 = vrot.slane %v13389_v0, %v12546_v37  ;;  %v3189_v60 = vrot.slane %v2662_v42, %v12546_v37  ;;  %v17624_v32 = vld [vmem:[#allocation34_spill] sm:$0xff] }
 0x2bc   : > { %17613 = vst [vmem:[#allocation11_spill] sm:$0xff] %v13365_v5  ;;  %3774 = vadd.xlane.f32.xlu1 %v3773_v63  ;;  %11515 = vtanh.f32 %v17620_v56  ;;  %v13404_v25 = vpop.eup %11503  ;;  %v17622_v56 = vld [vmem:[#allocation33_spill] sm:$0xff]  ;;  %v2679_v58 = vrot.slane %v2665_v3, %v12534_v28  ;;  %v2567_v49 = vcombine.high %v1902_v33, %v1902_v33  ;;  %v2564_v42 = vcombine.high %v13374_v36, %v13374_v36 }
 0x2bd   : > { %v13376_v26 = vpop.xlane.xlu1 %3630  ;;  %11517 = vtanh.f32 %v17622_v56  ;;  %v11506_v55 = vpop.eup %11505  ;;  %v2566_v36 = vcombine.high %v13389_v0, %v13389_v0 }
 0x2be   : > { %17615 = vst [vmem:[#allocation12_spill] sm:$0xff] %v13376_v26  ;;  %3825 = vadd.xlane.f32.xlu0 %v3824_v15  ;;  %v3830_v15 = vsel %vm766_vm0, %v3470_v31, 0.0  ;;  %v3833_v31 = vsel %vm766_vm0, %v3471_v19, 0.0  ;;  %v3454_v19 = vmul.f32 %v13014_v54, %v3117_v27  ;;  %11519 = vtanh.f32 %v17624_v32  ;;  %v11508_v56 = vpop.eup %11507  ;;  %v17626_v27 = vld [vmem:[#allocation36_spill] sm:$0xff] }
 0x2bf   : > { %v13384_v63 = vpop.xlane.xlu0 %3525  ;;  %v3193_v54 = vrot.slane %v2664_v43, %v12546_v37  ;;  %11521 = vtanh.f32 %v17626_v27  ;;  %v3472_v32 = vmul.f32 %v11506_v55, %v3189_v60  ;;  %v17629_v60 = vld [vmem:[#allocation35_spill] sm:$0xff] }
 0x2c0   : > { %17617 = vst [vmem:[#allocation13_spill] sm:$0xff] %v13384_v63  ;;  %3828 = vadd.xlane.f32.xlu1 %v3827_v39  ;;  %v2574_v39 = vrot.slane %v1902_v33, %v12534_v28  ;;  %11523 = vtanh.f32 %v17629_v60 }
 0x2c1   : > { %v13394_v11 = vpop.xlane.xlu1 %3528 }
 0x2c2   : > { %17619 = vst [vmem:[#allocation22_spill] sm:$0xff] %v13394_v11  ;;  %3831 = vadd.xlane.f32.xlu0 %v3830_v15  ;;  %v2688_v15 = vrot.slane %v2672_v50, %v12534_v28  ;;  %v2582_v30 = vcombine.high %v2574_v39, %v2574_v39  ;;  %v3779_v50 = vsel %vm766_vm0, %v3453_v41, 0.0 }
 0x2c3   : > { %v13406_v11 = vpop.xlane.xlu0 %3579 }
 0x2c4   : > { %17621 = vst [vmem:[#allocation24_spill] sm:$0xff] %v13406_v11  ;;  %3834 = vadd.xlane.f32.xlu1 %v3833_v31  ;;  %v3776_v11 = vsel %vm766_vm0, %v3452_v48, 0.0  ;;  %v2702_v31 = vrot.slane %v2680_v10, %v12534_v28  ;;  %v3455_v48 = vmul.f32 %v13210_v34, %v3121_v22  ;;  %v11510_v33 = vpop.eup %11509  ;;  %v3782_v10 = vsel %vm766_vm0, %v3454_v19, 0.0 }
 0x2c5   : > { %v13416_v63 = vpop.xlane.xlu1 %3582  ;;  %v3197_v41 = vrot.slane %v2688_v15, %v12546_v37  ;;  %v2581_v34 = vrot.slane %v2567_v49, %v12534_v28  ;;  %v13439_v22 = vrot.slane %v2582_v30, %v12534_v28  ;;  %v11512_v43 = vpop.eup %11511  ;;  %v3473_v19 = vmul.f32 %v11508_v56, %v3193_v54 }
 0x2c6   : > { %17623 = vst [vmem:[#allocation14_spill] sm:$0xff] %v13416_v63  ;;  %3777 = vadd.xlane.f32.xlu0 %v3776_v11  ;;  %v2590_v11 = vrot.slane %v2574_v39, %v12534_v28  ;;  %v2681_v63 = vcombine.high %v2679_v58, %v2679_v58  ;;  %v3785_v27 = vsel %vm766_vm0, %v3455_v48, 0.0  ;;  %v3201_v55 = vrot.slane %v2702_v31, %v12546_v37 }
 0x2c7   : > { %v13424_v5 = vpop.xlane.xlu0 %3633  ;;  %v13450_v30 = vrot.slane %v2679_v58, %v12534_v28  ;;  %v2712_v48 = vcombine.high %v2702_v31, %v2702_v31  ;;  %v13458_v54 = vrot.slane %v2581_v34, %v12534_v28  ;;  %v3137_v58 = vrot.slane %v13439_v22, %v12546_v37 }
 0x2c8   : > { %17625 = vst [vmem:[#allocation15_spill] sm:$0xff] %v13424_v5  ;;  %3780 = vadd.xlane.f32.xlu1 %v3779_v50  ;;  %v2710_v50 = vcombine.high %v2688_v15, %v2688_v15  ;;  %v11514_v0 = vpop.eup %11513  ;;  %v3836_v15 = vsel %vm766_vm0, %v3472_v32, 0.0  ;;  %v3133_v56 = vrot.slane %v2590_v11, %v12546_v37  ;;  %v2612_v60 = vcombine.high %v2590_v11, %v2590_v11 }
 0x2c9   : > { %v13433_v3 = vpop.xlane.xlu1 %3636  ;;  %v3839_v32 = vsel %vm766_vm0, %v3473_v19, 0.0 }
 0x2ca   : > { %17627 = vst [vmem:[#allocation16_spill] sm:$0xff] %v13433_v3  ;;  %3783 = vadd.xlane.f32.xlu0 %v3782_v10  ;;  %v17630_v3 = vlaneseq  ;;  %v3125_v10 = vrot.slane %v2564_v42, %v12546_v37  ;;  %v13464_v42 = vrot.slane %v2681_v63, %v12534_v28  ;;  %v3205_v31 = vrot.slane %v2710_v50, %v12546_v37 }
 0x2cb   : > { %v13443_v39 = vpop.xlane.xlu0 %3639  ;;  %v3458_v19 = vmul.f32 %v13314_v59, %v3133_v56  ;;  %v3213_v50 = vrot.slane %v13450_v30, %v12546_v37 }
 0x2cc   : > { %17628 = vst [vmem:[#allocation21_spill] sm:$0xff] %v13443_v39  ;;  %v3995_v49 = vand.u32 127, %v17630_v3  ;;  %3786 = vadd.xlane.f32.xlu1 %v3785_v27  ;;  %v3474_v39 = vmul.f32 %v11512_v43, %v3197_v41  ;;  %v3129_v3 = vrot.slane %v2566_v36, %v12546_v37  ;;  %v11516_v27 = vpop.eup %11515  ;;  %v3475_v41 = vmul.f32 %v11514_v0, %v3201_v55  ;;  %v17633_v43 = vld [vmem:[#allocation19_spill] sm:$0xff] }
 0x2cd   : > { %v13453_v6 = vpop.xlane.xlu1 %3642  ;;  %11525 = vtanh.f32 %v17633_v43  ;;  %v2583_v36 = vcombine.high %v2581_v34, %v2581_v34  ;;  %v3456_v17 = vmul.f32 %v12908_v35, %v3125_v10  ;;  %v13475_v63 = vpop.eup %11517  ;;  %v3209_v55 = vrot.slane %v2712_v48, %v12546_v37 }
 0x2ce   : > { %17631 = vst [vmem:[#allocation23_spill] sm:$0xff] %v13453_v6  ;;  %3837 = vadd.xlane.f32.xlu0 %v3836_v15  ;;  %v17634_v15 = vld [vmem:[#allocation47_spill] sm:$0xff]  ;;  %v3842_v11 = vsel %vm766_vm0, %v3474_v39, 0.0  ;;  %v3457_v34 = vmul.f32 %v13135_v45, %v3129_v3  ;;  %v3217_v35 = vrot.slane %v13464_v42, %v12546_v37  ;;  %v2614_v10 = vcombine.high %v13439_v22, %v13439_v22  ;;  %v11520_v39 = vpop.eup %11519 }
 0x2cf   : > { %v13466_v6 = vpop.xlane.xlu0 %3585  ;;  %v13472_v5 = vsub.s32 %v3995_v49, %v17634_v15  ;;  %v3459_v49 = vmul.f32 %v13336_v4, %v3137_v58  ;;  %v3845_v59 = vsel %vm766_vm0, %v3475_v41, 0.0  ;;  %v3476_v56 = vmul.f32 %v11510_v33, %v3205_v31  ;;  %v11522_v3 = vpop.eup %11521 }
 0x2d0   : > { %17632 = vst [vmem:[#allocation26_spill] sm:$0xff] %v13466_v6  ;;  %3840 = vadd.xlane.f32.xlu1 %v3839_v32  ;;  %v3141_v48 = vrot.slane %v2612_v60, %v12546_v37  ;;  %v3149_v32 = vrot.slane %v13458_v54, %v12546_v37  ;;  %v3788_v45 = vsel %vm766_vm0, %v3456_v17, 0.0  ;;  %v2611_v4 = vrot.slane %v2583_v36, %v12534_v28 }
 0x2d1   : > { %v13477_v26 = vpop.xlane.xlu1 %3588  ;;  %v2711_v22 = vcombine.high %v13450_v30, %v13450_v30  ;;  %v3794_v41 = vsel %vm766_vm0, %v3458_v19, 0.0  ;;  %v3477_v33 = vmul.f32 %v11516_v27, %v3209_v55  ;;  %v3478_v31 = vmul.f32 %v11520_v39, %v3213_v50 }
 0x2d2   : > { %3843 = vadd.xlane.f32.xlu0 %v3842_v11  ;;  %v2713_v60 = vcombine.high %v13464_v42, %v13464_v42  ;;  %v3791_v43 = vsel %vm766_vm0, %v3457_v34, 0.0  ;;  %v3797_v17 = vsel %vm766_vm0, %v3459_v49, 0.0  ;;  %v3479_v28 = vmul.f32 %v11522_v3, %v3217_v35  ;;  %v11524_v35 = vpop.eup %11523 }
 0x2d3   : > { %v13490_v0 = vpop.xlane.xlu0 %3591  ;;  %v3145_v36 = vrot.slane %v2614_v10, %v12546_v37  ;;  %v3848_v11 = vsel %vm766_vm0, %v3476_v56, 0.0  ;;  %v3460_v19 = vmul.f32 %v13277_v23, %v3141_v48  ;;  %v3462_v27 = vmul.f32 %v13392_v29, %v3149_v32 }
 0x2d4   : > { %3846 = vadd.xlane.f32.xlu1 %v3845_v59  ;;  %v2613_v42 = vcombine.high %v13458_v54, %v13458_v54  ;;  %v4003_v55 = vrot.slane %v13148_v1, %v13472_v5  ;;  %v3153_v50 = vrot.slane %v2611_v4, %v12546_v37  ;;  %v3221_v34 = vrot.slane %v2711_v22, %v12546_v37 }
 0x2d5   : > { %v13500_v58 = vpop.xlane.xlu1 %3594  ;;  %v2615_v49 = vcombine.high %v2611_v4, %v2611_v4  ;;  %v4067_v10 = vrot.slane %v13057_v13, %v13472_v5  ;;  %v3851_v29 = vsel %vm766_vm0, %v3477_v33, 0.0  ;;  %v3854_v54 = vsel %vm766_vm0, %v3478_v31, 0.0 }
 0x2d6   : > { %3789 = vadd.xlane.f32.xlu0 %v3788_v45  ;;  %v3225_v39 = vrot.slane %v2713_v60, %v12546_v37  ;;  %v3999_v59 = vrot.slane %v13071_v21, %v13472_v5  ;;  %v4071_v56 = vrot.slane %v13092_v8, %v13472_v5  ;;  %v3857_v48 = vsel %vm766_vm0, %v3479_v28, 0.0 }
 0x2d7   : > { %v13508_v30 = vpop.xlane.xlu0 %3645  ;;  %v3461_v32 = vmul.f32 %v13326_v57, %v3145_v36  ;;  %v4063_v45 = vrot.slane %v13042_v9, %v13472_v5  ;;  %v3800_v22 = vsel %vm766_vm0, %v3460_v19, 0.0  ;;  %v13538_v3 = vsel %vm766_vm0, %v3462_v27, 0.0 }
 0x2d8   : > { %3792 = vadd.xlane.f32.xlu1 %v3791_v43  ;;  %v3157_v33 = vrot.slane %v2613_v42, %v12546_v37  ;;  %v4509_v31 = vsel %vm4508_vm1, %v4003_v55, %v3999_v59  ;;  %v3480_v60 = vmul.f32 %v13475_v63, %v3221_v34  ;;  %v3161_v57 = vrot.slane %v2615_v49, %v12546_v37 }
 0x2d9   : > { %v13521_v23 = vpop.xlane.xlu1 %3648  ;;  %v4529_v28 = vsel %vm4508_vm1, %v4067_v10, %v4063_v45  ;;  %v4007_v36 = vrot.slane %v13083_v62, %v13472_v5  ;;  %v4075_v19 = vrot.slane %v13108_v40, %v13472_v5  ;;  %v3481_v42 = vmul.f32 %v11524_v35, %v3225_v39 }
 0x2da   : > { %3795 = vadd.xlane.f32.xlu0 %v3794_v41  ;;  %v3463_v41 = vmul.f32 %v13404_v25, %v3153_v50  ;;  %v11526_v43 = vpop.eup %11525  ;;  %v4011_v25 = vrot.slane %v13162_v18, %v13472_v5  ;;  %v4099_v63 = vrot.slane %v13223_v51, %v13472_v5  ;;  %v3803_v55 = vsel %vm766_vm0, %v3461_v32, 0.0 }
 0x2db   : > { %v13534_v4 = vpop.xlane.xlu0 %3651  ;;  %v4511_v50 = vsel %vm4510_vm2, %v4007_v36, %v4509_v31  ;;  %v4103_v34 = vrot.slane %v13272_v44, %v13472_v5  ;;  %v3464_v35 = vmul.f32 %v13382_v38, %v3157_v33  ;;  %v4079_v10 = vrot.slane %v13119_v16, %v13472_v5 }
 0x2dc   : > { %17635 = vst [vmem:[#allocation28_spill] sm:$0xff] %v13534_v4  ;;  %3798 = vadd.xlane.f32.xlu1 %v3797_v17  ;;  %v4530_v17 = vsel %vm4510_vm2, %v4071_v56, %v4529_v28  ;;  %v4095_v39 = vrot.slane %v13214_v47, %v13472_v5  ;;  %v3465_v59 = vmul.f32 %v11526_v43, %v3161_v57  ;;  %v13575_v38 = vsel %vm766_vm0, %v3480_v60, 0.0 }
 0x2dd   : > { %v13550_v27 = vpop.xlane.xlu1 %3654  ;;  %v4531_v56 = vsel %vm4512_vm3, %v4075_v19, %v4530_v17  ;;  %v4015_v32 = vrot.slane %v13172_v52, %v13472_v5  ;;  %v13578_v33 = vsel %vm766_vm0, %v3481_v42, 0.0  ;;  %v4513_v31 = vsel %vm4512_vm3, %v4011_v25, %v4511_v50 }
 0x2de   : > { %17636 = vst [vmem:[#allocation17_spill] sm:$0xff] %v13550_v27  ;;  %3849 = vadd.xlane.f32.xlu0 %v3848_v11  ;;  %v3809_v11 = vsel %vm766_vm0, %v3463_v41, 0.0  ;;  %v4035_v41 = vrot.slane %v13262_v61, %v13472_v5  ;;  %v4107_v57 = vrot.slane %v13279_v46, %v13472_v5  ;;  %v4083_v43 = vrot.slane %v13138_v24, %v13472_v5 }
 0x2df   : > { %v13561_v49 = vpop.xlane.xlu0 %3597  ;;  %v4039_v28 = vrot.slane %v13309_v20, %v13472_v5  ;;  %v13594_v19 = vsel %vm766_vm0, %v3464_v35, 0.0  ;;  %v4532_v42 = vsel %vm4514_vm4, %v4079_v10, %v4531_v56  ;;  %v4087_v17 = vrot.slane %v13193_v14, %v13472_v5  ;;  %v17640_v20 = vld [vmem:[#allocation15_spill] sm:$0xff] }
 0x2e0   : > { %3852 = vadd.xlane.f32.xlu1 %v3851_v29  ;;  %v4536_v29 = vsel %vm4508_vm1, %v4099_v63, %v4095_v39  ;;  %v13602_v25 = vsel %vm766_vm0, %v3465_v59, 0.0  ;;  %v4515_v63 = vsel %vm4514_vm4, %v4015_v32, %v4513_v31  ;;  %v4019_v50 = vrot.slane %v13188_v7, %v13472_v5  ;;  %v17638_v59 = vld [vmem:[#allocation12_spill] sm:$0xff]  ;;  %v17639_v32 = vld [vmem:[#allocation50_spill] sm:$0xff] }
 0x2e1   : > { %v13572_v45 = vpop.xlane.xlu1 %3600  ;;  %v4537_v60 = vsel %vm4510_vm2, %v4103_v34, %v4536_v29  ;;  %v4111_v34 = vrot.slane %v13289_v2, %v13472_v5  ;;  %v4195_v56 = vrot.slane %v17638_v59, %v13472_v5  ;;  %v4091_v31 = vrot.slane %v17639_v32, %v13472_v5  ;;  %v17646_v59 = vld [vmem:[#allocation43_spill] sm:$0xff] }
 0x2e2   : > { %3855 = vadd.xlane.f32.xlu0 %v3854_v54  ;;  %v4031_v54 = vrot.slane %v13251_v53, %v13472_v5  ;;  %v4538_v39 = vsel %vm4512_vm3, %v4107_v57, %v4537_v60  ;;  %v4199_v53 = vrot.slane %v17640_v20, %v13472_v5  ;;  %v17642_v57 = vld [vmem:[#allocation41_spill] sm:$0xff]  ;;  %v4119_v7 = vrot.slane %v17646_v59, %v13472_v5 }
 0x2e3   : > { %v13591_v36 = vpop.xlane.xlu0 %3603  ;;  %v4115_v60 = vrot.slane %v17642_v57, %v13472_v5  ;;  %v4539_v47 = vsel %vm4514_vm4, %v4111_v34, %v4538_v39  ;;  %v17648_v34 = vld [vmem:[#allocation14_spill] sm:$0xff] }
 0x2e4   : > { %17637 = vst [vmem:[#allocation18_spill] sm:$0xff] %v13591_v36  ;;  %3858 = vadd.xlane.f32.xlu1 %v3857_v48  ;;  %v4522_v10 = vsel %vm4508_vm1, %v4035_v41, %v4031_v54  ;;  %v4043_v48 = vrot.slane %v13318_v12, %v13472_v5  ;;  %v4533_v41 = vsel %vm4516_vm5, %v4083_v43, %v4532_v42  ;;  %v17643_v54 = vld [vmem:[#allocation11_spill] sm:$0xff] }
 0x2e5   : > { %v13609_v35 = vpop.xlane.xlu1 %3606  ;;  %v4523_v29 = vsel %vm4510_vm2, %v4039_v28, %v4522_v10  ;;  %v4191_v44 = vrot.slane %v17643_v54, %v13472_v5  ;;  %v17644_v28 = vld [vmem:[#allocation46_spill] sm:$0xff]  ;;  %v4517_v43 = vsel %vm4516_vm5, %v4019_v50, %v4515_v63  ;;  %v17647_v54 = vld [vmem:[#allocation16_spill] sm:$0xff]  ;;  %v4131_v39 = vrot.slane %v17648_v34, %v13472_v5  ;;  %v17652_v34 = vld [vmem:[#allocation21_spill] sm:$0xff] }
 0x2e6   : > { %3801 = vadd.xlane.f32.xlu0 %v3800_v22  ;;  %v4534_v22 = vsel %vm4518_vm6, %v4087_v17, %v4533_v41  ;;  %v4047_v10 = vrot.slane %v17644_v28, %v13472_v5  ;;  %v4524_v42 = vsel %vm4512_vm3, %v4043_v48, %v4523_v29  ;;  %v4203_v17 = vrot.slane %v17647_v54, %v13472_v5  ;;  %v17650_v29 = vld [vmem:[#allocation37_spill] sm:$0xff] }
 0x2e7   : > { %v13622_v2 = vpop.xlane.xlu0 %3657  ;;  %v4227_v63 = vrot.slane %v13550_v27, %v13472_v5  ;;  %v4535_v48 = vsel %vm4520_vm7, %v4091_v31, %v4534_v22  ;;  %v4540_v28 = vsel %vm4516_vm5, %v4115_v60, %v4539_v47  ;;  %v4207_v31 = vrot.slane %v17652_v34, %v13472_v5 }
 0x2e8   : > { %17641 = vst [vmem:[#allocation20_spill] sm:$0xff] %v13622_v2  ;;  %3804 = vadd.xlane.f32.xlu1 %v3803_v55  ;;  %v4557_v55 = vsel %vm4508_vm1, %v4195_v56, %v4191_v44  ;;  %v4023_v44 = vrot.slane %v17650_v29, %v13472_v5  ;;  %v4135_v56 = vrot.slane %v13466_v6, %v13472_v5  ;;  %v17653_v6 = vld [vmem:[#allocation10_spill] sm:$0xff]  ;;  %v17656_v29 = vld [vmem:[#allocation13_spill] sm:$0xff] }
 0x2e9   : > { %v13633_v20 = vpop.xlane.xlu1 %3660  ;;  %v4558_v41 = vsel %vm4510_vm2, %v4199_v53, %v4557_v55  ;;  %v4525_v53 = vsel %vm4514_vm4, %v4047_v10, %v4524_v42  ;;  %v17651_v55 = vld [vmem:[#allocation24_spill] sm:$0xff]  ;;  %v4223_v22 = vrot.slane %v13534_v4, %v13472_v5  ;;  %v4051_v54 = vrot.slane %v17653_v6, %v13472_v5 }
 0x2ea   : > { %17645 = vst [vmem:[#allocation25_spill] sm:$0xff] %v13633_v20  ;;  %3807 = vadd.xlane.f32.xlu0 %v13538_v3  ;;  %v4231_v3 = vrot.slane %v13622_v2, %v13472_v5  ;;  %v4127_v27 = vrot.slane %v17651_v55, %v13472_v5  ;;  %v4559_v47 = vsel %vm4512_vm3, %v4203_v17, %v4558_v41  ;;  %v17657_v17 = vld [vmem:[#allocation23_spill] sm:$0xff] }
 0x2eb   : > { %v13648_v50 = vpop.xlane.xlu0 %3663  ;;  %v4541_v60 = vsel %vm4518_vm6, %v4119_v7, %v4540_v28  ;;  %v4139_v42 = vrot.slane %v13477_v26, %v13472_v5  ;;  %v4564_v4 = vsel %vm4508_vm1, %v4227_v63, %v4223_v22  ;;  %v4235_v55 = vrot.slane %v13633_v20, %v13472_v5  ;;  %v17658_v28 = vld [vmem:[#allocation38_spill] sm:$0xff] }
 0x2ec   : > { %17649 = vst [vmem:[#allocation27_spill] sm:$0xff] %v13648_v50  ;;  %3810 = vadd.xlane.f32.xlu1 %v3809_v11  ;;  %v17654_v11 = vld [vmem:[#allocation45_spill] sm:$0xff]  ;;  %v4543_v10 = vsel %vm4508_vm1, %v4131_v39, %v4127_v27  ;;  %v4055_v6 = vrot.slane %v17656_v29, %v13472_v5  ;;  %v4565_v27 = vsel %vm4510_vm2, %v4231_v3, %v4564_v4  ;;  %v4650_v22 = vsel %vm4643_vm8, %v4535_v48, -inf }
 0x2ed   : > { %v13665_v59 = vpop.xlane.xlu1 %3666  ;;  %v4123_v2 = vrot.slane %v17654_v11, %v13472_v5  ;;  %v4544_v7 = vsel %vm4510_vm2, %v4135_v56, %v4543_v10  ;;  %v4027_v39 = vrot.slane %v17658_v28, %v13472_v5  ;;  %v4560_v41 = vsel %vm4514_vm4, %v4207_v31, %v4559_v47  ;;  %v17660_v47 = vld [vmem:[#allocation22_spill] sm:$0xff] }
 0x2ee   : > { %3861 = vadd.xlane.f32.xlu0 %v13575_v38  ;;  %v4211_v38 = vrot.slane %v17657_v17, %v13472_v5  ;;  %v4519_v20 = vsel %vm4518_vm6, %v4023_v44, %v4517_v43  ;;  %v4143_v29 = vrot.slane %v13490_v0, %v13472_v5  ;;  %v4215_v56 = vrot.slane %v13508_v30, %v13472_v5 }
 0x2ef   : > { %v13680_v34 = vpop.xlane.xlu0 %3609  ;;  %v4239_v4 = vrot.slane %v13648_v50, %v13472_v5  ;;  %v4545_v3 = vsel %vm4512_vm3, %v4139_v42, %v4544_v7  ;;  %v4163_v48 = vrot.slane %v13609_v35, %v13472_v5  ;;  %v4566_v43 = vsel %vm4512_vm3, %v4235_v55, %v4565_v27 }
 0x2f0   : > { %17655 = vst [vmem:[#allocation29_spill] sm:$0xff] %v13680_v34  ;;  %3864 = vadd.xlane.f32.xlu1 %v13578_v33  ;;  %v4526_v33 = vsel %vm4516_vm5, %v4051_v54, %v4525_v53  ;;  %v4542_v31 = vsel %vm4520_vm7, %v4123_v2, %v4541_v60  ;;  %v4059_v10 = vrot.slane %v17660_v47, %v13472_v5 }
 0x2f1   : > { %v13692_v63 = vpop.xlane.xlu1 %3612  ;;  %v4167_v50 = vrot.slane %v13680_v34, %v13472_v5  ;;  %v4561_v54 = vsel %vm4516_vm5, %v4211_v38, %v4560_v41  ;;  %v4147_v53 = vrot.slane %v13500_v58, %v13472_v5  ;;  %v4219_v55 = vrot.slane %v13521_v23, %v13472_v5 }
 0x2f2   : > { %3813 = vadd.xlane.f32.xlu0 %v13594_v19  ;;  %v4527_v19 = vsel %vm4518_vm6, %v4055_v6, %v4526_v33  ;;  %v4159_v2 = vrot.slane %v13591_v36, %v13472_v5  ;;  %v4243_v60 = vrot.slane %v13665_v59, %v13472_v5  ;;  %v4567_v6 = vsel %vm4514_vm4, %v4239_v4, %v4566_v43 }
 0x2f3   : > { %v13708_v44 = vpop.xlane.xlu0 %3615  ;;  %v4521_v38 = vsel %vm4520_vm7, %v4027_v39, %v4519_v20  ;;  %v4562_v7 = vsel %vm4518_vm6, %v4215_v56, %v4561_v54  ;;  %v4151_v27 = vrot.slane %v13561_v49, %v13472_v5  ;;  %v4171_v33 = vrot.slane %v13692_v63, %v13472_v5 }
 0x2f4   : > { %17659 = vst [vmem:[#allocation30_spill] sm:$0xff] %v13708_v44  ;;  %3816 = vadd.xlane.f32.xlu1 %v13602_v25  ;;  %v4546_v25 = vsel %vm4514_vm4, %v4143_v29, %v4545_v3  ;;  %v4550_v41 = vsel %vm4508_vm1, %v4163_v48, %v4159_v2  ;;  %v4653_v36 = vsel %vm4643_vm8, %v4542_v31, -inf  ;;  %v4528_v20 = vsel %vm4520_vm7, %v4059_v10, %v4527_v19 }
 0x2f5   : > { %v13726_v42 = vpop.xlane.xlu1 %3618  ;;  %v4551_v29 = vsel %vm4510_vm2, %v4167_v50, %v4550_v41  ;;  %v4644_v56 = vsel %vm4643_vm8, %v4521_v38, -inf  ;;  %v4563_v4 = vsel %vm4520_vm7, %v4219_v55, %v4562_v7  ;;  %v4568_v3 = vsel %vm4516_vm5, %v4243_v60, %v4567_v6 }
 0x2f6   : > { %4651 = vmax.xlane.f32.xlu0 %v4650_v22  ;;  %v4547_v48 = vsel %vm4516_vm5, %v4147_v53, %v4546_v25  ;;  %v4155_v43 = vrot.slane %v13572_v45, %v13472_v5  ;;  %v4175_v50 = vrot.slane %v13708_v44, %v13472_v5  ;;  %v4552_v10 = vsel %vm4512_vm3, %v4171_v33, %v4551_v29 }
 0x2f7   : > { %v13737_v34 = vpop.xlane.xlu0 %3669  ;;  %v4647_v54 = vsel %vm4643_vm8, %v4528_v20, -inf  ;;  %v4548_v53 = vsel %vm4518_vm6, %v4151_v27, %v4547_v48  ;;  %v4179_v2 = vrot.slane %v13726_v42, %v13472_v5  ;;  %v4662_v25 = vsel %vm4643_vm8, %v4563_v4, -inf }
 0x2f8   : > { %17661 = vst [vmem:[#allocation32_spill] sm:$0xff] %v13737_v34  ;;  %v4247_v22 = vrot.slane %v13737_v34, %v13472_v5  ;;  %4654 = vmax.xlane.f32.xlu1 %v4653_v36  ;;  %v4553_v6 = vsel %vm4514_vm4, %v4175_v50, %v4552_v10  ;;  %v4549_v38 = vsel %vm4520_vm7, %v4155_v43, %v4548_v53 }
 0x2f9   : > { %v13744_v39 = vpop.xlane.xlu1 %3672  ;;  %v4656_v29 = vsel %vm4643_vm8, %v4549_v38, -inf }
 0x2fa   : > { %v4251_v36 = vrot.slane %v13744_v39, %v13472_v5  ;;  %4645 = vmax.xlane.f32.xlu0 %v4644_v56  ;;  %v4569_v31 = vsel %vm4518_vm6, %v4247_v22, %v4568_v3  ;;  %v4554_v22 = vsel %vm4516_vm5, %v4179_v2, %v4553_v6 }
 0x2fb   : > { %v13758_v19 = vpop.xlane.xlu0 %3723 }
 0x2fc   : > { %17662 = vst [vmem:[#allocation31_spill] sm:$0xff] %v13758_v19  ;;  %4648 = vmax.xlane.f32.xlu1 %v4647_v54  ;;  %v4570_v55 = vsel %vm4520_vm7, %v4251_v36, %v4569_v31  ;;  %v4319_v53 = vrot.slane %v13758_v19, %v13472_v5 }
 0x2fd   : > { %v13765_v60 = vpop.xlane.xlu1 %3726  ;;  %v4665_v41 = vsel %vm4643_vm8, %v4570_v55, -inf }
 0x2fe   : > { %4663 = vmax.xlane.f32.xlu0 %v4662_v25  ;;  %v4323_v31 = vrot.slane %v13765_v60, %v13472_v5 }
 0x2ff   : > { %v13770_v7 = vpop.xlane.xlu0 %3621 }
 0x300   : > { %17663 = vst [vmem:[#allocation33_spill] sm:$0xff] %v13770_v7  ;;  %v4183_v27 = vrot.slane %v13770_v7, %v13472_v5  ;;  %4666 = vmax.xlane.f32.xlu1 %v4665_v41  ;;  %v4585_v2 = vsel %vm4508_vm1, %v4323_v31, %v4319_v53 }
 0x301   : > { %v13775_v33 = vpop.xlane.xlu1 %3624 }
 0x302   : > { %v4187_v20 = vrot.slane %v13775_v33, %v13472_v5  ;;  %4657 = vmax.xlane.f32.xlu0 %v4656_v29  ;;  %v4555_v56 = vsel %vm4518_vm6, %v4183_v27, %v4554_v22 }
 0x303   : > { %v13782_v4 = vpop.xlane.xlu0 %3675 }
 0x304   : > { %17664 = vst [vmem:[#allocation34_spill] sm:$0xff] %v13782_v4  ;;  %v4556_v3 = vsel %vm4520_vm7, %v4187_v20, %v4555_v56 }
 0x305   : > { %v13785_v48 = vpop.xlane.xlu1 %3678  ;;  %v4659_v43 = vsel %vm4643_vm8, %v4556_v3, -inf  ;;  %v4255_v3 = vrot.slane %v13782_v4, %v13472_v5 }
 0x306   : > { %17665 = vst [vmem:[#allocation36_spill] sm:$0xff] %v13785_v48  ;;  %4660 = vmax.xlane.f32.xlu1 %v4659_v43  ;;  %v4259_v29 = vrot.slane %v13785_v48, %v13472_v5 }
 0x307   : > { %v13788_v50 = vpop.xlane.xlu0 %3729 }
 0x308   : > { %17666 = vst [vmem:[#allocation35_spill] sm:$0xff] %v13788_v50  ;;  %v4327_v54 = vrot.slane %v13788_v50, %v13472_v5  ;;  %v4571_v53 = vsel %vm4508_vm1, %v4259_v29, %v4255_v3 }
 0x309   : > { %v13790_v36 = vpop.xlane.xlu1 %3732 }
 0x30a   : > { %v4331_v25 = vrot.slane %v13790_v36, %v13472_v5  ;;  %v4586_v38 = vsel %vm4510_vm2, %v4327_v54, %v4585_v2 }
 0x30b   : > { %v13794_v10 = vpop.xlane.xlu0 %3735 }
 0x30c   : > { %17667 = vst [vmem:[#allocation19_spill] sm:$0xff] %v13794_v10  ;;  %v4335_v27 = vrot.slane %v13794_v10, %v13472_v5  ;;  %v4587_v22 = vsel %vm4512_vm3, %v4331_v25, %v4586_v38 }
 0x30d   : > { %v13800_v55 = vpop.xlane.xlu1 %3738 }
 0x30e   : > { %v4339_v43 = vrot.slane %v13800_v55, %v13472_v5  ;;  %v4588_v54 = vsel %vm4514_vm4, %v4335_v27, %v4587_v22 }
 0x30f   : > { %v13805_v6 = vpop.xlane.xlu0 %3681 }
 0x310   : > { %17668 = vst [vmem:[#allocation47_spill] sm:$0xff] %v13805_v6  ;;  %v4263_v56 = vrot.slane %v13805_v6, %v13472_v5  ;;  %v4589_v10 = vsel %vm4516_vm5, %v4339_v43, %v4588_v54 }
 0x311   : > { %v13808_v41 = vpop.xlane.xlu1 %3684 }
 0x312   : > { %17669 = vst [vmem:[#allocation50_spill] sm:$0xff] %v13808_v41  ;;  %v4267_v2 = vrot.slane %v13808_v41, %v13472_v5  ;;  %v4572_v38 = vsel %vm4510_vm2, %v4263_v56, %v4571_v53 }
 0x313   : > { %v13815_v20 = vpop.xlane.xlu0 %3687 }
 0x314   : > { %17670 = vst [vmem:[#allocation41_spill] sm:$0xff] %v13815_v20  ;;  %v4271_v50 = vrot.slane %v13815_v20, %v13472_v5  ;;  %v4573_v22 = vsel %vm4512_vm3, %v4267_v2, %v4572_v38 }
 0x315   : > { %v13823_v31 = vpop.xlane.xlu1 %3690 }
 0x316   : > { %17671 = vst [vmem:[#allocation45_spill] sm:$0xff] %v13823_v31  ;;  %v4275_v53 = vrot.slane %v13823_v31, %v13472_v5  ;;  %v4574_v54 = vsel %vm4514_vm4, %v4271_v50, %v4573_v22 }
 0x317   : > { %v13829_v25 = vpop.xlane.xlu0 %3741 }
 0x318   : > { %17672 = vst [vmem:[#allocation23_spill] sm:$0xff] %v13829_v25  ;;  %v4343_v6 = vrot.slane %v13829_v25, %v13472_v5  ;;  %v4575_v2 = vsel %vm4516_vm5, %v4275_v53, %v4574_v54 }
 0x319   : > { %v13834_v4 = vpop.xlane.xlu1 %3744 }
 0x31a   : > { %v4347_v27 = vrot.slane %v13834_v4, %v13472_v5  ;;  %v4590_v29 = vsel %vm4518_vm6, %v4343_v6, %v4589_v10 }
 0x31b   : > { %v13843_v3 = vpop.xlane.xlu0 %3747 }
 0x31c   : > { %17673 = vst [vmem:[#allocation38_spill] sm:$0xff] %v13843_v3  ;;  %v4591_v56 = vsel %vm4520_vm7, %v4347_v27, %v4590_v29 }
 0x31d   : > { %v13848_v25 = vpop.xlane.xlu1 %3750  ;;  %v4674_v43 = vsel %vm4643_vm8, %v4591_v56, -inf }
 0x31e   : > { %17674 = vst [vmem:[#allocation22_spill] sm:$0xff] %v13848_v25  ;;  %4675 = vmax.xlane.f32.xlu0 %v4674_v43  ;;  %v4355_v53 = vrot.slane %v13848_v25, %v13472_v5 }
 0x31f   : > { %v13852_v20 = vpop.xlane.xlu0 %3693 }
 0x320   : > { %17675 = vst [vmem:[#allocation51_spill] sm:$0xff] %v13852_v20  ;;  %v4279_v10 = vrot.slane %v13852_v20, %v13472_v5 }
 0x321   : > { %v13856_v6 = vpop.xlane.xlu1 %3696 }
 0x322   : > { %17676 = vst [vmem:[#allocation52_spill] sm:$0xff] %v13856_v6  ;;  %v4283_v38 = vrot.slane %v13856_v6, %v13472_v5  ;;  %v4576_v27 = vsel %vm4518_vm6, %v4279_v10, %v4575_v2  ;;  %v4351_v2 = vrot.slane %v13843_v3, %v13472_v5 }
 0x323   : > { %v13862_v29 = vpop.xlane.xlu0 %3699 }
 0x324   : > { %17677 = vst [vmem:[#allocation53_spill] sm:$0xff] %v13862_v29  ;;  %v4577_v56 = vsel %vm4520_vm7, %v4283_v38, %v4576_v27  ;;  %v4592_v27 = vsel %vm4508_vm1, %v4355_v53, %v4351_v2  ;;  %v4287_v2 = vrot.slane %v13862_v29, %v13472_v5 }
 0x325   : > { %v13865_v50 = vpop.xlane.xlu1 %3702  ;;  %v4668_v22 = vsel %vm4643_vm8, %v4577_v56, -inf }
 0x326   : > { %17678 = vst [vmem:[#allocation54_spill] sm:$0xff] %v13865_v50  ;;  %4669 = vmax.xlane.f32.xlu0 %v4668_v22 }
 0x327   : > { %v13868_v43 = vpop.xlane.xlu0 %3753 }
 0x328   : > { %17679 = vst [vmem:[#allocation55_spill] sm:$0xff] %v13868_v43  ;;  %v4359_v10 = vrot.slane %v13868_v43, %v13472_v5  ;;  %v4291_v43 = vrot.slane %v13865_v50, %v13472_v5 }
 0x329   : > { %v13870_v20 = vpop.xlane.xlu1 %3756 }
 0x32a   : > { %17680 = vst [vmem:[#allocation56_spill] sm:$0xff] %v13870_v20  ;;  %v4363_v56 = vrot.slane %v13870_v20, %v13472_v5  ;;  %v4593_v19 = vsel %vm4510_vm2, %v4359_v10, %v4592_v27  ;;  %v4578_v20 = vsel %vm4508_vm1, %v4291_v43, %v4287_v2 }
 0x32b   : > { %v13874_v54 = vpop.xlane.xlu0 %3759 }
 0x32c   : > { %17681 = vst [vmem:[#allocation57_spill] sm:$0xff] %v13874_v54  ;;  %v4367_v7 = vrot.slane %v13874_v54, %v13472_v5  ;;  %v4594_v3 = vsel %vm4512_vm3, %v4363_v56, %v4593_v19 }
 0x32d   : > { %v13880_v38 = vpop.xlane.xlu1 %3762 }
 0x32e   : > { %17682 = vst [vmem:[#allocation58_spill] sm:$0xff] %v13880_v38  ;;  %v4371_v10 = vrot.slane %v13880_v38, %v13472_v5  ;;  %v4595_v54 = vsel %vm4514_vm4, %v4367_v7, %v4594_v3 }
 0x32f   : > { %v13885_v22 = vpop.xlane.xlu0 %3705 }
 0x330   : > { %17683 = vst [vmem:[#allocation59_spill] sm:$0xff] %v13885_v22  ;;  %v4295_v53 = vrot.slane %v13885_v22, %v13472_v5  ;;  %v4596_v38 = vsel %vm4516_vm5, %v4371_v10, %v4595_v54 }
 0x331   : > { %v13888_v25 = vpop.xlane.xlu1 %3708 }
 0x332   : > { %17684 = vst [vmem:[#allocation60_spill] sm:$0xff] %v13888_v25  ;;  %v4299_v19 = vrot.slane %v13888_v25, %v13472_v5  ;;  %v4579_v50 = vsel %vm4510_vm2, %v4295_v53, %v4578_v20 }
 0x333   : > { %v13895_v6 = vpop.xlane.xlu0 %3711 }
 0x334   : > { %17685 = vst [vmem:[#allocation61_spill] sm:$0xff] %v13895_v6  ;;  %v4303_v44 = vrot.slane %v13895_v6, %v13472_v5  ;;  %v4580_v43 = vsel %vm4512_vm3, %v4299_v19, %v4579_v50 }
 0x335   : > { %v13903_v27 = vpop.xlane.xlu1 %3714 }
 0x336   : > { %17686 = vst [vmem:[#allocation62_spill] sm:$0xff] %v13903_v27  ;;  %v4307_v53 = vrot.slane %v13903_v27, %v13472_v5  ;;  %v4581_v10 = vsel %vm4514_vm4, %v4303_v44, %v4580_v43 }
 0x337   : > { %v13909_v56 = vpop.xlane.xlu0 %3765 }
 0x338   : > { %17687 = vst [vmem:[#allocation63_spill] sm:$0xff] %v13909_v56  ;;  %v4375_v22 = vrot.slane %v13909_v56, %v13472_v5 }
 0x339   : > { %v13914_v29 = vpop.xlane.xlu1 %3768 }
 0x33a   : > { %17688 = vst [vmem:[#allocation64_spill] sm:$0xff] %v13914_v29  ;;  %v4379_v7 = vrot.slane %v13914_v29, %v13472_v5  ;;  %v4597_v3 = vsel %vm4518_vm6, %v4375_v22, %v4596_v38  ;;  %v4582_v22 = vsel %vm4516_vm5, %v4307_v53, %v4581_v10 }
 0x33b   : > { %v13923_v2 = vpop.xlane.xlu0 %3819 }
 0x33c   : > { %17689 = vst [vmem:[#allocation65_spill] sm:$0xff] %v13923_v2  ;;  %v4598_v20 = vsel %vm4520_vm7, %v4379_v7, %v4597_v3 }
 0x33d   : > { %v13928_v56 = vpop.xlane.xlu1 %3822  ;;  %v4677_v54 = vsel %vm4643_vm8, %v4598_v20, -inf }
 0x33e   : > { %17690 = vst [vmem:[#allocation66_spill] sm:$0xff] %v13928_v56  ;;  %4678 = vmax.xlane.f32.xlu1 %v4677_v54  ;;  %v12112_v54 = vmov 0   ;;  %v4451_v10 = vrot.slane %v13928_v56, %v13472_v5 }
 0x33f   : > { %v13932_v6 = vpop.xlane.xlu0 %3717  ;;  %11102 = vset.pattern.permute.xlu0 %v12112_v54  ;;  %11101 = vset.pattern.permute.xlu1 %v12112_v54 }
 0x340   : > { %17691 = vst [vmem:[#allocation67_spill] sm:$0xff] %v13932_v6  ;;  %v4311_v38 = vrot.slane %v13932_v6, %v13472_v5 }
 0x341   : > { %v13936_v50 = vpop.xlane.xlu1 %3720 }
 0x342   : > { %17692 = vst [vmem:[#allocation68_spill] sm:$0xff] %v13936_v50  ;;  %v4315_v19 = vrot.slane %v13936_v50, %v13472_v5  ;;  %v4583_v7 = vsel %vm4518_vm6, %v4311_v38, %v4582_v22 }
 0x343   : > { %v13942_v3 = vpop.xlane.xlu0 %3771 }
 0x344   : > { %17693 = vst [vmem:[#allocation69_spill] sm:$0xff] %v13942_v3  ;;  %v4584_v20 = vsel %vm4520_vm7, %v4315_v19, %v4583_v7  ;;  %v4447_v19 = vrot.slane %v13923_v2, %v13472_v5 }
 0x345   : > { %v13945_v44 = vpop.xlane.xlu1 %3774  ;;  %v4671_v43 = vsel %vm4643_vm8, %v4584_v20, -inf }
 0x346   : > { %17694 = vst [vmem:[#allocation70_spill] sm:$0xff] %v13945_v44  ;;  %4672 = vmax.xlane.f32.xlu1 %v4671_v43  ;;  %v4613_v20 = vsel %vm4508_vm1, %v4451_v10, %v4447_v19  ;;  %v4383_v19 = vrot.slane %v13942_v3, %v13472_v5 }
 0x347   : > { %v13948_v6 = vpop.xlane.xlu0 %3825 }
 0x348   : > { %17695 = vst [vmem:[#allocation71_spill] sm:$0xff] %v13948_v6  ;;  %v4455_v22 = vrot.slane %v13948_v6, %v13472_v5  ;;  %v4387_v6 = vrot.slane %v13945_v44, %v13472_v5 }
 0x349   : > { %v13950_v53 = vpop.xlane.xlu1 %3828 }
 0x34a   : > { %17696 = vst [vmem:[#allocation72_spill] sm:$0xff] %v13950_v53  ;;  %v4459_v43 = vrot.slane %v13950_v53, %v13472_v5  ;;  %v4614_v50 = vsel %vm4510_vm2, %v4455_v22, %v4613_v20  ;;  %v4599_v53 = vsel %vm4508_vm1, %v4387_v6, %v4383_v19 }
 0x34b   : > { %v13954_v38 = vpop.xlane.xlu0 %3831 }
 0x34c   : > { %17697 = vst [vmem:[#allocation73_spill] sm:$0xff] %v13954_v38  ;;  %v4463_v27 = vrot.slane %v13954_v38, %v13472_v5  ;;  %v4615_v2 = vsel %vm4512_vm3, %v4459_v43, %v4614_v50 }
 0x34d   : > { %v13960_v7 = vpop.xlane.xlu1 %3834 }
 0x34e   : > { %17698 = vst [vmem:[#allocation74_spill] sm:$0xff] %v13960_v7  ;;  %v4467_v22 = vrot.slane %v13960_v7, %v13472_v5  ;;  %v4616_v38 = vsel %vm4514_vm4, %v4463_v27, %v4615_v2 }
 0x34f   : > { %v13965_v54 = vpop.xlane.xlu0 %3777 }
 0x350   : > { %17699 = vst [vmem:[#allocation75_spill] sm:$0xff] %v13965_v54  ;;  %v4391_v10 = vrot.slane %v13965_v54, %v13472_v5  ;;  %v4617_v7 = vsel %vm4516_vm5, %v4467_v22, %v4616_v38 }
 0x351   : > { %v13968_v56 = vpop.xlane.xlu1 %3780 }
 0x352   : > { %17700 = vst [vmem:[#allocation76_spill] sm:$0xff] %v13968_v56  ;;  %v4395_v50 = vrot.slane %v13968_v56, %v13472_v5  ;;  %v4600_v44 = vsel %vm4510_vm2, %v4391_v10, %v4599_v53 }
 0x353   : > { %v13975_v25 = vpop.xlane.xlu0 %3783 }
 0x354   : > { %17701 = vst [vmem:[#allocation77_spill] sm:$0xff] %v13975_v25  ;;  %v4399_v29 = vrot.slane %v13975_v25, %v13472_v5  ;;  %v4601_v2 = vsel %vm4512_vm3, %v4395_v50, %v4600_v44 }
 0x355   : > { %v13983_v20 = vpop.xlane.xlu1 %3786 }
 0x356   : > { %17702 = vst [vmem:[#allocation78_spill] sm:$0xff] %v13983_v20  ;;  %v4403_v10 = vrot.slane %v13983_v20, %v13472_v5  ;;  %v4602_v22 = vsel %vm4514_vm4, %v4399_v29, %v4601_v2 }
 0x357   : > { %v13989_v43 = vpop.xlane.xlu0 %3837 }
 0x358   : > { %17703 = vst [vmem:[#allocation79_spill] sm:$0xff] %v13989_v43  ;;  %v4471_v54 = vrot.slane %v13989_v43, %v13472_v5 }
 0x359   : > { %v13994_v3 = vpop.xlane.xlu1 %3840 }
 0x35a   : > { %17704 = vst [vmem:[#allocation80_spill] sm:$0xff] %v13994_v3  ;;  %v4475_v6 = vrot.slane %v13994_v3, %v13472_v5  ;;  %v4618_v27 = vsel %vm4518_vm6, %v4471_v54, %v4617_v7  ;;  %v4603_v54 = vsel %vm4516_vm5, %v4403_v10, %v4602_v22 }
 0x35b   : > { %v14003_v19 = vpop.xlane.xlu0 %3843 }
 0x35c   : > { %17705 = vst [vmem:[#allocation81_spill] sm:$0xff] %v14003_v19  ;;  %v4619_v53 = vsel %vm4520_vm7, %v4475_v6, %v4618_v27 }
 0x35d   : > { %v14008_v43 = vpop.xlane.xlu1 %3846  ;;  %v4686_v38 = vsel %vm4643_vm8, %v4619_v53, -inf }
 0x35e   : > { %17706 = vst [vmem:[#allocation82_spill] sm:$0xff] %v14008_v43  ;;  %4687 = vmax.xlane.f32.xlu0 %v4686_v38  ;;  %v4483_v10 = vrot.slane %v14008_v43, %v13472_v5 }
 0x35f   : > { %v14012_v25 = vpop.xlane.xlu0 %3789 }
 0x360   : > { %17707 = vst [vmem:[#allocation83_spill] sm:$0xff] %v14012_v25  ;;  %v4407_v7 = vrot.slane %v14012_v25, %v13472_v5 }
 0x361   : > { %v14016_v44 = vpop.xlane.xlu1 %3792 }
 0x362   : > { %17708 = vst [vmem:[#allocation84_spill] sm:$0xff] %v14016_v44  ;;  %v4411_v50 = vrot.slane %v14016_v44, %v13472_v5  ;;  %v4604_v6 = vsel %vm4518_vm6, %v4407_v7, %v4603_v54  ;;  %v4479_v54 = vrot.slane %v14003_v19, %v13472_v5 }
 0x363   : > { %v14022_v27 = vpop.xlane.xlu0 %3795 }
 0x364   : > { %17709 = vst [vmem:[#allocation85_spill] sm:$0xff] %v14022_v27  ;;  %v4605_v53 = vsel %vm4520_vm7, %v4411_v50, %v4604_v6  ;;  %v4620_v6 = vsel %vm4508_vm1, %v4483_v10, %v4479_v54 }
 0x365   : > { %v14025_v29 = vpop.xlane.xlu1 %3798  ;;  %v4680_v2 = vsel %vm4643_vm8, %v4605_v53, -inf }
 0x366   : > { %17710 = vst [vmem:[#allocation86_spill] sm:$0xff] %v14025_v29  ;;  %4681 = vmax.xlane.f32.xlu0 %v4680_v2 }
 0x367   : > { %v14028_v38 = vpop.xlane.xlu0 %3849 }
 0x368   : > { %17711 = vst [vmem:[#allocation87_spill] sm:$0xff] %v14028_v38  ;;  %v4487_v7 = vrot.slane %v14028_v38, %v13472_v5 }
 0x369   : > { %v14030_v25 = vpop.xlane.xlu1 %3852 }
 0x36a   : > { %17712 = vst [vmem:[#allocation88_spill] sm:$0xff] %v14030_v25  ;;  %v4491_v53 = vrot.slane %v14030_v25, %v13472_v5  ;;  %v4621_v44 = vsel %vm4510_vm2, %v4487_v7, %v4620_v6 }
 0x36b   : > { %v14034_v22 = vpop.xlane.xlu0 %3855 }
 0x36c   : > { %17713 = vst [vmem:[#allocation89_spill] sm:$0xff] %v14034_v22  ;;  %v4495_v20 = vrot.slane %v14034_v22, %v13472_v5  ;;  %v4622_v38 = vsel %vm4512_vm3, %v4491_v53, %v4621_v44 }
 0x36d   : > { %v14040_v50 = vpop.xlane.xlu1 %3858 }
 0x36e   : > { %17714 = vst [vmem:[#allocation90_spill] sm:$0xff] %v14040_v50  ;;  %v4499_v19 = vrot.slane %v14040_v50, %v13472_v5  ;;  %v4623_v54 = vsel %vm4514_vm4, %v4495_v20, %v4622_v38  ;;  %v4419_v50 = vrot.slane %v14025_v29, %v13472_v5 }
 0x36f   : > { %v14045_v2 = vpop.xlane.xlu0 %3801 }
 0x370   : > { %17715 = vst [vmem:[#allocation91_spill] sm:$0xff] %v14045_v2  ;;  %v4624_v22 = vsel %vm4516_vm5, %v4499_v19, %v4623_v54  ;;  %v4423_v20 = vrot.slane %v14045_v2, %v13472_v5  ;;  %v14081_v19 = vsub.s32 3, %v17634_v15  ;;  %v4415_v54 = vrot.slane %v14022_v27, %v13472_v5 }
 0x371   : > { %v14048_v43 = vpop.xlane.xlu1 %3804  ;;  %v14090_v2 = vsub.s32 5, %v17634_v15 }
 0x372   : > { %17716 = vst [vmem:[#allocation92_spill] sm:$0xff] %v14048_v43  ;;  %17723 = vst [vmem:[#allocation99_spill] sm:$0xff] %v14081_v19  ;;  %v4427_v29 = vrot.slane %v14048_v43, %v13472_v5 }
 0x373   : > { %v14053_v56 = vpop.xlane.xlu0 %3807  ;;  %17724 = vst [vmem:[#allocation100_spill] sm:$0xff] %v14090_v2 }
 0x374   : > { %17717 = vst [vmem:[#allocation93_spill] sm:$0xff] %v14053_v56  ;;  %v4431_v27 = vrot.slane %v14053_v56, %v13472_v5 }
 0x375   : > { %v14057_v10 = vpop.xlane.xlu1 %3810 }
 0x376   : > { %17718 = vst [vmem:[#allocation94_spill] sm:$0xff] %v14057_v10  ;;  %v4435_v48 = vrot.slane %v14057_v10, %v13472_v5 }
 0x377   : > { %v14060_v25 = vpop.xlane.xlu0 %3861 }
 0x378   : > { %17719 = vst [vmem:[#allocation95_spill] sm:$0xff] %v14060_v25  ;;  %v4503_v7 = vrot.slane %v14060_v25, %v13472_v5  ;;  %v14078_v25 = vsub.s32 1, %v17634_v15 }
 0x379   : > { %v14064_v6 = vpop.xlane.xlu1 %3864 }
 0x37a   : > { %17720 = vst [vmem:[#allocation96_spill] sm:$0xff] %v14064_v6  ;;  %v4507_v44 = vrot.slane %v14064_v6, %v13472_v5  ;;  %v4625_v53 = vsel %vm4518_vm6, %v4503_v7, %v4624_v22  ;;  %17722 = vst [vmem:[#allocation98_spill] sm:$0xff] %v14078_v25  ;;  %v4606_v7 = vsel %vm4508_vm1, %v4419_v50, %v4415_v54  ;;  %v14100_v54 = vsub.s32 7, %v17634_v15 }
 0x37b   : > { %v14072_v3 = vpop.xlane.xlu0 %3813 }
 0x37c   : > { %17721 = vst [vmem:[#allocation97_spill] sm:$0xff] %v14072_v3  ;;  %v4626_v38 = vsel %vm4520_vm7, %v4507_v44, %v4625_v53  ;;  %v4607_v53 = vsel %vm4510_vm2, %v4423_v20, %v4606_v7  ;;  %17725 = vst [vmem:[#allocation101_spill] sm:$0xff] %v14100_v54 }
 0x37d   : > { %v4689_v22 = vsel %vm4643_vm8, %v4626_v38, -inf  ;;  %v4608_v50 = vsel %vm4512_vm3, %v4427_v29, %v4607_v53  ;;  %v14113_v29 = vsub.s32 2, %v17634_v15 }
 0x37e   : > { %4690 = vmax.xlane.f32.xlu1 %v4689_v22  ;;  %v4609_v7 = vsel %vm4514_vm4, %v4431_v27, %v4608_v50  ;;  %v14121_v50 = vsub.s32 4, %v17634_v15 }
 0x37f   : > { %v4652_v44 = vpop.xlane.xlu0 %4651  ;;  %17727 = vst [vmem:[#allocation103_spill] sm:$0xff] %v14113_v29  ;;  %v4610_v56 = vsel %vm4516_vm5, %v4435_v48, %v4609_v7 }
 0x380   : > { %v4779_v6 = vrot.slane %v4652_v44, %v14078_v25  ;;  %v4787_v31 = vrot.slane %v4652_v44, %v14081_v19  ;;  %v4795_v22 = vrot.slane %v4652_v44, %v14090_v2  ;;  %v4775_v20 = vrot.slane %v4652_v44, %v12546_v37  ;;  %17728 = vst [vmem:[#allocation104_spill] sm:$0xff] %v14121_v50 }
 0x381   : > { %v4803_v53 = vrot.slane %v4652_v44, %v14100_v54 }
 0x382   : > { %v5365_v38 = vsub.f32 %v13057_v13, %v4779_v6  ;;  %v5367_v43 = vsub.f32 %v13108_v40, %v4787_v31  ;;  %v4439_v13 = vrot.slane %v14072_v3, %v13472_v5  ;;  %v14110_v6 = vpop.xlane.xlu1 %3816  ;;  %v5369_v40 = vsub.f32 %v13138_v24, %v4795_v22 }
 0x383   : > { %17726 = vst [vmem:[#allocation102_spill] sm:$0xff] %v14110_v6  ;;  %v4443_v27 = vrot.slane %v14110_v6, %v13472_v5  ;;  %v4783_v3 = vrot.slane %v4652_v44, %v14113_v29  ;;  %v5371_v10 = vsub.f32 %v17639_v32, %v4803_v53 }
 0x384   : > { %v5510_v41 = vmul.f32 1.442695, %v5365_v38  ;;  %v5514_v31 = vmul.f32 1.442695, %v5367_v43  ;;  %v5364_v38 = vsub.f32 %v13042_v9, %v4775_v20  ;;  %v5518_v34 = vmul.f32 1.442695, %v5369_v40 }
 0x385   : > { %v4611_v24 = vsel %vm4518_vm6, %v4439_v13, %v4610_v56  ;;  %v14132_v9 = vsub.s32 6, %v17634_v15  ;;  %v4791_v20 = vrot.slane %v4652_v44, %v14121_v50  ;;  %v5366_v6 = vsub.f32 %v13092_v8, %v4783_v3 }
 0x386   : > { %11527 = vpow2.f32 %v5510_v41  ;;  %v14127_v41 = vpop.xlane.xlu0 %4645  ;;  %v14129_v43 = vpop.xlane.xlu1 %4654  ;;  %v5508_v22 = vmul.f32 1.442695, %v5364_v38  ;;  %v4612_v48 = vsel %vm4520_vm7, %v4443_v27, %v4611_v24  ;;  %v5522_v7 = vmul.f32 1.442695, %v5371_v10 }
 0x387   : > { %11529 = vpow2.f32 %v5514_v31  ;;  %17729 = vst [vmem:[#allocation105_spill] sm:$0xff] %v14132_v9  ;;  %v4711_v32 = vrot.slane %v14127_v41, %v12546_v37  ;;  %v4811_v56 = vrot.slane %v14129_v43, %v14078_v25  ;;  %v4683_v13 = vsel %vm4643_vm8, %v4612_v48, -inf }
 0x388   : > { %11531 = vpow2.f32 %v5518_v34  ;;  %4684 = vmax.xlane.f32.xlu1 %v4683_v13  ;;  %v4799_v53 = vrot.slane %v4652_v44, %v14132_v9  ;;  %v5368_v8 = vsub.f32 %v13119_v16, %v4791_v20  ;;  %v5512_v3 = vmul.f32 1.442695, %v5366_v6 }
 0x389   : > { %11533 = vpow2.f32 %v5508_v22  ;;  %v5348_v15 = vsub.f32 %v13071_v21, %v4711_v32  ;;  %v4819_v40 = vrot.slane %v14129_v43, %v14081_v19  ;;  %v5373_v34 = vsub.f32 %v13223_v51, %v4811_v56 }
 0x38a   : > { %11535 = vpow2.f32 %v5522_v7  ;;  %v5370_v38 = vsub.f32 %v13193_v14, %v4799_v53  ;;  %v5516_v21 = vmul.f32 1.442695, %v5368_v8  ;;  %v4827_v44 = vrot.slane %v14129_v43, %v14090_v2  ;;  %v14168_v7 = vpop.xlane.xlu1 %4648 }
 0x38b   : > { %v5476_v31 = vmul.f32 1.442695, %v5348_v15  ;;  %11537 = vpow2.f32 %v5512_v3  ;;  %v5375_v16 = vsub.f32 %v13279_v46, %v4819_v40  ;;  %v5526_v6 = vmul.f32 1.442695, %v5373_v34 }
 0x38c   : > { %v4715_v27 = vrot.slane %v14127_v41, %v14078_v25  ;;  %v5520_v24 = vmul.f32 1.442695, %v5370_v38  ;;  %v4835_v14 = vrot.slane %v14129_v43, %v14100_v54  ;;  %v5377_v22 = vsub.f32 %v17642_v57, %v4827_v44 }
 0x38d   : > { %11539 = vpow2.f32 %v5476_v31  ;;  %v5530_v20 = vmul.f32 1.442695, %v5375_v16  ;;  %v4719_v46 = vrot.slane %v14127_v41, %v14113_v29  ;;  %v4723_v57 = vrot.slane %v14127_v41, %v14081_v19 }
 0x38e   : > { %11541 = vpow2.f32 %v5516_v21  ;;  %v5349_v48 = vsub.f32 %v13148_v1, %v4715_v27  ;;  %v5379_v13 = vsub.f32 %v17654_v11, %v4835_v14  ;;  %v5534_v15 = vmul.f32 1.442695, %v5377_v22 }
 0x38f   : > { %11543 = vpow2.f32 %v5526_v6  ;;  %v5350_v53 = vsub.f32 %v13083_v62, %v4719_v46  ;;  %v4747_v1 = vrot.slane %v14168_v7, %v14078_v25  ;;  %v4727_v11 = vrot.slane %v14127_v41, %v14121_v50 }
 0x390   : > { %11545 = vpow2.f32 %v5520_v24  ;;  %v5478_v8 = vmul.f32 1.442695, %v5349_v48  ;;  %v5538_v40 = vmul.f32 1.442695, %v5379_v13  ;;  %v5351_v34 = vsub.f32 %v13162_v18, %v4723_v57 }
 0x391   : > { %11547 = vpow2.f32 %v5530_v20  ;;  %v5480_v62 = vmul.f32 1.442695, %v5350_v53  ;;  %v4755_v38 = vrot.slane %v14168_v7, %v14081_v19  ;;  %v5357_v21 = vsub.f32 %v13262_v61, %v4747_v1  ;;  %v14217_v1 = vpop.xlane.xlu0 %4663 }
 0x392   : > { %11549 = vpow2.f32 %v5534_v15  ;;  %v4731_v16 = vrot.slane %v14127_v41, %v14090_v2  ;;  %v5352_v18 = vsub.f32 %v13172_v52, %v4727_v11  ;;  %v5482_v6 = vmul.f32 1.442695, %v5351_v34  ;;  %v17739_v52 = vld [vmem:[#allocation49_spill] sm:$0xff] }
 0x393   : > { %v14148_v10 = vpop.eup %11527  ;;  %11551 = vpow2.f32 %v5478_v8  ;;  %v4763_v24 = vrot.slane %v14168_v7, %v14090_v2  ;;  %v5359_v61 = vsub.f32 %v13318_v12, %v4755_v38  ;;  %v5494_v14 = vmul.f32 1.442695, %v5357_v21  ;;  %v17741_v12 = vld [vmem:[#allocation10_spill] sm:$0xff]  ;;  %v17743_v11 = vld [vmem:[#allocation37_spill] sm:$0xff] }
 0x394   : > { %17730 = vst [vmem:[#allocation106_spill] sm:$0xff] %v14148_v10  ;;  %5912 = vperm.xlu0 %11102, %v14148_v10   ;;  %v14157_v51 = vpop.eup %11529  ;;  %11553 = vpow2.f32 %v5538_v40  ;;  %v4735_v20 = vrot.slane %v14127_v41, %v14132_v9  ;;  %v5353_v46 = vsub.f32 %v17739_v52, %v4731_v16  ;;  %v5484_v48 = vmul.f32 1.442695, %v5352_v18  ;;  %v17747_v52 = vld [vmem:[#allocation12_spill] sm:$0xff] }
 0x395   : > { %17731 = vst [vmem:[#allocation107_spill] sm:$0xff] %v14157_v51  ;;  %v14166_v32 = vpop.eup %11531  ;;  %11555 = vpow2.f32 %v5480_v62  ;;  %v4771_v15 = vrot.slane %v14168_v7, %v14100_v54  ;;  %v5361_v57 = vsub.f32 %v17741_v12, %v4763_v24  ;;  %v5498_v53 = vmul.f32 1.442695, %v5359_v61 }
 0x396   : > { %17732 = vst [vmem:[#allocation108_spill] sm:$0xff] %v14166_v32  ;;  %v14171_v56 = vpop.eup %11533  ;;  %11557 = vpow2.f32 %v5482_v6  ;;  %v4739_v40 = vrot.slane %v14127_v41, %v14100_v54  ;;  %v5354_v34 = vsub.f32 %v17743_v11, %v4735_v20  ;;  %v5486_v62 = vmul.f32 1.442695, %v5353_v46  ;;  %v17751_v11 = vld [vmem:[#allocation16_spill] sm:$0xff] }
 0x397   : > { %17733 = vst [vmem:[#allocation109_spill] sm:$0xff] %v14171_v56  ;;  %v14179_v3 = vpop.eup %11535  ;;  %11559 = vpow2.f32 %v5494_v14  ;;  %v5363_v21 = vsub.f32 %v17660_v47, %v4771_v15  ;;  %v5502_v16 = vmul.f32 1.442695, %v5361_v57  ;;  %v4907_v18 = vrot.slane %v14217_v1, %v14078_v25  ;;  %v17749_v15 = vld [vmem:[#allocation9_spill] sm:$0xff] }
 0x398   : > { %5918 = vperm.xlu0 %11102, %v14157_v51   ;;  %17734 = vst [vmem:[#allocation110_spill] sm:$0xff] %v14179_v3  ;;  %v14186_v31 = vpop.eup %11537  ;;  %11561 = vpow2.f32 %v5484_v48  ;;  %v4807_v41 = vrot.slane %v14129_v43, %v12546_v37  ;;  %v5355_v24 = vsub.f32 %v17658_v28, %v4739_v40  ;;  %v5488_v61 = vmul.f32 1.442695, %v5354_v34 }
 0x399   : > { %5909 = vperm.xlu1 %11101, %v14171_v56   ;;  %17735 = vst [vmem:[#allocation111_spill] sm:$0xff] %v14186_v31  ;;  %11563 = vpow2.f32 %v5498_v53  ;;  %v5506_v47 = vmul.f32 1.442695, %v5363_v21  ;;  %v4915_v20 = vrot.slane %v14217_v1, %v14081_v19  ;;  %v5397_v46 = vsub.f32 %v17747_v52, %v4907_v18  ;;  %v17753_v18 = vld [vmem:[#allocation42_spill] sm:$0xff] }
 0x39a   : > { %v14191_v44 = vpop.eup %11539  ;;  %11565 = vpow2.f32 %v5486_v62  ;;  %v4815_v28 = vrot.slane %v14129_v43, %v14113_v29  ;;  %v5372_v12 = vsub.f32 %v17749_v15, %v4807_v41  ;;  %v5490_v57 = vmul.f32 1.442695, %v5355_v24  ;;  %v14267_v15 = vpop.xlane.xlu0 %4657 }
 0x39b   : > { %17736 = vst [vmem:[#allocation112_spill] sm:$0xff] %v14191_v44  ;;  %v14198_v27 = vpop.eup %11541  ;;  %11567 = vpow2.f32 %v5502_v16  ;;  %v4923_v40 = vrot.slane %v14217_v1, %v14090_v2  ;;  %v5399_v34 = vsub.f32 %v17751_v11, %v4915_v20  ;;  %v5574_v62 = vmul.f32 1.442695, %v5397_v46 }
 0x39c   : > { %5924 = vperm.xlu0 %11102, %v14166_v32   ;;  %17737 = vst [vmem:[#allocation113_spill] sm:$0xff] %v14198_v27  ;;  %v14203_v22 = vpop.eup %11543  ;;  %11569 = vpow2.f32 %v5488_v61  ;;  %v4823_v16 = vrot.slane %v14129_v43, %v14121_v50  ;;  %v5374_v41 = vsub.f32 %v17753_v18, %v4815_v28  ;;  %v5524_v24 = vmul.f32 1.442695, %v5372_v12  ;;  %v17756_v12 = vld [vmem:[#allocation39_spill] sm:$0xff] }
 0x39d   : > { %5915 = vperm.xlu1 %11101, %v14186_v31   ;;  %17738 = vst [vmem:[#allocation114_spill] sm:$0xff] %v14203_v22  ;;  %v14210_v13 = vpop.eup %11545  ;;  %11571 = vpow2.f32 %v5506_v47  ;;  %v4931_v47 = vrot.slane %v14217_v1, %v14100_v54  ;;  %v5401_v20 = vsub.f32 %v17657_v17, %v4923_v40  ;;  %v5578_v52 = vmul.f32 1.442695, %v5399_v34 }
 0x39e   : > { %17740 = vst [vmem:[#allocation49_spill] sm:$0xff] %v14210_v13  ;;  %v14215_v8 = vpop.eup %11547  ;;  %11573 = vpow2.f32 %v5490_v57  ;;  %v4831_v28 = vrot.slane %v14129_v43, %v14132_v9  ;;  %v5376_v57 = vsub.f32 %v17756_v12, %v4823_v16  ;;  %v5528_v11 = vmul.f32 1.442695, %v5374_v41  ;;  %v17759_v43 = vld [vmem:[#allocation43_spill] sm:$0xff] }
 0x39f   : > { %17742 = vst [vmem:[#allocation10_spill] sm:$0xff] %v14215_v8  ;;  %v14224_v38 = vpop.eup %11549  ;;  %11575 = vpow2.f32 %v5574_v62  ;;  %v5403_v17 = vsub.f32 %v13521_v23, %v4931_v47  ;;  %v5582_v40 = vmul.f32 1.442695, %v5401_v20  ;;  %v4843_v34 = vrot.slane %v14267_v15, %v14078_v25  ;;  %v17761_v20 = vld [vmem:[#allocation14_spill] sm:$0xff] }
 0x3a0   : > { %5930 = vperm.xlu0 %11102, %v14179_v3   ;;  %17744 = vst [vmem:[#allocation37_spill] sm:$0xff] %v14224_v38  ;;  %v14229_v6 = vpop.eup %11551  ;;  %11577 = vpow2.f32 %v5524_v24  ;;  %v5532_v16 = vmul.f32 1.442695, %v5376_v57  ;;  %v4743_v41 = vrot.slane %v14168_v7, %v12546_v37  ;;  %v4851_v47 = vrot.slane %v14267_v15, %v14081_v19 }
 0x3a1   : > { %5921 = vperm.xlu1 %11101, %v14198_v27   ;;  %17745 = vst [vmem:[#allocation115_spill] sm:$0xff] %v14229_v6  ;;  %v14236_v14 = vpop.eup %11553  ;;  %11579 = vpow2.f32 %v5578_v52  ;;  %v5586_v23 = vmul.f32 1.442695, %v5403_v17  ;;  %v5381_v52 = vsub.f32 %v17761_v20, %v4843_v34  ;;  %v4751_v57 = vrot.slane %v14168_v7, %v14113_v29 }
 0x3a2   : > { %17746 = vst [vmem:[#allocation116_spill] sm:$0xff] %v14236_v14  ;;  %v14241_v48 = vpop.eup %11555  ;;  %11581 = vpow2.f32 %v5528_v11  ;;  %v17763_v11 = vld [vmem:[#allocation40_spill] sm:$0xff]  ;;  %v4859_v17 = vrot.slane %v14267_v15, %v14090_v2  ;;  %v5383_v34 = vsub.f32 %v13477_v26, %v4851_v47 }
 0x3a3   : > { %17748 = vst [vmem:[#allocation12_spill] sm:$0xff] %v14241_v48  ;;  %v14248_v53 = vpop.eup %11557  ;;  %11583 = vpow2.f32 %v5582_v40  ;;  %v5542_v20 = vmul.f32 1.442695, %v5381_v52 }
 0x3a4   : > { %5861 = vperm.xlu0 %11102, %v14191_v44   ;;  %17750 = vst [vmem:[#allocation9_spill] sm:$0xff] %v14248_v53  ;;  %v14253_v21 = vpop.eup %11559  ;;  %11585 = vpow2.f32 %v5532_v16  ;;  %v17766_v16 = vld [vmem:[#allocation44_spill] sm:$0xff]  ;;  %v5385_v26 = vsub.f32 %v13500_v58, %v4859_v17  ;;  %v5546_v47 = vmul.f32 1.442695, %v5383_v34 }
 0x3a5   : > { %5927 = vperm.xlu1 %11101, %v14210_v13   ;;  %17752 = vst [vmem:[#allocation16_spill] sm:$0xff] %v14253_v21  ;;  %v14260_v61 = vpop.eup %11561  ;;  %11587 = vpow2.f32 %v5586_v23 }
 0x3a6   : > { %17754 = vst [vmem:[#allocation42_spill] sm:$0xff] %v14260_v61  ;;  %v14265_v46 = vpop.eup %11563  ;;  %v5550_v17 = vmul.f32 1.442695, %v5385_v26 }
 0x3a7   : > { %17755 = vst [vmem:[#allocation117_spill] sm:$0xff] %v14265_v46  ;;  %v14274_v18 = vpop.eup %11565 }
 0x3a8   : > { %5936 = vperm.xlu0 %11102, %v14203_v22   ;;  %17757 = vst [vmem:[#allocation39_spill] sm:$0xff] %v14274_v18  ;;  %v14279_v62 = vpop.eup %11567 }
 0x3a9   : > { %5864 = vperm.xlu1 %11101, %v14229_v6   ;;  %17758 = vst [vmem:[#allocation118_spill] sm:$0xff] %v14279_v62  ;;  %v14286_v24 = vpop.eup %11569 }
 0x3aa   : > { %17760 = vst [vmem:[#allocation43_spill] sm:$0xff] %v14286_v24  ;;  %v14291_v12 = vpop.eup %11571 }
 0x3ab   : > { %17762 = vst [vmem:[#allocation14_spill] sm:$0xff] %v14291_v12  ;;  %v14298_v40 = vpop.eup %11573 }
 0x3ac   : > { %5942 = vperm.xlu0 %11102, %v14215_v8   ;;  %17764 = vst [vmem:[#allocation40_spill] sm:$0xff] %v14298_v40 }
 0x3ad   : > { %5867 = vperm.xlu1 %11101, %v14241_v48  }
 0x3b0   : > { %5948 = vperm.xlu0 %11102, %v14224_v38  }
 0x3b1   : > { %5870 = vperm.xlu1 %11101, %v14248_v53  }
 0x3b4   : > { %5954 = vperm.xlu0 %11102, %v14236_v14  }
 0x3b5   : > { %5873 = vperm.xlu1 %11101, %v14260_v61  }
 0x3b8   : > { %5888 = vperm.xlu0 %11102, %v14253_v21   ;;  %v14317_v21 = vpop.xlane.xlu1 %4666 }
 0x3b9   : > { %5876 = vperm.xlu1 %11101, %v14274_v18   ;;  %v4947_v26 = vrot.slane %v14317_v21, %v14081_v19  ;;  %v4963_v38 = vrot.slane %v14317_v21, %v14100_v54 }
 0x3bc   : > { %5894 = vperm.xlu0 %11102, %v14265_v46   ;;  %v5378_v46 = vsub.f32 %v17759_v43, %v4831_v28  ;;  %v5356_v43 = vsub.f32 %v17763_v11, %v4743_v41  ;;  %v5358_v41 = vsub.f32 %v17766_v16, %v4751_v57 }
 0x3bd   : > { %5879 = vperm.xlu1 %11101, %v14286_v24  }
 0x3be   : > { %v5536_v28 = vmul.f32 1.442695, %v5378_v46  ;;  %v4759_v46 = vrot.slane %v14168_v7, %v14121_v50  ;;  %v5492_v11 = vmul.f32 1.442695, %v5356_v43  ;;  %v5496_v43 = vmul.f32 1.442695, %v5358_v41 }
 0x3c0   : > { %5900 = vperm.xlu0 %11102, %v14279_v62   ;;  %v14303_v62 = vpop.eup %11575  ;;  %11589 = vpow2.f32 %v5536_v28  ;;  %v17769_v28 = vld [vmem:[#allocation46_spill] sm:$0xff] }
 0x3c1   : > { %17765 = vst [vmem:[#allocation119_spill] sm:$0xff] %v14303_v62  ;;  %5882 = vperm.xlu1 %11101, %v14298_v40   ;;  %v14310_v23 = vpop.eup %11577  ;;  %11591 = vpow2.f32 %v5542_v20  ;;  %v5360_v57 = vsub.f32 %v17769_v28, %v4759_v46  ;;  %v4939_v20 = vrot.slane %v14317_v21, %v14078_v25 }
 0x3c2   : > { %17767 = vst [vmem:[#allocation44_spill] sm:$0xff] %v14310_v23  ;;  %v14315_v52 = vpop.eup %11579  ;;  %11593 = vpow2.f32 %v5492_v11  ;;  %v17773_v11 = vld [vmem:[#allocation13_spill] sm:$0xff] }
 0x3c3   : > { %17768 = vst [vmem:[#allocation120_spill] sm:$0xff] %v14315_v52  ;;  %v14322_v16 = vpop.eup %11581  ;;  %11595 = vpow2.f32 %v5546_v47  ;;  %v5500_v46 = vmul.f32 1.442695, %v5360_v57  ;;  %v17775_v47 = vld [vmem:[#allocation17_spill] sm:$0xff] }
 0x3c4   : > { %5906 = vperm.xlu0 %11102, %v14291_v12   ;;  %v4867_v12 = vrot.slane %v14267_v15, %v14100_v54  ;;  %17770 = vst [vmem:[#allocation46_spill] sm:$0xff] %v14322_v16  ;;  %v14327_v34 = vpop.eup %11583  ;;  %11597 = vpow2.f32 %v5496_v43  ;;  %v4911_v43 = vrot.slane %v14217_v1, %v14113_v29 }
 0x3c5   : > { %5933 = vperm.xlu1 %11101, %v14310_v23   ;;  %17771 = vst [vmem:[#allocation121_spill] sm:$0xff] %v14327_v34  ;;  %v14333_v41 = vpop.eup %11585  ;;  %11599 = vpow2.f32 %v5550_v17  ;;  %v17777_v17 = vld [vmem:[#allocation11_spill] sm:$0xff] }
 0x3c6   : > { %v5387_v58 = vsub.f32 %v13572_v45, %v4867_v12  ;;  %17772 = vst [vmem:[#allocation122_spill] sm:$0xff] %v14333_v41  ;;  %v4903_v45 = vrot.slane %v14217_v1, %v12546_v37  ;;  %v14338_v12 = vpop.eup %11587  ;;  %11601 = vpow2.f32 %v5500_v46 }
 0x3c7   : > { %17774 = vst [vmem:[#allocation13_spill] sm:$0xff] %v14338_v12 }
 0x3c8   : > { %6008 = vperm.xlu0 %11102, %v14303_v62   ;;  %v4767_v62 = vrot.slane %v14168_v7, %v14132_v9  ;;  %v5554_v7 = vmul.f32 1.442695, %v5387_v58  ;;  %v5396_v58 = vsub.f32 %v17777_v17, %v4903_v45  ;;  %v17781_v45 = vld [vmem:[#allocation15_spill] sm:$0xff] }
 0x3c9   : > { %5939 = vperm.xlu1 %11101, %v14322_v16  }
 0x3ca   : > { %v5362_v28 = vsub.f32 %v17773_v11, %v4767_v62  ;;  %11603 = vpow2.f32 %v5554_v7  ;;  %v5398_v7 = vsub.f32 %v17781_v45, %v4911_v43  ;;  %v5572_v17 = vmul.f32 1.442695, %v5396_v58  ;;  %v17784_v58 = vld [vmem:[#allocation21_spill] sm:$0xff] }
 0x3cb   : > { %v4927_v43 = vrot.slane %v14217_v1, %v14132_v9 }
 0x3cc   : > { %6014 = vperm.xlu0 %11102, %v14315_v52   ;;  %v5405_v52 = vsub.f32 %v17775_v47, %v4939_v20  ;;  %v5504_v62 = vmul.f32 1.442695, %v5362_v28  ;;  %v17779_v20 = vld [vmem:[#allocation25_spill] sm:$0xff]  ;;  %v4919_v28 = vrot.slane %v14217_v1, %v14121_v50 }
 0x3cd   : > { %5945 = vperm.xlu1 %11101, %v14333_v41   ;;  %v14345_v57 = vpop.eup %11589  ;;  %v5407_v47 = vsub.f32 %v17779_v20, %v4947_v26  ;;  %v14367_v20 = vpop.xlane.xlu1 %4660  ;;  %v5402_v1 = vsub.f32 %v13508_v30, %v4927_v43 }
 0x3ce   : > { %17776 = vst [vmem:[#allocation17_spill] sm:$0xff] %v14345_v57  ;;  %v14350_v11 = vpop.eup %11591  ;;  %v5590_v14 = vmul.f32 1.442695, %v5405_v52  ;;  %11605 = vpow2.f32 %v5504_v62  ;;  %v5400_v45 = vsub.f32 %v17784_v58, %v4919_v28 }
 0x3cf   : > { %17778 = vst [vmem:[#allocation11_spill] sm:$0xff] %v14350_v11  ;;  %v14357_v46 = vpop.eup %11593  ;;  %v5594_v26 = vmul.f32 1.442695, %v5407_v47  ;;  %v5584_v30 = vmul.f32 1.442695, %v5402_v1  ;;  %v17791_v1 = vld [vmem:[#allocation26_spill] sm:$0xff] }
 0x3d0   : > { %6020 = vperm.xlu0 %11102, %v14327_v34   ;;  %v4955_v34 = vrot.slane %v14317_v21, %v14090_v2  ;;  %17780 = vst [vmem:[#allocation25_spill] sm:$0xff] %v14357_v46  ;;  %11607 = vpow2.f32 %v5590_v14  ;;  %v5580_v28 = vmul.f32 1.442695, %v5400_v45  ;;  %v4891_v45 = vrot.slane %v14367_v20, %v14090_v2 }
 0x3d1   : > { %5951 = vperm.xlu1 %11101, %v14345_v57   ;;  %11609 = vpow2.f32 %v5572_v17 }
 0x3d2   : > { %v5409_v52 = vsub.f32 %v13665_v59, %v4955_v34  ;;  %v5411_v59 = vsub.f32 %v13744_v39, %v4963_v38  ;;  %11611 = vpow2.f32 %v5594_v26  ;;  %v4875_v34 = vrot.slane %v14367_v20, %v14078_v25  ;;  %v17788_v26 = vld [vmem:[#allocation24_spill] sm:$0xff] }
 0x3d3   : > { %v4883_v38 = vrot.slane %v14367_v20, %v14081_v19 }
 0x3d4   : > { %6026 = vperm.xlu0 %11102, %v14338_v12   ;;  %v14362_v12 = vpop.eup %11595  ;;  %v5598_v14 = vmul.f32 1.442695, %v5409_v52  ;;  %v5602_v39 = vmul.f32 1.442695, %v5411_v59  ;;  %v5389_v52 = vsub.f32 %v13609_v35, %v4875_v34  ;;  %v4855_v34 = vrot.slane %v14267_v15, %v14121_v50 }
 0x3d5   : > { %17782 = vst [vmem:[#allocation15_spill] sm:$0xff] %v14362_v12  ;;  %5885 = vperm.xlu1 %11101, %v14357_v46   ;;  %v14371_v62 = vpop.eup %11597  ;;  %v5391_v59 = vsub.f32 %v13692_v63, %v4883_v38  ;;  %v5393_v63 = vsub.f32 %v13726_v42, %v4891_v45 }
 0x3d6   : > { %17783 = vst [vmem:[#allocation123_spill] sm:$0xff] %v14371_v62  ;;  %v14376_v57 = vpop.eup %11599  ;;  %v5558_v35 = vmul.f32 1.442695, %v5389_v52 }
 0x3d7   : > { %17785 = vst [vmem:[#allocation21_spill] sm:$0xff] %v14376_v57  ;;  %v14383_v47 = vpop.eup %11601  ;;  %v5562_v38 = vmul.f32 1.442695, %v5391_v59  ;;  %v5566_v45 = vmul.f32 1.442695, %v5393_v63 }
 0x3d8   : > { %5960 = vperm.xlu0 %11102, %v14350_v11   ;;  %v5576_v11 = vmul.f32 1.442695, %v5398_v7  ;;  %17786 = vst [vmem:[#allocation124_spill] sm:$0xff] %v14383_v47  ;;  %v4839_v7 = vrot.slane %v14267_v15, %v12546_v37  ;;  %v14388_v17 = vpop.eup %11603 }
 0x3d9   : > { %5891 = vperm.xlu1 %11101, %v14371_v62   ;;  %17787 = vst [vmem:[#allocation125_spill] sm:$0xff] %v14388_v17 }
 0x3da   : > { %11613 = vpow2.f32 %v5576_v11  ;;  %v4847_v11 = vrot.slane %v14267_v15, %v14113_v29  ;;  %v5380_v43 = vsub.f32 %v17788_v26, %v4839_v7  ;;  %v4899_v26 = vrot.slane %v14367_v20, %v14100_v54 }
 0x3db   : > { %11615 = vpow2.f32 %v5598_v14  ;;  %v14398_v58 = vpop.eup %11605 }
 0x3dc   : > { %5966 = vperm.xlu0 %11102, %v14362_v12   ;;  %11617 = vpow2.f32 %v5580_v28  ;;  %17789 = vst [vmem:[#allocation24_spill] sm:$0xff] %v14398_v58  ;;  %v5382_v28 = vsub.f32 %v17791_v1, %v4847_v11  ;;  %v5540_v7 = vmul.f32 1.442695, %v5380_v43  ;;  %v5384_v11 = vsub.f32 %v13490_v0, %v4855_v34 }
 0x3dd   : > { %5897 = vperm.xlu1 %11101, %v14383_v47   ;;  %11619 = vpow2.f32 %v5602_v39  ;;  %v14403_v14 = vpop.eup %11607  ;;  %v5395_v42 = vsub.f32 %v13775_v33, %v4899_v26  ;;  %v4935_v0 = vrot.slane %v14317_v21, %v12546_v37 }
 0x3de   : > { %17790 = vst [vmem:[#allocation126_spill] sm:$0xff] %v14403_v14  ;;  %11621 = vpow2.f32 %v5584_v30  ;;  %v14410_v39 = vpop.eup %11609  ;;  %v4863_v30 = vrot.slane %v14267_v15, %v14132_v9  ;;  %v5544_v43 = vmul.f32 1.442695, %v5382_v28  ;;  %v5548_v34 = vmul.f32 1.442695, %v5384_v11 }
 0x3df   : > { %17792 = vst [vmem:[#allocation26_spill] sm:$0xff] %v14410_v39  ;;  %11623 = vpow2.f32 %v5558_v35  ;;  %v14415_v52 = vpop.eup %11611  ;;  %v5570_v33 = vmul.f32 1.442695, %v5395_v42 }
 0x3e0   : > { %5972 = vperm.xlu0 %11102, %v14376_v57   ;;  %17793 = vst [vmem:[#allocation127_spill] sm:$0xff] %v14415_v52  ;;  %11625 = vpow2.f32 %v5540_v7  ;;  %v5386_v15 = vsub.f32 %v13561_v49, %v4863_v30  ;;  %v4943_v49 = vrot.slane %v14317_v21, %v14113_v29 }
 0x3e1   : > { %5903 = vperm.xlu1 %11101, %v14398_v58   ;;  %11627 = vpow2.f32 %v5562_v38  ;;  %v17798_v38 = vld [vmem:[#allocation28_spill] sm:$0xff] }
 0x3e2   : > { %11629 = vpow2.f32 %v5544_v43  ;;  %v5404_v30 = vsub.f32 %v17798_v38, %v4935_v0  ;;  %v5552_v11 = vmul.f32 1.442695, %v5386_v15  ;;  %v4951_v0 = vrot.slane %v14317_v21, %v14121_v50 }
 0x3e3   : > { %11631 = vpow2.f32 %v5566_v45 }
 0x3e4   : > { %5978 = vperm.xlu0 %11102, %v14388_v17   ;;  %v14417_v17 = vpop.xlane.xlu0 %4675  ;;  %11633 = vpow2.f32 %v5548_v34  ;;  %v17801_v34 = vld [vmem:[#allocation20_spill] sm:$0xff]  ;;  %v5588_v38 = vmul.f32 1.442695, %v5404_v30  ;;  %v17804_v30 = vld [vmem:[#allocation27_spill] sm:$0xff] }
 0x3e5   : > { %6005 = vperm.xlu1 %11101, %v14410_v39   ;;  %v5035_v59 = vrot.slane %v14417_v17, %v14078_v25  ;;  %v5043_v7 = vrot.slane %v14417_v17, %v14081_v19  ;;  %11635 = vpow2.f32 %v5570_v33  ;;  %v5051_v42 = vrot.slane %v14417_v17, %v14090_v2 }
 0x3e6   : > { %v5406_v15 = vsub.f32 %v17801_v34, %v4943_v49  ;;  %11637 = vpow2.f32 %v5552_v11  ;;  %v4959_v49 = vrot.slane %v14317_v21, %v14132_v9  ;;  %v5408_v11 = vsub.f32 %v17804_v30, %v4951_v0  ;;  %v17807_v21 = vld [vmem:[#allocation32_spill] sm:$0xff] }
 0x3e7   : > { %v14424_v1 = vpop.eup %11613  ;;  %v5429_v26 = vsub.f32 %v13765_v60, %v5035_v59  ;;  %v5431_v60 = vsub.f32 %v13790_v36, %v5043_v7  ;;  %v5433_v36 = vsub.f32 %v13800_v55, %v5051_v42 }
 0x3e8   : > { %6032 = vperm.xlu0 %11102, %v14403_v14   ;;  %17794 = vst [vmem:[#allocation128_spill] sm:$0xff] %v14424_v1  ;;  %v14429_v35 = vpop.eup %11615  ;;  %v5592_v34 = vmul.f32 1.442695, %v5406_v15  ;;  %v5596_v0 = vmul.f32 1.442695, %v5408_v11  ;;  %v4871_v15 = vrot.slane %v14367_v20, %v12546_v37  ;;  %v4879_v11 = vrot.slane %v14367_v20, %v14113_v29 }
 0x3e9   : > { %17795 = vst [vmem:[#allocation129_spill] sm:$0xff] %v14429_v35  ;;  %6011 = vperm.xlu1 %11101, %v14424_v1   ;;  %v14436_v28 = vpop.eup %11617  ;;  %v5638_v45 = vmul.f32 1.442695, %v5429_v26  ;;  %v5642_v7 = vmul.f32 1.442695, %v5431_v60 }
 0x3ea   : > { %17796 = vst [vmem:[#allocation130_spill] sm:$0xff] %v14436_v28  ;;  %v14441_v63 = vpop.eup %11619  ;;  %v5646_v42 = vmul.f32 1.442695, %v5433_v36  ;;  %v17809_v36 = vld [vmem:[#allocation36_spill] sm:$0xff] }
 0x3eb   : > { %17797 = vst [vmem:[#allocation131_spill] sm:$0xff] %v14441_v63  ;;  %v14448_v43 = vpop.eup %11621  ;;  %11639 = vpow2.f32 %v5638_v45 }
 0x3ec   : > { %6038 = vperm.xlu0 %11102, %v14415_v52   ;;  %17799 = vst [vmem:[#allocation28_spill] sm:$0xff] %v14448_v43  ;;  %v14453_v59 = vpop.eup %11623  ;;  %11641 = vpow2.f32 %v5588_v38 }
 0x3ed   : > { %6017 = vperm.xlu1 %11101, %v14436_v28   ;;  %17800 = vst [vmem:[#allocation132_spill] sm:$0xff] %v14453_v59  ;;  %v14460_v33 = vpop.eup %11625  ;;  %11643 = vpow2.f32 %v5642_v7 }
 0x3ee   : > { %17802 = vst [vmem:[#allocation20_spill] sm:$0xff] %v14460_v33  ;;  %v14465_v26 = vpop.eup %11627  ;;  %11645 = vpow2.f32 %v5592_v34  ;;  %v17811_v34 = vld [vmem:[#allocation18_spill] sm:$0xff] }
 0x3ef   : > { %17803 = vst [vmem:[#allocation133_spill] sm:$0xff] %v14465_v26  ;;  %11647 = vpow2.f32 %v5646_v42 }
 0x3f0   : > { %6044 = vperm.xlu0 %11102, %v14429_v35   ;;  %v14467_v35 = vpop.xlane.xlu0 %4669  ;;  %11649 = vpow2.f32 %v5596_v0  ;;  %v17815_v0 = vld [vmem:[#allocation29_spill] sm:$0xff] }
 0x3f1   : > { %6023 = vperm.xlu1 %11101, %v14448_v43   ;;  %v4971_v60 = vrot.slane %v14467_v35, %v14078_v25 }
 0x3f3   : > { %v5413_v7 = vsub.f32 %v17809_v36, %v4971_v60  ;;  %v17813_v60 = vld [vmem:[#allocation50_spill] sm:$0xff] }
 0x3f4   : > { %6050 = vperm.xlu0 %11102, %v14441_v63   ;;  %v5059_v63 = vrot.slane %v14417_v17, %v14100_v54  ;;  %v14503_v52 = vpop.xlane.xlu0 %4687 }
 0x3f5   : > { %5957 = vperm.xlu1 %11101, %v14460_v33   ;;  %v5163_v16 = vrot.slane %v14503_v52, %v14078_v25 }
 0x3f6   : > { %v5435_v55 = vsub.f32 %v13834_v4, %v5059_v63  ;;  %v4979_v63 = vrot.slane %v14467_v35, %v14081_v19 }
 0x3f8   : > { %5984 = vperm.xlu0 %11102, %v14453_v59   ;;  %v14474_v59 = vpop.eup %11629  ;;  %v5650_v4 = vmul.f32 1.442695, %v5435_v55  ;;  %v4987_v55 = vrot.slane %v14467_v35, %v14090_v2  ;;  %v5415_v36 = vsub.f32 %v17813_v60, %v4979_v63  ;;  %v4995_v63 = vrot.slane %v14467_v35, %v14100_v54 }
 0x3f9   : > { %17805 = vst [vmem:[#allocation27_spill] sm:$0xff] %v14474_v59  ;;  %v14479_v45 = vpop.eup %11631  ;;  %5963 = vperm.xlu1 %11101, %v14474_v59  }
 0x3fa   : > { %17806 = vst [vmem:[#allocation134_spill] sm:$0xff] %v14479_v45  ;;  %v14486_v38 = vpop.eup %11633  ;;  %11651 = vpow2.f32 %v5650_v4 }
 0x3fb   : > { %17808 = vst [vmem:[#allocation32_spill] sm:$0xff] %v14486_v38  ;;  %v14491_v30 = vpop.eup %11635 }
 0x3fc   : > { %5990 = vperm.xlu0 %11102, %v14465_v26   ;;  %v5410_v26 = vsub.f32 %v17807_v21, %v4959_v49  ;;  %17810 = vst [vmem:[#allocation36_spill] sm:$0xff] %v14491_v30  ;;  %v5388_v21 = vsub.f32 %v17811_v34, %v4871_v15  ;;  %v14498_v42 = vpop.eup %11637  ;;  %v5390_v15 = vsub.f32 %v17815_v0, %v4879_v11  ;;  %v14512_v34 = vpop.xlane.xlu1 %4678 }
 0x3fd   : > { %5969 = vperm.xlu1 %11101, %v14486_v38   ;;  %17812 = vst [vmem:[#allocation18_spill] sm:$0xff] %v14498_v42  ;;  %v14505_v14 = vpop.eup %11639  ;;  %v14519_v38 = vpop.xlane.xlu0 %4681  ;;  %v4895_v11 = vrot.slane %v14367_v20, %v14132_v9 }
 0x3fe   : > { %v5600_v49 = vmul.f32 1.442695, %v5410_v26  ;;  %17814 = vst [vmem:[#allocation50_spill] sm:$0xff] %v14505_v14  ;;  %v4887_v26 = vrot.slane %v14367_v20, %v14121_v50  ;;  %v5556_v4 = vmul.f32 1.442695, %v5388_v21  ;;  %v17819_v21 = vld [vmem:[#allocation30_spill] sm:$0xff]  ;;  %v5099_v53 = vrot.slane %v14519_v38, %v14078_v25 }
 0x3ff   : > { %v17823_v20 = vld [vmem:[#allocation33_spill] sm:$0xff] }
 0x400   : > { %5996 = vperm.xlu0 %11102, %v14479_v45   ;;  %v5606_v45 = vmul.f32 1.442695, %v5413_v7  ;;  %11653 = vpow2.f32 %v5600_v49  ;;  %v17817_v7 = vld [vmem:[#allocation45_spill] sm:$0xff]  ;;  %v5392_v0 = vsub.f32 %v17819_v21, %v4887_v26  ;;  %v14528_v57 = vpop.xlane.xlu1 %4672  ;;  %v5394_v26 = vsub.f32 %v17823_v20, %v4895_v11  ;;  %v17829_v20 = vld [vmem:[#allocation56_spill] sm:$0xff] }
 0x401   : > { %5975 = vperm.xlu1 %11101, %v14498_v42   ;;  %v5417_v60 = vsub.f32 %v17817_v7, %v4987_v55  ;;  %v5610_v42 = vmul.f32 1.442695, %v5415_v36  ;;  %v5075_v21 = vrot.slane %v14512_v34, %v14081_v19  ;;  %v5039_v11 = vrot.slane %v14417_v17, %v14113_v29 }
 0x402   : > { %11655 = vpow2.f32 %v5606_v45  ;;  %v17821_v45 = vld [vmem:[#allocation52_spill] sm:$0xff]  ;;  %v5003_v39 = vrot.slane %v14528_v57, %v14078_v25 }
 0x403   : > { %11657 = vpow2.f32 %v5556_v4  ;;  %v5419_v36 = vsub.f32 %v17821_v45, %v4995_v63  ;;  %v5614_v7 = vmul.f32 1.442695, %v5417_v60  ;;  %v5031_v4 = vrot.slane %v14417_v17, %v12546_v37  ;;  %v17825_v45 = vld [vmem:[#allocation22_spill] sm:$0xff] }
 0x404   : > { %6002 = vperm.xlu0 %11102, %v14491_v30   ;;  %v14514_v30 = vpop.eup %11641  ;;  %11659 = vpow2.f32 %v5610_v42 }
 0x405   : > { %17816 = vst [vmem:[#allocation29_spill] sm:$0xff] %v14514_v30  ;;  %v14521_v49 = vpop.eup %11643  ;;  %6029 = vperm.xlu1 %11101, %v14514_v30   ;;  %v5067_v30 = vrot.slane %v14512_v34, %v14078_v25  ;;  %v5618_v60 = vmul.f32 1.442695, %v5419_v36 }
 0x406   : > { %17818 = vst [vmem:[#allocation45_spill] sm:$0xff] %v14521_v49  ;;  %v14530_v55 = vpop.eup %11645 }
 0x407   : > { %17820 = vst [vmem:[#allocation30_spill] sm:$0xff] %v14530_v55  ;;  %v14544_v42 = vpop.xlane.xlu1 %4690 }
 0x408   : > { %6104 = vperm.xlu0 %11102, %v14505_v14   ;;  %v5560_v14 = vmul.f32 1.442695, %v5390_v15  ;;  %v5564_v15 = vmul.f32 1.442695, %v5392_v0  ;;  %v17827_v0 = vld [vmem:[#allocation31_spill] sm:$0xff]  ;;  %v5195_v32 = vrot.slane %v14544_v42, %v14078_v25 }
 0x409   : > { %6035 = vperm.xlu1 %11101, %v14530_v55   ;;  %v5437_v55 = vsub.f32 %v17825_v45, %v5067_v30  ;;  %v5428_v36 = vsub.f32 %v17827_v0, %v5031_v4  ;;  %v5083_v30 = vrot.slane %v14512_v34, %v14090_v2  ;;  %v5439_v45 = vsub.f32 %v17829_v20, %v5075_v21  ;;  %v17831_v4 = vld [vmem:[#allocation35_spill] sm:$0xff]  ;;  %v17833_v21 = vld [vmem:[#allocation58_spill] sm:$0xff] }
 0x40a   : > { %11661 = vpow2.f32 %v5560_v14  ;;  %v5568_v14 = vmul.f32 1.442695, %v5394_v26  ;;  %v5047_v26 = vrot.slane %v14417_v17, %v14121_v50 }
 0x40b   : > { %11663 = vpow2.f32 %v5614_v7  ;;  %v5654_v33 = vmul.f32 1.442695, %v5437_v55  ;;  %v5636_v0 = vmul.f32 1.442695, %v5428_v36  ;;  %v5091_v55 = vrot.slane %v14512_v34, %v14100_v54  ;;  %v17835_v36 = vld [vmem:[#allocation19_spill] sm:$0xff] }
 0x40c   : > { %6110 = vperm.xlu0 %11102, %v14521_v49   ;;  %v14537_v49 = vpop.eup %11647  ;;  %11665 = vpow2.f32 %v5564_v15  ;;  %v5441_v20 = vsub.f32 %v17833_v21, %v5083_v30  ;;  %v5658_v1 = vmul.f32 1.442695, %v5439_v45 }
 0x40d   : > { %17822 = vst [vmem:[#allocation52_spill] sm:$0xff] %v14537_v49  ;;  %v14546_v63 = vpop.eup %11649  ;;  %11667 = vpow2.f32 %v5618_v60  ;;  %v5430_v60 = vsub.f32 %v17831_v4, %v5039_v11  ;;  %v5055_v11 = vrot.slane %v14417_v17, %v14132_v9  ;;  %v5432_v4 = vsub.f32 %v17835_v36, %v5047_v26  ;;  %v17839_v17 = vld [vmem:[#allocation23_spill] sm:$0xff]  ;;  %v17841_v36 = vld [vmem:[#allocation54_spill] sm:$0xff] }
 0x40e   : > { %17824 = vst [vmem:[#allocation33_spill] sm:$0xff] %v14546_v63  ;;  %6041 = vperm.xlu1 %11101, %v14546_v63   ;;  %11669 = vpow2.f32 %v5568_v14  ;;  %v5662_v21 = vmul.f32 1.442695, %v5441_v20  ;;  %v5011_v20 = vrot.slane %v14528_v57, %v14081_v19 }
 0x40f   : > { %v14535_v59 = vpop.permute.xlu0 %5912  ;;  %11671 = vpow2.f32 %v5654_v33  ;;  %v17837_v33 = vld [vmem:[#allocation64_spill] sm:$0xff]  ;;  %v5434_v26 = vsub.f32 %v17839_v17, %v5055_v11  ;;  %v4975_v11 = vrot.slane %v14467_v35, %v14113_v29 }
 0x410   : > { %6116 = vperm.xlu0 %11102, %v14537_v49   ;;  %v14553_v49 = vpop.eup %11651  ;;  %11673 = vpow2.f32 %v5636_v0  ;;  %v5443_v45 = vsub.f32 %v17837_v33, %v5091_v55  ;;  %v5421_v33 = vsub.f32 %v17841_v36, %v5003_v39  ;;  %v5019_v39 = vrot.slane %v14528_v57, %v14090_v2  ;;  %v17845_v17 = vld [vmem:[#allocation60_spill] sm:$0xff] }
 0x411   : > { %17826 = vst [vmem:[#allocation22_spill] sm:$0xff] %v14553_v49  ;;  %v14560_v7 = vpop.eup %11653  ;;  %v14569_v15 = vpop.xlane.xlu1 %4684  ;;  %11675 = vpow2.f32 %v5658_v1  ;;  %v4967_v1 = vrot.slane %v14467_v35, %v12546_v37  ;;  %v5423_v36 = vsub.f32 %v17845_v17, %v5011_v20  ;;  %v5027_v20 = vrot.slane %v14528_v57, %v14100_v54 }
 0x412   : > { %17828 = vst [vmem:[#allocation31_spill] sm:$0xff] %v14560_v7  ;;  %v14567_v63 = vpop.eup %11655  ;;  %6047 = vperm.xlu1 %11101, %v14560_v7   ;;  %v5666_v55 = vmul.f32 1.442695, %v5443_v45  ;;  %v5622_v62 = vmul.f32 1.442695, %v5421_v33  ;;  %v17849_v33 = vld [vmem:[#allocation62_spill] sm:$0xff] }
 0x413   : > { %v14551_v12 = vpop.permute.xlu0 %5918  ;;  %17830 = vst [vmem:[#allocation56_spill] sm:$0xff] %v14567_v63  ;;  %v5425_v17 = vsub.f32 %v17849_v33, %v5019_v39  ;;  %v5626_v41 = vmul.f32 1.442695, %v5423_v36 }
 0x414   : > { %6122 = vperm.xlu0 %11102, %v14553_v49   ;;  %v14576_v49 = vpop.eup %11657 }
 0x415   : > { %17832 = vst [vmem:[#allocation35_spill] sm:$0xff] %v14576_v49  ;;  %v14583_v7 = vpop.eup %11659  ;;  %v14585_v14 = vpop.permute.xlu1 %5909  ;;  %v5630_v33 = vmul.f32 1.442695, %v5425_v17  ;;  %v5171_v17 = vrot.slane %v14503_v52, %v14081_v19 }
 0x416   : > { %17834 = vst [vmem:[#allocation58_spill] sm:$0xff] %v14583_v7  ;;  %5981 = vperm.xlu1 %11101, %v14576_v49  }
 0x417   : > { %v14565_v43 = vpop.permute.xlu0 %5924  ;;  %v14592_v30 = vpop.eup %11661 }
 0x418   : > { %6056 = vperm.xlu0 %11102, %v14567_v63   ;;  %v5640_v63 = vmul.f32 1.442695, %v5430_v60  ;;  %17836 = vst [vmem:[#allocation19_spill] sm:$0xff] %v14592_v30  ;;  %v14599_v49 = vpop.eup %11663  ;;  %v5644_v60 = vmul.f32 1.442695, %v5432_v4  ;;  %v17843_v4 = vld [vmem:[#allocation34_spill] sm:$0xff] }
 0x419   : > { %17838 = vst [vmem:[#allocation64_spill] sm:$0xff] %v14599_v49  ;;  %v14608_v0 = vpop.eup %11665  ;;  %v5412_v45 = vsub.f32 %v17843_v4, %v4967_v1  ;;  %v17847_v1 = vld [vmem:[#allocation47_spill] sm:$0xff] }
 0x41a   : > { %5987 = vperm.xlu1 %11101, %v14592_v30   ;;  %11677 = vpow2.f32 %v5640_v63  ;;  %17840 = vst [vmem:[#allocation23_spill] sm:$0xff] %v14608_v0  ;;  %v14615_v30 = vpop.eup %11667  ;;  %v5648_v63 = vmul.f32 1.442695, %v5434_v26  ;;  %v4983_v26 = vrot.slane %v14467_v35, %v14121_v50 }
 0x41b   : > { %v14581_v28 = vpop.permute.xlu0 %5930  ;;  %11679 = vpow2.f32 %v5662_v21  ;;  %17842 = vst [vmem:[#allocation54_spill] sm:$0xff] %v14615_v30  ;;  %v14624_v21 = vpop.eup %11669  ;;  %v5604_v4 = vmul.f32 1.442695, %v5412_v45  ;;  %v17851_v45 = vld [vmem:[#allocation41_spill] sm:$0xff] }
 0x41c   : > { %6062 = vperm.xlu0 %11102, %v14583_v7   ;;  %v14601_v7 = vpop.permute.xlu1 %5915  ;;  %11681 = vpow2.f32 %v5644_v60  ;;  %17844 = vst [vmem:[#allocation34_spill] sm:$0xff] %v14624_v21 }
 0x41d   : > { %11683 = vpow2.f32 %v5666_v55  ;;  %v5414_v55 = vsub.f32 %v17847_v1, %v4975_v11  ;;  %v4991_v11 = vrot.slane %v14467_v35, %v14132_v9  ;;  %v5416_v1 = vsub.f32 %v17851_v45, %v4983_v26  ;;  %v17856_v35 = vld [vmem:[#allocation51_spill] sm:$0xff]  ;;  %v17858_v45 = vld [vmem:[#allocation66_spill] sm:$0xff] }
 0x41e   : > { %5993 = vperm.xlu1 %11101, %v14608_v0   ;;  %v14631_v0 = vpop.eup %11671  ;;  %11685 = vpow2.f32 %v5648_v63 }
 0x41f   : > { %v14597_v58 = vpop.permute.xlu0 %5861  ;;  %17846 = vst [vmem:[#allocation60_spill] sm:$0xff] %v14631_v0  ;;  %11687 = vpow2.f32 %v5622_v62  ;;  %v17853_v62 = vld [vmem:[#allocation68_spill] sm:$0xff]  ;;  %v5418_v26 = vsub.f32 %v17856_v35, %v4991_v11  ;;  %v5071_v11 = vrot.slane %v14512_v34, %v14113_v29 }
 0x420   : > { %6068 = vperm.xlu0 %11102, %v14599_v49   ;;  %v14617_v49 = vpop.permute.xlu1 %5921  ;;  %11689 = vpow2.f32 %v5604_v4  ;;  %v5427_v36 = vsub.f32 %v17853_v62, %v5027_v20  ;;  %v5461_v62 = vsub.f32 %v17858_v45, %v5163_v16  ;;  %v5179_v16 = vrot.slane %v14503_v52, %v14090_v2  ;;  %v17862_v35 = vld [vmem:[#allocation72_spill] sm:$0xff] }
 0x421   : > { %11691 = vpow2.f32 %v5626_v41  ;;  %v5063_v41 = vrot.slane %v14512_v34, %v12546_v37  ;;  %v5463_v45 = vsub.f32 %v17862_v35, %v5171_v17  ;;  %v5187_v17 = vrot.slane %v14503_v52, %v14100_v54 }
 0x422   : > { %5999 = vperm.xlu1 %11101, %v14624_v21   ;;  %v5634_v20 = vmul.f32 1.442695, %v5427_v36  ;;  %v5702_v40 = vmul.f32 1.442695, %v5461_v62  ;;  %v17866_v62 = vld [vmem:[#allocation74_spill] sm:$0xff] }
 0x423   : > { %v14613_v47 = vpop.permute.xlu0 %5936  ;;  %v5465_v35 = vsub.f32 %v17866_v62, %v5179_v16  ;;  %v5706_v18 = vmul.f32 1.442695, %v5463_v45 }
 0x424   : > { %6074 = vperm.xlu0 %11102, %v14615_v30   ;;  %v14633_v60 = vpop.permute.xlu1 %5927  ;;  %v14640_v30 = vpop.eup %11673 }
 0x425   : > { %17848 = vst [vmem:[#allocation47_spill] sm:$0xff] %v14640_v30  ;;  %v14647_v21 = vpop.eup %11675  ;;  %v5710_v62 = vmul.f32 1.442695, %v5465_v35  ;;  %v5107_v35 = vrot.slane %v14519_v38, %v14081_v19 }
 0x426   : > { %17850 = vst [vmem:[#allocation62_spill] sm:$0xff] %v14647_v21  ;;  %6101 = vperm.xlu1 %11101, %v14640_v30  }
 0x427   : > { %v14629_v46 = vpop.permute.xlu0 %5942  ;;  %v14656_v39 = vpop.eup %11677 }
 0x428   : > { %6128 = vperm.xlu0 %11102, %v14631_v0   ;;  %v14649_v63 = vpop.permute.xlu1 %5864  ;;  %v5608_v0 = vmul.f32 1.442695, %v5414_v55  ;;  %17852 = vst [vmem:[#allocation41_spill] sm:$0xff] %v14656_v39  ;;  %v14663_v30 = vpop.eup %11679  ;;  %v5612_v55 = vmul.f32 1.442695, %v5416_v1  ;;  %v17860_v1 = vld [vmem:[#allocation38_spill] sm:$0xff] }
 0x429   : > { %17855 = vst [vmem:[#allocation135_spill] sm:$0xff] %v14663_v30  ;;  %v14672_v4 = vpop.eup %11681  ;;  %v5436_v36 = vsub.f32 %v17860_v1, %v5063_v41  ;;  %v17864_v41 = vld [vmem:[#allocation55_spill] sm:$0xff] }
 0x42a   : > { %6107 = vperm.xlu1 %11101, %v14656_v39   ;;  %11693 = vpow2.f32 %v5608_v0  ;;  %17857 = vst [vmem:[#allocation51_spill] sm:$0xff] %v14672_v4  ;;  %v14679_v39 = vpop.eup %11683  ;;  %v5616_v0 = vmul.f32 1.442695, %v5418_v26  ;;  %v5079_v26 = vrot.slane %v14512_v34, %v14121_v50 }
 0x42b   : > { %v14645_v8 = vpop.permute.xlu0 %5948  ;;  %11695 = vpow2.f32 %v5630_v33  ;;  %17859 = vst [vmem:[#allocation66_spill] sm:$0xff] %v14679_v39  ;;  %v14688_v33 = vpop.eup %11685  ;;  %v5652_v1 = vmul.f32 1.442695, %v5436_v36  ;;  %v17868_v36 = vld [vmem:[#allocation57_spill] sm:$0xff] }
 0x42c   : > { %6134 = vperm.xlu0 %11102, %v14647_v21   ;;  %v14665_v21 = vpop.permute.xlu1 %5867  ;;  %11697 = vpow2.f32 %v5612_v55  ;;  %17861 = vst [vmem:[#allocation38_spill] sm:$0xff] %v14688_v33 }
 0x42d   : > { %11699 = vpow2.f32 %v5634_v20  ;;  %v5438_v20 = vsub.f32 %v17864_v41, %v5071_v11  ;;  %v5087_v11 = vrot.slane %v14512_v34, %v14132_v9  ;;  %v5440_v41 = vsub.f32 %v17868_v36, %v5079_v26  ;;  %v17873_v34 = vld [vmem:[#allocation63_spill] sm:$0xff]  ;;  %v17875_v36 = vld [vmem:[#allocation70_spill] sm:$0xff] }
 0x42e   : > { %6113 = vperm.xlu1 %11101, %v14672_v4   ;;  %v14695_v4 = vpop.eup %11687  ;;  %11701 = vpow2.f32 %v5616_v0 }
 0x42f   : > { %v14661_v22 = vpop.permute.xlu0 %5954  ;;  %17863 = vst [vmem:[#allocation72_spill] sm:$0xff] %v14695_v4  ;;  %11703 = vpow2.f32 %v5702_v40  ;;  %v17870_v40 = vld [vmem:[#allocation80_spill] sm:$0xff]  ;;  %v5442_v26 = vsub.f32 %v17873_v34, %v5087_v11  ;;  %v5007_v11 = vrot.slane %v14528_v57, %v14113_v29 }
 0x430   : > { %17854 = vst [vmem:[#allocation68_spill] sm:$0xff] %v14661_v22  ;;  %6140 = vperm.xlu0 %11102, %v14663_v30   ;;  %v14681_v30 = vpop.permute.xlu1 %5870  ;;  %11705 = vpow2.f32 %v5652_v1  ;;  %v5467_v45 = vsub.f32 %v17870_v40, %v5187_v17  ;;  %v5445_v40 = vsub.f32 %v17875_v36, %v5099_v53  ;;  %v5115_v53 = vrot.slane %v14519_v38, %v14090_v2  ;;  %v17880_v34 = vld [vmem:[#allocation76_spill] sm:$0xff] }
 0x431   : > { %11707 = vpow2.f32 %v5706_v18  ;;  %v4999_v18 = vrot.slane %v14528_v57, %v12546_v37  ;;  %v5447_v36 = vsub.f32 %v17880_v34, %v5107_v35  ;;  %v5123_v35 = vrot.slane %v14519_v38, %v14100_v54 }
 0x432   : > { %6119 = vperm.xlu1 %11101, %v14688_v33   ;;  %v5714_v17 = vmul.f32 1.442695, %v5467_v45  ;;  %v5670_v6 = vmul.f32 1.442695, %v5445_v40  ;;  %v17884_v40 = vld [vmem:[#allocation78_spill] sm:$0xff] }
 0x433   : > { %v14677_v23 = vpop.permute.xlu0 %5888  ;;  %v5449_v34 = vsub.f32 %v17884_v40, %v5115_v53  ;;  %v5674_v3 = vmul.f32 1.442695, %v5447_v36 }
 0x434   : > { %6146 = vperm.xlu0 %11102, %v14679_v39   ;;  %v14697_v55 = vpop.permute.xlu1 %5873  ;;  %v14704_v39 = vpop.eup %11689 }
 0x435   : > { %17865 = vst [vmem:[#allocation55_spill] sm:$0xff] %v14704_v39  ;;  %v14711_v33 = vpop.eup %11691  ;;  %v5678_v40 = vmul.f32 1.442695, %v5449_v34  ;;  %v5203_v34 = vrot.slane %v14544_v42, %v14081_v19 }
 0x436   : > { %17867 = vst [vmem:[#allocation74_spill] sm:$0xff] %v14711_v33  ;;  %6053 = vperm.xlu1 %11101, %v14704_v39  }
 0x437   : > { %v14693_v24 = vpop.permute.xlu0 %5894  ;;  %v14720_v16 = vpop.eup %11693 }
 0x438   : > { %6080 = vperm.xlu0 %11102, %v14695_v4   ;;  %v14713_v0 = vpop.permute.xlu1 %5876  ;;  %v5656_v4 = vmul.f32 1.442695, %v5438_v20  ;;  %17869 = vst [vmem:[#allocation57_spill] sm:$0xff] %v14720_v16  ;;  %v14727_v39 = vpop.eup %11695  ;;  %v5660_v20 = vmul.f32 1.442695, %v5440_v41  ;;  %v17878_v41 = vld [vmem:[#allocation53_spill] sm:$0xff] }
 0x439   : > { %17871 = vst [vmem:[#allocation80_spill] sm:$0xff] %v14727_v39  ;;  %v14736_v1 = vpop.eup %11697  ;;  %v5420_v45 = vsub.f32 %v17878_v41, %v4999_v18  ;;  %v17882_v18 = vld [vmem:[#allocation59_spill] sm:$0xff] }
 0x43a   : > { %6059 = vperm.xlu1 %11101, %v14720_v16   ;;  %11709 = vpow2.f32 %v5656_v4  ;;  %17874 = vst [vmem:[#allocation63_spill] sm:$0xff] %v14736_v1  ;;  %v14743_v16 = vpop.eup %11699  ;;  %v5664_v4 = vmul.f32 1.442695, %v5442_v26  ;;  %v5015_v26 = vrot.slane %v14528_v57, %v14121_v50 }
 0x43b   : > { %v14709_v61 = vpop.permute.xlu0 %5900  ;;  %11711 = vpow2.f32 %v5710_v62  ;;  %17876 = vst [vmem:[#allocation70_spill] sm:$0xff] %v14743_v16  ;;  %v14752_v62 = vpop.eup %11701  ;;  %v5620_v41 = vmul.f32 1.442695, %v5420_v45  ;;  %v17886_v45 = vld [vmem:[#allocation61_spill] sm:$0xff] }
 0x43c   : > { %6086 = vperm.xlu0 %11102, %v14711_v33   ;;  %v14729_v33 = vpop.permute.xlu1 %5879  ;;  %11713 = vpow2.f32 %v5660_v20  ;;  %17879 = vst [vmem:[#allocation53_spill] sm:$0xff] %v14752_v62 }
 0x43d   : > { %17872 = vst [vmem:[#allocation136_spill] sm:$0xff] %v14729_v33  ;;  %11715 = vpow2.f32 %v5714_v17  ;;  %v5422_v17 = vsub.f32 %v17882_v18, %v5007_v11  ;;  %v5023_v11 = vrot.slane %v14528_v57, %v14132_v9  ;;  %v5424_v18 = vsub.f32 %v17886_v45, %v5015_v26  ;;  %v17890_v57 = vld [vmem:[#allocation67_spill] sm:$0xff]  ;;  %v17892_v45 = vld [vmem:[#allocation82_spill] sm:$0xff] }
 0x43e   : > { %6065 = vperm.xlu1 %11101, %v14736_v1   ;;  %v14759_v1 = vpop.eup %11703  ;;  %11717 = vpow2.f32 %v5664_v4 }
 0x43f   : > { %v14725_v48 = vpop.permute.xlu0 %5906  ;;  %17881 = vst [vmem:[#allocation76_spill] sm:$0xff] %v14759_v1  ;;  %11719 = vpow2.f32 %v5670_v6  ;;  %v17888_v6 = vld [vmem:[#allocation84_spill] sm:$0xff]  ;;  %v5426_v26 = vsub.f32 %v17890_v57, %v5023_v11 }
 0x440   : > { %6092 = vperm.xlu0 %11102, %v14727_v39   ;;  %v14745_v39 = vpop.permute.xlu1 %5882  ;;  %11721 = vpow2.f32 %v5620_v41  ;;  %v5451_v36 = vsub.f32 %v17888_v6, %v5123_v35  ;;  %v5469_v6 = vsub.f32 %v17892_v45, %v5195_v32  ;;  %v5211_v32 = vrot.slane %v14544_v42, %v14090_v2  ;;  %v17897_v57 = vld [vmem:[#allocation88_spill] sm:$0xff] }
 0x441   : > { %17877 = vst [vmem:[#allocation137_spill] sm:$0xff] %v14745_v39  ;;  %11723 = vpow2.f32 %v5674_v3  ;;  %v5159_v3 = vrot.slane %v14503_v52, %v12546_v37  ;;  %v5632_v11 = vmul.f32 1.442695, %v5426_v26  ;;  %v5471_v45 = vsub.f32 %v17897_v57, %v5203_v34  ;;  %v17901_v57 = vld [vmem:[#allocation90_spill] sm:$0xff] }
 0x442   : > { %6071 = vperm.xlu1 %11101, %v14752_v62   ;;  %v5682_v35 = vmul.f32 1.442695, %v5451_v36  ;;  %v5718_v56 = vmul.f32 1.442695, %v5469_v6  ;;  %v5175_v26 = vrot.slane %v14503_v52, %v14121_v50  ;;  %v5219_v34 = vrot.slane %v14544_v42, %v14100_v54 }
 0x443   : > { %v14741_v44 = vpop.permute.xlu0 %6008 }
 0x444   : > { %6098 = vperm.xlu0 %11102, %v14743_v16   ;;  %v14761_v20 = vpop.permute.xlu1 %5933  ;;  %v14768_v16 = vpop.eup %11705 }
 0x445   : > { %17883 = vst [vmem:[#allocation59_spill] sm:$0xff] %v14768_v16  ;;  %v14775_v62 = vpop.eup %11707 }
 0x446   : > { %17885 = vst [vmem:[#allocation78_spill] sm:$0xff] %v14775_v62  ;;  %6125 = vperm.xlu1 %11101, %v14768_v16  }
 0x447   : > { %v14757_v13 = vpop.permute.xlu0 %6014  ;;  %v14784_v53 = vpop.eup %11709 }
 0x448   : > { %6200 = vperm.xlu0 %11102, %v14759_v1   ;;  %v14777_v4 = vpop.permute.xlu1 %5939  ;;  %v5624_v1 = vmul.f32 1.442695, %v5422_v17  ;;  %17887 = vst [vmem:[#allocation61_spill] sm:$0xff] %v14784_v53  ;;  %v14791_v16 = vpop.eup %11711  ;;  %v5628_v17 = vmul.f32 1.442695, %v5424_v18  ;;  %v17895_v18 = vld [vmem:[#allocation65_spill] sm:$0xff] }
 0x449   : > { %17889 = vst [vmem:[#allocation84_spill] sm:$0xff] %v14791_v16  ;;  %v14800_v41 = vpop.eup %11713  ;;  %v5460_v36 = vsub.f32 %v17895_v18, %v5159_v3 }
 0x44a   : > { %6131 = vperm.xlu1 %11101, %v14784_v53   ;;  %11725 = vpow2.f32 %v5624_v1  ;;  %17891 = vst [vmem:[#allocation67_spill] sm:$0xff] %v14800_v41  ;;  %v14807_v53 = vpop.eup %11715  ;;  %v5167_v1 = vrot.slane %v14503_v52, %v14113_v29 }
 0x44b   : > { %v14773_v27 = vpop.permute.xlu0 %6020  ;;  %11727 = vpow2.f32 %v5678_v40  ;;  %17893 = vst [vmem:[#allocation82_spill] sm:$0xff] %v14807_v53  ;;  %v14816_v40 = vpop.eup %11717 }
 0x44c   : > { %6206 = vperm.xlu0 %11102, %v14775_v62   ;;  %v14793_v62 = vpop.permute.xlu1 %5945  ;;  %11729 = vpow2.f32 %v5628_v17  ;;  %17896 = vst [vmem:[#allocation65_spill] sm:$0xff] %v14816_v40  ;;  %v17899_v17 = vld [vmem:[#allocation71_spill] sm:$0xff] }
 0x44d   : > { %11731 = vpow2.f32 %v5682_v35  ;;  %v5462_v3 = vsub.f32 %v17899_v17, %v5167_v1  ;;  %v5700_v35 = vmul.f32 1.442695, %v5460_v36  ;;  %v6283_v1 = vrot.slane %v14677_v23, %v13472_v5 }
 0x44e   : > { %6137 = vperm.xlu1 %11101, %v14800_v41   ;;  %v14823_v41 = vpop.eup %11719  ;;  %11733 = vpow2.f32 %v5632_v11  ;;  %v5183_v36 = vrot.slane %v14503_v52, %v14132_v9 }
 0x44f   : > { %v14789_v31 = vpop.permute.xlu0 %6026  ;;  %17898 = vst [vmem:[#allocation88_spill] sm:$0xff] %v14823_v41  ;;  %v14833_v18 = vpop.eup %11721  ;;  %11735 = vpow2.f32 %v5718_v56  ;;  %v17904_v56 = vld [vmem:[#allocation96_spill] sm:$0xff] }
 0x450   : > { %6212 = vperm.xlu0 %11102, %v14791_v16   ;;  %v14809_v16 = vpop.permute.xlu1 %5951  ;;  %17900 = vst [vmem:[#allocation71_spill] sm:$0xff] %v14833_v18  ;;  %v14838_v39 = vpop.eup %11723  ;;  %11737 = vpow2.f32 %v5700_v35  ;;  %v6291_v35 = vrot.slane %v14693_v24, %v13472_v5 }
 0x451   : > { %17894 = vst [vmem:[#allocation138_spill] sm:$0xff] %v14809_v16  ;;  %17902 = vst [vmem:[#allocation90_spill] sm:$0xff] %v14838_v39 }
 0x452   : > { %6143 = vperm.xlu1 %11101, %v14816_v40   ;;  %v5722_v40 = vmul.f32 1.442695, %v5471_v45  ;;  %v5475_v45 = vsub.f32 %v17904_v56, %v5219_v34  ;;  %v17907_v34 = vld [vmem:[#allocation79_spill] sm:$0xff] }
 0x453   : > { %v14805_v51 = vpop.permute.xlu0 %5960 }
 0x454   : > { %6218 = vperm.xlu0 %11102, %v14807_v53   ;;  %v5886_v22 = vpop.permute.xlu1 %5885  ;;  %v5473_v53 = vsub.f32 %v17901_v57, %v5211_v32  ;;  %11739 = vpow2.f32 %v5722_v40 }
 0x455   : > { %v6279_v6 = vrot.slane %v5886_v22, %v13472_v5  ;;  %v17903_v22 = vld [vmem:[#allocation73_spill] sm:$0xff] }
 0x456   : > { %6077 = vperm.xlu1 %11101, %v14833_v18   ;;  %v5464_v17 = vsub.f32 %v17903_v22, %v5175_v26  ;;  %v5726_v23 = vmul.f32 1.442695, %v5473_v53  ;;  %v5131_v18 = vrot.slane %v14569_v15, %v14078_v25  ;;  %v5730_v22 = vmul.f32 1.442695, %v5475_v45 }
 0x457   : > { %v14821_v10 = vpop.permute.xlu0 %5966  ;;  %v6763_v57 = vsel %vm4508_vm1, %v6283_v1, %v6279_v6  ;;  %v14850_v33 = vpop.eup %11725  ;;  %v5466_v6 = vsub.f32 %v17907_v34, %v5183_v36  ;;  %v5095_v1 = vrot.slane %v14519_v38, %v12546_v37  ;;  %v17909_v36 = vld [vmem:[#allocation86_spill] sm:$0xff] }
 0x458   : > { %6152 = vperm.xlu0 %11102, %v14823_v41   ;;  %v5892_v11 = vpop.permute.xlu1 %5891  ;;  %v5704_v41 = vmul.f32 1.442695, %v5462_v3  ;;  %17905 = vst [vmem:[#allocation73_spill] sm:$0xff] %v14850_v33  ;;  %v14857_v3 = vpop.eup %11727  ;;  %v5708_v40 = vmul.f32 1.442695, %v5464_v17  ;;  %v5453_v17 = vsub.f32 %v17909_v36, %v5131_v18  ;;  %v5103_v18 = vrot.slane %v14519_v38, %v14113_v29  ;;  %v17913_v36 = vld [vmem:[#allocation92_spill] sm:$0xff] }
 0x459   : > { %v6287_v32 = vrot.slane %v5892_v11, %v13472_v5  ;;  %17906 = vst [vmem:[#allocation96_spill] sm:$0xff] %v14857_v3  ;;  %v14870_v56 = vpop.eup %11729 }
 0x45a   : > { %6083 = vperm.xlu1 %11101, %v14850_v33   ;;  %11741 = vpow2.f32 %v5704_v41  ;;  %17908 = vst [vmem:[#allocation79_spill] sm:$0xff] %v14870_v56  ;;  %v5139_v41 = vrot.slane %v14569_v15, %v14081_v19 }
 0x45b   : > { %v14836_v16 = vpop.permute.xlu0 %5972  ;;  %v6764_v52 = vsel %vm4510_vm2, %v6287_v32, %v6763_v57  ;;  %v6299_v32 = vrot.slane %v14709_v61, %v13472_v5  ;;  %11743 = vpow2.f32 %v5726_v23  ;;  %v5712_v23 = vmul.f32 1.442695, %v5466_v6 }
 0x45c   : > { %6158 = vperm.xlu0 %11102, %v14838_v39   ;;  %v5898_v11 = vpop.permute.xlu1 %5897  ;;  %v6765_v24 = vsel %vm4512_vm3, %v6291_v35, %v6764_v52  ;;  %11745 = vpow2.f32 %v5708_v40  ;;  %v17911_v52 = vld [vmem:[#allocation69_spill] sm:$0xff]  ;;  %v5686_v39 = vmul.f32 1.442695, %v5453_v17  ;;  %v5111_v40 = vrot.slane %v14519_v38, %v14121_v50  ;;  %v17917_v17 = vld [vmem:[#allocation94_spill] sm:$0xff] }
 0x45d   : > { %v6295_v53 = vrot.slane %v5898_v11, %v13472_v5  ;;  %v14876_v11 = vpop.eup %11731  ;;  %v5444_v35 = vsub.f32 %v17911_v52, %v5095_v1  ;;  %11747 = vpow2.f32 %v5730_v22  ;;  %v17915_v1 = vld [vmem:[#allocation75_spill] sm:$0xff] }
 0x45e   : > { %17910 = vst [vmem:[#allocation86_spill] sm:$0xff] %v14876_v11  ;;  %6089 = vperm.xlu1 %11101, %v14870_v56   ;;  %11749 = vpow2.f32 %v5712_v23  ;;  %v5446_v22 = vsub.f32 %v17915_v1, %v5103_v18  ;;  %v17920_v1 = vld [vmem:[#allocation77_spill] sm:$0xff] }
 0x45f   : > { %v14855_v26 = vpop.permute.xlu0 %5978  ;;  %v6766_v57 = vsel %vm4514_vm4, %v6295_v53, %v6765_v24  ;;  %v14890_v53 = vpop.eup %11733  ;;  %v5147_v24 = vrot.slane %v14569_v15, %v14090_v2  ;;  %v5668_v52 = vmul.f32 1.442695, %v5444_v35  ;;  %11751 = vpow2.f32 %v5686_v39  ;;  %v17924_v2 = vld [vmem:[#allocation83_spill] sm:$0xff] }
 0x460   : > { %6164 = vperm.xlu0 %11102, %v14857_v3   ;;  %v14878_v34 = vpop.permute.xlu1 %5903  ;;  %v14884_v61 = vsel %vm4516_vm5, %v6299_v32, %v6766_v57  ;;  %17912 = vst [vmem:[#allocation69_spill] sm:$0xff] %v14890_v53  ;;  %v5455_v3 = vsub.f32 %v17913_v36, %v5139_v41  ;;  %v14895_v32 = vpop.eup %11735  ;;  %v5155_v41 = vrot.slane %v14569_v15, %v14100_v54  ;;  %v5672_v39 = vmul.f32 1.442695, %v5446_v22 }
 0x461   : > { %17914 = vst [vmem:[#allocation92_spill] sm:$0xff] %v14895_v32  ;;  %v5457_v36 = vsub.f32 %v17917_v17, %v5147_v24  ;;  %v5119_v35 = vrot.slane %v14519_v38, %v14132_v9  ;;  %11753 = vpow2.f32 %v5668_v52  ;;  %v5191_v22 = vrot.slane %v14544_v42, %v12546_v37 }
 0x462   : > { %6095 = vperm.xlu1 %11101, %v14890_v53   ;;  %v5690_v53 = vmul.f32 1.442695, %v5455_v3  ;;  %v17921_v3 = vld [vmem:[#allocation102_spill] sm:$0xff] }
 0x463   : > { %v14881_v45 = vpop.permute.xlu0 %6032  ;;  %v5459_v24 = vsub.f32 %v17921_v3, %v5155_v41  ;;  %v5694_v17 = vmul.f32 1.442695, %v5457_v36  ;;  %v5450_v38 = vsub.f32 %v17924_v2, %v5119_v35  ;;  %v17927_v35 = vld [vmem:[#allocation81_spill] sm:$0xff] }
 0x464   : > { %6170 = vperm.xlu0 %11102, %v14876_v11   ;;  %v14897_v57 = vpop.permute.xlu1 %6005  ;;  %v14906_v11 = vpop.eup %11737  ;;  %11755 = vpow2.f32 %v5690_v53 }
 0x465   : > { %17916 = vst [vmem:[#allocation75_spill] sm:$0xff] %v14906_v11  ;;  %v14911_v56 = vpop.eup %11739  ;;  %11757 = vpow2.f32 %v5672_v39  ;;  %v5698_v53 = vmul.f32 1.442695, %v5459_v24  ;;  %v5680_v2 = vmul.f32 1.442695, %v5450_v38  ;;  %v5468_v39 = vsub.f32 %v17927_v35, %v5191_v22 }
 0x466   : > { %17918 = vst [vmem:[#allocation94_spill] sm:$0xff] %v14911_v56  ;;  %6197 = vperm.xlu1 %11101, %v14906_v11   ;;  %11759 = vpow2.f32 %v5694_v17  ;;  %v5207_v38 = vrot.slane %v14544_v42, %v14121_v50 }
 0x467   : > { %v14900_v6 = vpop.permute.xlu0 %6038  ;;  %v14919_v18 = vpop.eup %11741  ;;  %v5716_v22 = vmul.f32 1.442695, %v5468_v39 }
 0x468   : > { %6224 = vperm.xlu0 %11102, %v14895_v32   ;;  %v14913_v33 = vpop.permute.xlu1 %6011  ;;  %17919 = vst [vmem:[#allocation139_spill] sm:$0xff] %v14919_v18  ;;  %v5448_v32 = vsub.f32 %v17920_v1, %v5111_v40  ;;  %v14925_v54 = vpop.eup %11743 }
 0x469   : > { %17922 = vst [vmem:[#allocation77_spill] sm:$0xff] %v14925_v54  ;;  %v14936_v52 = vpop.eup %11745 }
 0x46a   : > { %6203 = vperm.xlu1 %11101, %v14919_v18   ;;  %v5676_v40 = vmul.f32 1.442695, %v5448_v32  ;;  %17925 = vst [vmem:[#allocation83_spill] sm:$0xff] %v14936_v52  ;;  %v14938_v41 = vpop.eup %11747  ;;  %v5199_v32 = vrot.slane %v14544_v42, %v14113_v29 }
 0x46b   : > { %v14916_v23 = vpop.permute.xlu0 %6044  ;;  %17926 = vst [vmem:[#allocation140_spill] sm:$0xff] %v14938_v41  ;;  %v14949_v3 = vpop.eup %11749 }
 0x46c   : > { %6230 = vperm.xlu0 %11102, %v14911_v56   ;;  %v14927_v11 = vpop.permute.xlu1 %6017  ;;  %11761 = vpow2.f32 %v5676_v40  ;;  %17928 = vst [vmem:[#allocation81_spill] sm:$0xff] %v14949_v3  ;;  %v14951_v24 = vpop.eup %11751  ;;  %v17931_v40 = vld [vmem:[#allocation87_spill] sm:$0xff] }
 0x46d   : > { %11763 = vpow2.f32 %v5698_v53  ;;  %17929 = vst [vmem:[#allocation141_spill] sm:$0xff] %v14951_v24 }
 0x46e   : > { %6209 = vperm.xlu1 %11101, %v14936_v52   ;;  %11765 = vpow2.f32 %v5680_v2  ;;  %v14962_v35 = vpop.eup %11753  ;;  %v5215_v2 = vrot.slane %v14544_v42, %v14132_v9 }
 0x46f   : > { %v14930_v56 = vpop.permute.xlu0 %6050  ;;  %17932 = vst [vmem:[#allocation87_spill] sm:$0xff] %v14962_v35  ;;  %11767 = vpow2.f32 %v5716_v22 }
 0x470   : > { %17923 = vst [vmem:[#allocation102_spill] sm:$0xff] %v14930_v56  ;;  %6236 = vperm.xlu0 %11102, %v14925_v54   ;;  %v14940_v36 = vpop.permute.xlu1 %6023 }
 0x471   : > { %v14964_v53 = vpop.eup %11755 }
 0x472   : > { %6215 = vperm.xlu1 %11101, %v14949_v3   ;;  %17933 = vst [vmem:[#allocation143_spill] sm:$0xff] %v14964_v53  ;;  %v14975_v39 = vpop.eup %11757 }
 0x473   : > { %v14943_v1 = vpop.permute.xlu0 %5984 }
 0x474   : > { %6242 = vperm.xlu0 %11102, %v14938_v41   ;;  %v14953_v17 = vpop.permute.xlu1 %5957  ;;  %v5470_v41 = vsub.f32 %v17931_v40, %v5199_v32  ;;  %v14977_v40 = vpop.eup %11759 }
 0x475   : > { %17937 = vst [vmem:[#allocation145_spill] sm:$0xff] %v14977_v40 }
 0x476   : > { %6149 = vperm.xlu1 %11101, %v14962_v35   ;;  %v5720_v32 = vmul.f32 1.442695, %v5470_v41 }
 0x477   : > { %v14956_v54 = vpop.permute.xlu0 %5990 }
 0x478   : > { %17930 = vst [vmem:[#allocation142_spill] sm:$0xff] %v14956_v54  ;;  %6176 = vperm.xlu0 %11102, %v14951_v24   ;;  %v14966_v52 = vpop.permute.xlu1 %5963  ;;  %v17935_v24 = vld [vmem:[#allocation89_spill] sm:$0xff]  ;;  %11769 = vpow2.f32 %v5720_v32 }
 0x479   : > { %v5472_v18 = vsub.f32 %v17935_v24, %v5207_v38  ;;  %17936 = vst [vmem:[#allocation89_spill] sm:$0xff] %v14975_v39  ;;  %v5127_v24 = vrot.slane %v14569_v15, %v12546_v37  ;;  %v14988_v41 = vpop.eup %11761 }
 0x47a   : > { %6155 = vperm.xlu1 %11101, %v14975_v39   ;;  %v14990_v38 = vpop.eup %11763 }
 0x47b   : > { %v14969_v3 = vpop.permute.xlu0 %5996  ;;  %v5724_v42 = vmul.f32 1.442695, %v5472_v18  ;;  %17941 = vst [vmem:[#allocation147_spill] sm:$0xff] %v14990_v38  ;;  %v5135_v18 = vrot.slane %v14569_v15, %v14113_v29  ;;  %v15001_v32 = vpop.eup %11765 }
 0x47c   : > { %17934 = vst [vmem:[#allocation144_spill] sm:$0xff] %v14969_v3  ;;  %6182 = vperm.xlu0 %11102, %v14964_v53   ;;  %v14979_v19 = vpop.permute.xlu1 %5969  ;;  %v17939_v53 = vld [vmem:[#allocation95_spill] sm:$0xff]  ;;  %v15011_v3 = vpop.eup %11767 }
 0x47d   : > { %v5474_v25 = vsub.f32 %v17939_v53, %v5215_v2  ;;  %17940 = vst [vmem:[#allocation95_spill] sm:$0xff] %v14988_v41  ;;  %11771 = vpow2.f32 %v5724_v42  ;;  %v17942_v53 = vld [vmem:[#allocation85_spill] sm:$0xff] }
 0x47e   : > { %6161 = vperm.xlu1 %11101, %v14988_v41   ;;  %v5452_v2 = vsub.f32 %v17942_v53, %v5127_v24  ;;  %17943 = vst [vmem:[#allocation85_spill] sm:$0xff] %v15001_v32  ;;  %v5143_v41 = vrot.slane %v14569_v15, %v14121_v50  ;;  %v5151_v53 = vrot.slane %v14569_v15, %v14132_v9 }
 0x47f   : > { %v14982_v35 = vpop.permute.xlu0 %6002  ;;  %v6319_v15 = vrot.slane %v14601_v7, %v13472_v5  ;;  %v6327_v7 = vrot.slane %v14617_v49, %v13472_v5 }
 0x480   : > { %17938 = vst [vmem:[#allocation146_spill] sm:$0xff] %v14982_v35  ;;  %6188 = vperm.xlu0 %11102, %v14977_v40   ;;  %v14992_v22 = vpop.permute.xlu1 %5975  ;;  %v5728_v40 = vmul.f32 1.442695, %v5474_v25  ;;  %v5684_v25 = vmul.f32 1.442695, %v5452_v2 }
 0x482   : > { %6167 = vperm.xlu1 %11101, %v15001_v32   ;;  %11773 = vpow2.f32 %v5728_v40  ;;  %v17946_v32 = vld [vmem:[#allocation93_spill] sm:$0xff] }
 0x483   : > { %v14995_v39 = vpop.permute.xlu0 %6104  ;;  %v5456_v56 = vsub.f32 %v17946_v32, %v5143_v41  ;;  %11775 = vpow2.f32 %v5684_v25  ;;  %v17948_v41 = vld [vmem:[#allocation97_spill] sm:$0xff] }
 0x484   : > { %6194 = vperm.xlu0 %11102, %v14990_v38   ;;  %v15003_v37 = vpop.permute.xlu1 %6029  ;;  %v17944_v38 = vld [vmem:[#allocation91_spill] sm:$0xff]  ;;  %v5458_v32 = vsub.f32 %v17948_v41, %v5151_v53  ;;  %v6335_v41 = vrot.slane %v14633_v60, %v13472_v5  ;;  %v6375_v60 = vrot.slane %v14953_v17, %v13472_v5  ;;  %v6451_v17 = vrot.slane %v14757_v13, %v13472_v5 }
 0x485   : > { %v5454_v42 = vsub.f32 %v17944_v38, %v5135_v18  ;;  %17945 = vst [vmem:[#allocation91_spill] sm:$0xff] %v15011_v3  ;;  %v15021_v54 = vpop.eup %11769  ;;  %v6315_v38 = vrot.slane %v14535_v59, %v13472_v5  ;;  %v6311_v18 = vrot.slane %v14585_v14, %v13472_v5  ;;  %v6323_v14 = vrot.slane %v14551_v12, %v13472_v5 }
 0x486   : > { %6221 = vperm.xlu1 %11101, %v15011_v3   ;;  %17947 = vst [vmem:[#allocation93_spill] sm:$0xff] %v15021_v54 }
 0x487   : > { %v15006_v35 = vpop.permute.xlu0 %6110  ;;  %v5688_v40 = vmul.f32 1.442695, %v5454_v42  ;;  %v5692_v42 = vmul.f32 1.442695, %v5456_v56  ;;  %v6770_v59 = vsel %vm4508_vm1, %v6315_v38, %v6311_v18  ;;  %v5696_v56 = vmul.f32 1.442695, %v5458_v32 }
 0x488   : > { %v15013_v29 = vpop.permute.xlu1 %6035  ;;  %v6771_v50 = vsel %vm4510_vm2, %v6319_v15, %v6770_v59  ;;  %v6439_v38 = vrot.slane %v14897_v57, %v13472_v5  ;;  %v6447_v32 = vrot.slane %v14913_v33, %v13472_v5  ;;  %v6339_v57 = vrot.slane %v14581_v28, %v13472_v5 }
 0x489   : > { %11777 = vpow2.f32 %v5688_v40  ;;  %v6331_v40 = vrot.slane %v14565_v43, %v13472_v5  ;;  %v6772_v12 = vsel %vm4512_vm3, %v6323_v14, %v6771_v50  ;;  %v6443_v50 = vrot.slane %v14741_v44, %v13472_v5 }
 0x48a   : > { %6227 = vperm.xlu1 %11101, %v15021_v54   ;;  %v15035_v25 = vpop.eup %11771  ;;  %11779 = vpow2.f32 %v5692_v42  ;;  %v6773_v49 = vsel %vm4514_vm4, %v6327_v7, %v6772_v12  ;;  %v6303_v42 = vrot.slane %v14878_v34, %v13472_v5  ;;  %v6455_v28 = vrot.slane %v14927_v11, %v13472_v5 }
 0x48b   : > { %v15016_v24 = vpop.permute.xlu0 %6116  ;;  %17949 = vst [vmem:[#allocation97_spill] sm:$0xff] %v15035_v25  ;;  %11781 = vpow2.f32 %v5696_v56  ;;  %v6798_v59 = vsel %vm4508_vm1, %v6443_v50, %v6439_v38  ;;  %v6774_v44 = vsel %vm4516_vm5, %v6331_v40, %v6773_v49  ;;  %v6383_v34 = vrot.slane %v14966_v52, %v13472_v5 }
 0x48c   : > { %v15027_v2 = vpop.permute.xlu1 %6041  ;;  %v6799_v7 = vsel %vm4510_vm2, %v6447_v32, %v6798_v59  ;;  %v6775_v56 = vsel %vm4518_vm6, %v6335_v41, %v6774_v44  ;;  %v6379_v12 = vrot.slane %v14805_v51, %v13472_v5  ;;  %v6768_v13 = vsel %vm4518_vm6, %v6303_v42, %v14884_v61 }
 0x48d   : > { %v6800_v40 = vsel %vm4512_vm3, %v6451_v17, %v6799_v7  ;;  %v6776_v52 = vsel %vm4520_vm7, %v6339_v57, %v6775_v56  ;;  %v6463_v51 = vrot.slane %v14940_v36, %v13472_v5  ;;  %v6391_v59 = vrot.slane %v14979_v19, %v13472_v5 }
 0x48e   : > { %6233 = vperm.xlu1 %11101, %v15035_v25   ;;  %v6784_v49 = vsel %vm4508_vm1, %v6379_v12, %v6375_v60  ;;  %v6801_v41 = vsel %vm4514_vm4, %v6455_v28, %v6800_v40  ;;  %v6307_v60 = vrot.slane %v14725_v48, %v13472_v5  ;;  %v6459_v44 = vrot.slane %v14773_v27, %v13472_v5 }
 0x48f   : > { %v15030_v3 = vpop.permute.xlu0 %6122  ;;  %v15048_v53 = vpop.eup %11773  ;;  %v6785_v50 = vsel %vm4510_vm2, %v6383_v34, %v6784_v49  ;;  %v6387_v57 = vrot.slane %v14821_v10, %v13472_v5  ;;  %v6890_v42 = vsel %vm4643_vm8, %v6776_v52, 0.0  ;;  %v6399_v10 = vrot.slane %v14992_v22, %v13472_v5 }
 0x490   : > { %v15040_v9 = vpop.permute.xlu1 %6047  ;;  %17950 = vst [vmem:[#allocation148_spill] sm:$0xff] %v15048_v53  ;;  %v15067_v43 = vpop.eup %11775  ;;  %v6769_v48 = vsel %vm4520_vm7, %v6307_v60, %v6768_v13  ;;  %v6802_v27 = vsel %vm4516_vm5, %v6459_v44, %v6801_v41  ;;  %v6467_v56 = vrot.slane %v14789_v31, %v13472_v5  ;;  %v6395_v17 = vrot.slane %v14836_v16, %v13472_v5 }
 0x491   : > { %17951 = vst [vmem:[#allocation149_spill] sm:$0xff] %v15067_v43  ;;  %v6786_v36 = vsel %vm4512_vm3, %v6387_v57, %v6785_v50  ;;  %v6803_v34 = vsel %vm4518_vm6, %v6463_v51, %v6802_v27  ;;  %v6887_v40 = vsel %vm4643_vm8, %v6769_v48, 0.0  ;;  %v6403_v31 = vrot.slane %v14855_v26, %v13472_v5 }
 0x492   : > { %6239 = vperm.xlu1 %11101, %v15048_v53   ;;  %v6787_v28 = vsel %vm4514_vm4, %v6391_v59, %v6786_v36  ;;  %v6804_v22 = vsel %vm4520_vm7, %v6467_v56, %v6803_v34  ;;  %v6571_v50 = vrot.slane %v14995_v39, %v13472_v5  ;;  %v6579_v48 = vrot.slane %v15006_v35, %v13472_v5 }
 0x493   : > { %v15043_v54 = vpop.permute.xlu0 %6056  ;;  %v6788_v13 = vsel %vm4516_vm5, %v6395_v17, %v6787_v28  ;;  %v6902_v51 = vsel %vm4643_vm8, %v6804_v22, 0.0  ;;  %v6587_v56 = vrot.slane %v15016_v24, %v13472_v5  ;;  %v6595_v35 = vrot.slane %v15030_v3, %v13472_v5 }
 0x494   : > { %v15055_v18 = vpop.permute.xlu1 %5981  ;;  %v6789_v41 = vsel %vm4518_vm6, %v6399_v10, %v6788_v13  ;;  %v6247_v24 = vrot.slane %v14597_v58, %v13472_v5  ;;  %v6255_v3 = vrot.slane %v14665_v21, %v13472_v5  ;;  %v6347_v58 = vrot.slane %v14613_v47, %v13472_v5 }
 0x495   : > { %v6790_v44 = vsel %vm4520_vm7, %v6403_v31, %v6789_v41  ;;  %v6355_v47 = vrot.slane %v14629_v46, %v13472_v5  ;;  %v6479_v46 = vrot.slane %v15013_v29, %v13472_v5 }
 0x496   : > { %6173 = vperm.xlu1 %11101, %v15067_v43   ;;  %v15092_v38 = vpop.eup %11777  ;;  %v6896_v26 = vsel %vm4643_vm8, %v6790_v44, 0.0  ;;  %v18015_v43 = vld [vmem:[#allocation27_spill] sm:$0xff] }
 0x497   : > { %v15058_v15 = vpop.permute.xlu0 %6062  ;;  %17952 = vst [vmem:[#allocation150_spill] sm:$0xff] %v15092_v38  ;;  %v15116_v61 = vpop.eup %11779 }
 0x498   : > { %v15076_v14 = vpop.permute.xlu1 %5987  ;;  %17953 = vst [vmem:[#allocation151_spill] sm:$0xff] %v15116_v61  ;;  %v15135_v12 = vpop.eup %11781 }
 0x499   : > { %17954 = vst [vmem:[#allocation152_spill] sm:$0xff] %v15135_v12 }
 0x49a   : > { %6179 = vperm.xlu1 %11101, %v15092_v38  }
 0x49b   : > { %v15079_v33 = vpop.permute.xlu0 %6068 }
 0x49c   : > { %v15096_v32 = vpop.permute.xlu1 %5993 }
 0x49e   : > { %6185 = vperm.xlu1 %11101, %v15116_v61   ;;  %v18019_v61 = vld [vmem:[#allocation18_spill] sm:$0xff] }
 0x49f   : > { %v15099_v11 = vpop.permute.xlu0 %6074 }
 0x4a0   : > { %v15120_v7 = vpop.permute.xlu1 %5999 }
 0x4a2   : > { %6191 = vperm.xlu1 %11101, %v15135_v12  }
 0x4a3   : > { %v15123_v19 = vpop.permute.xlu0 %6128  ;;  %6891 = vadd.xlane.f32.xlu0 %v6890_v42 }
 0x4a4   : > { %v6102_v49 = vpop.permute.xlu1 %6101 }
 0x4a5   : > { %v6567_v16 = vrot.slane %v6102_v49, %v13472_v5 }
 0x4a7   : > { %v15139_v52 = vpop.permute.xlu0 %6134  ;;  %6888 = vadd.xlane.f32.xlu0 %v6887_v40  ;;  %v6826_v42 = vsel %vm4508_vm1, %v6571_v50, %v6567_v16 }
 0x4a8   : > { %v6108_v59 = vpop.permute.xlu1 %6107 }
 0x4a9   : > { %v6575_v57 = vrot.slane %v6108_v59, %v13472_v5  ;;  %v6343_v59 = vrot.slane %v14761_v20, %v13472_v5  ;;  %v6263_v20 = vrot.slane %v14697_v55, %v13472_v5  ;;  %v6471_v55 = vrot.slane %v15003_v37, %v13472_v5 }
 0x4aa   : > { %v6475_v37 = vrot.slane %v14881_v45, %v13472_v5 }
 0x4ab   : > { %v15150_v60 = vpop.permute.xlu0 %6140  ;;  %6903 = vadd.xlane.f32.xlu0 %v6902_v51  ;;  %v6827_v36 = vsel %vm4510_vm2, %v6575_v57, %v6826_v42  ;;  %v6251_v51 = vrot.slane %v14649_v63, %v13472_v5  ;;  %v6351_v57 = vrot.slane %v14777_v4, %v13472_v5  ;;  %v6259_v63 = vrot.slane %v14681_v30, %v13472_v5 }
 0x4ac   : > { %v6114_v27 = vpop.permute.xlu1 %6113  ;;  %v6828_v10 = vsel %vm4512_vm3, %v6579_v48, %v6827_v36  ;;  %v6507_v42 = vrot.slane %v15043_v54, %v13472_v5  ;;  %v6777_v30 = vsel %vm4508_vm1, %v6347_v58, %v6343_v59  ;;  %v6523_v58 = vrot.slane %v15079_v33, %v13472_v5 }
 0x4ad   : > { %v6583_v39 = vrot.slane %v6114_v27, %v13472_v5  ;;  %v6756_v21 = vsel %vm4508_vm1, %v6251_v51, %v6247_v24  ;;  %v6778_v54 = vsel %vm4510_vm2, %v6351_v57, %v6777_v30  ;;  %v17957_v51 = vld [vmem:[#allocation138_spill] sm:$0xff]  ;;  %v6407_v57 = vrot.slane %v15055_v18, %v13472_v5 }
 0x4ae   : > { %v6757_v4 = vsel %vm4510_vm2, %v6255_v3, %v6756_v21  ;;  %v6415_v21 = vrot.slane %v15076_v14, %v13472_v5  ;;  %v6531_v18 = vrot.slane %v15099_v11, %v13472_v5 }
 0x4af   : > { %v15159_v28 = vpop.permute.xlu0 %6146  ;;  %6897 = vadd.xlane.f32.xlu0 %v6896_v26  ;;  %v6829_v34 = vsel %vm4514_vm4, %v6583_v39, %v6828_v10  ;;  %v6359_v39 = vrot.slane %v14793_v62, %v13472_v5  ;;  %v6267_v62 = vrot.slane %v14713_v0, %v13472_v5  ;;  %v6367_v0 = vrot.slane %v17957_v51, %v13472_v5 }
 0x4b0   : > { %v6120_v17 = vpop.permute.xlu1 %6119  ;;  %v6830_v22 = vsel %vm4516_vm5, %v6587_v56, %v6829_v34  ;;  %v6758_v34 = vsel %vm4512_vm3, %v6259_v63, %v6757_v4  ;;  %v6363_v56 = vrot.slane %v14645_v8, %v13472_v5 }
 0x4b1   : > { %v6591_v49 = vrot.slane %v6120_v17, %v13472_v5  ;;  %v6515_v17 = vrot.slane %v15058_v15, %v13472_v5 }
 0x4b3   : > { %v15166_v40 = vpop.permute.xlu0 %6080  ;;  %v6831_v13 = vsel %vm4518_vm6, %v6591_v49, %v6830_v22 }
 0x4b4   : > { %v6054_v41 = vpop.permute.xlu1 %6053  ;;  %v6832_v31 = vsel %vm4520_vm7, %v6595_v35, %v6831_v13  ;;  %v6759_v35 = vsel %vm4514_vm4, %v6263_v20, %v6758_v34  ;;  %v17955_v13 = vld [vmem:[#allocation136_spill] sm:$0xff] }
 0x4b5   : > { %v6914_v50 = vsel %vm4643_vm8, %v6832_v31, 0.0  ;;  %v6503_v44 = vrot.slane %v6054_v41, %v13472_v5  ;;  %v6271_v8 = vrot.slane %v17955_v13, %v13472_v5  ;;  %v17956_v41 = vld [vmem:[#allocation137_spill] sm:$0xff]  ;;  %v6779_v31 = vsel %vm4512_vm3, %v6355_v47, %v6778_v54 }
 0x4b6   : > { %6915 = vadd.xlane.f32.xlu0 %v6914_v50  ;;  %v6275_v29 = vrot.slane %v17956_v41, %v13472_v5  ;;  %v6780_v24 = vsel %vm4514_vm4, %v6359_v39, %v6779_v31  ;;  %v6805_v50 = vsel %vm4508_vm1, %v6475_v37, %v6471_v55  ;;  %v6495_v39 = vrot.slane %v15040_v9, %v13472_v5 }
 0x4b7   : > { %v15174_v16 = vpop.permute.xlu0 %6086  ;;  %v6812_v27 = vsel %vm4508_vm1, %v6507_v42, %v6503_v44  ;;  %v6806_v59 = vsel %vm4510_vm2, %v6479_v46, %v6805_v50  ;;  %v6487_v44 = vrot.slane %v15027_v2, %v13472_v5  ;;  %v6760_v42 = vsel %vm4516_vm5, %v6267_v62, %v6759_v35  ;;  %v17958_v46 = vld [vmem:[#allocation68_spill] sm:$0xff]  ;;  %v17959_v35 = vld [vmem:[#allocation142_spill] sm:$0xff] }
 0x4b8   : > { %v6060_v36 = vpop.permute.xlu1 %6059  ;;  %v6411_v2 = vrot.slane %v14943_v1, %v13472_v5  ;;  %v6761_v33 = vsel %vm4518_vm6, %v6271_v8, %v6760_v42  ;;  %v6781_v14 = vsel %vm4516_vm5, %v6363_v56, %v6780_v24  ;;  %v6419_v62 = vrot.slane %v17959_v35, %v13472_v5  ;;  %v17960_v24 = vld [vmem:[#allocation102_spill] sm:$0xff] }
 0x4b9   : > { %v6511_v26 = vrot.slane %v6060_v36, %v13472_v5  ;;  %v6483_v36 = vrot.slane %v14900_v6, %v13472_v5  ;;  %v6762_v6 = vsel %vm4520_vm7, %v6275_v29, %v6761_v33  ;;  %v6782_v11 = vsel %vm4518_vm6, %v6367_v0, %v6781_v14 }
 0x4ba   : > { %v6884_v37 = vsel %vm4643_vm8, %v6762_v6, 0.0  ;;  %v6431_v29 = vrot.slane %v15120_v7, %v13472_v5  ;;  %v6499_v51 = vrot.slane %v17960_v24, %v13472_v5  ;;  %v6611_v7 = vrot.slane %v15139_v52, %v13472_v5 }
 0x4bb   : > { %v15198_v48 = vpop.permute.xlu0 %6092  ;;  %v6813_v10 = vsel %vm4510_vm2, %v6511_v26, %v6812_v27  ;;  %v6807_v4 = vsel %vm4512_vm3, %v6483_v36, %v6806_v59  ;;  %v6791_v27 = vsel %vm4508_vm1, %v6411_v2, %v6407_v57  ;;  %v6619_v52 = vrot.slane %v15150_v60, %v13472_v5 }
 0x4bc   : > { %v6066_v49 = vpop.permute.xlu1 %6065  ;;  %v6814_v15 = vsel %vm4512_vm3, %v6515_v17, %v6813_v10  ;;  %v6808_v30 = vsel %vm4514_vm4, %v6487_v44, %v6807_v4  ;;  %v6792_v55 = vsel %vm4510_vm2, %v6415_v21, %v6791_v27  ;;  %v6423_v10 = vrot.slane %v15096_v32, %v13472_v5  ;;  %v17962_v21 = vld [vmem:[#allocation146_spill] sm:$0xff] }
 0x4bd   : > { %v6519_v22 = vrot.slane %v6066_v49, %v13472_v5  ;;  %v6371_v17 = vrot.slane %v17958_v46, %v13472_v5  ;;  %v6491_v49 = vrot.slane %v14916_v23, %v13472_v5  ;;  %v6793_v32 = vsel %vm4512_vm3, %v6419_v62, %v6792_v55 }
 0x4be   : > { %v6794_v23 = vsel %vm4514_vm4, %v6423_v10, %v6793_v32  ;;  %v6627_v14 = vrot.slane %v15159_v28, %v13472_v5  ;;  %v6539_v10 = vrot.slane %v15166_v40, %v13472_v5  ;;  %v6555_v40 = vrot.slane %v15198_v48, %v13472_v5 }
 0x4bf   : > { %v6815_v45 = vsel %vm4514_vm4, %v6519_v22, %v6814_v15  ;;  %v15235_v3 = vpop.permute.xlu0 %6098  ;;  %v6603_v22 = vrot.slane %v15123_v19, %v13472_v5  ;;  %v6783_v8 = vsel %vm4520_vm7, %v6371_v17, %v6782_v11  ;;  %v6809_v41 = vsel %vm4516_vm5, %v6491_v49, %v6808_v30  ;;  %v17961_v19 = vld [vmem:[#allocation144_spill] sm:$0xff] }
 0x4c0   : > { %v6072_v63 = vpop.permute.xlu1 %6071  ;;  %v6816_v26 = vsel %vm4516_vm5, %v6523_v58, %v6815_v45  ;;  %v6810_v15 = vsel %vm4518_vm6, %v6495_v39, %v6809_v41  ;;  %v6427_v0 = vrot.slane %v17961_v19, %v13472_v5  ;;  %v6893_v59 = vsel %vm4643_vm8, %v6783_v8, 0.0 }
 0x4c1   : > { %v6527_v20 = vrot.slane %v6072_v63, %v13472_v5  ;;  %v6811_v58 = vsel %vm4520_vm7, %v6499_v51, %v6810_v15  ;;  %v6547_v49 = vrot.slane %v15174_v16, %v13472_v5  ;;  %v6563_v8 = vrot.slane %v15235_v3, %v13472_v5 }
 0x4c2   : > { %v6795_v63 = vsel %vm4516_vm5, %v6427_v0, %v6794_v23 }
 0x4c3   : > { %v6817_v47 = vsel %vm4518_vm6, %v6527_v20, %v6816_v26  ;;  %v15270_v56 = vpop.permute.xlu0 %6200  ;;  %v6796_v36 = vsel %vm4518_vm6, %v6431_v29, %v6795_v63  ;;  %v6435_v20 = vrot.slane %v17962_v21, %v13472_v5  ;;  %v6905_v26 = vsel %vm4643_vm8, %v6811_v58, 0.0 }
 0x4c4   : > { %v6126_v1 = vpop.permute.xlu1 %6125  ;;  %v6818_v54 = vsel %vm4520_vm7, %v6531_v18, %v6817_v47  ;;  %v6699_v48 = vrot.slane %v15270_v56, %v13472_v5 }
 0x4c5   : > { %v6908_v34 = vsel %vm4643_vm8, %v6818_v54, 0.0  ;;  %v6599_v9 = vrot.slane %v6126_v1, %v13472_v5  ;;  %v6797_v4 = vsel %vm4520_vm7, %v6435_v20, %v6796_v36 }
 0x4c6   : > { %6909 = vadd.xlane.f32.xlu0 %v6908_v34  ;;  %6885 = vadd.xlane.f32.xlu1 %v6884_v37  ;;  %v6899_v27 = vsel %vm4643_vm8, %v6797_v4, 0.0 }
 0x4c7   : > { %v6833_v50 = vsel %vm4508_vm1, %v6603_v22, %v6599_v9  ;;  %v15297_v44 = vpop.permute.xlu0 %6206 }
 0x4c8   : > { %v6132_v13 = vpop.permute.xlu1 %6131 }
 0x4c9   : > { %v6607_v31 = vrot.slane %v6132_v13, %v13472_v5 }
 0x4ca   : > { %6894 = vadd.xlane.f32.xlu1 %v6893_v59 }
 0x4cb   : > { %v6834_v45 = vsel %vm4510_vm2, %v6607_v31, %v6833_v50  ;;  %v6213_v6 = vpop.permute.xlu0 %6212 }
 0x4cc   : > { %v6138_v57 = vpop.permute.xlu1 %6137  ;;  %v6835_v2 = vsel %vm4512_vm3, %v6611_v7, %v6834_v45  ;;  %v6707_v45 = vrot.slane %v15297_v44, %v13472_v5  ;;  %v6715_v56 = vrot.slane %v6213_v6, %v13472_v5 }
 0x4cd   : > { %v6615_v42 = vrot.slane %v6138_v57, %v13472_v5 }
 0x4ce   : > { %6906 = vadd.xlane.f32.xlu1 %v6905_v26 }
 0x4cf   : > { %v6836_v18 = vsel %vm4514_vm4, %v6615_v42, %v6835_v2  ;;  %v6219_v39 = vpop.permute.xlu0 %6218 }
 0x4d0   : > { %v6144_v33 = vpop.permute.xlu1 %6143  ;;  %v6837_v30 = vsel %vm4516_vm5, %v6619_v52, %v6836_v18  ;;  %v6723_v21 = vrot.slane %v6219_v39, %v13472_v5 }
 0x4d1   : > { %v6623_v47 = vrot.slane %v6144_v33, %v13472_v5 }
 0x4d2   : > { %6900 = vadd.xlane.f32.xlu1 %v6899_v27 }
 0x4d3   : > { %v6838_v1 = vsel %vm4518_vm6, %v6623_v47, %v6837_v30  ;;  %v6153_v62 = vpop.permute.xlu0 %6152 }
 0x4d4   : > { %v6078_v54 = vpop.permute.xlu1 %6077  ;;  %v6839_v60 = vsel %vm4520_vm7, %v6627_v14, %v6838_v1  ;;  %v6635_v4 = vrot.slane %v6153_v62, %v13472_v5 }
 0x4d5   : > { %v6535_v11 = vrot.slane %v6078_v54, %v13472_v5  ;;  %v6917_v55 = vsel %vm4643_vm8, %v6839_v60, 0.0 }
 0x4d6   : > { %6918 = vadd.xlane.f32.xlu1 %v6917_v55 }
 0x4d7   : > { %v6819_v46 = vsel %vm4508_vm1, %v6539_v10, %v6535_v11  ;;  %v6159_v16 = vpop.permute.xlu0 %6158 }
 0x4d8   : > { %v6084_v34 = vpop.permute.xlu1 %6083  ;;  %v6643_v1 = vrot.slane %v6159_v16, %v13472_v5 }
 0x4d9   : > { %v6543_v28 = vrot.slane %v6084_v34, %v13472_v5 }
 0x4db   : > { %v6820_v17 = vsel %vm4510_vm2, %v6543_v28, %v6819_v46  ;;  %v6165_v19 = vpop.permute.xlu0 %6164 }
 0x4dc   : > { %v6090_v35 = vpop.permute.xlu1 %6089  ;;  %v6821_v37 = vsel %vm4512_vm3, %v6547_v49, %v6820_v17  ;;  %v6651_v55 = vrot.slane %v6165_v19, %v13472_v5 }
 0x4dd   : > { %v6551_v9 = vrot.slane %v6090_v35, %v13472_v5 }
 0x4df   : > { %v6822_v32 = vsel %vm4514_vm4, %v6551_v9, %v6821_v37  ;;  %v6171_v58 = vpop.permute.xlu0 %6170 }
 0x4e0   : > { %v6096_v22 = vpop.permute.xlu1 %6095  ;;  %v6823_v41 = vsel %vm4516_vm5, %v6555_v40, %v6822_v32  ;;  %v6659_v46 = vrot.slane %v6171_v58, %v13472_v5 }
 0x4e1   : > { %v6559_v13 = vrot.slane %v6096_v22, %v13472_v5 }
 0x4e3   : > { %v6824_v23 = vsel %vm4518_vm6, %v6559_v13, %v6823_v41  ;;  %v6225_v26 = vpop.permute.xlu0 %6224 }
 0x4e4   : > { %v6198_v29 = vpop.permute.xlu1 %6197  ;;  %v6825_v31 = vsel %vm4520_vm7, %v6563_v8, %v6824_v23  ;;  %v6731_v40 = vrot.slane %v6225_v26, %v13472_v5 }
 0x4e5   : > { %v6911_v15 = vsel %vm4643_vm8, %v6825_v31, 0.0  ;;  %v6695_v24 = vrot.slane %v6198_v29, %v13472_v5 }
 0x4e6   : > { %6912 = vadd.xlane.f32.xlu1 %v6911_v15 }
 0x4e7   : > { %v6854_v0 = vsel %vm4508_vm1, %v6699_v48, %v6695_v24  ;;  %v6231_v30 = vpop.permute.xlu0 %6230 }
 0x4e8   : > { %v6204_v51 = vpop.permute.xlu1 %6203  ;;  %v6739_v16 = vrot.slane %v6231_v30, %v13472_v5 }
 0x4e9   : > { %v6703_v3 = vrot.slane %v6204_v51, %v13472_v5 }
 0x4eb   : > { %v6855_v50 = vsel %vm4510_vm2, %v6703_v3, %v6854_v0  ;;  %v6237_v34 = vpop.permute.xlu0 %6236 }
 0x4ec   : > { %v6210_v59 = vpop.permute.xlu1 %6209  ;;  %v6856_v57 = vsel %vm4512_vm3, %v6707_v45, %v6855_v50  ;;  %v6747_v48 = vrot.slane %v6237_v34, %v13472_v5  ;;  %v17965_v34 = vld [vmem:[#allocation99_spill] sm:$0xff] }
 0x4ed   : > { %v6711_v7 = vrot.slane %v6210_v59, %v13472_v5 }
 0x4ef   : > { %v6857_v63 = vsel %vm4514_vm4, %v6711_v7, %v6856_v57  ;;  %v6243_v32 = vpop.permute.xlu0 %6242 }
 0x4f0   : > { %v6216_v42 = vpop.permute.xlu1 %6215  ;;  %v6858_v20 = vsel %vm4516_vm5, %v6715_v56, %v6857_v63  ;;  %v6755_v3 = vrot.slane %v6243_v32, %v13472_v5  ;;  %v17970_v32 = vld [vmem:[#allocation105_spill] sm:$0xff] }
 0x4f1   : > { %v6719_v36 = vrot.slane %v6216_v42, %v13472_v5 }
 0x4f3   : > { %v6859_v2 = vsel %vm4518_vm6, %v6719_v36, %v6858_v20  ;;  %v6177_v29 = vpop.permute.xlu0 %6176 }
 0x4f4   : > { %v6150_v44 = vpop.permute.xlu1 %6149  ;;  %v6860_v18 = vsel %vm4520_vm7, %v6723_v21, %v6859_v2  ;;  %v6667_v63 = vrot.slane %v6177_v29, %v13472_v5 }
 0x4f5   : > { %v6926_v52 = vsel %vm4643_vm8, %v6860_v18, 0.0  ;;  %v6631_v33 = vrot.slane %v6150_v44, %v13472_v5 }
 0x4f6   : > { %6927 = vadd.xlane.f32.xlu0 %v6926_v52 }
 0x4f7   : > { %v6840_v14 = vsel %vm4508_vm1, %v6635_v4, %v6631_v33  ;;  %v6183_v50 = vpop.permute.xlu0 %6182 }
 0x4f8   : > { %v6156_v47 = vpop.permute.xlu1 %6155  ;;  %v6675_v2 = vrot.slane %v6183_v50, %v13472_v5 }
 0x4f9   : > { %v6639_v6 = vrot.slane %v6156_v47, %v13472_v5 }
 0x4fb   : > { %v6841_v27 = vsel %vm4510_vm2, %v6639_v6, %v6840_v14  ;;  %v6189_v42 = vpop.permute.xlu0 %6188 }
 0x4fc   : > { %v6162_v54 = vpop.permute.xlu1 %6161  ;;  %v6842_v11 = vsel %vm4512_vm3, %v6643_v1, %v6841_v27  ;;  %v6683_v4 = vrot.slane %v6189_v42, %v13472_v5 }
 0x4fd   : > { %v6647_v60 = vrot.slane %v6162_v54, %v13472_v5 }
 0x4ff   : > { %v6843_v39 = vsel %vm4514_vm4, %v6647_v60, %v6842_v11  ;;  %v6195_v52 = vpop.permute.xlu0 %6194  ;;  %v17963_v11 = vld [vmem:[#allocation98_spill] sm:$0xff] }
 0x500   : > { %v6168_v10 = vpop.permute.xlu1 %6167  ;;  %v6844_v17 = vsel %vm4516_vm5, %v6651_v55, %v6843_v39  ;;  %v6691_v14 = vrot.slane %v6195_v52, %v13472_v5  ;;  %v17964_v55 = vld [vmem:[#allocation48_spill] sm:$0xff] }
 0x501   : > { %v6655_v28 = vrot.slane %v6168_v10, %v13472_v5 }
 0x503   : > { %v6845_v49 = vsel %vm4518_vm6, %v6655_v28, %v6844_v17 }
 0x504   : > { %v6222_v35 = vpop.permute.xlu1 %6221  ;;  %v6846_v62 = vsel %vm4520_vm7, %v6659_v46, %v6845_v49  ;;  %v17966_v46 = vld [vmem:[#allocation103_spill] sm:$0xff] }
 0x505   : > { %v6920_v9 = vsel %vm4643_vm8, %v6846_v62, 0.0  ;;  %v6727_v37 = vrot.slane %v6222_v35, %v13472_v5  ;;  %v17968_v35 = vld [vmem:[#allocation104_spill] sm:$0xff] }
 0x506   : > { %6921 = vadd.xlane.f32.xlu0 %v6920_v9  ;;  %v17969_v9 = vld [vmem:[#allocation101_spill] sm:$0xff] }
 0x507   : > { %v6861_v8 = vsel %vm4508_vm1, %v6731_v40, %v6727_v37 }
 0x508   : > { %v6228_v22 = vpop.permute.xlu1 %6227 }
 0x509   : > { %v6735_v13 = vrot.slane %v6228_v22, %v13472_v5 }
 0x50b   : > { %v6862_v41 = vsel %vm4510_vm2, %v6735_v13, %v6861_v8  ;;  %v17971_v8 = vld [vmem:[#allocation106_spill] sm:$0xff] }
 0x50c   : > { %v6234_v23 = vpop.permute.xlu1 %6233  ;;  %v6863_v15 = vsel %vm4512_vm3, %v6739_v16, %v6862_v41 }
 0x50d   : > { %v6743_v31 = vrot.slane %v6234_v23, %v13472_v5  ;;  %v17972_v23 = vld [vmem:[#allocation109_spill] sm:$0xff] }
 0x50f   : > { %v6864_v24 = vsel %vm4514_vm4, %v6743_v31, %v6863_v15  ;;  %v17973_v15 = vld [vmem:[#allocation107_spill] sm:$0xff] }
 0x510   : > { %v6240_v51 = vpop.permute.xlu1 %6239  ;;  %v6865_v0 = vsel %vm4516_vm5, %v6747_v48, %v6864_v24 }
 0x511   : > { %v6751_v19 = vrot.slane %v6240_v51, %v13472_v5  ;;  %v17974_v51 = vld [vmem:[#allocation111_spill] sm:$0xff] }
 0x513   : > { %v6866_v45 = vsel %vm4518_vm6, %v6751_v19, %v6865_v0  ;;  %v17975_v0 = vld [vmem:[#allocation108_spill] sm:$0xff] }
 0x514   : > { %v6174_v59 = vpop.permute.xlu1 %6173  ;;  %v6867_v7 = vsel %vm4520_vm7, %v6755_v3, %v6866_v45 }
 0x515   : > { %v6929_v57 = vsel %vm4643_vm8, %v6867_v7, 0.0  ;;  %v6663_v58 = vrot.slane %v6174_v59, %v13472_v5  ;;  %v17976_v59 = vld [vmem:[#allocation113_spill] sm:$0xff] }
 0x516   : > { %6930 = vadd.xlane.f32.xlu1 %v6929_v57 }
 0x517   : > { %v6847_v21 = vsel %vm4508_vm1, %v6667_v63, %v6663_v58  ;;  %v17977_v58 = vld [vmem:[#allocation110_spill] sm:$0xff] }
 0x518   : > { %v6180_v56 = vpop.permute.xlu1 %6179 }
 0x519   : > { %v6671_v36 = vrot.slane %v6180_v56, %v13472_v5  ;;  %v17978_v56 = vld [vmem:[#allocation49_spill] sm:$0xff] }
 0x51b   : > { %v6848_v20 = vsel %vm4510_vm2, %v6671_v36, %v6847_v21 }
 0x51c   : > { %v6186_v44 = vpop.permute.xlu1 %6185  ;;  %v6849_v26 = vsel %vm4512_vm3, %v6675_v2, %v6848_v20 }
 0x51d   : > { %v6679_v18 = vrot.slane %v6186_v44, %v13472_v5 }
 0x51f   : > { %v6850_v33 = vsel %vm4514_vm4, %v6679_v18, %v6849_v26 }
 0x520   : > { %v6192_v47 = vpop.permute.xlu1 %6191  ;;  %v6851_v30 = vsel %vm4516_vm5, %v6683_v4, %v6850_v33 }
 0x521   : > { %v6687_v6 = vrot.slane %v6192_v47, %v13472_v5  ;;  %v17967_v5 = vld [vmem:[#allocation100_spill] sm:$0xff] }
 0x523   : > { %v6852_v27 = vsel %vm4518_vm6, %v6687_v6, %v6851_v30 }
 0x524   : > { %v6853_v1 = vsel %vm4520_vm7, %v6691_v14, %v6852_v27 }
 0x525   : > { %v6923_v54 = vsel %vm4643_vm8, %v6853_v1, 0.0 }
 0x526   : > { %6924 = vadd.xlane.f32.xlu1 %v6923_v54 }
 0x52c   : > { %v6892_v60 = vpop.xlane.xlu0 %6891 }
 0x52d   : > { %v7019_v39 = vrot.slane %v6892_v60, %v17963_v11  ;;  %v7015_v10 = vrot.slane %v6892_v60, %v17964_v55  ;;  %v7027_v28 = vrot.slane %v6892_v60, %v17965_v34  ;;  %v7023_v17 = vrot.slane %v6892_v60, %v17966_v46 }
 0x52e   : > { %v7035_v49 = vrot.slane %v6892_v60, %v17967_v5  ;;  %v7031_v62 = vrot.slane %v6892_v60, %v17968_v35  ;;  %v7043_v37 = vrot.slane %v6892_v60, %v17969_v9  ;;  %v7039_v40 = vrot.slane %v6892_v60, %v17970_v32 }
 0x52f   : > { %11783 = vrcp.f32 %v7019_v39 }
 0x530   : > { %11785 = vrcp.f32 %v7015_v10  ;;  %v6889_v21 = vpop.xlane.xlu0 %6888 }
 0x531   : > { %11787 = vrcp.f32 %v7027_v28  ;;  %v6987_v26 = vrot.slane %v6889_v21, %v17963_v11  ;;  %v6983_v4 = vrot.slane %v6889_v21, %v17964_v55  ;;  %v6995_v47 = vrot.slane %v6889_v21, %v17965_v34 }
 0x532   : > { %11789 = vrcp.f32 %v7023_v17  ;;  %v6991_v27 = vrot.slane %v6889_v21, %v17966_v46  ;;  %v7003_v1 = vrot.slane %v6889_v21, %v17967_v5  ;;  %v6999_v39 = vrot.slane %v6889_v21, %v17968_v35 }
 0x533   : > { %11791 = vrcp.f32 %v7035_v49  ;;  %v7011_v28 = vrot.slane %v6889_v21, %v17969_v9 }
 0x534   : > { %11793 = vrcp.f32 %v7031_v62  ;;  %v15444_v49 = vpop.xlane.xlu0 %6903  ;;  %v17979_v62 = vld [vmem:[#allocation115_spill] sm:$0xff] }
 0x535   : > { %11795 = vrcp.f32 %v7043_v37 }
 0x536   : > { %11797 = vrcp.f32 %v7039_v40 }
 0x53c   : > { %v11784_v22 = vpop.eup %11783 }
 0x53d   : > { %v11786_v13 = vpop.eup %11785  ;;  %v7623_v41 = vmul.f32 %v11784_v22, %v17971_v8 }
 0x53e   : > { %v11788_v16 = vpop.eup %11787  ;;  %v7621_v29 = vmul.f32 %v11786_v13, %v17972_v23  ;;  %v17980_v13 = vld [vmem:[#allocation112_spill] sm:$0xff]  ;;  %v7007_v23 = vrot.slane %v6889_v21, %v17970_v32 }
 0x53f   : > { %v11790_v31 = vpop.eup %11789  ;;  %8059 = vperm.xlu0 %11102, %v7623_v41   ;;  %v7627_v24 = vmul.f32 %v11788_v16, %v17973_v15  ;;  %v17981_v15 = vld [vmem:[#allocation12_spill] sm:$0xff] }
 0x540   : > { %8054 = vperm.xlu1 %11101, %v7621_v29   ;;  %v11792_v48 = vpop.eup %11791  ;;  %v7625_v19 = vmul.f32 %v11790_v31, %v17974_v51  ;;  %v7143_v29 = vrot.slane %v15444_v49, %v17964_v55 }
 0x541   : > { %v11794_v3 = vpop.eup %11793  ;;  %v7631_v50 = vmul.f32 %v11792_v48, %v17975_v0 }
 0x542   : > { %v11796_v45 = vpop.eup %11795  ;;  %v7629_v7 = vmul.f32 %v11794_v3, %v17976_v59 }
 0x543   : > { %8069 = vperm.xlu0 %11102, %v7627_v24   ;;  %v11798_v57 = vpop.eup %11797  ;;  %v7635_v63 = vmul.f32 %v11796_v45, %v17977_v58  ;;  %v7147_v45 = vrot.slane %v15444_v49, %v17963_v11  ;;  %v17983_v58 = vld [vmem:[#allocation42_spill] sm:$0xff] }
 0x544   : > { %8064 = vperm.xlu1 %11101, %v7625_v19   ;;  %v7633_v42 = vmul.f32 %v11798_v57, %v17978_v56  ;;  %v17982_v19 = vld [vmem:[#allocation9_spill] sm:$0xff] }
 0x547   : > { %8079 = vperm.xlu0 %11102, %v7631_v50  }
 0x548   : > { %8074 = vperm.xlu1 %11101, %v7629_v7   ;;  %v7151_v7 = vrot.slane %v15444_v49, %v17966_v46 }
 0x54b   : > { %8089 = vperm.xlu0 %11102, %v7635_v63  }
 0x54c   : > { %8084 = vperm.xlu1 %11101, %v7633_v42  }
 0x54f   : > { %v6886_v36 = vpop.xlane.xlu1 %6885 }
 0x550   : > { %v6955_v20 = vrot.slane %v6886_v36, %v17963_v11  ;;  %v6951_v2 = vrot.slane %v6886_v36, %v17964_v55  ;;  %v6959_v44 = vrot.slane %v6886_v36, %v17966_v46  ;;  %v6963_v18 = vrot.slane %v6886_v36, %v17965_v34 }
 0x551   : > { %v6967_v52 = vrot.slane %v6886_v36, %v17968_v35  ;;  %v6971_v33 = vrot.slane %v6886_v36, %v17967_v5  ;;  %v6975_v6 = vrot.slane %v6886_v36, %v17970_v32  ;;  %v6979_v30 = vrot.slane %v6886_v36, %v17969_v9  ;;  %v17984_v36 = vld [vmem:[#allocation39_spill] sm:$0xff] }
 0x552   : > { %11799 = vrcp.f32 %v6955_v20 }
 0x553   : > { %11801 = vrcp.f32 %v6951_v2  ;;  %v15433_v14 = vpop.xlane.xlu1 %6894 }
 0x554   : > { %11803 = vrcp.f32 %v6959_v44  ;;  %v7047_v54 = vrot.slane %v15433_v14, %v17964_v55  ;;  %v7051_v60 = vrot.slane %v15433_v14, %v17963_v11  ;;  %v7055_v40 = vrot.slane %v15433_v14, %v17966_v46 }
 0x555   : > { %11805 = vrcp.f32 %v6963_v18  ;;  %v7059_v41 = vrot.slane %v15433_v14, %v17965_v34  ;;  %v7063_v48 = vrot.slane %v15433_v14, %v17968_v35  ;;  %v7067_v0 = vrot.slane %v15433_v14, %v17967_v5 }
 0x556   : > { %11807 = vrcp.f32 %v6987_v26  ;;  %v7071_v56 = vrot.slane %v15433_v14, %v17970_v32  ;;  %v7075_v20 = vrot.slane %v15433_v14, %v17969_v9  ;;  %v7159_v44 = vrot.slane %v15444_v49, %v17968_v35 }
 0x557   : > { %11809 = vrcp.f32 %v6967_v52  ;;  %v7155_v26 = vrot.slane %v15444_v49, %v17965_v34 }
 0x558   : > { %11811 = vrcp.f32 %v6971_v33  ;;  %v6898_v33 = vpop.xlane.xlu0 %6897 }
 0x559   : > { %11813 = vrcp.f32 %v6983_v4  ;;  %v17985_v4 = vld [vmem:[#allocation43_spill] sm:$0xff] }
 0x55a   : > { %11815 = vrcp.f32 %v6995_v47 }
 0x55b   : > { %11817 = vrcp.f32 %v6975_v6  ;;  %v7167_v6 = vrot.slane %v15444_v49, %v17970_v32 }
 0x55c   : > { %11819 = vrcp.f32 %v6979_v30  ;;  %v17986_v30 = vld [vmem:[#allocation40_spill] sm:$0xff] }
 0x55d   : > { %11821 = vrcp.f32 %v6991_v27 }
 0x55e   : > { %11823 = vrcp.f32 %v7003_v1  ;;  %v7163_v1 = vrot.slane %v15444_v49, %v17967_v5 }
 0x55f   : > { %v11800_v10 = vpop.eup %11799  ;;  %11825 = vrcp.f32 %v7047_v54 }
 0x560   : > { %v11802_v17 = vpop.eup %11801  ;;  %v7591_v37 = vmul.f32 %v11800_v10, %v17979_v62  ;;  %11827 = vrcp.f32 %v7051_v60  ;;  %v7171_v60 = vrot.slane %v15444_v49, %v17969_v9  ;;  %v7083_v10 = vrot.slane %v6898_v33, %v17963_v11 }
 0x561   : > { %v11804_v22 = vpop.eup %11803  ;;  %v7589_v8 = vmul.f32 %v11802_v17, %v17980_v13  ;;  %11829 = vrcp.f32 %v6999_v39  ;;  %v17987_v17 = vld [vmem:[#allocation44_spill] sm:$0xff] }
 0x562   : > { %v11806_v16 = vpop.eup %11805  ;;  %7979 = vperm.xlu1 %11101, %v7591_v37   ;;  %11831 = vrcp.f32 %v7011_v28  ;;  %v7593_v24 = vmul.f32 %v11804_v22, %v17981_v15  ;;  %v7079_v37 = vrot.slane %v6898_v33, %v17964_v55  ;;  %v17988_v22 = vld [vmem:[#allocation114_spill] sm:$0xff]  ;;  %v15508_v15 = vpop.xlane.xlu0 %6915 }
 0x563   : > { %7974 = vperm.xlu0 %11102, %v7589_v8   ;;  %v15455_v31 = vpop.eup %11807  ;;  %11833 = vrcp.f32 %v7055_v40  ;;  %v7595_v3 = vmul.f32 %v11806_v16, %v17982_v19  ;;  %v7091_v8 = vrot.slane %v6898_v33, %v17965_v34 }
 0x564   : > { %v11810_v51 = vpop.eup %11809  ;;  %11835 = vrcp.f32 %v7059_v41  ;;  %v7087_v41 = vrot.slane %v6898_v33, %v17966_v46 }
 0x565   : > { %v11812_v50 = vpop.eup %11811  ;;  %11837 = vrcp.f32 %v7007_v23  ;;  %v7597_v63 = vmul.f32 %v11810_v51, %v17983_v58  ;;  %v7099_v23 = vrot.slane %v6898_v33, %v17967_v5  ;;  %v7095_v51 = vrot.slane %v6898_v33, %v17968_v35 }
 0x566   : > { %7984 = vperm.xlu1 %11101, %v7593_v24   ;;  %v15465_v59 = vpop.eup %11813  ;;  %11839 = vrcp.f32 %v7143_v29  ;;  %v7599_v21 = vmul.f32 %v11812_v50, %v17984_v36  ;;  %v17989_v24 = vld [vmem:[#allocation46_spill] sm:$0xff]  ;;  %v7107_v50 = vrot.slane %v6898_v33, %v17969_v9 }
 0x567   : > { %7989 = vperm.xlu0 %11102, %v7595_v3   ;;  %v15469_v57 = vpop.eup %11815  ;;  %11841 = vrcp.f32 %v7063_v48  ;;  %v17990_v3 = vld [vmem:[#allocation10_spill] sm:$0xff] }
 0x568   : > { %v11818_v42 = vpop.eup %11817  ;;  %11843 = vrcp.f32 %v7067_v0 }
 0x569   : > { %v11820_v2 = vpop.eup %11819  ;;  %11845 = vrcp.f32 %v7147_v45  ;;  %v7601_v47 = vmul.f32 %v11818_v42, %v17985_v4  ;;  %v17991_v42 = vld [vmem:[#allocation122_spill] sm:$0xff]  ;;  %v6907_v4 = vpop.xlane.xlu1 %6906 }
 0x56a   : > { %7994 = vperm.xlu1 %11101, %v7597_v63   ;;  %v15479_v18 = vpop.eup %11821  ;;  %11847 = vrcp.f32 %v7151_v7  ;;  %v7603_v27 = vmul.f32 %v11820_v2, %v17986_v30  ;;  %v7103_v7 = vrot.slane %v6898_v33, %v17970_v32  ;;  %v7275_v63 = vrot.slane %v15508_v15, %v17963_v11  ;;  %v17992_v2 = vld [vmem:[#allocation37_spill] sm:$0xff] }
 0x56b   : > { %7999 = vperm.xlu0 %11102, %v7599_v21   ;;  %v15483_v52 = vpop.eup %11823  ;;  %11849 = vrcp.f32 %v7071_v56  ;;  %v7271_v21 = vrot.slane %v15508_v15, %v17964_v55 }
 0x56c   : > { %v11826_v14 = vpop.eup %11825  ;;  %11851 = vrcp.f32 %v7075_v20 }
 0x56d   : > { %v11828_v54 = vpop.eup %11827  ;;  %11853 = vrcp.f32 %v7159_v44  ;;  %v7637_v62 = vmul.f32 %v11826_v14, %v17987_v17  ;;  %v7287_v14 = vrot.slane %v15508_v15, %v17968_v35 }
 0x56e   : > { %8004 = vperm.xlu1 %11101, %v7601_v47   ;;  %v15493_v39 = vpop.eup %11829  ;;  %11855 = vrcp.f32 %v7155_v26  ;;  %v7639_v13 = vmul.f32 %v11828_v54, %v17988_v22  ;;  %v7279_v26 = vrot.slane %v15508_v15, %v17966_v46  ;;  %v7283_v47 = vrot.slane %v15508_v15, %v17965_v34 }
 0x56f   : > { %8009 = vperm.xlu0 %11102, %v7603_v27   ;;  %v15496_v28 = vpop.eup %11831  ;;  %11857 = vrcp.f32 %v7167_v6  ;;  %v17993_v27 = vld [vmem:[#allocation17_spill] sm:$0xff]  ;;  %v7291_v54 = vrot.slane %v15508_v15, %v17967_v5 }
 0x570   : > { %v11834_v40 = vpop.eup %11833  ;;  %11859 = vrcp.f32 %v7163_v1 }
 0x571   : > { %v11836_v49 = vpop.eup %11835  ;;  %11861 = vrcp.f32 %v7171_v60  ;;  %v7641_v48 = vmul.f32 %v11834_v40, %v17989_v24  ;;  %v7175_v40 = vrot.slane %v6907_v4, %v17964_v55 }
 0x572   : > { %8094 = vperm.xlu1 %11101, %v7637_v62   ;;  %v15503_v16 = vpop.eup %11837  ;;  %11863 = vrcp.f32 %v7083_v10  ;;  %v7643_v0 = vmul.f32 %v11836_v49, %v17990_v3  ;;  %v17994_v10 = vld [vmem:[#allocation116_spill] sm:$0xff]  ;;  %v7179_v62 = vrot.slane %v6907_v4, %v17963_v11  ;;  %v17995_v49 = vld [vmem:[#allocation25_spill] sm:$0xff] }
 0x573   : > { %8099 = vperm.xlu0 %11102, %v7639_v13   ;;  %v15506_v29 = vpop.eup %11839  ;;  %11865 = vrcp.f32 %v7079_v37  ;;  %v7183_v13 = vrot.slane %v6907_v4, %v17966_v46 }
 0x574   : > { %v11842_v19 = vpop.eup %11841  ;;  %11867 = vrcp.f32 %v7091_v8 }
 0x575   : > { %v11844_v45 = vpop.eup %11843  ;;  %11869 = vrcp.f32 %v7087_v41  ;;  %v7645_v36 = vmul.f32 %v11842_v19, %v17991_v42  ;;  %v7605_v41 = vmul.f32 %v15465_v59, %v17995_v49  ;;  %v7187_v19 = vrot.slane %v6907_v4, %v17965_v34 }
 0x576   : > { %8104 = vperm.xlu1 %11101, %v7641_v48   ;;  %v15515_v58 = vpop.eup %11845  ;;  %11871 = vrcp.f32 %v7099_v23  ;;  %v7647_v44 = vmul.f32 %v11844_v45, %v17992_v2  ;;  %v7191_v23 = vrot.slane %v6907_v4, %v17968_v35  ;;  %v17996_v48 = vld [vmem:[#allocation16_spill] sm:$0xff]  ;;  %v7195_v59 = vrot.slane %v6907_v4, %v17967_v5 }
 0x577   : > { %8109 = vperm.xlu0 %11102, %v7643_v0   ;;  %v15519_v56 = vpop.eup %11847  ;;  %11873 = vrcp.f32 %v7095_v51  ;;  %v7607_v51 = vmul.f32 %v15455_v31, %v17996_v48  ;;  %v6901_v0 = vpop.xlane.xlu1 %6900  ;;  %v7203_v42 = vrot.slane %v6907_v4, %v17969_v9 }
 0x578   : > { %v11850_v20 = vpop.eup %11849  ;;  %11875 = vrcp.f32 %v7107_v50  ;;  %v7199_v50 = vrot.slane %v6907_v4, %v17970_v32  ;;  %v7115_v2 = vrot.slane %v6901_v0, %v17963_v11  ;;  %v7139_v49 = vrot.slane %v6901_v0, %v17969_v9 }
 0x579   : > { %v11852_v33 = vpop.eup %11851  ;;  %11877 = vrcp.f32 %v7103_v7  ;;  %v7649_v1 = vmul.f32 %v11850_v20, %v17993_v27  ;;  %v7135_v48 = vrot.slane %v6901_v0, %v17970_v32 }
 0x57a   : > { %8114 = vperm.xlu1 %11101, %v7645_v36   ;;  %v15529_v6 = vpop.eup %11853  ;;  %11879 = vrcp.f32 %v7275_v63  ;;  %v7651_v17 = vmul.f32 %v11852_v33, %v17994_v10  ;;  %v17997_v63 = vld [vmem:[#allocation123_spill] sm:$0xff]  ;;  %v7131_v10 = vrot.slane %v6901_v0, %v17967_v5 }
 0x57b   : > { %8119 = vperm.xlu0 %11102, %v7647_v44   ;;  %v15533_v30 = vpop.eup %11855  ;;  %11881 = vrcp.f32 %v7271_v21  ;;  %v7609_v31 = vmul.f32 %v15479_v18, %v17997_v63  ;;  %v17998_v21 = vld [vmem:[#allocation117_spill] sm:$0xff]  ;;  %v7123_v18 = vrot.slane %v6901_v0, %v17965_v34 }
 0x57c   : > { %v15538_v60 = vpop.eup %11857  ;;  %11883 = vrcp.f32 %v7279_v26  ;;  %v7611_v20 = vmul.f32 %v15469_v57, %v17998_v21  ;;  %v7111_v26 = vrot.slane %v6901_v0, %v17964_v55 }
 0x57d   : > { %v15542_v37 = vpop.eup %11859  ;;  %11885 = vrcp.f32 %v7283_v47  ;;  %v17999_v47 = vld [vmem:[#allocation124_spill] sm:$0xff] }
 0x57e   : > { %8124 = vperm.xlu1 %11101, %v7649_v1   ;;  %v15545_v22 = vpop.eup %11861  ;;  %11887 = vrcp.f32 %v7287_v14  ;;  %v7613_v57 = vmul.f32 %v15493_v39, %v17999_v47  ;;  %v7119_v14 = vrot.slane %v6901_v0, %v17966_v46  ;;  %v18000_v1 = vld [vmem:[#allocation118_spill] sm:$0xff]  ;;  %v7295_v47 = vrot.slane %v15508_v15, %v17970_v32 }
 0x57f   : > { %8129 = vperm.xlu0 %11102, %v7651_v17   ;;  %v15548_v8 = vpop.eup %11863  ;;  %11889 = vrcp.f32 %v7291_v54  ;;  %v7615_v54 = vmul.f32 %v15483_v52, %v18000_v1  ;;  %v15638_v1 = vld [vmem:[%s12168_s7] sm:$0xff]  }
 0x580   : > { %v15553_v24 = vpop.eup %11865  ;;  %11891 = vrcp.f32 %v7179_v62  ;;  %v15592_v62 = vpop.xlane.xlu0 %6909  ;;  %18005 = vst [vmem:[#allocation136_spill] sm:$0xff] %v15638_v1  ;;  %v18024_v1 = vld [vmem:[#allocation45_spill] sm:$0xff] }
 0x581   : > { %v15558_v3 = vpop.eup %11867  ;;  %11893 = vrcp.f32 %v7175_v40  ;;  %v7127_v40 = vrot.slane %v6901_v0, %v17968_v35 }
 0x582   : > { %8014 = vperm.xlu1 %11101, %v7605_v41   ;;  %v15561_v45 = vpop.eup %11869  ;;  %11895 = vrcp.f32 %v7183_v13  ;;  %v15597_v13 = vpop.xlane.xlu1 %6918  ;;  %v18001_v41 = vld [vmem:[#allocation24_spill] sm:$0xff] }
 0x583   : > { %8019 = vperm.xlu0 %11102, %v7607_v51   ;;  %v15564_v7 = vpop.eup %11871  ;;  %11897 = vrcp.f32 %v7191_v23  ;;  %v7617_v23 = vmul.f32 %v15503_v16, %v18001_v41  ;;  %v7311_v0 = vrot.slane %v15597_v13, %v17966_v46 }
 0x584   : > { %v15569_v36 = vpop.eup %11873  ;;  %11899 = vrcp.f32 %v7187_v19  ;;  %v18002_v19 = vld [vmem:[#allocation14_spill] sm:$0xff] }
 0x585   : > { %v15574_v44 = vpop.eup %11875  ;;  %11901 = vrcp.f32 %v7199_v50  ;;  %v7619_v50 = vmul.f32 %v15496_v28, %v18002_v19  ;;  %v7323_v19 = vrot.slane %v15597_v13, %v17967_v5 }
 0x586   : > { %8024 = vperm.xlu1 %11101, %v7609_v31   ;;  %v15577_v33 = vpop.eup %11877  ;;  %11903 = vrcp.f32 %v7195_v59  ;;  %v7211_v59 = vrot.slane %v15592_v62, %v17963_v11  ;;  %v7307_v31 = vrot.slane %v15597_v13, %v17963_v11 }
 0x587   : > { %8029 = vperm.xlu0 %11102, %v7611_v20   ;;  %v15580_v4 = vpop.eup %11879  ;;  %11905 = vrcp.f32 %v7203_v42  ;;  %v18003_v42 = vld [vmem:[#allocation119_spill] sm:$0xff]  ;;  %v7315_v20 = vrot.slane %v15597_v13, %v17965_v34  ;;  %v15749_v38 = vmul.f32 %v15577_v33, %v18019_v61  ;;  %v7231_v61 = vrot.slane %v15592_v62, %v17970_v32 }
 0x588   : > { %v15585_v27 = vpop.eup %11881  ;;  %11907 = vrcp.f32 %v7115_v2  ;;  %v7687_v21 = vmul.f32 %v15515_v58, %v18003_v42  ;;  %v7319_v58 = vrot.slane %v15597_v13, %v17968_v35 }
 0x589   : > { %v15590_v17 = vpop.eup %11883  ;;  %11909 = vrcp.f32 %v7111_v26  ;;  %v18004_v26 = vld [vmem:[#allocation26_spill] sm:$0xff] }
 0x58a   : > { %8034 = vperm.xlu1 %11101, %v7613_v57   ;;  %v15595_v39 = vpop.eup %11885  ;;  %11911 = vrcp.f32 %v7123_v18  ;;  %v7685_v18 = vmul.f32 %v15506_v29, %v18004_v26  ;;  %v7215_v29 = vrot.slane %v15592_v62, %v17966_v46  ;;  %v18010_v26 = vld [vmem:[#allocation121_spill] sm:$0xff] }
 0x58b   : > { %8039 = vperm.xlu0 %11102, %v7615_v54   ;;  %v15600_v52 = vpop.eup %11887  ;;  %11913 = vrcp.f32 %v7119_v14 }
 0x58c   : > { %v15605_v51 = vpop.eup %11889  ;;  %11915 = vrcp.f32 %v7131_v10  ;;  %v7299_v10 = vrot.slane %v15508_v15, %v17969_v9  ;;  %v18007_v15 = vld [vmem:[#allocation128_spill] sm:$0xff] }
 0x58d   : > { %v15611_v63 = vpop.eup %11891  ;;  %11917 = vrcp.f32 %v7127_v40 }
 0x58e   : > { %8044 = vperm.xlu1 %11101, %v7617_v23   ;;  %v15615_v16 = vpop.eup %11893  ;;  %11919 = vrcp.f32 %v7139_v49  ;;  %v18006_v49 = vld [vmem:[#allocation130_spill] sm:$0xff] }
 0x58f   : > { %8049 = vperm.xlu0 %11102, %v7619_v50   ;;  %v15619_v28 = vpop.eup %11895  ;;  %11921 = vrcp.f32 %v7135_v48  ;;  %v7693_v41 = vmul.f32 %v15529_v6, %v18006_v49  ;;  %v15649_v23 = vld [vmem:[%s12168_s7 + $0x40] sm:$0xff]   ;;  %v11171_v50 = vld [vmem:[%s17241_s4 + $0x8] sm:$0xff]   ;;  %v7207_v6 = vrot.slane %v15592_v62, %v17964_v55  ;;  %v18008_v49 = vld [vmem:[#allocation120_spill] sm:$0xff] }
 0x590   : > { %v15625_v2 = vpop.eup %11897  ;;  %11923 = vrcp.f32 %v7211_v59  ;;  %11046 = vmatprep.subr.bf16.mxu1 %v11171_v50 }
 0x591   : > { %v15631_v57 = vpop.eup %11899  ;;  %11925 = vrcp.f32 %v7307_v31  ;;  %v7689_v31 = vmul.f32 %v15519_v56, %v18007_v15  ;;  %v7327_v56 = vrot.slane %v15597_v13, %v17970_v32  ;;  %v18009_v15 = vld [vmem:[#allocation28_spill] sm:$0xff]  ;;  %11047 = vmatpush3.bf16.msra.mxu1 %v11171_v50 }
 0x592   : > { %8219 = vperm.xlu1 %11101, %v7687_v21   ;;  %v15635_v14 = vpop.eup %11901  ;;  %11927 = vrcp.f32 %v7311_v0  ;;  %v15667_v21 = vld [vmem:[%s12168_s7 + $0x48] sm:$0xff]   ;;  %v7697_v54 = vmul.f32 %v15538_v60, %v18009_v15  ;;  %v15688_v0 = vld [vmem:[%s12168_s7 + $0x50] sm:$0xff]   ;;  %v18011_v60 = vld [vmem:[#allocation13_spill] sm:$0xff] }
 0x593   : > { %8214 = vperm.xlu0 %11102, %v7685_v18   ;;  %v15644_v40 = vpop.eup %11903  ;;  %11929 = vrcp.f32 %v7315_v20  ;;  %v7695_v20 = vmul.f32 %v15542_v37, %v18010_v26  ;;  %v7219_v37 = vrot.slane %v15592_v62, %v17965_v34  ;;  %v18012_v15 = vld [vmem:[#allocation11_spill] sm:$0xff] }
 0x594   : > { %v15657_v59 = vpop.eup %11905  ;;  %11931 = vrcp.f32 %v7295_v47  ;;  %v15675_v47 = vpop.xlane.xlu1 %6912 }
 0x595   : > { %v15664_v42 = vpop.eup %11907  ;;  %11933 = vrcp.f32 %v7319_v58 }
 0x596   : > { %8234 = vperm.xlu1 %11101, %v7693_v41   ;;  %v15673_v18 = vpop.eup %11909  ;;  %v7691_v41 = vmul.f32 %v15533_v30, %v18008_v49  ;;  %11935 = vrcp.f32 %v7299_v10  ;;  %v7331_v30 = vrot.slane %v15597_v13, %v17969_v9  ;;  %v7699_v10 = vmul.f32 %v15545_v22, %v18011_v60 }
 0x597   : > { %8224 = vperm.xlu0 %11102, %v7689_v31   ;;  %v15683_v58 = vpop.eup %11911  ;;  %11937 = vrcp.f32 %v7323_v19  ;;  %v7655_v19 = vmul.f32 %v15548_v8, %v18012_v15  ;;  %v18013_v31 = vld [vmem:[#allocation20_spill] sm:$0xff]  ;;  %v7243_v22 = vrot.slane %v15675_v47, %v17963_v11  ;;  %v7223_v8 = vrot.slane %v15592_v62, %v17968_v35 }
 0x598   : > { %v15693_v49 = vpop.eup %11913  ;;  %11939 = vrcp.f32 %v7207_v6  ;;  %v7653_v48 = vmul.f32 %v15553_v24, %v18013_v31  ;;  %v18014_v6 = vld [vmem:[#allocation15_spill] sm:$0xff]  ;;  %v7227_v31 = vrot.slane %v15592_v62, %v17967_v5 }
 0x599   : > { %v15700_v26 = vpop.eup %11915  ;;  %11941 = vrcp.f32 %v7327_v56  ;;  %v15712_v50 = vmul.f32 %v15558_v3, %v18014_v6  ;;  %v15723_v56 = vld [vmem:[%s12168_s7 + $0x58] sm:$0xff]   ;;  %v7247_v3 = vrot.slane %v15675_v47, %v17966_v46 }
 0x59a   : > { %8244 = vperm.xlu1 %11101, %v7697_v54   ;;  %v15708_v60 = vpop.eup %11917  ;;  %v15716_v54 = vmul.f32 %v15561_v45, %v18015_v43  ;;  %11943 = vrcp.f32 %v7215_v29  ;;  %v18016_v43 = vld [vmem:[#allocation21_spill] sm:$0xff]  ;;  %v18017_v29 = vld [vmem:[#allocation32_spill] sm:$0xff] }
 0x59b   : > { %8229 = vperm.xlu0 %11102, %v7691_v41   ;;  %v15720_v24 = vpop.eup %11919  ;;  %11945 = vrcp.f32 %v7331_v30  ;;  %v15733_v45 = vmul.f32 %v15564_v7, %v18016_v43  ;;  %v15737_v6 = vmul.f32 %v15569_v36, %v18017_v29  ;;  %v18018_v30 = vld [vmem:[#allocation125_spill] sm:$0xff]  ;;  %v11172_v7 = vld [vmem:[%s17241_s4] sm:$0xff]   ;;  %v7251_v36 = vrot.slane %v15675_v47, %v17965_v34 }
 0x59c   : > { %v15729_v15 = vpop.eup %11921  ;;  %11947 = vrcp.f32 %v7219_v37  ;;  %v15745_v41 = vmul.f32 %v15574_v44, %v18018_v30  ;;  %v18021_v44 = vld [vmem:[#allocation47_spill] sm:$0xff]  ;;  %11048 = vmatprep.subr.bf16.mxu1 %v11172_v7 }
 0x59d   : > { %v15741_v12 = vpop.eup %11923  ;;  %11949 = vrcp.f32 %v7243_v22  ;;  %v15764_v29 = vmul.f32 %v15585_v27, %v18021_v44  ;;  %v18022_v22 = vld [vmem:[#allocation41_spill] sm:$0xff]  ;;  %v18028_v44 = vld [vmem:[#allocation52_spill] sm:$0xff]  ;;  %11049 = vmatpush3.bf16.msra.mxu1 %v11172_v7 }
 0x59e   : > { %8249 = vperm.xlu1 %11101, %v7699_v10   ;;  %v15756_v37 = vpop.eup %11925  ;;  %v18020_v10 = vld [vmem:[#allocation50_spill] sm:$0xff]  ;;  %11951 = vrcp.f32 %v7223_v8  ;;  %v15772_v30 = vmul.f32 %v15590_v17, %v18022_v22  ;;  %v18026_v8 = vld [vmem:[#allocation51_spill] sm:$0xff]  ;;  %v15788_v53 = vmul.f32 %v15605_v51, %v18028_v44  ;;  %v7235_v17 = vrot.slane %v15592_v62, %v17969_v9  ;;  %v18031_v7 = vld [vmem:[#allocation29_spill] sm:$0xff]  ;;  %v15814_v22 = vpop.xlane.xlu0 %6927 }
 0x59f   : > { %8239 = vperm.xlu0 %11102, %v7695_v20   ;;  %v15760_v43 = vmul.f32 %v15580_v4, %v18020_v10  ;;  %v15768_v33 = vpop.eup %11927  ;;  %v15776_v20 = vmul.f32 %v15595_v39, %v18024_v1  ;;  %11953 = vrcp.f32 %v7247_v3  ;;  %v7255_v4 = vrot.slane %v15675_v47, %v17968_v35  ;;  %v18030_v1 = vld [vmem:[#allocation126_spill] sm:$0xff]  ;;  %v15939_v25 = vpop.xlane.xlu1 %6930 }
 0x5a0   : > { %18023 = vst [vmem:[#allocation137_spill] sm:$0xff] %v15772_v30  ;;  %v15780_v27 = vpop.eup %11929  ;;  %v15784_v10 = vmul.f32 %v15600_v52, %v18026_v8  ;;  %18029 = vst [vmem:[#allocation142_spill] sm:$0xff] %v15788_v53  ;;  %11955 = vrcp.f32 %v7227_v31  ;;  %v15796_v3 = vmul.f32 %v15611_v63, %v18030_v1  ;;  %v7259_v52 = vrot.slane %v15675_v47, %v17967_v5  ;;  %v18032_v8 = vld [vmem:[#allocation30_spill] sm:$0xff]  ;;  %v18055_v30 = vld [vmem:[#allocation60_spill] sm:$0xff] }
 0x5a1   : > { %18025 = vst [vmem:[#allocation138_spill] sm:$0xff] %v15776_v20  ;;  %v15792_v39 = vpop.eup %11931  ;;  %11957 = vrcp.f32 %v7251_v36  ;;  %v7303_v51 = vrot.slane %v15597_v13, %v17964_v55  ;;  %v15806_v62 = vmul.f32 %v15615_v16, %v18031_v7  ;;  %v7267_v63 = vrot.slane %v15675_v47, %v17969_v9  ;;  %v18035_v7 = vld [vmem:[#allocation33_spill] sm:$0xff]  ;;  %v18037_v16 = vld [vmem:[#allocation3_spill] sm:$0xff] }
 0x5a2   : > { %18027 = vst [vmem:[#allocation68_spill] sm:$0xff] %v15784_v10  ;;  %8134 = vperm.xlu1 %11101, %v7653_v48   ;;  %v15802_v31 = vpop.eup %11933  ;;  %11959 = vrcp.f32 %v7231_v61  ;;  %v7263_v48 = vrot.slane %v15675_v47, %v17970_v32  ;;  %v15818_v13 = vmul.f32 %v15619_v28, %v18032_v8  ;;  %v18034_v61 = vld [vmem:[#allocation2_spill] sm:$0xff]  ;;  %v7239_v44 = vrot.slane %v15675_v47, %v17964_v55  ;;  %v18036_v28 = vld [vmem:[#allocation127_spill] sm:$0xff] }
 0x5a3   : > { %8139 = vperm.xlu0 %11102, %v7655_v19   ;;  %v15812_v36 = vpop.eup %11935  ;;  %v15821_v19 = vld [vmem:[%s12168_s7 + $0x8] sm:$0xff]   ;;  %11051 = vmatmul.mubr.msk.bf16.vlgmr.msra.gmra.mxu1 %vm766_vm0, %v18034_v61  ;;  %11961 = vrcp.f32 %v7255_v4  ;;  %v15832_v53 = vmul.f32 %v15625_v2, %v18035_v7  ;;  %v15836_v8 = vmul.f32 %v15631_v57, %v18036_v28  ;;  %v18039_v2 = vld [vmem:[#allocation129_spill] sm:$0xff]  ;;  %v15853_v57 = vld [vmem:[%s12168_s7 + $0x10] sm:$0xff]   ;;  %v15871_v28 = vpop.xlane.xlu0 %6921 }
 0x5a4   : > { %18033 = vst [vmem:[#allocation102_spill] sm:$0xff] %v15821_v19  ;;  %v15828_v1 = vpop.eup %11937  ;;  %11963 = vrcp.f32 %v7235_v17  ;;  %11054 = vmatprep.mubr.msk.bf16.mxu1 %vm766_vm0, %v18037_v16  ;;  %v18038_v47 = vld [vmem:[#allocation31_spill] sm:$0xff]  ;;  %v15850_v7 = vmul.f32 %v15644_v40, %v18039_v2  ;;  %18040 = vst [vmem:[#allocation144_spill] sm:$0xff] %v15853_v57  ;;  %v7403_v40 = vrot.slane %v15814_v22, %v17963_v11  ;;  %v18047_v57 = vld [vmem:[#allocation134_spill] sm:$0xff] }
 0x5a5   : > { %v15841_v4 = vpop.eup %11939  ;;  %v15846_v61 = vmul.f32 %v15635_v14, %v18038_v47  ;;  %11965 = vrcp.f32 %v7259_v52  ;;  %v18041_v16 = vld [vmem:[#allocation131_spill] sm:$0xff]  ;;  %v18042_v14 = vld [vmem:[#allocation132_spill] sm:$0xff] }
 0x5a6   : > { %8144 = vperm.xlu1 %11101, %v15716_v54   ;;  %v15856_v17 = vpop.eup %11941  ;;  %v15861_v54 = vmul.f32 %v15657_v59, %v18041_v16  ;;  %v15865_v47 = vmul.f32 %v15664_v42, %v18042_v14  ;;  %11967 = vrcp.f32 %v7263_v48  ;;  %v18043_v52 = vld [vmem:[#allocation35_spill] sm:$0xff]  ;;  %v7399_v59 = vrot.slane %v15814_v22, %v17964_v55  ;;  %v18044_v48 = vld [vmem:[#allocation133_spill] sm:$0xff] }
 0x5a7   : > { %8149 = vperm.xlu0 %11102, %v15712_v50   ;;  %v15869_v2 = vpop.eup %11943  ;;  %v15875_v10 = vmul.f32 %v15673_v18, %v18043_v52  ;;  %11969 = vrcp.f32 %v7303_v51  ;;  %v15884_v16 = vmul.f32 %v15683_v58, %v18044_v48  ;;  %v15887_v14 = vld [vmem:[%s12168_s7 + $0x18] sm:$0xff]   ;;  %v7407_v18 = vrot.slane %v15814_v22, %v17966_v46  ;;  %v18046_v51 = vld [vmem:[#allocation19_spill] sm:$0xff] }
 0x5a8   : > { %v15880_v42 = vpop.eup %11945  ;;  %18045 = vst [vmem:[#allocation146_spill] sm:$0xff] %v15887_v14  ;;  %11971 = vrcp.f32 %v7267_v63  ;;  %v15897_v50 = vmul.f32 %v15693_v49, %v18046_v51  ;;  %v15901_v58 = vmul.f32 %v15700_v26, %v18047_v57  ;;  %v7411_v63 = vrot.slane %v15814_v22, %v17965_v34  ;;  %v18048_v19 = vld [vmem:[#allocation23_spill] sm:$0xff]  ;;  %v18049_v57 = vld [vmem:[#allocation36_spill] sm:$0xff]  ;;  %v15920_v51 = vld [vmem:[%s12168_s7 + $0x60] sm:$0xff]  }
 0x5a9   : > { %v15892_v52 = vpop.eup %11947  ;;  %11973 = vrcp.f32 %v7239_v44  ;;  %v15910_v20 = vmul.f32 %v15708_v60, %v18048_v19  ;;  %v7339_v49 = vrot.slane %v15871_v28, %v17963_v11  ;;  %v15917_v44 = vmul.f32 %v15720_v24, %v18049_v57  ;;  %18050 = vst [vmem:[#allocation98_spill] sm:$0xff] %v15920_v51  ;;  %v18053_v14 = vld [vmem:[#allocation56_spill] sm:$0xff]  ;;  %v18054_v57 = vld [vmem:[#allocation5_spill] sm:$0xff]  ;;  %v18063_v51 = vld [vmem:[#allocation135_spill] sm:$0xff] }
 0x5aa   : > { %8154 = vperm.xlu1 %11101, %v15737_v6   ;;  %v15905_v48 = vpop.eup %11949  ;;  %11975 = vrcp.f32 %v7403_v40  ;;  %v7415_v60 = vrot.slane %v15814_v22, %v17968_v35  ;;  %v18052_v40 = vld [vmem:[#allocation34_spill] sm:$0xff]  ;;  %v15933_v24 = vmul.f32 %v15741_v12, %v18053_v14 }
 0x5ab   : > { %8159 = vperm.xlu0 %11102, %v15733_v45   ;;  %v11952_v26 = vpop.eup %11951  ;;  %v18051_v45 = vld [vmem:[#allocation4_spill] sm:$0xff]  ;;  %11977 = vrcp.f32 %v7399_v59  ;;  %v15929_v6 = vmul.f32 %v15729_v15, %v18052_v40  ;;  %v15944_v15 = vmul.f32 %v15756_v37, %v18055_v30  ;;  %v18057_v40 = vld [vmem:[#allocation61_spill] sm:$0xff]  ;;  %v7335_v37 = vrot.slane %v15871_v28, %v17964_v55  ;;  %v18060_v14 = vld [vmem:[#allocation38_spill] sm:$0xff] }
 0x5ac   : > { %11055 = vmatmul.mubr.msk.bf16.gmra.mxu1 %vm766_vm0, %v18051_v45  ;;  %v11954_v19 = vpop.eup %11953  ;;  %11979 = vrcp.f32 %v7407_v18  ;;  %v7419_v45 = vrot.slane %v15814_v22, %v17967_v5 }
 0x5ad   : > { %11058 = vmatprep.mubr.msk.bf16.mxu1 %vm766_vm0, %v18054_v57  ;;  %v11956_v59 = vpop.eup %11955  ;;  %18056 = vst [vmem:[#allocation48_spill] sm:$0xff] %v15944_v15  ;;  %11981 = vrcp.f32 %v7411_v63  ;;  %v15953_v57 = vmul.f32 %v15768_v33, %v18057_v40  ;;  %v18059_v63 = vld [vmem:[#allocation62_spill] sm:$0xff]  ;;  %v15964_v15 = vmul.f32 %v15792_v39, %v18060_v14 }
 0x5ae   : > { %8164 = vperm.xlu1 %11101, %v15749_v38   ;;  %v11958_v18 = vpop.eup %11957  ;;  %11983 = vrcp.f32 %v7339_v49  ;;  %v15960_v12 = vmul.f32 %v15780_v27, %v18059_v63  ;;  %v18062_v49 = vld [vmem:[#allocation22_spill] sm:$0xff]  ;;  %v7343_v27 = vrot.slane %v15871_v28, %v17966_v46 }
 0x5af   : > { %8169 = vperm.xlu0 %11102, %v15745_v41   ;;  %18058 = vst [vmem:[#allocation99_spill] sm:$0xff] %v15953_v57  ;;  %v11960_v30 = vpop.eup %11959  ;;  %v18061_v41 = vld [vmem:[#allocation67_spill] sm:$0xff]  ;;  %11985 = vrcp.f32 %v7415_v60  ;;  %v15972_v38 = vmul.f32 %v15812_v36, %v18062_v49  ;;  %v15976_v57 = vmul.f32 %v15828_v1, %v18063_v51  ;;  %v15980_v14 = vpop.xlane.xlu1 %6924  ;;  %v7347_v51 = vrot.slane %v15871_v28, %v17965_v34  ;;  %v18072_v1 = vld [vmem:[#allocation66_spill] sm:$0xff] }
 0x5b0   : > { %v15968_v33 = vmul.f32 %v15802_v31, %v18061_v41  ;;  %v11962_v40 = vpop.eup %11961  ;;  %11987 = vrcp.f32 %v7419_v45  ;;  %v18065_v31 = vld [vmem:[#allocation55_spill] sm:$0xff]  ;;  %v18068_v41 = vld [vmem:[#allocation65_spill] sm:$0xff] }
 0x5b1   : > { %18064 = vst [vmem:[#allocation103_spill] sm:$0xff] %v15976_v57  ;;  %v11964_v39 = vpop.eup %11963  ;;  %v15985_v60 = vmul.f32 %v15841_v4, %v18065_v31  ;;  %v15988_v36 = vld [vmem:[%s12168_s7 + $0x68] sm:$0xff]   ;;  %v15997_v49 = vmul.f32 %v15856_v17, %v18068_v41  ;;  %11989 = vrcp.f32 %v7335_v37  ;;  %v7351_v31 = vrot.slane %v15871_v28, %v17968_v35  ;;  %v18075_v17 = vld [vmem:[#allocation58_spill] sm:$0xff] }
 0x5b2   : > { %8259 = vperm.xlu1 %11101, %v15796_v3   ;;  %18067 = vst [vmem:[#allocation104_spill] sm:$0xff] %v15988_v36  ;;  %v11966_v45 = vpop.eup %11965  ;;  %v18070_v3 = vld [vmem:[#allocation57_spill] sm:$0xff]  ;;  %v16007_v36 = vmul.f32 %v15880_v42, %v18072_v1  ;;  %v16015_v41 = vmul.f32 %v15892_v52, %v18075_v17  ;;  %v7355_v37 = vrot.slane %v15871_v28, %v17967_v5  ;;  %v18078_v1 = vld [vmem:[#allocation72_spill] sm:$0xff]  ;;  %v18080_v57 = vld [vmem:[#allocation7_spill] sm:$0xff]  ;;  %11991 = vrcp.f32 %v7343_v27 }
 0x5b3   : > { %18066 = vst [vmem:[#allocation100_spill] sm:$0xff] %v15985_v60  ;;  %8254 = vperm.xlu0 %11102, %v15806_v62   ;;  %18069 = vst [vmem:[#allocation101_spill] sm:$0xff] %v15997_v49  ;;  %v16001_v4 = vmul.f32 %v15869_v2, %v18070_v3  ;;  %v11968_v63 = vpop.eup %11967  ;;  %v16010_v60 = vld [vmem:[%s12168_s7 + $0x70] sm:$0xff]   ;;  %v18077_v2 = vld [vmem:[#allocation6_spill] sm:$0xff]  ;;  %11993 = vrcp.f32 %v7347_v51 }
 0x5b4   : > { %18073 = vst [vmem:[#allocation106_spill] sm:$0xff] %v16007_v36  ;;  %18074 = vst [vmem:[#allocation109_spill] sm:$0xff] %v16010_v60  ;;  %11059 = vmatmul.mubr.msk.bf16.gmra.mxu1 %vm766_vm0, %v18077_v2  ;;  %v11970_v3 = vpop.eup %11969  ;;  %v16024_v36 = vmul.f32 %v15905_v48, %v18078_v1  ;;  %v18079_v49 = vld [vmem:[#allocation63_spill] sm:$0xff]  ;;  %v16033_v2 = vld [vmem:[%s12168_s7 + $0x78] sm:$0xff]   ;;  %11995 = vrcp.f32 %v7351_v31 }
 0x5b5   : > { %18071 = vst [vmem:[#allocation105_spill] sm:$0xff] %v16001_v4  ;;  %18076 = vst [vmem:[#allocation107_spill] sm:$0xff] %v16015_v41  ;;  %v16027_v62 = vmul.f32 %v11952_v26, %v18079_v49  ;;  %11062 = vmatprep.mubr.msk.bf16.mxu1 %vm766_vm0, %v18080_v57  ;;  %v11972_v52 = vpop.eup %11971  ;;  %v18082_v42 = vld [vmem:[#allocation73_spill] sm:$0xff]  ;;  %v18084_v48 = vld [vmem:[#allocation64_spill] sm:$0xff]  ;;  %v18086_v57 = vunpack.c.h.bf16 %v15649_v23  ;;  %v7359_v49 = vrot.slane %v15871_v28, %v17970_v32  ;;  %11997 = vrcp.f32 %v7355_v37 }
 0x5b6   : > { %8264 = vperm.xlu1 %11101, %v15818_v13   ;;  %18081 = vst [vmem:[#allocation111_spill] sm:$0xff] %v16033_v2  ;;  %v16037_v60 = vmul.f32 %v11954_v19, %v18082_v42  ;;  %v16040_v1 = vmul.f32 %v11956_v59, %v18084_v48  ;;  %v11974_v26 = vpop.eup %11973  ;;  %v18087_v19 = vunpack.c.l.bf16 %v15649_v23  ;;  %v18091_v2 = vld [vmem:[#allocation79_spill] sm:$0xff]  ;;  %v18092_v23 = vld [vmem:[#allocation54_spill] sm:$0xff]  ;;  %v18094_v37 = vld [vmem:[#allocation80_spill] sm:$0xff] }
 0x5b7   : > { %8274 = vperm.xlu0 %11102, %v15832_v53   ;;  %v11976_v41 = vpop.eup %11975  ;;  %v7363_v53 = vrot.slane %v15871_v28, %v17969_v9  ;;  %11999 = vrcp.f32 %v7359_v49  ;;  %v18102_v28 = vld [vmem:[#allocation8_spill] sm:$0xff]  ;;  %v18104_v49 = vld [vmem:[#allocation75_spill] sm:$0xff] }
 0x5b8   : > { %18083 = vst [vmem:[#allocation108_spill] sm:$0xff] %v16037_v60  ;;  %18085 = vst [vmem:[#allocation113_spill] sm:$0xff] %v16040_v1  ;;  %v18088_v60 = vld [vmem:[#allocation74_spill] sm:$0xff]  ;;  %v11978_v51 = vpop.eup %11977  ;;  %v16063_v1 = vmul.f32 %v11962_v40, %v18091_v2 }
 0x5b9   : > { %v16051_v59 = vmul.f32 %v11958_v18, %v18088_v60  ;;  %v11980_v18 = vpop.eup %11979  ;;  %v18097_v2 = vld [vmem:[#allocation70_spill] sm:$0xff]  ;;  %12001 = vrcp.f32 %v7363_v53  ;;  %v18107_v53 = vld [vmem:[#allocation139_spill] sm:$0xff] }
 0x5ba   : > { %v8060_v4 = vpop.permute.xlu0 %8059  ;;  %8269 = vperm.xlu1 %11101, %v15836_v8   ;;  %v11982_v40 = vpop.eup %11981  ;;  %v18098_v8 = vld [vmem:[#allocation71_spill] sm:$0xff] }
 0x5bb   : > { %v8055_v17 = vpop.permute.xlu1 %8054  ;;  %v8629_v27 = vmul.f32 %v8060_v4, %v18086_v57  ;;  %18089 = vst [vmem:[#allocation110_spill] sm:$0xff] %v16051_v59  ;;  %v16056_v4 = vld [vmem:[%s12168_s7 + $0x20] sm:$0xff]   ;;  %v18090_v57 = vld [vmem:[#allocation53_spill] sm:$0xff]  ;;  %8284 = vperm.xlu0 %11102, %v15846_v61   ;;  %v11173_v61 = vld [vmem:[%s17242_s5 + $0x8] sm:$0xff]  }
 0x5bc   : > { %v8628_v42 = vmul.f32 %v8055_v17, %v18087_v19  ;;  %v16060_v13 = vmul.f32 %v11960_v30, %v18090_v57  ;;  %v16066_v17 = vmul.f32 %v11964_v39, %v18092_v23  ;;  %v16071_v19 = vmul.f32 %v11966_v45, %v18094_v37  ;;  %v18095_v59 = vld [vmem:[#allocation69_spill] sm:$0xff]  ;;  %v18096_v30 = vld [vmem:[#allocation59_spill] sm:$0xff]  ;;  %v11984_v45 = vpop.eup %11983  ;;  %11063 = vmatmul.mubr.msk.bf16.gmra.mxu1 %vm766_vm0, %v18102_v28 }
 0x5bd   : > { %v16074_v31 = vmul.f32 %v11968_v63, %v18095_v59  ;;  %v16077_v57 = vmul.f32 %v11970_v3, %v18096_v30  ;;  %v8859_v39 = vsel %vm766_vm0, %v8629_v27, 0.0  ;;  %v16082_v23 = vmul.f32 %v11972_v52, %v18097_v2  ;;  %v18100_v3 = vld [vmem:[#allocation76_spill] sm:$0xff]  ;;  %v11986_v52 = vpop.eup %11985  ;;  %11066 = vmatprep.subr.bf16.mxu1 %v11173_v61 }
 0x5be   : > { %v8070_v48 = vpop.permute.xlu0 %8069  ;;  %18093 = vst [vmem:[#allocation49_spill] sm:$0xff] %v16066_v17  ;;  %v16085_v17 = vmul.f32 %v11974_v26, %v18098_v8  ;;  %v8852_v37 = vsel %vm766_vm0, %v8628_v42, 0.0  ;;  %v18099_v63 = vunpack.c.h.bf16 %v15667_v21  ;;  %v16091_v30 = vmul.f32 %v11976_v41, %v18100_v3  ;;  %v11988_v28 = vpop.eup %11987  ;;  %8279 = vperm.xlu1 %11101, %v15850_v7   ;;  %v16119_v3 = vld [vmem:[%s12168_s7 + $0x28] sm:$0xff]   ;;  %11067 = vmatpush3.bf16.msra.mxu1 %v11173_v61 }
 0x5bf   : > { %v8065_v60 = vpop.permute.xlu1 %8064  ;;  %v18103_v26 = vunpack.c.l.bf16 %v15667_v21  ;;  %v16101_v42 = vmul.f32 %v11978_v51, %v18104_v49  ;;  %v7435_v41 = vrot.slane %v15939_v25, %v17963_v11  ;;  %v8860_v2 = vrot.slane %v8859_v39, 4  ;;  %8289 = vperm.xlu0 %11102, %v15861_v54   ;;  %v18114_v54 = vld [vmem:[#allocation83_spill] sm:$0xff] }
 0x5c0   : > { %v8631_v59 = vmul.f32 %v8070_v48, %v18099_v63  ;;  %18101 = vst [vmem:[#allocation115_spill] sm:$0xff] %v16091_v30  ;;  %v18106_v48 = vrot.slane %v15814_v22, %v17970_v32  ;;  %v16110_v8 = vmul.f32 %v11980_v18, %v18107_v53  ;;  %v7439_v21 = vrot.slane %v15939_v25, %v17966_v46  ;;  %v18110_v18 = vld [vmem:[#allocation78_spill] sm:$0xff] }
 0x5c1   : > { %v8630_v27 = vmul.f32 %v8065_v60, %v18103_v26  ;;  %18105 = vst [vmem:[#allocation112_spill] sm:$0xff] %v16101_v42  ;;  %v18109_v51 = vrot.slane %v15814_v22, %v17969_v9  ;;  %v8853_v60 = vrot.slane %v8852_v37, 4  ;;  %v16124_v49 = vmul.f32 %v11982_v40, %v18110_v18  ;;  %v18112_v22 = vld [vmem:[#allocation88_spill] sm:$0xff] }
 0x5c2   : > { %12003 = vrcp.f32 %v18106_v48  ;;  %18108 = vst [vmem:[#allocation12_spill] sm:$0xff] %v16110_v8  ;;  %v8080_v63 = vpop.permute.xlu0 %8079  ;;  %v11990_v48 = vpop.eup %11989  ;;  %v8873_v53 = vsel %vm766_vm0, %v8631_v59, 0.0  ;;  %v16131_v30 = vmul.f32 %v11986_v52, %v18114_v54  ;;  %v7443_v42 = vrot.slane %v15939_v25, %v17965_v34  ;;  %v18116_v26 = vld [vmem:[#allocation84_spill] sm:$0xff]  ;;  %8174 = vperm.xlu1 %11101, %v15875_v10  }
 0x5c3   : > { %12005 = vrcp.f32 %v18109_v51  ;;  %18111 = vst [vmem:[#allocation9_spill] sm:$0xff] %v16124_v49  ;;  %v8075_v8 = vpop.permute.xlu1 %8074  ;;  %v16128_v51 = vmul.f32 %v11984_v45, %v18112_v22  ;;  %v8866_v7 = vsel %vm766_vm0, %v8630_v27, 0.0  ;;  %v16137_v40 = vmul.f32 %v11988_v28, %v18116_v26  ;;  %v11992_v59 = vpop.eup %11991  ;;  %8179 = vperm.xlu0 %11102, %v15865_v47   ;;  %v18119_v26 = vld [vmem:[#allocation87_spill] sm:$0xff] }
 0x5c4   : > { %18115 = vst [vmem:[#allocation39_spill] sm:$0xff] %v16131_v30  ;;  %12007 = vrcp.f32 %v7435_v41  ;;  %v7447_v61 = vrot.slane %v15939_v25, %v17968_v35  ;;  %v8861_v18 = vadd.f32 %v8860_v2, %v8859_v39  ;;  %v18118_v45 = vunpack.c.h.bf16 %v15688_v0  ;;  %v11994_v27 = vpop.eup %11993 }
 0x5c5   : > { %18113 = vst [vmem:[#allocation42_spill] sm:$0xff] %v16128_v51  ;;  %18117 = vst [vmem:[#allocation43_spill] sm:$0xff] %v16137_v40  ;;  %12009 = vrcp.f32 %v7439_v21  ;;  %v7451_v22 = vrot.slane %v15939_v25, %v17967_v5  ;;  %v8854_v41 = vadd.f32 %v8853_v60, %v8852_v37  ;;  %v8874_v28 = vrot.slane %v8873_v53, 4  ;;  %v11996_v10 = vpop.eup %11995  ;;  %v16157_v37 = vld [vmem:[%s12168_s7 + $0x30] sm:$0xff]   ;;  %v18122_v60 = vld [vmem:[#allocation89_spill] sm:$0xff] }
 0x5c6   : > { %v8633_v52 = vmul.f32 %v8080_v63, %v18118_v45  ;;  %v16148_v54 = vmul.f32 %v11990_v48, %v18119_v26  ;;  %v7455_v39 = vrot.slane %v15939_v25, %v17970_v32  ;;  %v8867_v2 = vrot.slane %v8866_v7, 4  ;;  %v11998_v45 = vpop.eup %11997  ;;  %8184 = vperm.xlu1 %11101, %v15897_v50  }
 0x5c7   : > { %v18121_v40 = vunpack.c.l.bf16 %v15688_v0  ;;  %12011 = vrcp.f32 %v7443_v42  ;;  %v7431_v21 = vrot.slane %v15939_v25, %v17964_v55  ;;  %v16161_v48 = vmul.f32 %v11992_v59, %v18122_v60  ;;  %v8085_v42 = vpop.permute.xlu1 %8084  ;;  %8189 = vperm.xlu0 %11102, %v15884_v16   ;;  %v18124_v59 = vld [vmem:[#allocation90_spill] sm:$0xff]  ;;  %v12000_v50 = vpop.eup %11999 }
 0x5c8   : > { %18120 = vst [vmem:[#allocation40_spill] sm:$0xff] %v16148_v54  ;;  %12013 = vrcp.f32 %v7447_v61  ;;  %v7459_v26 = vrot.slane %v15939_v25, %v17969_v9  ;;  %v8862_v54 = vrot.slane %v8861_v18, 2  ;;  %v8887_v0 = vsel %vm766_vm0, %v8633_v52, 0.0  ;;  %v11174_v61 = vld [vmem:[%s17242_s5] sm:$0xff]   ;;  %v18125_v25 = vld [vmem:[#allocation95_spill] sm:$0xff]  ;;  %v12002_v16 = vpop.eup %12001 }
 0x5c9   : > { %v8632_v63 = vmul.f32 %v8075_v8, %v18121_v40  ;;  %18123 = vst [vmem:[#allocation44_spill] sm:$0xff] %v16161_v48  ;;  %12015 = vrcp.f32 %v7451_v22  ;;  %v8855_v40 = vrot.slane %v8854_v41, 2  ;;  %v8875_v30 = vadd.f32 %v8874_v28, %v8873_v53  ;;  %v8090_v22 = vpop.permute.xlu0 %8089  ;;  %v18127_v53 = vld [vmem:[#allocation96_spill] sm:$0xff]  ;;  %11068 = vmatprep.subr.bf16.mxu1 %v11174_v61 }
 0x5ca   : > { %v16173_v60 = vmul.f32 %v11994_v27, %v18124_v59  ;;  %v16176_v47 = vmul.f32 %v11996_v10, %v18125_v25  ;;  %v8868_v52 = vadd.f32 %v8867_v2, %v8866_v7  ;;  %12017 = vrcp.f32 %v7455_v39  ;;  %8194 = vperm.xlu1 %11101, %v15910_v20   ;;  %v16188_v7 = vld [vmem:[%s12168_s7 + $0x38] sm:$0xff]   ;;  %11069 = vmatpush3.bf16.msra.mxu1 %v11174_v61  ;;  %v18133_v61 = vld [vmem:[#allocation86_spill] sm:$0xff] }
 0x5cb   : > { %v8880_v8 = vsel %vm766_vm0, %v8632_v63, 0.0  ;;  %v16180_v28 = vmul.f32 %v11998_v45, %v18127_v53  ;;  %v8888_v48 = vrot.slane %v8887_v0, 4  ;;  %v18129_v49 = vunpack.c.l.bf16 %v15723_v56  ;;  %8199 = vperm.xlu0 %11102, %v15901_v58  }
 0x5cc   : > { %18126 = vst [vmem:[#allocation114_spill] sm:$0xff] %v16176_v47  ;;  %v7371_v27 = vrot.slane %v15980_v14, %v17963_v11  ;;  %12019 = vrcp.f32 %v7431_v21  ;;  %v8863_v59 = vadd.f32 %v8862_v54, %v8861_v18  ;;  %v7375_v2 = vrot.slane %v15980_v14, %v17966_v46  ;;  %v18131_v21 = vld [vmem:[#allocation85_spill] sm:$0xff] }
 0x5cd   : > { %18128 = vst [vmem:[#allocation46_spill] sm:$0xff] %v16180_v28  ;;  %v8634_v51 = vmul.f32 %v8085_v42, %v18129_v49  ;;  %12021 = vrcp.f32 %v7459_v26  ;;  %v8856_v49 = vadd.f32 %v8855_v40, %v8854_v41  ;;  %v8876_v45 = vrot.slane %v8875_v30, 2 }
 0x5ce   : > { %v8881_v42 = vrot.slane %v8880_v8, 4  ;;  %v18130_v11 = vunpack.c.h.bf16 %v15723_v56  ;;  %v8869_v20 = vrot.slane %v8868_v52, 2  ;;  %v16198_v25 = vmul.f32 %v12000_v50, %v18131_v21  ;;  %8204 = vperm.xlu1 %11101, %v15929_v6   ;;  %v16208_v56 = vld [vmem:[%s12168_s7 + $0xc0] sm:$0xff]   ;;  %v18135_v21 = vld [vmem:[#allocation81_spill] sm:$0xff] }
 0x5cf   : > { %v12004_v10 = vpop.eup %12003  ;;  %v16201_v53 = vmul.f32 %v12002_v16, %v18133_v61  ;;  %v8889_v46 = vadd.f32 %v8888_v48, %v8887_v0  ;;  %v8894_v41 = vsel %vm766_vm0, %v8634_v51, 0.0  ;;  %12023 = vrcp.f32 %v7371_v27  ;;  %8209 = vperm.xlu0 %11102, %v15917_v44   ;;  %v18137_v61 = vld [vmem:[#allocation82_spill] sm:$0xff]  ;;  %v18139_v44 = vld [vmem:[#allocation92_spill] sm:$0xff] }
 0x5d0   : > { %v12006_v63 = vpop.eup %12005  ;;  %v8635_v18 = vmul.f32 %v8090_v22, %v18130_v11  ;;  %18132 = vst [vmem:[#allocation10_spill] sm:$0xff] %v16198_v25  ;;  %v7379_v26 = vrot.slane %v15980_v14, %v17965_v34  ;;  %v8864_v40 = vrot.slane %v8863_v59, 1  ;;  %12025 = vrcp.f32 %v7375_v2 }
 0x5d1   : > { %18134 = vst [vmem:[#allocation122_spill] sm:$0xff] %v16201_v53  ;;  %v12008_v58 = vpop.eup %12007  ;;  %v7383_v50 = vrot.slane %v15980_v14, %v17968_v35  ;;  %v8857_v48 = vrot.slane %v8856_v49, 1  ;;  %v8877_v0 = vadd.f32 %v8876_v45, %v8875_v30  ;;  %v8882_v51 = vadd.f32 %v8881_v42, %v8880_v8  ;;  %v18141_v35 = vld [vmem:[#allocation94_spill] sm:$0xff] }
 0x5d2   : > { %v12010_v16 = vpop.eup %12009  ;;  %v8901_v27 = vsel %vm766_vm0, %v8635_v18, 0.0  ;;  %v8870_v34 = vadd.f32 %v8869_v20, %v8868_v52  ;;  %v8895_v11 = vrot.slane %v8894_v41, 4  ;;  %v16216_v6 = vmul.f32 %v12004_v10, %v18135_v21  ;;  %8374 = vperm.xlu1 %11101, %v15764_v29   ;;  %v18140_v10 = vld [vmem:[#allocation93_spill] sm:$0xff] }
 0x5d3   : > { %v16219_v54 = vmul.f32 %v12006_v63, %v18137_v61  ;;  %v8890_v22 = vrot.slane %v8889_v46, 2  ;;  %12027 = vrcp.f32 %v7379_v26  ;;  %v7387_v30 = vrot.slane %v15980_v14, %v17967_v5  ;;  %8379 = vperm.xlu0 %11102, %v15760_v43   ;;  %v18142_v43 = vld [vmem:[#allocation137_spill] sm:$0xff] }
 0x5d4   : > { %18136 = vst [vmem:[#allocation37_spill] sm:$0xff] %v16216_v6  ;;  %v12012_v2 = vpop.eup %12011  ;;  %v8902_v45 = vrot.slane %v8901_v27, 4  ;;  %v16226_v52 = vmul.f32 %v12008_v58, %v18139_v44  ;;  %v16229_v42 = vmul.f32 %v12010_v16, %v18140_v10  ;;  %12029 = vrcp.f32 %v7383_v50 }
 0x5d5   : > { %18138 = vst [vmem:[#allocation17_spill] sm:$0xff] %v16219_v54  ;;  %v12014_v8 = vpop.eup %12013  ;;  %v8865_v18 = vadd.f32 %v8864_v40, %v8863_v59  ;;  %v8858_v20 = vadd.f32 %v8857_v48, %v8856_v49  ;;  %v8878_v21 = vrot.slane %v8877_v0, 1  ;;  %v8883_v26 = vrot.slane %v8882_v51, 2 }
 0x5d6   : > { %v12016_v63 = vpop.eup %12015  ;;  %v8871_v5 = vrot.slane %v8870_v34, 1  ;;  %v8896_v61 = vadd.f32 %v8895_v11, %v8894_v41  ;;  %v16233_v39 = vmul.f32 %v12012_v2, %v18141_v35  ;;  %v7391_v29 = vrot.slane %v15980_v14, %v17970_v32  ;;  %8384 = vperm.xlu1 %11101, %v18142_v43   ;;  %v16243_v41 = vld [vmem:[%s12168_s7 + $0xc8] sm:$0xff]   ;;  %v18143_v11 = vld [vmem:[#allocation97_spill] sm:$0xff]  ;;  %v16257_v43 = vld [vmem:[%s12168_s7 + $0xd0] sm:$0xff]  }
 0x5d7   : > { %v12018_v58 = vpop.eup %12017  ;;  %v8891_v16 = vadd.f32 %v8890_v22, %v8889_v46  ;;  %12031 = vrcp.f32 %v7387_v30  ;;  %v7367_v59 = vrot.slane %v15980_v14, %v17964_v55  ;;  %v7395_v49 = vrot.slane %v15980_v14, %v17969_v9  ;;  %v18144_v46 = vld [vmem:[#allocation77_spill] sm:$0xff]  ;;  %8299 = vperm.xlu0 %11102, %v15933_v24  }
 0x5d8   : > { %v8903_v50 = vadd.f32 %v8902_v45, %v8901_v27  ;;  %v16247_v32 = vmul.f32 %v12014_v8, %v18143_v11  ;;  %v16250_v22 = vmul.f32 %v12016_v63, %v18144_v46  ;;  %v9766_v55 = vpack.c.bf16 %v8865_v18, %v8865_v18  ;;  %v18145_v45 = vld [vmem:[#allocation148_spill] sm:$0xff]  ;;  %v18146_v63 = vld [vmem:[#allocation91_spill] sm:$0xff]  ;;  %v18148_v18 = vld [vmem:[#allocation138_spill] sm:$0xff] }
 0x5d9   : > { %v12020_v40 = vpop.eup %12019  ;;  %v9765_v35 = vpack.c.bf16 %v8858_v20, %v8858_v20  ;;  %v8879_v30 = vadd.f32 %v8878_v21, %v8877_v0  ;;  %v8884_v9 = vadd.f32 %v8883_v26, %v8882_v51  ;;  %v8872_v14 = vadd.f32 %v8871_v5, %v8870_v34  ;;  %v18149_v34 = vld [vmem:[#allocation140_spill] sm:$0xff] }
 0x5da   : > { %v12022_v2 = vpop.eup %12021  ;;  %v8897_v27 = vrot.slane %v8896_v61, 2  ;;  %v16254_v44 = vmul.f32 %v12018_v58, %v18145_v45  ;;  %12033 = vrcp.f32 %v7391_v29  ;;  %v8892_v10 = vrot.slane %v8891_v16, 1  ;;  %8389 = vperm.xlu1 %11101, %v18148_v18   ;;  %v16270_v45 = vld [vmem:[%s12168_s7 + $0xd8] sm:$0xff]   ;;  %v18156_v18 = vld [vmem:[#allocation68_spill] sm:$0xff] }
 0x5db   : > { %v16261_v11 = vmul.f32 %v12020_v40, %v18146_v63  ;;  %12035 = vrcp.f32 %v7367_v59  ;;  %v8904_v51 = vrot.slane %v8903_v50, 2  ;;  %v16266_v20 = vmul.f32 %v12022_v2, %v18149_v34  ;;  %v18151_v40 = vld [vmem:[#allocation48_spill] sm:$0xff]  ;;  %v16278_v34 = vld [vmem:[%s12168_s7 + $0x80] sm:$0xff]  }
 0x5dc   : > { %v12024_v0 = vpop.eup %12023  ;;  %12037 = vrcp.f32 %v7395_v49  ;;  %v10026_v26 = vunpack.c.l.b16 %v9766_v55  ;;  %v10025_v5 = vunpack.c.l.b16 %v9765_v35  ;;  %v9768_v29 = vpack.c.bf16 %v8879_v30, %v8879_v30  ;;  %8419 = vperm.xlu0 %11102, %v18151_v40   ;;  %v18152_v35 = vld [vmem:[#allocation141_spill] sm:$0xff]  ;;  %v18154_v40 = vld [vmem:[#allocation136_spill] sm:$0xff] }
 0x5dd   : > { %18147 = vst [vmem:[#allocation116_spill] sm:$0xff] %v16261_v11  ;;  %18150 = vst [vmem:[#allocation25_spill] sm:$0xff] %v16266_v20  ;;  %v12026_v21 = vpop.eup %12025  ;;  %v8885_v58 = vrot.slane %v8884_v9, 1  ;;  %v9767_v46 = vpack.c.bf16 %v8872_v14, %v8872_v14  ;;  %v8898_v59 = vadd.f32 %v8897_v27, %v8896_v61  ;;  %v16274_v49 = vadd.f32 %v8892_v10, %v8891_v16  ;;  %v7980_v24 = vpop.permute.xlu1 %7979  ;;  %v18157_v10 = vld [vmem:[#allocation150_spill] sm:$0xff]  ;;  %v18165_v16 = vld [vmem:[#allocation143_spill] sm:$0xff] }
 0x5de   : > { %v16282_v30 = vmul.f32 %v12024_v0, %v18152_v35  ;;  %v8905_v61 = vadd.f32 %v8904_v51, %v8903_v50  ;;  %v7975_v27 = vpop.permute.xlu0 %7974  ;;  %v18155_v63 = vunpack.c.h.bf16 %v18154_v40  ;;  %8394 = vperm.xlu1 %11101, %v18156_v18   ;;  %v16289_v2 = vmul.f32 %v12026_v21, %v18157_v10  ;;  %v18160_v50 = vld [vmem:[#allocation99_spill] sm:$0xff]  ;;  %v18162_v10 = vld [vmem:[#allocation102_spill] sm:$0xff] }
 0x5df   : > { %v10151_v55 = vsel %vm4508_vm1, %v10026_v26, %v10025_v5  ;;  %v10028_v20 = vunpack.c.l.b16 %v9768_v29  ;;  %v8886_v0 = vadd.f32 %v8885_v58, %v8884_v9  ;;  %v18159_v35 = vunpack.c.l.bf16 %v18154_v40  ;;  %v18168_v29 = vld [vmem:[#allocation151_spill] sm:$0xff] }
 0x5e0   : > { %18153 = vst [vmem:[#allocation16_spill] sm:$0xff] %v16282_v30  ;;  %v12028_v14 = vpop.eup %12027  ;;  %v8613_v8 = vmul.f32 %v7980_v24, %v18155_v63  ;;  %18158 = vst [vmem:[#allocation123_spill] sm:$0xff] %v16289_v2  ;;  %8424 = vperm.xlu0 %11102, %v18160_v50   ;;  %v10027_v51 = vunpack.c.l.b16 %v9767_v46  ;;  %v8899_v6 = vrot.slane %v8898_v59, 1  ;;  %v16297_v63 = vld [vmem:[%s12168_s7 + $0x88] sm:$0xff]   ;;  %v9770_v21 = vpack.c.bf16 %v16274_v49, %v16274_v49  ;;  %v18164_v50 = vld [vmem:[#allocation142_spill] sm:$0xff] }
 0x5e1   : > { %v12030_v48 = vpop.eup %12029  ;;  %v8612_v54 = vmul.f32 %v7975_v27, %v18159_v35  ;;  %18161 = vst [vmem:[#allocation117_spill] sm:$0xff] %v16297_v63  ;;  %v7985_v9 = vpop.permute.xlu1 %7984  ;;  %v8906_v27 = vrot.slane %v8905_v61, 1  ;;  %v18163_v35 = vunpack.c.l.bf16 %v18162_v10  ;;  %v16308_v18 = vmul.f32 %v12028_v14, %v18165_v16 }
 0x5e2   : > { %v8747_v24 = vsel %vm766_vm0, %v8613_v8, 0.0  ;;  %v7990_v46 = vpop.permute.xlu0 %7989  ;;  %8399 = vperm.xlu1 %11101, %v18164_v50   ;;  %v9769_v11 = vpack.c.bf16 %v8886_v0, %v8886_v0  ;;  %v16314_v25 = vmul.f32 %v12030_v48, %v18168_v29  ;;  %v10152_v63 = vsel %vm4510_vm2, %v10027_v51, %v10151_v55 }
 0x5e3   : > { %v8740_v26 = vsel %vm766_vm0, %v8612_v54, 0.0  ;;  %v8748_v5 = vrot.slane %v8747_v24, 4  ;;  %v8614_v8 = vmul.f32 %v7985_v9, %v18163_v35  ;;  %18166 = vst [vmem:[#allocation124_spill] sm:$0xff] %v16308_v18  ;;  %v18167_v54 = vunpack.c.h.bf16 %v18162_v10 }
 0x5e4   : > { %v12032_v58 = vpop.eup %12031  ;;  %v8741_v40 = vrot.slane %v8740_v26, 4  ;;  %8429 = vperm.xlu0 %11102, %v15960_v12   ;;  %18169 = vst [vmem:[#allocation118_spill] sm:$0xff] %v16314_v25  ;;  %v8900_v2 = vadd.f32 %v8899_v6, %v8898_v59  ;;  %v8907_v12 = vadd.f32 %v8906_v27, %v8905_v61  ;;  %v10029_v51 = vunpack.c.l.b16 %v9769_v11 }
 0x5e5   : > { %v8749_v49 = vadd.f32 %v8748_v5, %v8747_v24  ;;  %v8615_v53 = vmul.f32 %v7990_v46, %v18167_v54  ;;  %v8754_v9 = vsel %vm766_vm0, %v8614_v8, 0.0  ;;  %v7995_v0 = vpop.permute.xlu1 %7994  ;;  %v18170_v24 = vld [vmem:[#allocation145_spill] sm:$0xff]  ;;  %v18172_v54 = vld [vmem:[#allocation144_spill] sm:$0xff]  ;;  %v10153_v11 = vsel %vm4512_vm3, %v10028_v20, %v10152_v63  ;;  %v18177_v20 = vld [vmem:[#allocation146_spill] sm:$0xff] }
 0x5e6   : > { %v8742_v28 = vadd.f32 %v8741_v40, %v8740_v26  ;;  %v8755_v16 = vrot.slane %v8754_v9, 4  ;;  %v16320_v5 = vmul.f32 %v12032_v58, %v18170_v24  ;;  %v8000_v29 = vpop.permute.xlu0 %7999  ;;  %v18173_v55 = vunpack.c.l.bf16 %v18172_v54  ;;  %8404 = vperm.xlu1 %11101, %v15964_v15  }
 0x5e7   : > { %v12034_v35 = vpop.eup %12033  ;;  %v8750_v50 = vrot.slane %v8749_v49, 2  ;;  %v8761_v14 = vsel %vm766_vm0, %v8615_v53, 0.0  ;;  %v18174_v53 = vunpack.c.h.bf16 %v18172_v54  ;;  %v9771_v58 = vpack.c.bf16 %v8900_v2, %v8900_v2 }
 0x5e8   : > { %18171 = vst [vmem:[#allocation24_spill] sm:$0xff] %v16320_v5  ;;  %v12036_v46 = vpop.eup %12035  ;;  %v8743_v10 = vrot.slane %v8742_v28, 2  ;;  %v8762_v48 = vrot.slane %v8761_v14, 4  ;;  %v8616_v6 = vmul.f32 %v7995_v0, %v18173_v55  ;;  %v8756_v40 = vadd.f32 %v8755_v16, %v8754_v9  ;;  %8434 = vperm.xlu0 %11102, %v15968_v33  }
 0x5e9   : > { %v12038_v59 = vpop.eup %12037  ;;  %v8751_v26 = vadd.f32 %v8750_v50, %v8749_v49  ;;  %v8617_v8 = vmul.f32 %v8000_v29, %v18174_v53  ;;  %v8005_v55 = vpop.permute.xlu1 %8004  ;;  %v10030_v33 = vunpack.c.l.b16 %v9770_v21  ;;  %v9772_v2 = vpack.c.bf16 %v8907_v12, %v8907_v12 }
 0x5ea   : > { %v8744_v24 = vadd.f32 %v8743_v10, %v8742_v28  ;;  %v8763_v61 = vadd.f32 %v8762_v48, %v8761_v14  ;;  %v8768_v27 = vsel %vm766_vm0, %v8616_v6, 0.0  ;;  %v8757_v25 = vrot.slane %v8756_v40, 2  ;;  %v8010_v16 = vpop.permute.xlu0 %8009  ;;  %8409 = vperm.xlu1 %11101, %v15972_v38   ;;  %v18175_v14 = vld [vmem:[#allocation103_spill] sm:$0xff]  ;;  %v16335_v10 = vld [vmem:[%s12168_s7 + $0x90] sm:$0xff]  }
 0x5eb   : > { %v8752_v5 = vrot.slane %v8751_v26, 1  ;;  %v8775_v0 = vsel %vm766_vm0, %v8617_v8, 0.0  ;;  %v8769_v15 = vrot.slane %v8768_v27, 4  ;;  %v10154_v28 = vsel %vm4514_vm4, %v10029_v51, %v10153_v11  ;;  %18176 = vst [vmem:[#allocation14_spill] sm:$0xff] %v16335_v10  ;;  %v18179_v51 = vld [vmem:[#allocation152_spill] sm:$0xff] }
 0x5ec   : > { %v8745_v49 = vrot.slane %v8744_v24, 1  ;;  %v8764_v9 = vrot.slane %v8763_v61, 2  ;;  %v8776_v50 = vrot.slane %v8775_v0, 4  ;;  %8439 = vperm.xlu0 %11102, %v18175_v14   ;;  %v10031_v29 = vunpack.c.l.b16 %v9771_v58 }
 0x5ed   : > { %v8758_v54 = vadd.f32 %v8757_v25, %v8756_v40  ;;  %v8770_v6 = vadd.f32 %v8769_v15, %v8768_v27  ;;  %v18178_v63 = vunpack.c.h.bf16 %v18177_v20  ;;  %v8753_v18 = vadd.f32 %v8752_v5, %v8751_v26  ;;  %v8095_v38 = vpop.permute.xlu1 %8094  ;;  %v18182_v25 = vld [vmem:[#allocation100_spill] sm:$0xff]  ;;  %v18183_v40 = vld [vmem:[#allocation149_spill] sm:$0xff] }
 0x5ee   : > { %v8746_v8 = vadd.f32 %v8745_v49, %v8744_v24  ;;  %v16342_v12 = vmul.f32 %v12034_v35, %v18179_v51  ;;  %v8765_v11 = vadd.f32 %v8764_v9, %v8763_v61  ;;  %v8777_v14 = vadd.f32 %v8776_v50, %v8775_v0  ;;  %v8100_v58 = vpop.permute.xlu0 %8099  ;;  %8294 = vperm.xlu1 %11101, %v18182_v25   ;;  %v18185_v26 = vld [vmem:[#allocation101_spill] sm:$0xff]  ;;  %v18187_v61 = vld [vmem:[#allocation147_spill] sm:$0xff] }
 0x5ef   : > { %v8619_v53 = vmul.f32 %v8010_v16, %v18178_v63  ;;  %v18181_v30 = vunpack.c.l.bf16 %v18177_v20  ;;  %v16348_v27 = vmul.f32 %v12036_v46, %v18183_v40  ;;  %v10032_v15 = vunpack.c.l.b16 %v9772_v2  ;;  %v16353_v24 = vld [vmem:[%s12168_s7 + $0x98] sm:$0xff]   ;;  %v18189_v16 = vld [vmem:[#allocation98_spill] sm:$0xff]  ;;  %v16377_v20 = vld [vmem:[%s12168_s7 + $0xf0] sm:$0xff]  }
 0x5f0   : > { %18180 = vst [vmem:[#allocation119_spill] sm:$0xff] %v16342_v12  ;;  %v10155_v5 = vsel %vm4516_vm5, %v10030_v33, %v10154_v28  ;;  %8444 = vperm.xlu0 %11102, %v18185_v26   ;;  %18186 = vst [vmem:[#allocation130_spill] sm:$0xff] %v16353_v24  ;;  %v16357_v0 = vmul.f32 %v12038_v59, %v18187_v61  ;;  %v8771_v49 = vrot.slane %v8770_v6, 2  ;;  %v18190_v33 = vunpack.c.h.bf16 %v18189_v16  ;;  %v18191_v40 = vld [vmem:[#allocation105_spill] sm:$0xff] }
 0x5f1   : > { %v8618_v48 = vmul.f32 %v8005_v55, %v18181_v30  ;;  %18184 = vst [vmem:[#allocation26_spill] sm:$0xff] %v16348_v27  ;;  %v10156_v30 = vsel %vm4518_vm6, %v10031_v29, %v10155_v5  ;;  %v8759_v55 = vrot.slane %v8758_v54, 1  ;;  %v8789_v46 = vsel %vm766_vm0, %v8619_v53, 0.0  ;;  %v8105_v2 = vpop.permute.xlu1 %8104  ;;  %v16367_v29 = vld [vmem:[%s12168_s7 + $0xe0] sm:$0xff]   ;;  %18195 = vst [vmem:[#allocation121_spill] sm:$0xff] %v16377_v20 }
 0x5f2   : > { %18188 = vst [vmem:[#allocation128_spill] sm:$0xff] %v16357_v0  ;;  %v9749_v9 = vpack.c.bf16 %v8746_v8, %v8746_v8  ;;  %v9750_v50 = vpack.c.bf16 %v8753_v18, %v8753_v18  ;;  %v8637_v28 = vmul.f32 %v8100_v58, %v18190_v33  ;;  %v8766_v63 = vrot.slane %v8765_v11, 1  ;;  %v8110_v25 = vpop.permute.xlu0 %8109  ;;  %8304 = vperm.xlu1 %11101, %v18191_v40   ;;  %v18194_v5 = vld [vmem:[#allocation106_spill] sm:$0xff] }
 0x5f3   : > { %v8778_v51 = vrot.slane %v8777_v14, 2  ;;  %v8782_v59 = vsel %vm766_vm0, %v8618_v48, 0.0  ;;  %18192 = vst [vmem:[#allocation120_spill] sm:$0xff] %v16367_v29  ;;  %v16371_v18 = vsel %vm4520_vm7, %v10032_v15, %v10156_v30  ;;  %v8790_v8 = vrot.slane %v8789_v46, 4 }
 0x5f4   : > { %18193 = vst [vmem:[#allocation28_spill] sm:$0xff] %v16371_v18  ;;  %v8915_v58 = vsel %vm766_vm0, %v8637_v28, 0.0  ;;  %8449 = vperm.xlu0 %11102, %v18194_v5   ;;  %v8760_v61 = vadd.f32 %v8759_v55, %v8758_v54  ;;  %v8772_v48 = vadd.f32 %v8771_v49, %v8770_v6  ;;  %v10009_v35 = vunpack.c.l.b16 %v9749_v9  ;;  %v18197_v54 = vld [vmem:[#allocation107_spill] sm:$0xff] }
 0x5f5   : > { %v8916_v33 = vrot.slane %v8915_v58, 4  ;;  %v10010_v53 = vunpack.c.l.b16 %v9750_v50  ;;  %v8783_v15 = vrot.slane %v8782_v59, 4  ;;  %v18196_v30 = vunpack.c.l.bf16 %v18189_v16  ;;  %v8115_v28 = vpop.permute.xlu1 %8114  ;;  %v16386_v6 = vld [vmem:[%s12168_s7 + $0xe8] sm:$0xff]   ;;  %v18198_v50 = vld [vmem:[#allocation104_spill] sm:$0xff] }
 0x5f6   : > { %v8767_v0 = vadd.f32 %v8766_v63, %v8765_v11  ;;  %v16382_v5 = vadd.f32 %v8778_v51, %v8777_v14  ;;  %v8120_v12 = vpop.permute.xlu0 %8119  ;;  %8309 = vperm.xlu1 %11101, %v18197_v54   ;;  %v8791_v49 = vadd.f32 %v8790_v8, %v8789_v46  ;;  %v18199_v40 = vunpack.c.h.bf16 %v18198_v50 }
 0x5f7   : > { %v8636_v21 = vmul.f32 %v8095_v38, %v18196_v30  ;;  %v8917_v26 = vadd.f32 %v8916_v33, %v8915_v58  ;;  %v16394_v38 = vld [vmem:[%s12168_s7 + $0xf8] sm:$0xff]   ;;  %v9751_v14 = vpack.c.bf16 %v8760_v61, %v8760_v61  ;;  %v8773_v16 = vrot.slane %v8772_v48, 1 }
 0x5f8   : > { %v8639_v20 = vmul.f32 %v8110_v25, %v18199_v40  ;;  %8339 = vperm.xlu0 %11102, %v16024_v36   ;;  %v10137_v58 = vsel %vm4508_vm1, %v10010_v53, %v10009_v35  ;;  %v16398_v33 = vadd.f32 %v8783_v15, %v8782_v59  ;;  %v9752_v40 = vpack.c.bf16 %v8767_v0, %v8767_v0  ;;  %v18201_v35 = vld [vmem:[#allocation109_spill] sm:$0xff] }
 0x5f9   : > { %v8908_v9 = vsel %vm766_vm0, %v8636_v21, 0.0  ;;  %v8918_v63 = vrot.slane %v8917_v26, 2  ;;  %v18200_v21 = vunpack.c.l.bf16 %v18198_v50  ;;  %v8125_v25 = vpop.permute.xlu1 %8124  ;;  %v8780_v36 = vrot.slane %v16382_v5, 1  ;;  %v18204_v50 = vld [vmem:[#allocation108_spill] sm:$0xff] }
 0x5fa   : > { %v8909_v51 = vrot.slane %v8908_v9, 4  ;;  %v8929_v46 = vsel %vm766_vm0, %v8639_v20, 0.0  ;;  %v8130_v11 = vpop.permute.xlu0 %8129  ;;  %8314 = vperm.xlu1 %11101, %v16027_v62   ;;  %v8792_v61 = vrot.slane %v8791_v49, 2  ;;  %v18202_v59 = vunpack.c.h.bf16 %v18201_v35 }
 0x5fb   : > { %v8638_v8 = vmul.f32 %v8105_v2, %v18200_v21  ;;  %v8930_v54 = vrot.slane %v8929_v46, 4  ;;  %v18203_v20 = vunpack.c.l.bf16 %v18201_v35  ;;  %v10011_v2 = vunpack.c.l.b16 %v9751_v14 }
 0x5fc   : > { %v8910_v30 = vadd.f32 %v8909_v51, %v8908_v9  ;;  %v8641_v53 = vmul.f32 %v8120_v12, %v18202_v59  ;;  %8344 = vperm.xlu0 %11102, %v18204_v50   ;;  %v8919_v0 = vadd.f32 %v8918_v63, %v8917_v26  ;;  %v16411_v9 = vadd.f32 %v8773_v16, %v8772_v48  ;;  %v18206_v63 = vld [vmem:[#allocation111_spill] sm:$0xff] }
 0x5fd   : > { %v8922_v55 = vsel %vm766_vm0, %v8638_v8, 0.0  ;;  %v8640_v15 = vmul.f32 %v8115_v28, %v18203_v20  ;;  %v8931_v27 = vadd.f32 %v8930_v54, %v8929_v46  ;;  %v8015_v8 = vpop.permute.xlu1 %8014  ;;  %v8785_v24 = vrot.slane %v16398_v33, 2  ;;  %v18205_v20 = vld [vmem:[#allocation113_spill] sm:$0xff] }
 0x5fe   : > { %v8911_v21 = vrot.slane %v8910_v30, 2  ;;  %v8923_v51 = vrot.slane %v8922_v55, 4  ;;  %v8943_v62 = vsel %vm766_vm0, %v8641_v53, 0.0  ;;  %v8020_v28 = vpop.permute.xlu0 %8019  ;;  %8319 = vperm.xlu1 %11101, %v18205_v20   ;;  %v18207_v46 = vunpack.c.h.bf16 %v18206_v63  ;;  %v18209_v53 = vld [vmem:[#allocation110_spill] sm:$0xff] }
 0x5ff   : > { %v8936_v29 = vsel %vm766_vm0, %v8640_v15, 0.0  ;;  %v8932_v59 = vrot.slane %v8931_v27, 2  ;;  %v8944_v35 = vrot.slane %v8943_v62, 4  ;;  %v18208_v16 = vunpack.c.l.bf16 %v18206_v63 }
 0x600   : > { %v8912_v12 = vadd.f32 %v8911_v21, %v8910_v30  ;;  %v8924_v14 = vadd.f32 %v8923_v51, %v8922_v55  ;;  %v8937_v26 = vrot.slane %v8936_v29, 4  ;;  %v8643_v48 = vmul.f32 %v8130_v11, %v18207_v46  ;;  %8349 = vperm.xlu0 %11102, %v18209_v53  }
 0x601   : > { %v8642_v54 = vmul.f32 %v8125_v25, %v18208_v16  ;;  %v10012_v15 = vunpack.c.l.b16 %v9752_v40  ;;  %v8920_v50 = vrot.slane %v8919_v0, 1  ;;  %v8945_v10 = vadd.f32 %v8944_v35, %v8943_v62  ;;  %v16424_v55 = vpop.permute.xlu1 %8024 }
 0x602   : > { %v8913_v18 = vrot.slane %v8912_v12, 1  ;;  %v8925_v30 = vrot.slane %v8924_v14, 2  ;;  %v8938_v21 = vadd.f32 %v8937_v26, %v8936_v29  ;;  %v8957_v47 = vsel %vm766_vm0, %v8643_v48, 0.0  ;;  %v8030_v46 = vpop.permute.xlu0 %8029  ;;  %8324 = vperm.xlu1 %11101, %v16060_v13  }
 0x603   : > { %v8950_v20 = vsel %vm766_vm0, %v8642_v54, 0.0  ;;  %v10138_v51 = vsel %vm4510_vm2, %v10011_v2, %v10137_v58  ;;  %v8781_v11 = vadd.f32 %v8780_v36, %v16382_v5  ;;  %v16428_v63 = vadd.f32 %v8792_v61, %v8791_v49 }
 0x604   : > { %v8933_v25 = vadd.f32 %v8932_v59, %v8931_v27  ;;  %v8926_v40 = vadd.f32 %v8925_v30, %v8924_v14  ;;  %v8939_v62 = vrot.slane %v8938_v21, 2  ;;  %v8958_v35 = vrot.slane %v8957_v47, 4  ;;  %8354 = vperm.xlu0 %11102, %v16063_v1   ;;  %v18211_v14 = vld [vmem:[#allocation49_spill] sm:$0xff] }
 0x605   : > { %v8951_v29 = vrot.slane %v8950_v20, 4  ;;  %v8921_v26 = vadd.f32 %v8920_v50, %v8919_v0  ;;  %v8914_v48 = vadd.f32 %v8913_v18, %v8912_v12  ;;  %v8946_v16 = vrot.slane %v8945_v10, 2  ;;  %v16434_v27 = vpop.permute.xlu1 %8034 }
 0x606   : > { %v18210_v54 = vunpack.c.h.bf16 %v16056_v4  ;;  %v8927_v2 = vrot.slane %v8926_v40, 1  ;;  %v8940_v5 = vadd.f32 %v8939_v62, %v8938_v21  ;;  %v8959_v49 = vadd.f32 %v8958_v35, %v8957_v47  ;;  %v8040_v59 = vpop.permute.xlu0 %8039  ;;  %8329 = vperm.xlu1 %11101, %v18211_v14  }
 0x607   : > { %v8952_v36 = vadd.f32 %v8951_v29, %v8950_v20  ;;  %v9753_v13 = vpack.c.bf16 %v16411_v9, %v16411_v9  ;;  %v8786_v61 = vadd.f32 %v8785_v24, %v16398_v33  ;;  %v7903_v1 = vunpack.c.h.bf16 %v16386_v6 }
 0x608   : > { %v8621_v58 = vmul.f32 %v8020_v28, %v18210_v54  ;;  %v7907_v18 = vunpack.c.h.bf16 %v16394_v38  ;;  %v9754_v0 = vpack.c.bf16 %v8781_v11, %v8781_v11  ;;  %v8934_v12 = vrot.slane %v8933_v25, 1  ;;  %8359 = vperm.xlu0 %11102, %v16071_v19  }
 0x609   : > { %v8953_v28 = vrot.slane %v8952_v36, 2  ;;  %v16445_v53 = vsel %vm4512_vm3, %v10012_v15, %v10138_v51  ;;  %v8794_v9 = vrot.slane %v16428_v63, 1  ;;  %v8928_v24 = vadd.f32 %v8927_v2, %v8926_v40  ;;  %v16452_v14 = vpop.permute.xlu1 %8044 }
 0x60a   : > { %v8803_v47 = vsel %vm766_vm0, %v8621_v58, 0.0  ;;  %v8947_v33 = vadd.f32 %v8946_v16, %v8945_v10  ;;  %v9774_v50 = vpack.c.bf16 %v8921_v26, %v8921_v26  ;;  %v9773_v30 = vpack.c.bf16 %v8914_v48, %v8914_v48  ;;  %v8050_v19 = vpop.permute.xlu0 %8049  ;;  %8414 = vperm.xlu1 %11101, %v16077_v57  }
 0x60b   : > { %v8941_v21 = vrot.slane %v8940_v5, 1  ;;  %v8960_v20 = vrot.slane %v8959_v49, 2  ;;  %v8954_v62 = vadd.f32 %v8953_v28, %v8952_v36  ;;  %v8804_v35 = vrot.slane %v8803_v47, 4 }
 0x60c   : > { %v18212_v11 = vunpack.c.l.bf16 %v16056_v4  ;;  %v18213_v54 = vunpack.c.h.bf16 %v16119_v3  ;;  %v16455_v15 = vunpack.c.l.b16 %v9754_v0  ;;  %v16457_v10 = vunpack.c.l.b16 %v9753_v13  ;;  %8364 = vperm.xlu0 %11102, %v16074_v31  }
 0x60d   : > { %v8787_v51 = vrot.slane %v8786_v61, 1  ;;  %v8935_v40 = vadd.f32 %v8934_v12, %v8933_v25  ;;  %v9775_v26 = vpack.c.bf16 %v8928_v24, %v8928_v24  ;;  %v8948_v48 = vrot.slane %v8947_v33, 1 }
 0x60e   : > { %v8620_v29 = vmul.f32 %v8015_v8, %v18212_v11  ;;  %v8623_v58 = vmul.f32 %v8030_v46, %v18213_v54  ;;  %v10034_v46 = vunpack.c.l.b16 %v9774_v50  ;;  %v10033_v16 = vunpack.c.l.b16 %v9773_v30  ;;  %v8215_v13 = vpop.permute.xlu0 %8214  ;;  %8334 = vperm.xlu1 %11101, %v16085_v17  }
 0x60f   : > { %v8942_v2 = vadd.f32 %v8941_v21, %v8940_v5  ;;  %v8961_v36 = vadd.f32 %v8960_v20, %v8959_v49  ;;  %v8955_v28 = vrot.slane %v8954_v62, 1  ;;  %v8805_v57 = vadd.f32 %v8804_v35, %v8803_v47  ;;  %v16472_v21 = vpop.permute.xlu1 %8219 }
 0x610   : > { %v8796_v4 = vsel %vm766_vm0, %v8620_v29, 0.0  ;;  %v8817_v8 = vsel %vm766_vm0, %v8623_v58, 0.0  ;;  %v16464_v25 = vadd.f32 %v8794_v9, %v16428_v63  ;;  %v16466_v31 = vadd.f32 %v8787_v51, %v8786_v61  ;;  %8369 = vperm.xlu0 %11102, %v16082_v23   ;;  %v18216_v23 = vld [vmem:[#allocation112_spill] sm:$0xff] }
 0x611   : > { %v8797_v0 = vrot.slane %v8796_v4, 4  ;;  %v8818_v11 = vrot.slane %v8817_v8, 4  ;;  %v9776_v12 = vpack.c.bf16 %v8935_v40, %v8935_v40  ;;  %v18214_v24 = vunpack.c.l.bf16 %v16119_v3 }
 0x612   : > { %v10035_v5 = vunpack.c.l.b16 %v9775_v26  ;;  %v8949_v49 = vadd.f32 %v8948_v48, %v8947_v33  ;;  %v10158_v17 = vsel %vm4508_vm1, %v10034_v46, %v10033_v16  ;;  %v9777_v20 = vpack.c.bf16 %v8942_v2, %v8942_v2  ;;  %v16478_v54 = vpop.permute.xlu0 %8224  ;;  %8534 = vperm.xlu1 %11101, %v18216_v23  }
 0x613   : > { %v8622_v50 = vmul.f32 %v16424_v55, %v18214_v24  ;;  %v8798_v47 = vadd.f32 %v8797_v0, %v8796_v4  ;;  %v8819_v30 = vadd.f32 %v8818_v11, %v8817_v8  ;;  %v18215_v61 = vunpack.c.h.bf16 %v16157_v37  ;;  %v18219_v4 = vld [vmem:[#allocation115_spill] sm:$0xff] }
 0x614   : > { %v8962_v35 = vrot.slane %v8961_v36, 1  ;;  %v8956_v3 = vadd.f32 %v8955_v28, %v8954_v62  ;;  %v8806_v29 = vrot.slane %v8805_v57, 2  ;;  %v18217_v51 = vunpack.c.l.bf16 %v16157_v37  ;;  %8539 = vperm.xlu0 %11102, %v18219_v4  }
 0x615   : > { %v8810_v63 = vsel %vm766_vm0, %v8622_v50, 0.0  ;;  %v8625_v9 = vmul.f32 %v8040_v59, %v18215_v61  ;;  %v8799_v33 = vrot.slane %v8798_v47, 2  ;;  %v18218_v26 = vunpack.c.h.bf16 %v16188_v7  ;;  %v16491_v50 = vpop.permute.xlu1 %8234 }
 0x616   : > { %v8811_v55 = vrot.slane %v8810_v63, 4  ;;  %v8624_v40 = vmul.f32 %v16434_v27, %v18217_v51  ;;  %v10036_v59 = vunpack.c.l.b16 %v9776_v12  ;;  %v10159_v62 = vsel %vm4510_vm2, %v10035_v5, %v10158_v17  ;;  %v16497_v17 = vpop.permute.xlu0 %8229 }
 0x617   : > { %v8831_v58 = vsel %vm766_vm0, %v8625_v9, 0.0  ;;  %v8627_v48 = vmul.f32 %v8050_v19, %v18218_v26  ;;  %v9778_v8 = vpack.c.bf16 %v8949_v49, %v8949_v49  ;;  %v8820_v46 = vrot.slane %v8819_v30, 2  ;;  %v18220_v19 = vld [vmem:[#allocation12_spill] sm:$0xff] }
 0x618   : > { %v8812_v16 = vadd.f32 %v8811_v55, %v8810_v63  ;;  %v8832_v2 = vrot.slane %v8831_v58, 4  ;;  %v8824_v28 = vsel %vm766_vm0, %v8624_v40, 0.0  ;;  %v10037_v11 = vunpack.c.l.b16 %v9777_v20  ;;  %8544 = vperm.xlu1 %11101, %v18220_v19   ;;  %v18222_v63 = vld [vmem:[#allocation42_spill] sm:$0xff]  ;;  %v18224_v40 = vld [vmem:[#allocation9_spill] sm:$0xff] }
 0x619   : > { %v8845_v0 = vsel %vm766_vm0, %v8627_v48, 0.0  ;;  %v8963_v37 = vadd.f32 %v8962_v35, %v8961_v36  ;;  %v8807_v24 = vadd.f32 %v8806_v29, %v8805_v57  ;;  %v8825_v27 = vrot.slane %v8824_v28, 4  ;;  %8459 = vperm.xlu0 %11102, %v18222_v63  }
 0x61a   : > { %v9779_v61 = vpack.c.bf16 %v8956_v3, %v8956_v3  ;;  %v8800_v12 = vadd.f32 %v8799_v33, %v8798_v47  ;;  %v8813_v9 = vrot.slane %v8812_v16, 2  ;;  %v18221_v5 = vunpack.c.l.bf16 %v16188_v7 }
 0x61b   : > { %v10038_v55 = vunpack.c.l.b16 %v9778_v8  ;;  %v8821_v20 = vadd.f32 %v8820_v46, %v8819_v30  ;;  %v8846_v36 = vrot.slane %v8845_v0, 4  ;;  %v18223_v57 = vunpack.c.l.bf16 %v16208_v56  ;;  %v8245_v8 = vpop.permute.xlu1 %8244 }
 0x61c   : > { %v8626_v49 = vmul.f32 %v16452_v14, %v18221_v5  ;;  %v10160_v29 = vsel %vm4512_vm3, %v10036_v59, %v10159_v62  ;;  %v8833_v23 = vadd.f32 %v8832_v2, %v8831_v58  ;;  %v8826_v3 = vadd.f32 %v8825_v27, %v8824_v28  ;;  %8549 = vperm.xlu1 %11101, %v18224_v40  }
 0x61d   : > { %v8660_v35 = vmul.f32 %v8215_v13, %v18223_v57  ;;  %v10161_v7 = vsel %vm4514_vm4, %v10037_v11, %v10160_v29  ;;  %v9780_v33 = vpack.c.bf16 %v8963_v37, %v8963_v37  ;;  %v8808_v14 = vrot.slane %v8807_v24, 1  ;;  %8579 = vperm.xlu0 %11102, %v16226_v52   ;;  %v8240_v11 = vpop.permute.xlu0 %8239 }
 0x61e   : > { %v8838_v47 = vsel %vm766_vm0, %v8626_v49, 0.0  ;;  %v8814_v51 = vadd.f32 %v8813_v9, %v8812_v16  ;;  %v10039_v26 = vunpack.c.l.b16 %v9779_v61  ;;  %v8801_v48 = vrot.slane %v8800_v12, 1 }
 0x61f   : > { %v8839_v30 = vrot.slane %v8838_v47, 4  ;;  %v9076_v4 = vsel %vm766_vm0, %v8660_v35, 0.0  ;;  %v9756_v13 = vpack.c.bf16 %v16464_v25, %v16464_v25  ;;  %v9755_v58 = vpack.c.bf16 %v16466_v31, %v16466_v31  ;;  %v18226_v25 = vld [vmem:[#allocation39_spill] sm:$0xff] }
 0x620   : > { %v8822_v59 = vrot.slane %v8821_v20, 1  ;;  %v8847_v62 = vadd.f32 %v8846_v36, %v8845_v0  ;;  %v10162_v46 = vsel %vm4516_vm5, %v10038_v55, %v10161_v7  ;;  %v8834_v16 = vrot.slane %v8833_v23, 2  ;;  %8554 = vperm.xlu1 %11101, %v18226_v25   ;;  %v18228_v7 = vld [vmem:[#allocation43_spill] sm:$0xff] }
 0x621   : > { %v8827_v2 = vrot.slane %v8826_v3, 2  ;;  %v9077_v28 = vrot.slane %v9076_v4, 4  ;;  %v10040_v37 = vunpack.c.l.b16 %v9780_v33  ;;  %v8809_v27 = vadd.f32 %v8808_v14, %v8807_v24  ;;  %8584 = vperm.xlu0 %11102, %v16229_v42  }
 0x622   : > { %v8815_v19 = vrot.slane %v8814_v51, 1  ;;  %v18225_v52 = vunpack.c.h.bf16 %v16208_v56  ;;  %v10163_v31 = vsel %vm4518_vm6, %v10039_v26, %v10162_v46  ;;  %v8802_v9 = vadd.f32 %v8801_v48, %v8800_v12 }
 0x623   : > { %v8840_v0 = vadd.f32 %v8839_v30, %v8838_v47  ;;  %v9078_v5 = vadd.f32 %v9077_v28, %v9076_v4  ;;  %v8823_v49 = vadd.f32 %v8822_v59, %v8821_v20  ;;  %v8848_v63 = vrot.slane %v8847_v62, 2  ;;  %v8250_v47 = vpop.permute.xlu1 %8249  ;;  %v18231_v28 = vld [vmem:[#allocation40_spill] sm:$0xff] }
 0x624   : > { %v8661_v61 = vmul.f32 %v16472_v21, %v18225_v52  ;;  %v18227_v24 = vunpack.c.l.bf16 %v16243_v41  ;;  %v16526_v56 = vsel %vm4514_vm4, %v16457_v10, %v16445_v53  ;;  %v16528_v21 = vunpack.c.l.b16 %v9756_v13  ;;  %8559 = vperm.xlu1 %11101, %v18228_v7   ;;  %v8140_v10 = vpop.permute.xlu0 %8139 }
 0x625   : > { %v8835_v12 = vadd.f32 %v8834_v16, %v8833_v23  ;;  %v8828_v57 = vadd.f32 %v8827_v2, %v8826_v3  ;;  %v8816_v35 = vadd.f32 %v8815_v19, %v8814_v51  ;;  %v9079_v29 = vrot.slane %v9078_v5, 2  ;;  %8589 = vperm.xlu0 %11102, %v16233_v39  }
 0x626   : > { %v9083_v55 = vsel %vm766_vm0, %v8661_v61, 0.0  ;;  %v8662_v36 = vmul.f32 %v16478_v54, %v18227_v24  ;;  %v16532_v33 = vunpack.c.l.b16 %v9755_v58  ;;  %v16535_v54 = vsel %vm4520_vm7, %v10040_v37, %v10163_v31 }
 0x627   : > { %v9084_v42 = vrot.slane %v9083_v55, 4  ;;  %v9758_v14 = vpack.c.bf16 %v8809_v27, %v8809_v27  ;;  %v8841_v53 = vrot.slane %v8840_v0, 2  ;;  %v9757_v23 = vpack.c.bf16 %v8802_v9, %v8802_v9  ;;  %v8135_v31 = vpop.permute.xlu1 %8134 }
 0x628   : > { %v9090_v20 = vsel %vm766_vm0, %v8662_v36, 0.0  ;;  %v9760_v3 = vpack.c.bf16 %v8823_v49, %v8823_v49  ;;  %v8849_v51 = vadd.f32 %v8848_v63, %v8847_v62  ;;  %v8836_v26 = vrot.slane %v8835_v12, 1  ;;  %8454 = vperm.xlu1 %11101, %v18231_v28  }
 0x629   : > { %v9085_v40 = vadd.f32 %v9084_v42, %v9083_v55  ;;  %v8829_v48 = vrot.slane %v8828_v57, 1  ;;  %v9091_v30 = vrot.slane %v9090_v20, 4  ;;  %v18229_v4 = vunpack.c.l.bf16 %v16257_v43  ;;  %8594 = vperm.xlu0 %11102, %v16247_v32   ;;  %v18234_v32 = vld [vmem:[#allocation44_spill] sm:$0xff] }
 0x62a   : > { %v9759_v58 = vpack.c.bf16 %v8816_v35, %v8816_v35  ;;  %v9080_v59 = vadd.f32 %v9079_v29, %v9078_v5  ;;  %v18230_v16 = vunpack.c.h.bf16 %v16243_v41  ;;  %v8842_v39 = vadd.f32 %v8841_v53, %v8840_v0  ;;  %v16551_v0 = vpop.permute.xlu0 %8149 }
 0x62b   : > { %v8664_v13 = vmul.f32 %v16491_v50, %v18229_v4  ;;  %v9086_v46 = vrot.slane %v9085_v40, 2  ;;  %v9092_v37 = vadd.f32 %v9091_v30, %v9090_v20  ;;  %v18232_v27 = vunpack.c.l.bf16 %v16270_v45 }
 0x62c   : > { %v8663_v2 = vmul.f32 %v16497_v17, %v18230_v16  ;;  %v8850_v52 = vrot.slane %v8849_v51, 1  ;;  %v8837_v41 = vadd.f32 %v8836_v26, %v8835_v12  ;;  %v8830_v49 = vadd.f32 %v8829_v48, %v8828_v57  ;;  %8464 = vperm.xlu1 %11101, %v18234_v32  }
 0x62d   : > { %v9104_v62 = vsel %vm766_vm0, %v8664_v13, 0.0  ;;  %v8666_v19 = vmul.f32 %v8245_v8, %v18232_v27  ;;  %v9087_v50 = vadd.f32 %v9086_v46, %v9085_v40  ;;  %v9093_v9 = vrot.slane %v9092_v37, 2  ;;  %8599 = vperm.xlu0 %11102, %v16250_v22  }
 0x62e   : > { %v9105_v61 = vrot.slane %v9104_v62, 4  ;;  %v9097_v25 = vsel %vm766_vm0, %v8663_v2, 0.0  ;;  %v9081_v63 = vrot.slane %v9080_v59, 1  ;;  %v18233_v8 = vunpack.c.h.bf16 %v16257_v43  ;;  %v16566_v46 = vpop.permute.xlu0 %8159 }
 0x62f   : > { %v9098_v17 = vrot.slane %v9097_v25, 4  ;;  %v9118_v5 = vsel %vm766_vm0, %v8666_v19, 0.0  ;;  %v9088_v55 = vrot.slane %v9087_v50, 1  ;;  %v10018_v36 = vunpack.c.l.b16 %v9758_v14 }
 0x630   : > { %v8665_v24 = vmul.f32 %v8240_v11, %v18233_v8  ;;  %v10017_v35 = vunpack.c.l.b16 %v9757_v23  ;;  %v8843_v29 = vrot.slane %v8842_v39, 1  ;;  %v9106_v42 = vadd.f32 %v9105_v61, %v9104_v62  ;;  %v16560_v23 = vpop.permute.xlu1 %8144  ;;  %8469 = vperm.xlu1 %11101, %v16173_v60  }
 0x631   : > { %v10020_v12 = vunpack.c.l.b16 %v9760_v3  ;;  %v10019_v20 = vunpack.c.l.b16 %v9759_v58  ;;  %v8851_v7 = vadd.f32 %v8850_v52, %v8849_v51  ;;  %v9119_v53 = vrot.slane %v9118_v5, 4  ;;  %8604 = vperm.xlu0 %11102, %v16254_v44  }
 0x632   : > { %v9094_v40 = vadd.f32 %v9093_v9, %v9092_v37  ;;  %v9099_v26 = vadd.f32 %v9098_v17, %v9097_v25  ;;  %v9111_v57 = vsel %vm766_vm0, %v8665_v24, 0.0  ;;  %v18235_v48 = vunpack.c.h.bf16 %v16270_v45  ;;  %v18238_v25 = vld [vmem:[#allocation16_spill] sm:$0xff] }
 0x633   : > { %v9762_v11 = vpack.c.bf16 %v8837_v41, %v8837_v41  ;;  %v9761_v30 = vpack.c.bf16 %v8830_v49, %v8830_v49  ;;  %v9082_v4 = vadd.f32 %v9081_v63, %v9080_v59  ;;  %v9089_v14 = vadd.f32 %v9088_v55, %v9087_v50 }
 0x634   : > { %v8667_v43 = vmul.f32 %v8250_v47, %v18235_v48  ;;  %v10144_v22 = vsel %vm4508_vm1, %v10018_v36, %v10017_v35  ;;  %v8844_v3 = vadd.f32 %v8843_v29, %v8842_v39  ;;  %v9107_v51 = vrot.slane %v9106_v42, 2  ;;  %v8155_v63 = vpop.permute.xlu1 %8154  ;;  %v8170_v36 = vpop.permute.xlu0 %8169 }
 0x635   : > { %v18236_v13 = vunpack.c.h.bf16 %v16278_v34  ;;  %v10145_v45 = vsel %vm4510_vm2, %v10019_v20, %v10144_v22  ;;  %v9764_v47 = vpack.c.bf16 %v8851_v7, %v8851_v7  ;;  %v9120_v59 = vadd.f32 %v9119_v53, %v9118_v5  ;;  %8499 = vperm.xlu0 %11102, %v18238_v25   ;;  %v18240_v20 = vld [vmem:[#allocation46_spill] sm:$0xff] }
 0x636   : > { %v9112_v16 = vrot.slane %v9111_v57, 4  ;;  %v9095_v2 = vrot.slane %v9094_v40, 1  ;;  %v9100_v28 = vrot.slane %v9099_v26, 2  ;;  %v9125_v60 = vsel %vm766_vm0, %v8667_v43, 0.0  ;;  %v18242_v43 = vld [vmem:[#allocation117_spill] sm:$0xff]  ;;  %v18247_v25 = vld [vmem:[#allocation14_spill] sm:$0xff] }
 0x637   : > { %v8645_v58 = vmul.f32 %v8140_v10, %v18236_v13  ;;  %v10022_v39 = vunpack.c.l.b16 %v9762_v11  ;;  %v10021_v62 = vunpack.c.l.b16 %v9761_v30  ;;  %v9797_v27 = vpack.c.bf16 %v9082_v4, %v9082_v4  ;;  %v18237_v10 = vld [vmem:[#allocation114_spill] sm:$0xff] }
 0x638   : > { %v9798_v19 = vpack.c.bf16 %v9089_v14, %v9089_v14  ;;  %8474 = vperm.xlu1 %11101, %v18237_v10   ;;  %v10146_v52 = vsel %vm4512_vm3, %v10020_v12, %v10145_v45  ;;  %v9763_v44 = vpack.c.bf16 %v8844_v3, %v8844_v3  ;;  %v9108_v50 = vadd.f32 %v9107_v51, %v9106_v42 }
 0x639   : > { %v8971_v37 = vsel %vm766_vm0, %v8645_v58, 0.0  ;;  %v9121_v41 = vrot.slane %v9120_v59, 2  ;;  %v9113_v9 = vadd.f32 %v9112_v16, %v9111_v57  ;;  %v9126_v17 = vrot.slane %v9125_v60, 4 }
 0x63a   : > { %v8972_v61 = vrot.slane %v8971_v37, 4  ;;  %v18239_v5 = vunpack.c.l.bf16 %v16278_v34  ;;  %v10024_v55 = vunpack.c.l.b16 %v9764_v47  ;;  %v9096_v8 = vadd.f32 %v9095_v2, %v9094_v40  ;;  %v18241_v34 = vld [vmem:[#allocation123_spill] sm:$0xff]  ;;  %v8165_v47 = vpop.permute.xlu1 %8164 }
 0x63b   : > { %v9101_v24 = vadd.f32 %v9100_v28, %v9099_v26  ;;  %v10147_v35 = vsel %vm4514_vm4, %v10021_v62, %v10146_v52  ;;  %v10057_v29 = vunpack.c.l.b16 %v9797_v27  ;;  %v10058_v12 = vunpack.c.l.b16 %v9798_v19  ;;  %8504 = vperm.xlu0 %11102, %v18241_v34  }
 0x63c   : > { %v8644_v49 = vmul.f32 %v8135_v31, %v18239_v5  ;;  %v8973_v32 = vadd.f32 %v8972_v61, %v8971_v37  ;;  %8479 = vperm.xlu1 %11101, %v18240_v20   ;;  %v10023_v7 = vunpack.c.l.b16 %v9763_v44  ;;  %v9109_v53 = vrot.slane %v9108_v50, 1  ;;  %v18245_v37 = vld [vmem:[#allocation124_spill] sm:$0xff] }
 0x63d   : > { %v16581_v31 = vadd.f32 %v9121_v41, %v9120_v59  ;;  %v9114_v40 = vrot.slane %v9113_v9, 2  ;;  %v9127_v26 = vadd.f32 %v9126_v17, %v9125_v60  ;;  %v18243_v11 = vunpack.c.h.bf16 %v18242_v43  ;;  %v18244_v59 = vld [vmem:[#allocation10_spill] sm:$0xff]  ;;  %v8255_v60 = vpop.permute.xlu0 %8254 }
 0x63e   : > { %v8964_v42 = vsel %vm766_vm0, %v8644_v49, 0.0  ;;  %v8974_v57 = vrot.slane %v8973_v32, 2  ;;  %v9799_v4 = vpack.c.bf16 %v9096_v8, %v9096_v8  ;;  %v9102_v14 = vrot.slane %v9101_v24, 1  ;;  %v18249_v17 = vld [vmem:[#allocation122_spill] sm:$0xff]  ;;  %v18250_v8 = vld [vmem:[#allocation28_spill] sm:$0xff] }
 0x63f   : > { %v8965_v48 = vrot.slane %v8964_v42, 4  ;;  %v8647_v30 = vmul.f32 %v16551_v0, %v18243_v11  ;;  %v10141_v3 = vsel %vm4516_vm5, %v16455_v15, %v16526_v56  ;;  %v16590_v51 = vsel %vm4508_vm1, %v10058_v12, %v10057_v29  ;;  %8509 = vperm.xlu0 %11102, %v18245_v37   ;;  %v18253_v12 = vld [vmem:[#allocation130_spill] sm:$0xff] }
 0x640   : > { %v8975_v13 = vadd.f32 %v8974_v57, %v8973_v32  ;;  %v10142_v45 = vsel %vm4518_vm6, %v16532_v33, %v10141_v3  ;;  %8484 = vperm.xlu1 %11101, %v18244_v59   ;;  %v9110_v0 = vadd.f32 %v9109_v53, %v9108_v50  ;;  %v10148_v28 = vsel %vm4516_vm5, %v10022_v39, %v10147_v35  ;;  %v18251_v35 = vld [vmem:[#allocation118_spill] sm:$0xff]  ;;  %v8260_v53 = vpop.permute.xlu1 %8259  ;;  %v18258_v59 = vld [vmem:[#allocation120_spill] sm:$0xff] }
 0x641   : > { %v8966_v22 = vadd.f32 %v8965_v48, %v8964_v42  ;;  %v8985_v58 = vsel %vm766_vm0, %v8647_v30, 0.0  ;;  %v9115_v15 = vadd.f32 %v9114_v40, %v9113_v9  ;;  %v9128_v56 = vrot.slane %v9127_v26, 2  ;;  %v8275_v40 = vpop.permute.xlu0 %8274 }
 0x642   : > { %v8986_v2 = vrot.slane %v8985_v58, 4  ;;  %v10149_v62 = vsel %vm4518_vm6, %v10023_v7, %v10148_v28  ;;  %v18246_v27 = vunpack.c.l.bf16 %v18242_v43  ;;  %v10143_v52 = vsel %vm4520_vm7, %v16528_v21, %v10142_v45 }
 0x643   : > { %v8967_v16 = vrot.slane %v8966_v22, 2  ;;  %v10150_v44 = vsel %vm4520_vm7, %v10024_v55, %v10149_v62  ;;  %v8976_v50 = vrot.slane %v8975_v13, 1  ;;  %v18248_v41 = vunpack.c.h.bf16 %v18247_v25  ;;  %8514 = vperm.xlu0 %11102, %v18251_v35  }
 0x644   : > { %v8646_v19 = vmul.f32 %v16560_v23, %v18246_v27  ;;  %v8987_v10 = vadd.f32 %v8986_v2, %v8985_v58  ;;  %v10249_v39 = vpack.c.b16 %v10150_v44, %v10143_v52  ;;  %8489 = vperm.xlu1 %11101, %v18249_v17   ;;  %v10250_v32 = vpack.c.b16 %v16535_v54, %v18250_v8  ;;  %v18260_v52 = vld [vmem:[#allocation26_spill] sm:$0xff] }
 0x645   : > { %v8968_v33 = vadd.f32 %v8967_v16, %v8966_v22  ;;  %v8649_v9 = vmul.f32 %v16566_v46, %v18248_v41  ;;  %v18252_v55 = vunpack.c.l.bf16 %v18247_v25  ;;  %v18254_v42 = vunpack.c.h.bf16 %v18253_v12  ;;  %v18256_v22 = vld [vmem:[#allocation116_spill] sm:$0xff] }
 0x646   : > { %v8978_v61 = vsel %vm766_vm0, %v8646_v19, 0.0  ;;  %v8988_v49 = vrot.slane %v8987_v10, 2  ;;  %11070 = vmatprep.mubr.msk.bf16.mxu1 %vm766_vm0, %v10249_v39  ;;  %v18255_v20 = vunpack.c.l.bf16 %v18253_v12  ;;  %v10059_v57 = vunpack.c.l.b16 %v9799_v4  ;;  %v18257_v4 = vld [vmem:[#allocation24_spill] sm:$0xff]  ;;  %v18261_v39 = vld [vmem:[#allocation119_spill] sm:$0xff] }
 0x647   : > { %v8969_v5 = vrot.slane %v8968_v33, 1  ;;  %v8979_v23 = vrot.slane %v8978_v61, 4  ;;  %v8999_v21 = vsel %vm766_vm0, %v8649_v9, 0.0  ;;  %v8648_v29 = vmul.f32 %v8155_v63, %v18252_v55  ;;  %11071 = vmatmul.mubr.msk.bf16.vlgmr.msra.gmra.mxu1 %vm766_vm0, %v10250_v32  ;;  %8519 = vperm.xlu0 %11102, %v18257_v4  }
 0x648   : > { %v8651_v46 = vmul.f32 %v8170_v36, %v18254_v42  ;;  %v8650_v7 = vmul.f32 %v8165_v47, %v18255_v20  ;;  %v9103_v48 = vadd.f32 %v9102_v14, %v9101_v24  ;;  %v9123_v54 = vrot.slane %v16581_v31, 1  ;;  %8574 = vperm.xlu1 %11101, %v18256_v22   ;;  %v18266_v20 = vld [vmem:[#allocation128_spill] sm:$0xff] }
 0x649   : > { %v8980_v34 = vadd.f32 %v8979_v23, %v8978_v61  ;;  %v9801_v43 = vpack.c.bf16 %v9110_v0, %v9110_v0  ;;  %v8989_v11 = vadd.f32 %v8988_v49, %v8987_v10  ;;  %v9000_v30 = vrot.slane %v8999_v21, 4  ;;  %v8265_v10 = vpop.permute.xlu1 %8264 }
 0x64a   : > { %v8992_v63 = vsel %vm766_vm0, %v8648_v29, 0.0  ;;  %v9116_v36 = vrot.slane %v9115_v15, 1  ;;  %v9129_v3 = vadd.f32 %v9128_v56, %v9127_v26  ;;  %v9013_v45 = vsel %vm766_vm0, %v8651_v46, 0.0 }
 0x64b   : > { %v8981_v58 = vrot.slane %v8980_v34, 2  ;;  %v8977_v24 = vadd.f32 %v8976_v50, %v8975_v13  ;;  %v8970_v14 = vadd.f32 %v8969_v5, %v8968_v33  ;;  %v9006_v47 = vsel %vm766_vm0, %v8650_v7, 0.0  ;;  %v8285_v50 = vpop.permute.xlu0 %8284  ;;  %8524 = vperm.xlu0 %11102, %v18261_v39  }
 0x64c   : > { %v18259_v16 = vunpack.c.l.bf16 %v18258_v59  ;;  %v9800_v2 = vpack.c.bf16 %v9103_v48, %v9103_v48  ;;  %v9124_v28 = vadd.f32 %v9123_v54, %v16581_v31  ;;  %v9001_v37 = vadd.f32 %v9000_v30, %v8999_v21  ;;  %8494 = vperm.xlu1 %11101, %v18260_v52   ;;  %v18263_v21 = vld [vmem:[#allocation37_spill] sm:$0xff] }
 0x64d   : > { %v8993_v62 = vrot.slane %v8992_v63, 4  ;;  %v8990_v27 = vrot.slane %v8989_v11, 1  ;;  %v8982_v19 = vadd.f32 %v8981_v58, %v8980_v34  ;;  %v9014_v26 = vrot.slane %v9013_v45, 4  ;;  %v8270_v54 = vpop.permute.xlu1 %8269 }
 0x64e   : > { %v8668_v0 = vmul.f32 %v8255_v60, %v18259_v16  ;;  %v10180_v13 = vsel %vm4510_vm2, %v10059_v57, %v16590_v51  ;;  %v16635_v33 = vunpack.c.l.b16 %v9801_v43  ;;  %v9130_v44 = vrot.slane %v9129_v3, 1 }
 0x64f   : > { %v9007_v60 = vrot.slane %v9006_v47, 4  ;;  %v9117_v31 = vadd.f32 %v9116_v36, %v9115_v15  ;;  %v9782_v61 = vpack.c.bf16 %v8977_v24, %v8977_v24  ;;  %v9781_v25 = vpack.c.bf16 %v8970_v14, %v8970_v14  ;;  %v18264_v15 = vld [vmem:[#allocation121_spill] sm:$0xff]  ;;  %8529 = vperm.xlu0 %11102, %v18266_v20  }
 0x650   : > { %v9132_v56 = vsel %vm766_vm0, %v8668_v0, 0.0  ;;  %v9803_v9 = vpack.c.bf16 %v9124_v28, %v9124_v28  ;;  %v9002_v17 = vrot.slane %v9001_v37, 2  ;;  %v8994_v5 = vadd.f32 %v8993_v62, %v8992_v63  ;;  %8564 = vperm.xlu1 %11101, %v18263_v21   ;;  %v8290_v63 = vpop.permute.xlu0 %8289 }
 0x651   : > { %v9133_v41 = vrot.slane %v9132_v56, 4  ;;  %v18262_v49 = vunpack.c.h.bf16 %v18258_v59  ;;  %v10060_v8 = vunpack.c.l.b16 %v9800_v2  ;;  %v8991_v32 = vadd.f32 %v8990_v27, %v8989_v11 }
 0x652   : > { %v8983_v51 = vrot.slane %v8982_v19, 1  ;;  %v9015_v35 = vadd.f32 %v9014_v26, %v9013_v45  ;;  %v9008_v55 = vadd.f32 %v9007_v60, %v9006_v47  ;;  %v18265_v42 = vunpack.c.l.bf16 %v18264_v15  ;;  %v18268_v47 = vld [vmem:[#allocation25_spill] sm:$0xff]  ;;  %v8280_v60 = vpop.permute.xlu1 %8279 }
 0x653   : > { %v8669_v23 = vmul.f32 %v8260_v53, %v18262_v49  ;;  %v9134_v29 = vadd.f32 %v9133_v41, %v9132_v56  ;;  %v9802_v7 = vpack.c.bf16 %v9117_v31, %v9117_v31  ;;  %v16645_v57 = vadd.f32 %v9130_v44, %v9129_v3  ;;  %8609 = vperm.xlu0 %11102, %v18268_v47  }
 0x654   : > { %v8672_v46 = vmul.f32 %v8275_v40, %v18265_v42  ;;  %v10042_v48 = vunpack.c.l.b16 %v9782_v61  ;;  %v10041_v53 = vunpack.c.l.b16 %v9781_v25  ;;  %v9003_v34 = vadd.f32 %v9002_v17, %v9001_v37  ;;  %v18267_v40 = vld [vmem:[#allocation17_spill] sm:$0xff]  ;;  %v8180_v41 = vpop.permute.xlu0 %8179 }
 0x655   : > { %v9139_v12 = vsel %vm766_vm0, %v8669_v23, 0.0  ;;  %v8995_v43 = vrot.slane %v8994_v5, 2  ;;  %v16648_v22 = vunpack.c.l.b16 %v9803_v9  ;;  %v9784_v36 = vpack.c.bf16 %v8991_v32, %v8991_v32  ;;  %8569 = vperm.xlu1 %11101, %v18267_v40  }
 0x656   : > { %v9140_v11 = vrot.slane %v9139_v12, 4  ;;  %v9160_v30 = vsel %vm766_vm0, %v8672_v46, 0.0  ;;  %v8984_v58 = vadd.f32 %v8983_v51, %v8982_v19  ;;  %v9016_v45 = vrot.slane %v9015_v35, 2  ;;  %v8175_v46 = vpop.permute.xlu1 %8174 }
 0x657   : > { %v9009_v4 = vrot.slane %v9008_v55, 2  ;;  %v9135_v24 = vrot.slane %v9134_v29, 2  ;;  %v9161_v14 = vrot.slane %v9160_v30, 4  ;;  %v16653_v59 = vsel %vm4512_vm3, %v10060_v8, %v10180_v13 }
 0x658   : > { %v9141_v3 = vadd.f32 %v9140_v11, %v9139_v12  ;;  %v16655_v16 = vunpack.c.l.b16 %v9802_v7  ;;  %v9804_v0 = vpack.c.bf16 %v16645_v57, %v16645_v57  ;;  %v10165_v2 = vsel %vm4508_vm1, %v10042_v48, %v10041_v53  ;;  %v12067_v48 = vld [vmem:[%s12168_s7 + $0xa0] sm:$0xff]  }
 0x659   : > { %v9004_v28 = vrot.slane %v9003_v34, 1  ;;  %v8996_v37 = vadd.f32 %v8995_v43, %v8994_v5  ;;  %v9162_v27 = vadd.f32 %v9161_v14, %v9160_v30  ;;  %v9783_v19 = vpack.c.bf16 %v8984_v58, %v8984_v58 }
 0x65a   : > { %v9142_v62 = vrot.slane %v9141_v3, 2  ;;  %v9017_v26 = vadd.f32 %v9016_v45, %v9015_v35  ;;  %v18269_v56 = vunpack.c.l.bf16 %v16386_v6  ;;  %v18270_v44 = vunpack.c.l.bf16 %v16394_v38 }
 0x65b   : > { %v10044_v39 = vunpack.c.l.b16 %v9784_v36  ;;  %v9010_v31 = vadd.f32 %v9009_v4, %v9008_v55  ;;  %v9136_v61 = vadd.f32 %v9135_v24, %v9134_v29  ;;  %v8671_v5 = vmul.f32 %v8270_v54, %v7903_v1  ;;  %v8190_v54 = vpop.permute.xlu0 %8189 }
 0x65c   : > { %v8670_v52 = vmul.f32 %v8265_v10, %v18269_v56  ;;  %v8674_v13 = vmul.f32 %v8285_v50, %v18270_v44  ;;  %v9143_v25 = vadd.f32 %v9142_v62, %v9141_v3  ;;  %v8675_v49 = vmul.f32 %v8290_v63, %v7907_v18 }
 0x65d   : > { %v9005_v10 = vadd.f32 %v9004_v28, %v9003_v34  ;;  %v8997_v23 = vrot.slane %v8996_v37, 1  ;;  %v9163_v8 = vrot.slane %v9162_v27, 2  ;;  %v10043_v32 = vunpack.c.l.b16 %v9783_v19 }
 0x65e   : > { %v9146_v9 = vsel %vm766_vm0, %v8670_v52, 0.0  ;;  %v9174_v17 = vsel %vm766_vm0, %v8674_v13, 0.0  ;;  %v9018_v51 = vrot.slane %v9017_v26, 1  ;;  %v7905_v21 = vunpack.c.h.bf16 %v18264_v15 }
 0x65f   : > { %v9147_v50 = vrot.slane %v9146_v9, 4  ;;  %v9175_v35 = vrot.slane %v9174_v17, 4  ;;  %v9011_v55 = vrot.slane %v9010_v31, 1  ;;  %v9137_v29 = vrot.slane %v9136_v61, 1  ;;  %v8200_v44 = vpop.permute.xlu0 %8199 }
 0x660   : > { %v9144_v12 = vrot.slane %v9143_v25, 1  ;;  %v9153_v42 = vsel %vm766_vm0, %v8671_v5, 0.0  ;;  %v9181_v38 = vsel %vm766_vm0, %v8675_v49, 0.0  ;;  %v8673_v18 = vmul.f32 %v8280_v60, %v7905_v21 }
 0x661   : > { %v9148_v6 = vadd.f32 %v9147_v50, %v9146_v9  ;;  %v9176_v1 = vadd.f32 %v9175_v35, %v9174_v17  ;;  %v9786_v20 = vpack.c.bf16 %v9005_v10, %v9005_v10  ;;  %v8998_v7 = vadd.f32 %v8997_v23, %v8996_v37 }
 0x662   : > { %v9164_v57 = vadd.f32 %v9163_v8, %v9162_v27  ;;  %v7885_v53 = vunpack.c.h.bf16 %v12067_v48  ;;  %v16674_v34 = vunpack.c.l.b16 %v9804_v0  ;;  %v10166_v15 = vsel %vm4510_vm2, %v10043_v32, %v10165_v2  ;;  %v8185_v27 = vpop.permute.xlu1 %8184 }
 0x663   : > { %v9019_v43 = vadd.f32 %v9018_v51, %v9017_v26  ;;  %v9154_v11 = vrot.slane %v9153_v42, 4  ;;  %v9138_v30 = vadd.f32 %v9137_v29, %v9136_v61  ;;  %v9145_v63 = vadd.f32 %v9144_v12, %v9143_v25  ;;  %v12068_v61 = vld [vmem:[%s12168_s7 + $0xa8] sm:$0xff]  }
 0x664   : > { %v9182_v36 = vrot.slane %v9181_v38, 4  ;;  %v9167_v58 = vsel %vm766_vm0, %v8673_v18, 0.0  ;;  %v9012_v45 = vadd.f32 %v9011_v55, %v9010_v31  ;;  %v9149_v40 = vrot.slane %v9148_v6, 2  ;;  %v8210_v18 = vpop.permute.xlu0 %8209 }
 0x665   : > { %v9177_v4 = vrot.slane %v9176_v1, 2  ;;  %v8653_v24 = vmul.f32 %v8180_v41, %v7885_v53  ;;  %v16678_v3 = vunpack.c.l.b16 %v9786_v20  ;;  %v10167_v14 = vsel %vm4512_vm3, %v10044_v39, %v10166_v15  ;;  %v12069_v15 = vld [vmem:[%s12168_s7 + $0xb0] sm:$0xff]  }
 0x666   : > { %v9785_v47 = vpack.c.bf16 %v8998_v7, %v8998_v7  ;;  %v9165_v0 = vrot.slane %v9164_v57, 1  ;;  %v9788_v28 = vpack.c.bf16 %v9019_v43, %v9019_v43  ;;  %v9155_v2 = vadd.f32 %v9154_v11, %v9153_v42  ;;  %v8195_v12 = vpop.permute.xlu1 %8194 }
 0x667   : > { %v9168_v37 = vrot.slane %v9167_v58, 4  ;;  %v9027_v62 = vsel %vm766_vm0, %v8653_v24, 0.0  ;;  %v9805_v19 = vpack.c.bf16 %v9138_v30, %v9138_v30  ;;  %v9806_v26 = vpack.c.bf16 %v9145_v63, %v9145_v63 }
 0x668   : > { %v9183_v56 = vadd.f32 %v9182_v36, %v9181_v38  ;;  %v7884_v52 = vunpack.c.l.bf16 %v12067_v48  ;;  %v9150_v13 = vadd.f32 %v9149_v40, %v9148_v6  ;;  %v9178_v60 = vadd.f32 %v9177_v4, %v9176_v1 }
 0x669   : > { %v9028_v31 = vrot.slane %v9027_v62, 4  ;;  %v7887_v25 = vunpack.c.h.bf16 %v12068_v61  ;;  %v10045_v39 = vunpack.c.l.b16 %v9785_v47  ;;  %v9787_v41 = vpack.c.bf16 %v9012_v45, %v9012_v45 }
 0x66a   : > { %v16683_v9 = vadd.f32 %v9165_v0, %v9164_v57  ;;  %v8652_v17 = vmul.f32 %v8175_v46, %v7884_v52  ;;  %v16685_v5 = vunpack.c.l.b16 %v9788_v28  ;;  %v9156_v49 = vrot.slane %v9155_v2, 2  ;;  %v12070_v0 = vld [vmem:[%s12168_s7 + $0xb8] sm:$0xff]  }
 0x66b   : > { %v9169_v10 = vadd.f32 %v9168_v37, %v9167_v58  ;;  %v8655_v23 = vmul.f32 %v8190_v54, %v7887_v25  ;;  %v10065_v8 = vunpack.c.l.b16 %v9805_v19  ;;  %v10066_v50 = vunpack.c.l.b16 %v9806_v26 }
 0x66c   : > { %v9184_v32 = vrot.slane %v9183_v56, 2  ;;  %v9020_v51 = vsel %vm766_vm0, %v8652_v17, 0.0  ;;  %v9151_v35 = vrot.slane %v9150_v13, 1  ;;  %v9179_v21 = vrot.slane %v9178_v60, 1 }
 0x66d   : > { %v9029_v55 = vadd.f32 %v9028_v31, %v9027_v62  ;;  %v9021_v29 = vrot.slane %v9020_v51, 4  ;;  %v16689_v42 = vsel %vm4514_vm4, %v10045_v39, %v10167_v14  ;;  %v16691_v6 = vunpack.c.l.b16 %v9787_v41 }
 0x66e   : > { %v9809_v1 = vpack.c.bf16 %v16683_v9, %v16683_v9  ;;  %v9041_v38 = vsel %vm766_vm0, %v8655_v23, 0.0  ;;  %v9157_v46 = vadd.f32 %v9156_v49, %v9155_v2  ;;  %v9170_v20 = vrot.slane %v9169_v10, 2  ;;  %v8205_v2 = vpop.permute.xlu1 %8204 }
 0x66f   : > { %v9022_v7 = vadd.f32 %v9021_v29, %v9020_v51  ;;  %v9042_v57 = vrot.slane %v9041_v38, 4  ;;  %v10186_v48 = vsel %vm4508_vm1, %v10066_v50, %v10065_v8  ;;  %v9185_v53 = vadd.f32 %v9184_v32, %v9183_v56  ;;  %v8380_v56 = vpop.permute.xlu0 %8379  ;;  %v12071_v8 = vld [vmem:[%s12168_s7 + $0x140] sm:$0xff]  }
 0x670   : > { %v7886_v54 = vunpack.c.l.bf16 %v12068_v61  ;;  %v7889_v43 = vunpack.c.h.bf16 %v12069_v15  ;;  %v9152_v11 = vadd.f32 %v9151_v35, %v9150_v13  ;;  %v9180_v30 = vadd.f32 %v9179_v21, %v9178_v60 }
 0x671   : > { %v9030_v63 = vrot.slane %v9029_v55, 2  ;;  %v7888_v36 = vunpack.c.l.bf16 %v12069_v15  ;;  %v9023_v58 = vrot.slane %v9022_v7, 2  ;;  %v9043_v45 = vadd.f32 %v9042_v57, %v9041_v38 }
 0x672   : > { %v8654_v40 = vmul.f32 %v8185_v27, %v7886_v54  ;;  %v8657_v4 = vmul.f32 %v8200_v44, %v7889_v43  ;;  %v9158_v24 = vrot.slane %v9157_v46, 1  ;;  %v9171_v14 = vadd.f32 %v9170_v20, %v9169_v10 }
 0x673   : > { %v8656_v47 = vmul.f32 %v8195_v12, %v7888_v36  ;;  %v7891_v28 = vunpack.c.h.bf16 %v12070_v0  ;;  %v9186_v37 = vrot.slane %v9185_v53, 1  ;;  %v7890_v26 = vunpack.c.l.bf16 %v12070_v0  ;;  %v16712_v0 = vld [vmem:[%s12168_s7 + $0x100] sm:$0xff]  }
 0x674   : > { %v9034_v62 = vsel %vm766_vm0, %v8654_v40, 0.0  ;;  %v9055_v19 = vsel %vm766_vm0, %v8657_v4, 0.0  ;;  %v9807_v52 = vpack.c.bf16 %v9152_v11, %v9152_v11  ;;  %v9031_v13 = vadd.f32 %v9030_v63, %v9029_v55  ;;  %v8375_v55 = vpop.permute.xlu1 %8374 }
 0x675   : > { %v9035_v60 = vrot.slane %v9034_v62, 4  ;;  %v9056_v31 = vrot.slane %v9055_v19, 4  ;;  %v9024_v27 = vadd.f32 %v9023_v58, %v9022_v7  ;;  %v9044_v44 = vrot.slane %v9043_v45, 2 }
 0x676   : > { %v9048_v61 = vsel %vm766_vm0, %v8656_v47, 0.0  ;;  %v8659_v25 = vmul.f32 %v8210_v18, %v7891_v28  ;;  %v9159_v39 = vadd.f32 %v9158_v24, %v9157_v46  ;;  %v9172_v41 = vrot.slane %v9171_v14, 1  ;;  %v8300_v46 = vpop.permute.xlu0 %8299 }
 0x677   : > { %v9036_v9 = vadd.f32 %v9035_v60, %v9034_v62  ;;  %v8658_v17 = vmul.f32 %v8205_v2, %v7890_v26  ;;  %v9811_v49 = vpack.c.bf16 %v9180_v30, %v9180_v30  ;;  %v9057_v10 = vadd.f32 %v9056_v31, %v9055_v19 }
 0x678   : > { %v9049_v23 = vrot.slane %v9048_v61, 4  ;;  %v7925_v50 = vunpack.c.h.bf16 %v12071_v8  ;;  %v10067_v32 = vunpack.c.l.b16 %v9807_v52  ;;  %v9187_v51 = vadd.f32 %v9186_v37, %v9185_v53  ;;  %v8385_v2 = vpop.permute.xlu1 %8384 }
 0x679   : > { %v9032_v35 = vrot.slane %v9031_v13, 1  ;;  %v9069_v21 = vsel %vm766_vm0, %v8659_v25, 0.0  ;;  %v16704_v29 = vunpack.c.l.b16 %v9809_v1  ;;  %v9025_v12 = vrot.slane %v9024_v27, 1 }
 0x67a   : > { %v9045_v38 = vadd.f32 %v9044_v44, %v9043_v45  ;;  %v8693_v18 = vmul.f32 %v8380_v56, %v7925_v50  ;;  %v9808_v20 = vpack.c.bf16 %v9159_v39, %v9159_v39  ;;  %v9173_v7 = vadd.f32 %v9172_v41, %v9171_v14  ;;  %v8420_v26 = vpop.permute.xlu0 %8419 }
 0x67b   : > { %v9037_v57 = vrot.slane %v9036_v9, 2  ;;  %v9062_v54 = vsel %vm766_vm0, %v8658_v17, 0.0  ;;  %v9058_v15 = vrot.slane %v9057_v10, 2  ;;  %v9050_v43 = vadd.f32 %v9049_v23, %v9048_v61 }
 0x67c   : > { %v9070_v11 = vrot.slane %v9069_v21, 4  ;;  %v9307_v53 = vsel %vm766_vm0, %v8693_v18, 0.0  ;;  %v10187_v30 = vsel %vm4510_vm2, %v10067_v32, %v10186_v48  ;;  %v16709_v63 = vunpack.c.l.b16 %v9811_v49 }
 0x67d   : > { %v9812_v1 = vpack.c.bf16 %v9187_v51, %v9187_v51  ;;  %v9033_v36 = vadd.f32 %v9032_v35, %v9031_v13  ;;  %v9026_v58 = vadd.f32 %v9025_v12, %v9024_v27  ;;  %v9046_v45 = vrot.slane %v9045_v38, 1  ;;  %v12073_v51 = vld [vmem:[%s12168_s7 + $0x148] sm:$0xff]  }
 0x67e   : > { %v9063_v40 = vrot.slane %v9062_v54, 4  ;;  %v9308_v4 = vrot.slane %v9307_v53, 4  ;;  %v10068_v24 = vunpack.c.l.b16 %v9808_v20  ;;  %v9038_v14 = vadd.f32 %v9037_v57, %v9036_v9 }
 0x67f   : > { %v7924_v47 = vunpack.c.l.bf16 %v12071_v8  ;;  %v7909_v28 = vunpack.c.h.bf16 %v16712_v0  ;;  %v9810_v37 = vpack.c.bf16 %v9173_v7, %v9173_v7  ;;  %v9059_v62 = vadd.f32 %v9058_v15, %v9057_v10 }
 0x680   : > { %v9051_v19 = vrot.slane %v9050_v43, 2  ;;  %v9071_v48 = vadd.f32 %v9070_v11, %v9069_v21  ;;  %v16715_v56 = vunpack.c.l.b16 %v9812_v1  ;;  %v9309_v52 = vadd.f32 %v9308_v4, %v9307_v53  ;;  %v8390_v21 = vpop.permute.xlu1 %8389  ;;  %v16730_v53 = vld [vmem:[%s12168_s7 + $0x160] sm:$0xff]  }
 0x681   : > { %v8692_v13 = vmul.f32 %v8375_v55, %v7924_v47  ;;  %v8677_v60 = vmul.f32 %v8300_v46, %v7909_v28  ;;  %v9790_v31 = vpack.c.bf16 %v9033_v36, %v9033_v36  ;;  %v9789_v27 = vpack.c.bf16 %v9026_v58, %v9026_v58  ;;  %v8425_v46 = vpop.permute.xlu0 %8424 }
 0x682   : > { %v16717_v44 = vadd.f32 %v9046_v45, %v9045_v38  ;;  %v9064_v61 = vadd.f32 %v9063_v40, %v9062_v54  ;;  %v16720_v25 = vsel %vm4512_vm3, %v10068_v24, %v10187_v30  ;;  %v9039_v39 = vrot.slane %v9038_v14, 1 }
 0x683   : > { %v9300_v41 = vsel %vm766_vm0, %v8692_v13, 0.0  ;;  %v9195_v9 = vsel %vm766_vm0, %v8677_v60, 0.0  ;;  %v16724_v17 = vunpack.c.l.b16 %v9810_v37  ;;  %v9060_v49 = vrot.slane %v9059_v62, 1 }
 0x684   : > { %v9052_v10 = vadd.f32 %v9051_v19, %v9050_v43  ;;  %v9072_v23 = vrot.slane %v9071_v48, 2  ;;  %v9310_v8 = vrot.slane %v9309_v52, 2  ;;  %v9301_v50 = vrot.slane %v9300_v41, 4 }
 0x685   : > { %v9196_v32 = vrot.slane %v9195_v9, 4  ;;  %v7926_v35 = vunpack.c.l.bf16 %v12073_v51  ;;  %v10050_v55 = vunpack.c.l.b16 %v9790_v31  ;;  %v10049_v12 = vunpack.c.l.b16 %v9789_v27  ;;  %v8430_v27 = vpop.permute.xlu0 %8429 }
 0x686   : > { %v9792_v38 = vpack.c.bf16 %v16717_v44, %v16717_v44  ;;  %v9065_v18 = vrot.slane %v9064_v61, 2  ;;  %v9040_v20 = vadd.f32 %v9039_v39, %v9038_v14  ;;  %v9302_v7 = vadd.f32 %v9301_v50, %v9300_v41  ;;  %v12075_v14 = vld [vmem:[%s12168_s7 + $0x168] sm:$0xff]  }
 0x687   : > { %v9197_v57 = vadd.f32 %v9196_v32, %v9195_v9  ;;  %v8694_v54 = vmul.f32 %v8385_v2, %v7926_v35  ;;  %v9061_v15 = vadd.f32 %v9060_v49, %v9059_v62  ;;  %v9053_v43 = vrot.slane %v9052_v10, 1  ;;  %v12076_v62 = vld [vmem:[%s12168_s7 + $0x150] sm:$0xff]  }
 0x688   : > { %v9073_v11 = vadd.f32 %v9072_v23, %v9071_v48  ;;  %v7933_v30 = vunpack.c.h.bf16 %v16730_v53  ;;  %v9311_v1 = vadd.f32 %v9310_v8, %v9309_v52  ;;  %v9303_v36 = vrot.slane %v9302_v7, 2  ;;  %v8395_v48 = vpop.permute.xlu1 %8394 }
 0x689   : > { %v9198_v58 = vrot.slane %v9197_v57, 2  ;;  %v9314_v45 = vsel %vm766_vm0, %v8694_v54, 0.0  ;;  %v7927_v24 = vunpack.c.h.bf16 %v12073_v51  ;;  %v7934_v47 = vunpack.c.l.bf16 %v12075_v14 }
 0x68a   : > { %v9315_v40 = vrot.slane %v9314_v45, 4  ;;  %v8701_v4 = vmul.f32 %v8420_v26, %v7933_v30  ;;  %v9791_v28 = vpack.c.bf16 %v9040_v20, %v9040_v20  ;;  %v9066_v2 = vadd.f32 %v9065_v18, %v9064_v61 }
 0x68b   : > { %v9304_v37 = vadd.f32 %v9303_v36, %v9302_v7  ;;  %v7928_v19 = vunpack.c.l.bf16 %v12076_v62  ;;  %v8695_v31 = vmul.f32 %v8390_v21, %v7927_v24  ;;  %v8702_v52 = vmul.f32 %v8425_v46, %v7934_v47 }
 0x68c   : > { %v9316_v13 = vadd.f32 %v9315_v40, %v9314_v45  ;;  %v9363_v60 = vsel %vm766_vm0, %v8701_v4, 0.0  ;;  %v9054_v44 = vadd.f32 %v9053_v43, %v9052_v10  ;;  %v9312_v39 = vrot.slane %v9311_v1, 1  ;;  %v8400_v54 = vpop.permute.xlu1 %8399  ;;  %v8435_v45 = vpop.permute.xlu0 %8434 }
 0x68d   : > { %v9199_v41 = vadd.f32 %v9198_v58, %v9197_v57  ;;  %v9364_v9 = vrot.slane %v9363_v60, 4  ;;  %v9305_v26 = vrot.slane %v9304_v37, 1  ;;  %v9321_v23 = vsel %vm766_vm0, %v8695_v31, 0.0 }
 0x68e   : > { %v9317_v49 = vrot.slane %v9316_v13, 2  ;;  %v8696_v8 = vmul.f32 %v8395_v48, %v7928_v19  ;;  %v9067_v61 = vrot.slane %v9066_v2, 1  ;;  %v9322_v32 = vrot.slane %v9321_v23, 4 }
 0x68f   : > { %v9365_v50 = vadd.f32 %v9364_v9, %v9363_v60  ;;  %v9370_v51 = vsel %vm766_vm0, %v8702_v52, 0.0  ;;  %v9794_v35 = vpack.c.bf16 %v9061_v15, %v9061_v15  ;;  %v9074_v18 = vrot.slane %v9073_v11, 1 }
 0x690   : > { %v9318_v20 = vadd.f32 %v9317_v49, %v9316_v13  ;;  %v7935_v21 = vunpack.c.h.bf16 %v12075_v14  ;;  %v10051_v46 = vunpack.c.l.b16 %v9791_v28  ;;  %v9793_v7 = vpack.c.bf16 %v9054_v44, %v9054_v44  ;;  %v8405_v9 = vpop.permute.xlu1 %8404 }
 0x691   : > { %v9313_v10 = vadd.f32 %v9312_v39, %v9311_v1  ;;  %v9328_v57 = vsel %vm766_vm0, %v8696_v8, 0.0  ;;  %v10172_v43 = vsel %vm4508_vm1, %v10050_v55, %v10049_v12  ;;  %v9306_v30 = vadd.f32 %v9305_v26, %v9304_v37  ;;  %v8440_v8 = vpop.permute.xlu0 %8439 }
 0x692   : > { %v9200_v36 = vrot.slane %v9199_v41, 1  ;;  %v9371_v58 = vrot.slane %v9370_v51, 4  ;;  %v10052_v40 = vunpack.c.l.b16 %v9792_v38  ;;  %v9068_v4 = vadd.f32 %v9067_v61, %v9066_v2  ;;  %v16743_v2 = vld [vmem:[%s12168_s7 + $0x170] sm:$0xff]  }
 0x693   : > { %v9366_v24 = vrot.slane %v9365_v50, 2  ;;  %v9323_v47 = vadd.f32 %v9322_v32, %v9321_v23  ;;  %v10054_v15 = vunpack.c.l.b16 %v9794_v35  ;;  %v9319_v19 = vrot.slane %v9318_v20, 1 }
 0x694   : > { %v9329_v14 = vrot.slane %v9328_v57, 4  ;;  %v8703_v28 = vmul.f32 %v8430_v27, %v7935_v21  ;;  %v10173_v1 = vsel %vm4510_vm2, %v10051_v46, %v10172_v43  ;;  %v10053_v48 = vunpack.c.l.b16 %v9793_v7 }
 0x695   : > { %v9075_v13 = vadd.f32 %v9074_v18, %v9073_v11  ;;  %v9830_v60 = vpack.c.bf16 %v9313_v10, %v9313_v10  ;;  %v9829_v31 = vpack.c.bf16 %v9306_v30, %v9306_v30  ;;  %v9201_v55 = vadd.f32 %v9200_v36, %v9199_v41 }
 0x696   : > { %v9372_v12 = vadd.f32 %v9371_v58, %v9370_v51  ;;  %v7929_v37 = vunpack.c.h.bf16 %v12076_v62  ;;  %v9795_v52 = vpack.c.bf16 %v9068_v4, %v9068_v4  ;;  %v9367_v44 = vadd.f32 %v9366_v24, %v9365_v50 }
 0x697   : > { %v9324_v38 = vrot.slane %v9323_v47, 2  ;;  %v7936_v39 = vunpack.c.l.bf16 %v16743_v2  ;;  %v9320_v26 = vadd.f32 %v9319_v19, %v9318_v20  ;;  %v9330_v49 = vadd.f32 %v9329_v14, %v9328_v57  ;;  %v8445_v19 = vpop.permute.xlu0 %8444 }
 0x698   : > { %v9377_v27 = vsel %vm766_vm0, %v8703_v28, 0.0  ;;  %v8697_v23 = vmul.f32 %v8400_v54, %v7929_v37  ;;  %v10174_v11 = vsel %vm4512_vm3, %v10052_v40, %v10173_v1  ;;  %v9796_v61 = vpack.c.bf16 %v9075_v13, %v9075_v13 }
 0x699   : > { %v10090_v41 = vunpack.c.l.b16 %v9830_v60  ;;  %v8704_v32 = vmul.f32 %v8435_v45, %v7936_v39  ;;  %v10089_v62 = vunpack.c.l.b16 %v9829_v31  ;;  %v9814_v51 = vpack.c.bf16 %v9201_v55, %v9201_v55  ;;  %v8410_v45 = vpop.permute.xlu1 %8409 }
 0x69a   : > { %v9373_v50 = vrot.slane %v9372_v12, 2  ;;  %v9335_v35 = vsel %vm766_vm0, %v8697_v23, 0.0  ;;  %v10175_v18 = vsel %vm4514_vm4, %v10053_v48, %v10174_v11  ;;  %v9368_v21 = vrot.slane %v9367_v44, 1 }
 0x69b   : > { %v9325_v46 = vadd.f32 %v9324_v38, %v9323_v47  ;;  %v9378_v20 = vrot.slane %v9377_v27, 4  ;;  %v10055_v7 = vunpack.c.l.b16 %v9795_v52  ;;  %v9831_v10 = vpack.c.bf16 %v9320_v26, %v9320_v26 }
 0x69c   : > { %v9331_v57 = vrot.slane %v9330_v49, 2  ;;  %v9384_v54 = vsel %vm766_vm0, %v8704_v32, 0.0  ;;  %v10056_v43 = vunpack.c.l.b16 %v9796_v61  ;;  %v9336_v30 = vrot.slane %v9335_v35, 4 }
 0x69d   : > { %v9385_v36 = vrot.slane %v9384_v54, 4  ;;  %v10169_v58 = vsel %vm4516_vm5, %v16678_v3, %v16689_v42  ;;  %v10207_v40 = vsel %vm4508_vm1, %v10090_v41, %v10089_v62  ;;  %v16755_v4 = vunpack.c.l.b16 %v9814_v51  ;;  %v12078_v3 = vld [vmem:[%s12168_s7 + $0x158] sm:$0xff]   ;;  %v8295_v23 = vpop.permute.xlu1 %8294 }
 0x69e   : > { %v9374_v24 = vadd.f32 %v9373_v50, %v9372_v12  ;;  %v10170_v47 = vsel %vm4518_vm6, %v16691_v6, %v10169_v58  ;;  %v9369_v14 = vadd.f32 %v9368_v21, %v9367_v44  ;;  %v9326_v28 = vrot.slane %v9325_v46, 1 }
 0x69f   : > { %v9379_v1 = vadd.f32 %v9378_v20, %v9377_v27  ;;  %v10176_v48 = vsel %vm4516_vm5, %v10054_v15, %v10175_v18  ;;  %v10091_v13 = vunpack.c.l.b16 %v9831_v10  ;;  %v9332_v60 = vadd.f32 %v9331_v57, %v9330_v49 }
 0x6a0   : > { %v10177_v31 = vsel %vm4518_vm6, %v10055_v7, %v10176_v48  ;;  %v7930_v42 = vunpack.c.l.bf16 %v12078_v3  ;;  %v9337_v55 = vadd.f32 %v9336_v30, %v9335_v35  ;;  %v9386_v37 = vadd.f32 %v9385_v36, %v9384_v54  ;;  %v12079_v35 = vld [vmem:[%s12168_s7 + $0x178] sm:$0xff]  }
 0x6a1   : > { %v10171_v12 = vsel %vm4520_vm7, %v16685_v5, %v10170_v47  ;;  %v10178_v52 = vsel %vm4520_vm7, %v10056_v43, %v10177_v31  ;;  %v9375_v6 = vrot.slane %v9374_v24, 1  ;;  %v10182_v15 = vsel %vm4514_vm4, %v16635_v33, %v16653_v59  ;;  %v8450_v33 = vpop.permute.xlu0 %8449  ;;  %v8305_v54 = vpop.permute.xlu1 %8304 }
 0x6a2   : > { %v10251_v38 = vpack.c.b16 %v10178_v52, %v10171_v12  ;;  %v8698_v44 = vmul.f32 %v8405_v9, %v7930_v42  ;;  %v9838_v39 = vpack.c.bf16 %v9369_v14, %v9369_v14  ;;  %v16768_v26 = vadd.f32 %v9326_v28, %v9325_v46  ;;  %v12080_v28 = vld [vmem:[%s12168_s7 + $0x108] sm:$0xff]  }
 0x6a3   : > { %v9380_v49 = vrot.slane %v9379_v1, 2  ;;  %v10183_v27 = vsel %vm4516_vm5, %v16655_v16, %v10182_v15  ;;  %v9333_v11 = vrot.slane %v9332_v60, 1  ;;  %v7937_v61 = vunpack.c.h.bf16 %v16743_v2 }
 0x6a4   : > { %11074 = vmatprep.mubr.msk.bf16.mxu1 %vm766_vm0, %v10251_v38  ;;  %v9342_v5 = vsel %vm766_vm0, %v8698_v44, 0.0  ;;  %v10184_v9 = vsel %vm4518_vm6, %v16648_v22, %v10183_v27  ;;  %v9338_v59 = vrot.slane %v9337_v55, 2  ;;  %v9387_v41 = vrot.slane %v9386_v37, 2 }
 0x6a5   : > { %v9343_v32 = vrot.slane %v9342_v5, 4  ;;  %v10189_v62 = vsel %vm4514_vm4, %v16704_v29, %v16720_v25  ;;  %v8705_v51 = vmul.f32 %v8440_v8, %v7937_v61  ;;  %v7931_v50 = vunpack.c.h.bf16 %v12078_v3  ;;  %v8340_v36 = vpop.permute.xlu0 %8339  ;;  %v8310_v38 = vpop.permute.xlu1 %8309 }
 0x6a6   : > { %v10190_v16 = vsel %vm4516_vm5, %v16724_v17, %v10189_v62  ;;  %v7938_v18 = vunpack.c.l.bf16 %v12079_v35  ;;  %v16784_v21 = vsel %vm4510_vm2, %v10091_v13, %v10207_v40  ;;  %v9381_v22 = vadd.f32 %v9380_v49, %v9379_v1 }
 0x6a7   : > { %v10185_v2 = vsel %vm4520_vm7, %v16674_v34, %v10184_v9  ;;  %v10191_v46 = vsel %vm4518_vm6, %v16709_v63, %v10190_v16  ;;  %v9391_v25 = vsel %vm766_vm0, %v8705_v51, 0.0  ;;  %v8699_v17 = vmul.f32 %v8410_v45, %v7931_v50 }
 0x6a8   : > { %v10192_v29 = vsel %vm4520_vm7, %v16715_v56, %v10191_v46  ;;  %v8706_v8 = vmul.f32 %v8445_v19, %v7938_v18  ;;  %v9339_v20 = vadd.f32 %v9338_v59, %v9337_v55  ;;  %v9388_v7 = vadd.f32 %v9387_v41, %v9386_v37 }
 0x6a9   : > { %v9344_v10 = vadd.f32 %v9343_v32, %v9342_v5  ;;  %v10252_v57 = vpack.c.b16 %v10192_v29, %v10185_v2  ;;  %v16793_v43 = vunpack.c.l.b16 %v9838_v39  ;;  %v9376_v30 = vadd.f32 %v9375_v6, %v9374_v24  ;;  %v8345_v49 = vpop.permute.xlu0 %8344 }
 0x6aa   : > { %v9334_v34 = vadd.f32 %v9333_v11, %v9332_v60  ;;  %v7908_v63 = vunpack.c.l.bf16 %v16712_v0  ;;  %v9832_v56 = vpack.c.bf16 %v16768_v26, %v16768_v26  ;;  %v9382_v58 = vrot.slane %v9381_v22, 1  ;;  %v16803_v0 = vld [vmem:[%s12168_s7 + $0x120] sm:$0xff]  }
 0x6ab   : > { %11075 = vmatmul.mubr.msk.bf16.gmra.mxu1 %vm766_vm0, %v10252_v57  ;;  %v9392_v45 = vrot.slane %v9391_v25, 4  ;;  %v9349_v40 = vsel %vm766_vm0, %v8699_v17, 0.0  ;;  %v9398_v47 = vsel %vm766_vm0, %v8706_v8, 0.0  ;;  %v7939_v14 = vunpack.c.h.bf16 %v12079_v35 }
 0x6ac   : > { %v8676_v19 = vmul.f32 %v8295_v23, %v7908_v63  ;;  %v7910_v24 = vunpack.c.l.bf16 %v12080_v28  ;;  %v9340_v1 = vrot.slane %v9339_v20, 1  ;;  %v9389_v48 = vrot.slane %v9388_v7, 1 }
 0x6ad   : > { %v9345_v13 = vrot.slane %v9344_v10, 2  ;;  %v7917_v60 = vunpack.c.h.bf16 %v16803_v0  ;;  %v9833_v31 = vpack.c.bf16 %v9334_v34, %v9334_v34  ;;  %v8707_v42 = vmul.f32 %v8450_v33, %v7939_v14 }
 0x6ae   : > { %v9188_v3 = vsel %vm766_vm0, %v8676_v19, 0.0  ;;  %v8678_v55 = vmul.f32 %v8305_v54, %v7910_v24  ;;  %v9383_v37 = vadd.f32 %v9382_v58, %v9381_v22  ;;  %v9350_v12 = vrot.slane %v9349_v40, 4 }
 0x6af   : > { %v9399_v52 = vrot.slane %v9398_v47, 4  ;;  %v9189_v6 = vrot.slane %v9188_v3, 4  ;;  %v9393_v44 = vadd.f32 %v9392_v45, %v9391_v25  ;;  %v9405_v15 = vsel %vm766_vm0, %v8707_v42, 0.0  ;;  %v8315_v25 = vpop.permute.xlu1 %8314 }
 0x6b0   : > { %v9202_v39 = vsel %vm766_vm0, %v8678_v55, 0.0  ;;  %v8685_v26 = vmul.f32 %v8340_v36, %v7917_v60  ;;  %v9341_v27 = vadd.f32 %v9340_v1, %v9339_v20  ;;  %v9390_v23 = vadd.f32 %v9389_v48, %v9388_v7  ;;  %v12082_v48 = vld [vmem:[%s12168_s7 + $0x128] sm:$0xff]   ;;  %v12083_v60 = vld [vmem:[%s12168_s7 + $0x110] sm:$0xff]  }
 0x6b1   : > { %v9346_v11 = vadd.f32 %v9345_v13, %v9344_v10  ;;  %v9190_v5 = vadd.f32 %v9189_v6, %v9188_v3  ;;  %v10092_v9 = vunpack.c.l.b16 %v9832_v56  ;;  %v9839_v61 = vpack.c.bf16 %v9376_v30, %v9376_v30  ;;  %v8350_v10 = vpop.permute.xlu0 %8349 }
 0x6b2   : > { %v9406_v33 = vrot.slane %v9405_v15, 4  ;;  %v9203_v59 = vrot.slane %v9202_v39, 4  ;;  %v10093_v41 = vunpack.c.l.b16 %v9833_v31  ;;  %v9840_v32 = vpack.c.bf16 %v9383_v37, %v9383_v37 }
 0x6b3   : > { %v9351_v62 = vadd.f32 %v9350_v12, %v9349_v40  ;;  %v9251_v16 = vsel %vm766_vm0, %v8685_v26, 0.0  ;;  %v9394_v51 = vrot.slane %v9393_v44, 2  ;;  %v9400_v50 = vadd.f32 %v9399_v52, %v9398_v47  ;;  %v8320_v42 = vpop.permute.xlu1 %8319 }
 0x6b4   : > { %v9191_v35 = vrot.slane %v9190_v5, 2  ;;  %v9204_v18 = vadd.f32 %v9203_v59, %v9202_v39  ;;  %v9834_v22 = vpack.c.bf16 %v9341_v27, %v9341_v27  ;;  %v9841_v2 = vpack.c.bf16 %v9390_v23, %v9390_v23 }
 0x6b5   : > { %v9347_v46 = vrot.slane %v9346_v11, 1  ;;  %v7911_v29 = vunpack.c.h.bf16 %v12080_v28  ;;  %v10209_v17 = vsel %vm4512_vm3, %v10092_v9, %v16784_v21  ;;  %v9407_v8 = vadd.f32 %v9406_v33, %v9405_v15  ;;  %v8355_v6 = vpop.permute.xlu0 %8354 }
 0x6b6   : > { %v9205_v20 = vrot.slane %v9204_v18, 2  ;;  %v9252_v7 = vrot.slane %v9251_v16, 4  ;;  %v16812_v57 = vunpack.c.l.b16 %v9839_v61  ;;  %v16815_v54 = vsel %vm4514_vm4, %v10093_v41, %v10209_v17 }
 0x6b7   : > { %v9352_v30 = vrot.slane %v9351_v62, 2  ;;  %v8679_v34 = vmul.f32 %v8310_v38, %v7911_v29  ;;  %v16817_v63 = vunpack.c.l.b16 %v9840_v32  ;;  %v9395_v36 = vadd.f32 %v9394_v51, %v9393_v44 }
 0x6b8   : > { %v9401_v56 = vrot.slane %v9400_v50, 2  ;;  %v9192_v58 = vadd.f32 %v9191_v35, %v9190_v5  ;;  %v16819_v45 = vunpack.c.l.b16 %v9834_v22  ;;  %v16821_v21 = vunpack.c.l.b16 %v9841_v2  ;;  %v8325_v35 = vpop.permute.xlu1 %8324 }
 0x6b9   : > { %v9348_v40 = vadd.f32 %v9347_v46, %v9346_v11  ;;  %v9209_v47 = vsel %vm766_vm0, %v8679_v34, 0.0  ;;  %v9408_v19 = vrot.slane %v9407_v8, 2  ;;  %v9206_v14 = vadd.f32 %v9205_v20, %v9204_v18  ;;  %v12084_v46 = vld [vmem:[%s12168_s7 + $0x130] sm:$0xff]   ;;  %v12085_v34 = vld [vmem:[%s12168_s7 + $0x118] sm:$0xff]  }
 0x6ba   : > { %v9253_v28 = vadd.f32 %v9252_v7, %v9251_v16  ;;  %v9210_v24 = vrot.slane %v9209_v47, 4  ;;  %v9353_v1 = vadd.f32 %v9352_v30, %v9351_v62  ;;  %v7918_v13 = vunpack.c.l.bf16 %v12082_v48 }
 0x6bb   : > { %v7912_v31 = vunpack.c.l.bf16 %v12083_v60  ;;  %v7919_v3 = vunpack.c.h.bf16 %v12082_v48  ;;  %v9396_v55 = vrot.slane %v9395_v36, 1  ;;  %v9402_v37 = vadd.f32 %v9401_v56, %v9400_v50 }
 0x6bc   : > { %v9193_v12 = vrot.slane %v9192_v58, 1  ;;  %v9211_v52 = vadd.f32 %v9210_v24, %v9209_v47  ;;  %v9835_v38 = vpack.c.bf16 %v9348_v40, %v9348_v40  ;;  %v8686_v44 = vmul.f32 %v8345_v49, %v7918_v13 }
 0x6bd   : > { %v8680_v15 = vmul.f32 %v8315_v25, %v7912_v31  ;;  %v8687_v39 = vmul.f32 %v8350_v10, %v7919_v3  ;;  %v9409_v26 = vadd.f32 %v9408_v19, %v9407_v8  ;;  %v9207_v27 = vrot.slane %v9206_v14, 1  ;;  %v8360_v25 = vpop.permute.xlu0 %8359 }
 0x6be   : > { %v9254_v23 = vrot.slane %v9253_v28, 2  ;;  %v9212_v11 = vrot.slane %v9211_v52, 2  ;;  %v9354_v5 = vrot.slane %v9353_v1, 1  ;;  %v9258_v9 = vsel %vm766_vm0, %v8686_v44, 0.0 }
 0x6bf   : > { %v9216_v61 = vsel %vm766_vm0, %v8680_v15, 0.0  ;;  %v9265_v33 = vsel %vm766_vm0, %v8687_v39, 0.0  ;;  %v9397_v59 = vadd.f32 %v9396_v55, %v9395_v36  ;;  %v9403_v41 = vrot.slane %v9402_v37, 1 }
 0x6c0   : > { %v9194_v32 = vadd.f32 %v9193_v12, %v9192_v58  ;;  %v9213_v62 = vadd.f32 %v9212_v11, %v9211_v52  ;;  %v9259_v16 = vrot.slane %v9258_v9, 4  ;;  %v9217_v49 = vrot.slane %v9216_v61, 4 }
 0x6c1   : > { %v9266_v51 = vrot.slane %v9265_v33, 4  ;;  %v7913_v50 = vunpack.c.h.bf16 %v12083_v60  ;;  %v9410_v18 = vrot.slane %v9409_v26, 1  ;;  %v9208_v22 = vadd.f32 %v9207_v27, %v9206_v14  ;;  %v8365_v44 = vpop.permute.xlu0 %8364 }
 0x6c2   : > { %v9255_v2 = vadd.f32 %v9254_v23, %v9253_v28  ;;  %v7920_v29 = vunpack.c.l.bf16 %v12084_v46  ;;  %v9214_v17 = vrot.slane %v9213_v62, 1  ;;  %v9260_v8 = vadd.f32 %v9259_v16, %v9258_v9 }
 0x6c3   : > { %v9218_v20 = vadd.f32 %v9217_v49, %v9216_v61  ;;  %v8681_v7 = vmul.f32 %v8320_v42, %v7913_v50  ;;  %v9267_v10 = vadd.f32 %v9266_v51, %v9265_v33  ;;  %v7914_v36 = vunpack.c.l.bf16 %v12085_v34  ;;  %v8330_v42 = vpop.permute.xlu1 %8329 }
 0x6c4   : > { %v8688_v30 = vmul.f32 %v8355_v6, %v7920_v29  ;;  %v7921_v56 = vunpack.c.h.bf16 %v12084_v46  ;;  %v9842_v58 = vpack.c.bf16 %v9397_v59, %v9397_v59  ;;  %v9355_v40 = vadd.f32 %v9354_v5, %v9353_v1 }
 0x6c5   : > { %v9404_v47 = vadd.f32 %v9403_v41, %v9402_v37  ;;  %v9813_v19 = vpack.c.bf16 %v9194_v32, %v9194_v32  ;;  %v9411_v24 = vadd.f32 %v9410_v18, %v9409_v26  ;;  %v9256_v48 = vrot.slane %v9255_v2, 1  ;;  %v8370_v46 = vpop.permute.xlu0 %8369 }
 0x6c6   : > { %v9223_v14 = vsel %vm766_vm0, %v8681_v7, 0.0  ;;  %v9272_v28 = vsel %vm766_vm0, %v8688_v30, 0.0  ;;  %v16833_v13 = vunpack.c.l.b16 %v9835_v38  ;;  %v9215_v60 = vadd.f32 %v9214_v17, %v9213_v62 }
 0x6c7   : > { %v9261_v31 = vrot.slane %v9260_v8, 2  ;;  %v8682_v3 = vmul.f32 %v8325_v35, %v7914_v36  ;;  %v9815_v55 = vpack.c.bf16 %v9208_v22, %v9208_v22  ;;  %v9219_v12 = vrot.slane %v9218_v20, 2  ;;  %v8415_v50 = vpop.permute.xlu1 %8414 }
 0x6c8   : > { %v9268_v52 = vrot.slane %v9267_v10, 2  ;;  %v8689_v6 = vmul.f32 %v8360_v25, %v7921_v56  ;;  %v9836_v1 = vpack.c.bf16 %v9355_v40, %v9355_v40  ;;  %v9843_v37 = vpack.c.bf16 %v9404_v47, %v9404_v47 }
 0x6c9   : > { %v9224_v15 = vrot.slane %v9223_v14, 4  ;;  %v9273_v39 = vrot.slane %v9272_v28, 4  ;;  %v16835_v26 = vunpack.c.l.b16 %v9842_v58  ;;  %v10073_v27 = vunpack.c.l.b16 %v9813_v19  ;;  %v12086_v58 = vld [vmem:[%s12168_s7 + $0x138] sm:$0xff]  }
 0x6ca   : > { %v9844_v23 = vpack.c.bf16 %v9411_v24, %v9411_v24  ;;  %v9257_v11 = vadd.f32 %v9256_v48, %v9255_v2  ;;  %v9816_v38 = vpack.c.bf16 %v9215_v60, %v9215_v60  ;;  %v9262_v5 = vadd.f32 %v9261_v31, %v9260_v8 }
 0x6cb   : > { %v9230_v9 = vsel %vm766_vm0, %v8682_v3, 0.0  ;;  %v9279_v61 = vsel %vm766_vm0, %v8689_v6, 0.0  ;;  %v10075_v33 = vunpack.c.l.b16 %v9815_v55  ;;  %v9220_v59 = vadd.f32 %v9219_v12, %v9218_v20  ;;  %v8335_v31 = vpop.permute.xlu1 %8334 }
 0x6cc   : > { %v9269_v41 = vadd.f32 %v9268_v52, %v9267_v10  ;;  %v7915_v32 = vunpack.c.h.bf16 %v12085_v34  ;;  %v16839_v62 = vunpack.c.l.b16 %v9836_v1  ;;  %v16841_v16 = vunpack.c.l.b16 %v9843_v37  ;;  %v8540_v52 = vpop.permute.xlu0 %8539 }
 0x6cd   : > { %v9225_v49 = vadd.f32 %v9224_v15, %v9223_v14  ;;  %v9274_v51 = vadd.f32 %v9273_v39, %v9272_v28  ;;  %v9822_v35 = vpack.c.bf16 %v9257_v11, %v9257_v11  ;;  %v9231_v18 = vrot.slane %v9230_v9, 4 }
 0x6ce   : > { %v9280_v22 = vrot.slane %v9279_v61, 4  ;;  %v8683_v2 = vmul.f32 %v8330_v42, %v7915_v32  ;;  %v10193_v29 = vsel %vm4508_vm1, %v16755_v4, %v10073_v27  ;;  %v16845_v25 = vunpack.c.l.b16 %v9844_v23 }
 0x6cf   : > { %v10076_v17 = vunpack.c.l.b16 %v9816_v38  ;;  %v9263_v8 = vrot.slane %v9262_v5, 1  ;;  %v10194_v20 = vsel %vm4510_vm2, %v10075_v33, %v10193_v29  ;;  %v9221_v7 = vrot.slane %v9220_v59, 1 }
 0x6d0   : > { %v9270_v10 = vrot.slane %v9269_v41, 1  ;;  %v9237_v30 = vsel %vm766_vm0, %v8683_v2, 0.0  ;;  %v9226_v34 = vrot.slane %v9225_v49, 2  ;;  %v9275_v36 = vrot.slane %v9274_v51, 2  ;;  %v8460_v29 = vpop.permute.xlu0 %8459 }
 0x6d1   : > { %v9238_v56 = vrot.slane %v9237_v30, 4  ;;  %v7922_v40 = vunpack.c.l.bf16 %v12086_v58  ;;  %v16850_v47 = vunpack.c.l.b16 %v9822_v35  ;;  %v9232_v19 = vadd.f32 %v9231_v18, %v9230_v9  ;;  %v8535_v35 = vpop.permute.xlu1 %8534 }
 0x6d2   : > { %v9281_v24 = vadd.f32 %v9280_v22, %v9279_v61  ;;  %v7932_v4 = vunpack.c.l.bf16 %v16730_v53  ;;  %v16854_v48 = vsel %vm4512_vm3, %v10076_v17, %v10194_v20  ;;  %v9264_v14 = vadd.f32 %v9263_v8, %v9262_v5 }
 0x6d3   : > { %v8690_v28 = vmul.f32 %v8365_v44, %v7922_v40  ;;  %v7923_v60 = vunpack.c.h.bf16 %v12086_v58  ;;  %v9222_v3 = vadd.f32 %v9221_v7, %v9220_v59  ;;  %v16856_v42 = vadd.f32 %v9270_v10, %v9269_v41  ;;  %v16869_v40 = vld [vmem:[%s12168_s7 + $0x180] sm:$0xff]  }
 0x6d4   : > { %v9239_v55 = vadd.f32 %v9238_v56, %v9237_v30  ;;  %v8700_v12 = vmul.f32 %v8415_v50, %v7932_v4  ;;  %v9227_v6 = vadd.f32 %v9226_v34, %v9225_v49  ;;  %v9276_v1 = vadd.f32 %v9275_v36, %v9274_v51  ;;  %v12087_v51 = vld [vmem:[%s12168_s7 + $0x1c0] sm:$0xff]  }
 0x6d5   : > { %v9286_v37 = vsel %vm766_vm0, %v8690_v28, 0.0  ;;  %v8691_v15 = vmul.f32 %v8370_v46, %v7923_v60  ;;  %v9233_v53 = vrot.slane %v9232_v19, 2  ;;  %v9282_v39 = vrot.slane %v9281_v24, 2 }
 0x6d6   : > { %v9287_v27 = vrot.slane %v9286_v37, 4  ;;  %v9356_v23 = vsel %vm766_vm0, %v8700_v12, 0.0  ;;  %v9823_v44 = vpack.c.bf16 %v9264_v14, %v9264_v14  ;;  %v7916_v5 = vunpack.c.l.bf16 %v16803_v0  ;;  %v8545_v12 = vpop.permute.xlu1 %8544 }
 0x6d7   : > { %v9357_v11 = vrot.slane %v9356_v23, 4  ;;  %v9293_v38 = vsel %vm766_vm0, %v8691_v15, 0.0  ;;  %v9817_v9 = vpack.c.bf16 %v9222_v3, %v9222_v3  ;;  %v9240_v61 = vrot.slane %v9239_v55, 2  ;;  %v8580_v15 = vpop.permute.xlu0 %8579 }
 0x6d8   : > { %v9288_v33 = vadd.f32 %v9287_v27, %v9286_v37  ;;  %v9294_v59 = vrot.slane %v9293_v38, 4  ;;  %v9228_v41 = vrot.slane %v9227_v6, 1  ;;  %v8684_v49 = vmul.f32 %v8335_v31, %v7916_v5 }
 0x6d9   : > { %v9358_v32 = vadd.f32 %v9357_v11, %v9356_v23  ;;  %v7957_v50 = vunpack.c.h.bf16 %v12087_v51  ;;  %v9277_v18 = vrot.slane %v9276_v1, 1  ;;  %v9234_v22 = vadd.f32 %v9233_v53, %v9232_v19 }
 0x6da   : > { %v9283_v2 = vadd.f32 %v9282_v39, %v9281_v24  ;;  %v7956_v46 = vunpack.c.l.bf16 %v12087_v51  ;;  %v9289_v17 = vrot.slane %v9288_v33, 2  ;;  %v9295_v8 = vadd.f32 %v9294_v59, %v9293_v38 }
 0x6db   : > { %v9244_v0 = vsel %vm766_vm0, %v8684_v49, 0.0  ;;  %v8725_v20 = vmul.f32 %v8540_v52, %v7957_v50  ;;  %v9241_v7 = vadd.f32 %v9240_v61, %v9239_v55  ;;  %v9359_v10 = vrot.slane %v9358_v32, 2 }
 0x6dc   : > { %v9245_v30 = vrot.slane %v9244_v0, 4  ;;  %v8724_v34 = vmul.f32 %v8535_v35, %v7956_v46  ;;  %v16864_v36 = vunpack.c.l.b16 %v9823_v44  ;;  %v9824_v56 = vpack.c.bf16 %v16856_v42, %v16856_v42 }
 0x6dd   : > { %v9229_v58 = vadd.f32 %v9228_v41, %v9227_v6  ;;  %v7941_v19 = vunpack.c.h.bf16 %v16869_v40  ;;  %v9278_v24 = vadd.f32 %v9277_v18, %v9276_v1  ;;  %v9235_v4 = vrot.slane %v9234_v22, 1  ;;  %v12089_v1 = vld [vmem:[%s12168_s7 + $0x1c8] sm:$0xff]  }
 0x6de   : > { %v9284_v14 = vrot.slane %v9283_v2, 1  ;;  %v9531_v28 = vsel %vm766_vm0, %v8725_v20, 0.0  ;;  %v9290_v60 = vadd.f32 %v9289_v17, %v9288_v33  ;;  %v9296_v31 = vrot.slane %v9295_v8, 2 }
 0x6df   : > { %v9524_v3 = vsel %vm766_vm0, %v8724_v34, 0.0  ;;  %v8709_v55 = vmul.f32 %v8460_v29, %v7941_v19  ;;  %v10077_v52 = vunpack.c.l.b16 %v9817_v9  ;;  %v9242_v37 = vrot.slane %v9241_v7, 1 }
 0x6e0   : > { %v9360_v42 = vadd.f32 %v9359_v10, %v9358_v32  ;;  %v9246_v6 = vadd.f32 %v9245_v30, %v9244_v0  ;;  %v9818_v53 = vpack.c.bf16 %v9229_v58, %v9229_v58  ;;  %v9532_v39 = vrot.slane %v9531_v28, 4  ;;  %v8585_v0 = vpop.permute.xlu0 %8584  ;;  %v16888_v10 = vld [vmem:[%s12168_s7 + $0x1e0] sm:$0xff]  }
 0x6e1   : > { %v9525_v27 = vrot.slane %v9524_v3, 4  ;;  %v7958_v23 = vunpack.c.l.bf16 %v12089_v1  ;;  %v16875_v44 = vunpack.c.l.b16 %v9824_v56  ;;  %v9825_v11 = vpack.c.bf16 %v9278_v24, %v9278_v24 }
 0x6e2   : > { %v9236_v38 = vadd.f32 %v9235_v4, %v9234_v22  ;;  %v9285_v5 = vadd.f32 %v9284_v14, %v9283_v2  ;;  %v9291_v61 = vrot.slane %v9290_v60, 1  ;;  %v9297_v33 = vadd.f32 %v9296_v31, %v9295_v8  ;;  %v8550_v2 = vpop.permute.xlu1 %8549 }
 0x6e3   : > { %v9419_v59 = vsel %vm766_vm0, %v8709_v55, 0.0  ;;  %v8726_v41 = vmul.f32 %v8545_v12, %v7958_v23  ;;  %v16880_v9 = vsel %vm4514_vm4, %v10077_v52, %v16854_v48  ;;  %v9243_v32 = vadd.f32 %v9242_v37, %v9241_v7  ;;  %v12091_v12 = vld [vmem:[%s12168_s7 + $0x1e8] sm:$0xff]  }
 0x6e4   : > { %v9361_v49 = vrot.slane %v9360_v42, 1  ;;  %v9247_v51 = vrot.slane %v9246_v6, 2  ;;  %v16882_v50 = vunpack.c.l.b16 %v9818_v53  ;;  %v9533_v35 = vadd.f32 %v9532_v39, %v9531_v28  ;;  %v8590_v23 = vpop.permute.xlu0 %8589 }
 0x6e5   : > { %v9526_v18 = vadd.f32 %v9525_v27, %v9524_v3  ;;  %v9538_v22 = vsel %vm766_vm0, %v8726_v41, 0.0  ;;  %v9819_v46 = vpack.c.bf16 %v9236_v38, %v9236_v38  ;;  %v9826_v29 = vpack.c.bf16 %v9285_v5, %v9285_v5 }
 0x6e6   : > { %v9420_v17 = vrot.slane %v9419_v59, 4  ;;  %v9539_v8 = vrot.slane %v9538_v22, 4  ;;  %v16885_v20 = vunpack.c.l.b16 %v9825_v11  ;;  %v9292_v48 = vadd.f32 %v9291_v61, %v9290_v60 }
 0x6e7   : > { %v9298_v7 = vrot.slane %v9297_v33, 1  ;;  %v7965_v30 = vunpack.c.h.bf16 %v16888_v10  ;;  %v9820_v34 = vpack.c.bf16 %v9243_v32, %v9243_v32  ;;  %v9362_v56 = vadd.f32 %v9361_v49, %v9360_v42  ;;  %v8555_v42 = vpop.permute.xlu1 %8554 }
 0x6e8   : > { %v9248_v58 = vadd.f32 %v9247_v51, %v9246_v6  ;;  %v9540_v19 = vadd.f32 %v9539_v8, %v9538_v22  ;;  %v9534_v24 = vrot.slane %v9533_v35, 2  ;;  %v9527_v4 = vrot.slane %v9526_v18, 2  ;;  %v12092_v22 = vld [vmem:[%s12168_s7 + $0x1d0] sm:$0xff]  }
 0x6e9   : > { %v8733_v14 = vmul.f32 %v8580_v15, %v7965_v30  ;;  %v7959_v28 = vunpack.c.h.bf16 %v12089_v1  ;;  %v16891_v31 = vunpack.c.l.b16 %v9819_v46  ;;  %v16893_v3 = vunpack.c.l.b16 %v9826_v29 }
 0x6ea   : > { %v9421_v55 = vadd.f32 %v9420_v17, %v9419_v59  ;;  %v7966_v60 = vunpack.c.l.bf16 %v12091_v12  ;;  %v9827_v52 = vpack.c.bf16 %v9292_v48, %v9292_v48  ;;  %v16896_v37 = vadd.f32 %v9298_v7, %v9297_v33 }
 0x6eb   : > { %v9587_v53 = vsel %vm766_vm0, %v8733_v14, 0.0  ;;  %v8727_v39 = vmul.f32 %v8550_v2, %v7959_v28  ;;  %v16899_v6 = vunpack.c.l.b16 %v9820_v34  ;;  %v9837_v27 = vpack.c.bf16 %v9362_v56, %v9362_v56  ;;  %v8560_v34 = vpop.permute.xlu1 %8559  ;;  %v8595_v14 = vpop.permute.xlu0 %8594 }
 0x6ec   : > { %v9541_v15 = vrot.slane %v9540_v19, 2  ;;  %v9588_v1 = vrot.slane %v9587_v53, 4  ;;  %v9249_v11 = vrot.slane %v9248_v58, 1  ;;  %v9535_v38 = vadd.f32 %v9534_v24, %v9533_v35 }
 0x6ed   : > { %v9528_v5 = vadd.f32 %v9527_v4, %v9526_v18  ;;  %v9545_v61 = vsel %vm766_vm0, %v8727_v39, 0.0  ;;  %v9422_v59 = vrot.slane %v9421_v55, 2  ;;  %v8734_v32 = vmul.f32 %v8585_v0, %v7966_v60 }
 0x6ee   : > { %v9589_v41 = vadd.f32 %v9588_v1, %v9587_v53  ;;  %v9546_v33 = vrot.slane %v9545_v61, 4  ;;  %v16902_v49 = vunpack.c.l.b16 %v9827_v52  ;;  %v9828_v51 = vpack.c.bf16 %v16896_v37, %v16896_v37 }
 0x6ef   : > { %v7960_v2 = vunpack.c.l.bf16 %v12092_v22  ;;  %v7967_v46 = vunpack.c.h.bf16 %v12091_v12  ;;  %v9542_v29 = vadd.f32 %v9541_v15, %v9540_v19  ;;  %v9594_v35 = vsel %vm766_vm0, %v8734_v32, 0.0  ;;  %v12093_v19 = vld [vmem:[%s12168_s7 + $0x1f0] sm:$0xff]  }
 0x6f0   : > { %v9590_v17 = vrot.slane %v9589_v41, 2  ;;  %v9547_v8 = vadd.f32 %v9546_v33, %v9545_v61  ;;  %v9250_v18 = vadd.f32 %v9249_v11, %v9248_v58  ;;  %v9536_v48 = vrot.slane %v9535_v38, 1 }
 0x6f1   : > { %v9595_v7 = vrot.slane %v9594_v35, 4  ;;  %v8728_v30 = vmul.f32 %v8555_v42, %v7960_v2  ;;  %v9529_v0 = vrot.slane %v9528_v5, 1  ;;  %v9423_v56 = vadd.f32 %v9422_v59, %v9421_v55 }
 0x6f2   : > { %v9548_v24 = vrot.slane %v9547_v8, 2  ;;  %v8735_v4 = vmul.f32 %v8590_v23, %v7967_v46  ;;  %v7961_v12 = vunpack.c.h.bf16 %v12092_v22  ;;  %v7968_v52 = vunpack.c.l.bf16 %v12093_v19  ;;  %v8455_v46 = vpop.permute.xlu1 %8454 }
 0x6f3   : > { %v9596_v28 = vadd.f32 %v9595_v7, %v9594_v35  ;;  %v9552_v60 = vsel %vm766_vm0, %v8728_v30, 0.0  ;;  %v9543_v37 = vrot.slane %v9542_v29, 1  ;;  %v9591_v53 = vadd.f32 %v9590_v17, %v9589_v41 }
 0x6f4   : > { %v9549_v39 = vadd.f32 %v9548_v24, %v9547_v8  ;;  %v9553_v15 = vrot.slane %v9552_v60, 4  ;;  %v9601_v1 = vsel %vm766_vm0, %v8735_v4, 0.0  ;;  %v8729_v42 = vmul.f32 %v8560_v34, %v7961_v12 }
 0x6f5   : > { %v9597_v58 = vrot.slane %v9596_v28, 2  ;;  %v8736_v11 = vmul.f32 %v8595_v14, %v7968_v52  ;;  %v10097_v61 = vunpack.c.l.b16 %v9837_v27  ;;  %v9537_v55 = vadd.f32 %v9536_v48, %v9535_v38 }
 0x6f6   : > { %v9530_v59 = vadd.f32 %v9529_v0, %v9528_v5  ;;  %v9554_v23 = vadd.f32 %v9553_v15, %v9552_v60  ;;  %v9821_v33 = vpack.c.bf16 %v9250_v18, %v9250_v18  ;;  %v9602_v32 = vrot.slane %v9601_v1, 4 }
 0x6f7   : > { %v9559_v2 = vsel %vm766_vm0, %v8729_v42, 0.0  ;;  %v9608_v22 = vsel %vm766_vm0, %v8736_v11, 0.0  ;;  %v9424_v35 = vrot.slane %v9423_v56, 1  ;;  %v9544_v41 = vadd.f32 %v9543_v37, %v9542_v29  ;;  %v8600_v37 = vpop.permute.xlu0 %8599 }
 0x6f8   : > { %v9555_v17 = vrot.slane %v9554_v23, 2  ;;  %v9560_v8 = vrot.slane %v9559_v2, 4  ;;  %v9592_v7 = vrot.slane %v9591_v53, 1  ;;  %v9550_v30 = vrot.slane %v9549_v39, 1 }
 0x6f9   : > { %v9598_v24 = vadd.f32 %v9597_v58, %v9596_v28  ;;  %v7940_v34 = vunpack.c.l.bf16 %v16869_v40  ;;  %v9862_v27 = vpack.c.bf16 %v9537_v55, %v9537_v55  ;;  %v9861_v38 = vpack.c.bf16 %v9530_v59, %v9530_v59  ;;  %v8465_v58 = vpop.permute.xlu1 %8464  ;;  %v16917_v59 = vpop.f32.mrf.mxu1 }
 0x6fa   : > { %v9603_v5 = vadd.f32 %v9602_v32, %v9601_v1  ;;  %v9609_v48 = vrot.slane %v9608_v22, 4  ;;  %v16914_v18 = vunpack.c.l.b16 %v9828_v51  ;;  %v9556_v0 = vadd.f32 %v9555_v17, %v9554_v23 }
 0x6fb   : > { %v9561_v4 = vadd.f32 %v9560_v8, %v9559_v2  ;;  %v8708_v14 = vmul.f32 %v8455_v46, %v7940_v34  ;;  %v10081_v60 = vunpack.c.l.b16 %v9821_v33  ;;  %v9425_v12 = vadd.f32 %v9424_v35, %v9423_v56  ;;  %v16922_v2 = vld [vmem:[%s12168_s7 + $0x188] sm:$0xff]   ;;  %v16932_v34 = vpop.f32.mrf.mxu1 }
 0x6fc   : > { %v9863_v52 = vpack.c.bf16 %v9544_v41, %v9544_v41  ;;  %v7969_v29 = vunpack.c.h.bf16 %v12093_v19  ;;  %v9593_v15 = vadd.f32 %v9592_v7, %v9591_v53  ;;  %v9551_v42 = vadd.f32 %v9550_v30, %v9549_v39  ;;  %v8605_v30 = vpop.permute.xlu0 %8604 }
 0x6fd   : > { %v9599_v28 = vrot.slane %v9598_v24, 1  ;;  %v9412_v40 = vsel %vm766_vm0, %v8708_v14, 0.0  ;;  %v10122_v11 = vunpack.c.l.b16 %v9862_v27  ;;  %v10121_v1 = vunpack.c.l.b16 %v9861_v38  ;;  %v8470_v14 = vpop.permute.xlu1 %8469 }
 0x6fe   : > { %v9604_v55 = vrot.slane %v9603_v5, 2  ;;  %v9610_v51 = vadd.f32 %v9609_v48, %v9608_v22  ;;  %v10214_v23 = vsel %vm4508_vm1, %v16793_v43, %v10097_v61  ;;  %v9557_v56 = vrot.slane %v9556_v0, 1 }
 0x6ff   : > { %v9562_v33 = vrot.slane %v9561_v4, 2  ;;  %v8737_v19 = vmul.f32 %v8600_v37, %v7969_v29  ;;  %v9846_v32 = vpack.c.bf16 %v9425_v12, %v9425_v12  ;;  %v10123_v53 = vunpack.c.l.b16 %v9863_v52 }
 0x700   : > { %v9413_v39 = vrot.slane %v9412_v40, 4  ;;  %v7942_v46 = vunpack.c.l.bf16 %v16922_v2  ;;  %v10200_v35 = vsel %vm4508_vm1, %v16850_v47, %v10081_v60  ;;  %v9870_v41 = vpack.c.bf16 %v9593_v15, %v9593_v15 }
 0x701   : > { %v9864_v22 = vpack.c.bf16 %v9551_v42, %v9551_v42  ;;  %v16927_v17 = vadd.f32 %v9599_v28, %v9598_v24  ;;  %v10215_v43 = vsel %vm4510_vm2, %v16812_v57, %v10214_v23  ;;  %v10235_v61 = vsel %vm4508_vm1, %v10122_v11, %v10121_v1  ;;  %v16955_v42 = vpop.f32.mrf.mxu1 }
 0x702   : > { %v9605_v8 = vadd.f32 %v9604_v55, %v9603_v5  ;;  %v9611_v7 = vrot.slane %v9610_v51, 2  ;;  %v16934_v27 = vadd.f32 %v9557_v56, %v9556_v0  ;;  %v16936_v38 = vadd.f32 %v9562_v33, %v9561_v4  ;;  %v8500_v56 = vpop.permute.xlu0 %8499 }
 0x703   : > { %v9615_v47 = vsel %vm766_vm0, %v8737_v19, 0.0  ;;  %v8710_v48 = vmul.f32 %v8465_v58, %v7942_v46  ;;  %v10201_v24 = vsel %vm4510_vm2, %v16864_v36, %v10200_v35  ;;  %v16941_v60 = vunpack.c.l.b16 %v9846_v32 }
 0x704   : > { %v16944_v57 = vsel %vm4510_vm2, %v10123_v53, %v10235_v61  ;;  %v9414_v5 = vadd.f32 %v9413_v39, %v9412_v40  ;;  %v16946_v12 = vunpack.c.l.b16 %v9870_v41  ;;  %v16948_v52 = vunpack.c.l.b16 %v9864_v22  ;;  %v8475_v53 = vpop.permute.xlu1 %8474 }
 0x705   : > { %v9871_v0 = vpack.c.bf16 %v16927_v17, %v16927_v17  ;;  %v9426_v4 = vsel %vm766_vm0, %v8710_v48, 0.0  ;;  %v9606_v29 = vrot.slane %v9605_v8, 1  ;;  %v16953_v37 = vadd.f32 %v9611_v7, %v9610_v51  ;;  %v17001_v7 = vld [vmem:[%s12168_s7 + $0x1a0] sm:$0xff]  }
 0x706   : > { %v9616_v36 = vrot.slane %v9615_v47, 4  ;;  %v9427_v15 = vrot.slane %v9426_v4, 4  ;;  %v9865_v28 = vpack.c.bf16 %v16934_v27, %v16934_v27  ;;  %v9564_v40 = vrot.slane %v16936_v38, 1 }
 0x707   : > { %v10202_v58 = vsel %vm4512_vm3, %v16875_v44, %v10201_v24  ;;  %v10216_v11 = vsel %vm4512_vm3, %v16817_v63, %v10215_v43  ;;  %v9415_v1 = vrot.slane %v9414_v5, 2  ;;  %v10197_v51 = vsel %vm4516_vm5, %v16882_v50, %v16880_v9  ;;  %v16976_v63 = vld [vmem:[%s12168_s7 + $0x1f8] sm:$0xff]  }
 0x708   : > { %v9428_v55 = vadd.f32 %v9427_v15, %v9426_v4  ;;  %v10203_v23 = vsel %vm4514_vm4, %v16885_v20, %v10202_v58  ;;  %v10198_v33 = vsel %vm4518_vm6, %v16891_v31, %v10197_v51  ;;  %v10217_v44 = vsel %vm4514_vm4, %v16821_v21, %v10216_v11  ;;  %v16983_v31 = vpop.f32.mrf.mxu1  ;;  %v12098_v58 = vld [vmem:[%s12168_s7 + $0x1a8] sm:$0xff]  }
 0x709   : > { %v10204_v19 = vsel %vm4516_vm5, %v16893_v3, %v10203_v23  ;;  %v7970_v32 = vunpack.c.l.bf16 %v16976_v63  ;;  %v9617_v39 = vadd.f32 %v9616_v36, %v9615_v47  ;;  %v10199_v50 = vsel %vm4520_vm7, %v16899_v6, %v10198_v33  ;;  %v12097_v36 = vld [vmem:[%s12168_s7 + $0x190] sm:$0xff]  }
 0x70a   : > { %v9429_v9 = vrot.slane %v9428_v55, 2  ;;  %v10205_v20 = vsel %vm4518_vm6, %v16902_v49, %v10204_v19  ;;  %v10211_v21 = vsel %vm4516_vm5, %v16819_v45, %v16815_v54  ;;  %v10218_v46 = vsel %vm4516_vm5, %v16835_v26, %v10217_v44 }
 0x70b   : > { %v10206_v3 = vsel %vm4520_vm7, %v16914_v18, %v10205_v20  ;;  %v8738_v35 = vmul.f32 %v8605_v30, %v7970_v32  ;;  %v16992_v41 = vadd.f32 %v9606_v29, %v9605_v8  ;;  %v9416_v22 = vadd.f32 %v9415_v1, %v9414_v5  ;;  %v8505_v8 = vpop.permute.xlu0 %8504  ;;  %v17009_v30 = vpop.f32.mrf.mxu1 }
 0x70c   : > { %v10253_v6 = vpack.c.b16 %v10206_v3, %v10199_v50  ;;  %v10212_v49 = vsel %vm4518_vm6, %v16833_v13, %v10211_v21  ;;  %v10219_v43 = vsel %vm4518_vm6, %v16841_v16, %v10218_v46  ;;  %v7943_v61 = vunpack.c.h.bf16 %v16922_v2  ;;  %v8480_v5 = vpop.permute.xlu1 %8479 }
 0x70d   : > { %v9622_v18 = vsel %vm766_vm0, %v8738_v35, 0.0  ;;  %v7949_v54 = vunpack.c.h.bf16 %v17001_v7  ;;  %v9618_v45 = vrot.slane %v9617_v39, 2  ;;  %v9430_v26 = vadd.f32 %v9429_v9, %v9428_v55  ;;  %v17017_v33 = vpop.f32.mrf.mxu1 }
 0x70e   : > { %11078 = vmatprep.mubr.msk.bf16.mxu1 %vm766_vm0, %v10253_v6  ;;  %v10213_v13 = vsel %vm4520_vm7, %v16839_v62, %v10212_v49  ;;  %v10220_v16 = vsel %vm4520_vm7, %v16845_v25, %v10219_v43  ;;  %v9623_v47 = vrot.slane %v9622_v18, 4  ;;  %v8711_v48 = vmul.f32 %v8470_v14, %v7943_v61 }
 0x70f   : > { %v10254_v2 = vpack.c.b16 %v10220_v16, %v10213_v13  ;;  %v8717_v24 = vmul.f32 %v8500_v56, %v7949_v54  ;;  %v9613_v4 = vrot.slane %v16953_v37, 1  ;;  %v9417_v29 = vrot.slane %v9416_v22, 1  ;;  %v8510_v46 = vpop.permute.xlu0 %8509 }
 0x710   : > { %v7944_v15 = vunpack.c.l.bf16 %v12097_v36  ;;  %v7950_v11 = vunpack.c.l.bf16 %v12098_v58  ;;  %v9624_v62 = vadd.f32 %v9623_v47, %v9622_v18  ;;  %v9433_v25 = vsel %vm766_vm0, %v8711_v48, 0.0  ;;  %v8485_v43 = vpop.permute.xlu1 %8484 }
 0x711   : > { %11079 = vmatmul.mubr.msk.bf16.gmra.mxu1 %vm766_vm0, %v10254_v2  ;;  %v9475_v1 = vsel %vm766_vm0, %v8717_v24, 0.0  ;;  %v7945_v55 = vunpack.c.h.bf16 %v12097_v36  ;;  %v9619_v51 = vadd.f32 %v9618_v45, %v9617_v39  ;;  %v9434_v23 = vrot.slane %v9433_v25, 4  ;;  %v17022_v45 = vpop.f32.mrf.mxu1 }
 0x712   : > { %v9476_v14 = vrot.slane %v9475_v1, 4  ;;  %v8712_v56 = vmul.f32 %v8475_v53, %v7944_v15  ;;  %v9431_v19 = vrot.slane %v9430_v26, 1  ;;  %v8718_v44 = vmul.f32 %v8505_v8, %v7950_v11 }
 0x713   : > { %v8713_v32 = vmul.f32 %v8480_v5, %v7945_v55  ;;  %v7951_v9 = vunpack.c.h.bf16 %v12098_v58  ;;  %v9625_v50 = vrot.slane %v9624_v62, 2  ;;  %v9435_v20 = vadd.f32 %v9434_v23, %v9433_v25  ;;  %v12099_v25 = vld [vmem:[%s12168_s7 + $0x198] sm:$0xff]   ;;  %v8515_v55 = vpop.permute.xlu0 %8514  ;;  %v17032_v23 = vpop.f32.mrf.mxu1 }
 0x714   : > { %v9477_v3 = vadd.f32 %v9476_v14, %v9475_v1  ;;  %v9440_v21 = vsel %vm766_vm0, %v8712_v56, 0.0  ;;  %v9418_v35 = vadd.f32 %v9417_v29, %v9416_v22  ;;  %v9482_v49 = vsel %vm766_vm0, %v8718_v44, 0.0 }
 0x715   : > { %v9441_v6 = vrot.slane %v9440_v21, 4  ;;  %v9447_v39 = vsel %vm766_vm0, %v8713_v32, 0.0  ;;  %v9620_v53 = vrot.slane %v9619_v51, 1  ;;  %v9436_v18 = vrot.slane %v9435_v20, 2 }
 0x716   : > { %v9478_v61 = vrot.slane %v9477_v3, 2  ;;  %v9483_v54 = vrot.slane %v9482_v49, 4  ;;  %v9432_v13 = vadd.f32 %v9431_v19, %v9430_v26  ;;  %v9448_v8 = vrot.slane %v9447_v39, 4 }
 0x717   : > { %v9442_v16 = vadd.f32 %v9441_v6, %v9440_v21  ;;  %v8719_v2 = vmul.f32 %v8510_v46, %v7951_v9  ;;  %v9565_v22 = vadd.f32 %v9564_v40, %v16936_v38  ;;  %v9626_v47 = vadd.f32 %v9625_v50, %v9624_v62  ;;  %v8490_v62 = vpop.permute.xlu1 %8489  ;;  %v12100_v6 = vld [vmem:[%s12168_s7 + $0x1b0] sm:$0xff]  }
 0x718   : > { %v9437_v48 = vadd.f32 %v9436_v18, %v9435_v20  ;;  %v9479_v24 = vadd.f32 %v9478_v61, %v9477_v3  ;;  %v9614_v5 = vadd.f32 %v9613_v4, %v16953_v37  ;;  %v9845_v29 = vpack.c.bf16 %v9418_v35, %v9418_v35  ;;  %v17046_v3 = vpop.f32.mrf.mxu1  ;;  %v8520_v18 = vpop.permute.xlu0 %8519 }
 0x719   : > { %v9484_v36 = vadd.f32 %v9483_v54, %v9482_v49  ;;  %v9489_v15 = vsel %vm766_vm0, %v8719_v2, 0.0  ;;  %v9872_v58 = vpack.c.bf16 %v16992_v41, %v16992_v41  ;;  %v9443_v26 = vrot.slane %v9442_v16, 2 }
 0x71a   : > { %v9449_v11 = vadd.f32 %v9448_v8, %v9447_v39  ;;  %v7946_v1 = vunpack.c.l.bf16 %v12099_v25  ;;  %v17037_v38 = vunpack.c.l.b16 %v9871_v0  ;;  %v9621_v37 = vadd.f32 %v9620_v53, %v9619_v51 }
 0x71b   : > { %v9847_v40 = vpack.c.bf16 %v9432_v13, %v9432_v13  ;;  %v9438_v4 = vrot.slane %v9437_v48, 1  ;;  %v9866_v14 = vpack.c.bf16 %v9565_v22, %v9565_v22  ;;  %v9627_v56 = vrot.slane %v9626_v47, 1 }
 0x71c   : > { %v9480_v41 = vrot.slane %v9479_v24, 1  ;;  %v9490_v19 = vrot.slane %v9489_v15, 4  ;;  %v17042_v44 = vunpack.c.l.b16 %v9865_v28  ;;  %v9873_v32 = vpack.c.bf16 %v9614_v5, %v9614_v5  ;;  %v17058_v5 = vpop.f32.mrf.mxu1 }
 0x71d   : > { %v10105_v9 = vunpack.c.l.b16 %v9845_v29  ;;  %v9485_v50 = vrot.slane %v9484_v36, 2  ;;  %v17044_v17 = vunpack.c.l.b16 %v9872_v58  ;;  %v9444_v0 = vadd.f32 %v9443_v26, %v9442_v16  ;;  %v8575_v16 = vpop.permute.xlu1 %8574 }
 0x71e   : > { %v9450_v51 = vrot.slane %v9449_v11, 2  ;;  %v8714_v20 = vmul.f32 %v8485_v43, %v7946_v1  ;;  %v9874_v21 = vpack.c.bf16 %v9621_v37, %v9621_v37  ;;  %v10107_v46 = vunpack.c.l.b16 %v9847_v40 }
 0x71f   : > { %v9439_v35 = vadd.f32 %v9438_v4, %v9437_v48  ;;  %v7952_v49 = vunpack.c.l.bf16 %v12100_v6  ;;  %v17049_v39 = vunpack.c.l.b16 %v9866_v14  ;;  %v17051_v27 = vadd.f32 %v9627_v56, %v9626_v47  ;;  %v8525_v56 = vpop.permute.xlu0 %8524 }
 0x720   : > { %v9481_v28 = vadd.f32 %v9480_v41, %v9479_v24  ;;  %v9491_v53 = vadd.f32 %v9490_v19, %v9489_v15  ;;  %v17053_v61 = vunpack.c.l.b16 %v9873_v32  ;;  %v10221_v54 = vsel %vm4508_vm1, %v16941_v60, %v10105_v9  ;;  %v17068_v41 = vpop.f32.mrf.mxu1 }
 0x721   : > { %v9486_v43 = vadd.f32 %v9485_v50, %v9484_v36  ;;  %v8720_v13 = vmul.f32 %v8515_v55, %v7952_v49  ;;  %v9445_v8 = vrot.slane %v9444_v0, 1  ;;  %v9451_v2 = vadd.f32 %v9450_v51, %v9449_v11  ;;  %v12101_v50 = vld [vmem:[%s12168_s7 + $0x1b8] sm:$0xff]  }
 0x722   : > { %v9454_v22 = vsel %vm766_vm0, %v8714_v20, 0.0  ;;  %v7947_v48 = vunpack.c.h.bf16 %v12099_v25  ;;  %v17060_v47 = vunpack.c.l.b16 %v9874_v21  ;;  %v10222_v24 = vsel %vm4510_vm2, %v10107_v46, %v10221_v54  ;;  %v8495_v20 = vpop.permute.xlu1 %8494 }
 0x723   : > { %v9848_v29 = vpack.c.bf16 %v9439_v35, %v9439_v35  ;;  %v9496_v15 = vsel %vm766_vm0, %v8720_v13, 0.0  ;;  %v9854_v36 = vpack.c.bf16 %v9481_v28, %v9481_v28  ;;  %v9492_v58 = vrot.slane %v9491_v53, 2 }
 0x724   : > { %v8715_v26 = vmul.f32 %v8490_v62, %v7947_v48  ;;  %v9487_v11 = vrot.slane %v9486_v43, 1  ;;  %v9455_v1 = vrot.slane %v9454_v22, 4  ;;  %v9497_v55 = vrot.slane %v9496_v15, 4 }
 0x725   : > { %v7953_v25 = vunpack.c.h.bf16 %v12100_v6  ;;  %v9446_v37 = vadd.f32 %v9445_v8, %v9444_v0  ;;  %v9452_v40 = vrot.slane %v9451_v2, 1  ;;  %v7964_v14 = vunpack.c.l.bf16 %v16888_v10 }
 0x726   : > { %v9461_v4 = vsel %vm766_vm0, %v8715_v26, 0.0  ;;  %v10108_v19 = vunpack.c.l.b16 %v9848_v29  ;;  %v7954_v51 = vunpack.c.l.bf16 %v12101_v50  ;;  %v17071_v62 = vunpack.c.l.b16 %v9854_v36 }
 0x727   : > { %v9462_v32 = vrot.slane %v9461_v4, 4  ;;  %v8721_v9 = vmul.f32 %v8520_v18, %v7953_v25  ;;  %v9493_v21 = vadd.f32 %v9492_v58, %v9491_v53  ;;  %v8732_v46 = vmul.f32 %v8575_v16, %v7964_v14  ;;  %v17076_v18 = vpop.f32.mrf.mxu1 }
 0x728   : > { %v7948_v0 = vunpack.c.l.bf16 %v17001_v7  ;;  %v9456_v35 = vadd.f32 %v9455_v1, %v9454_v22  ;;  %v9498_v6 = vadd.f32 %v9497_v55, %v9496_v15  ;;  %v8722_v10 = vmul.f32 %v8525_v56, %v7954_v51 }
 0x729   : > { %v9503_v49 = vsel %vm766_vm0, %v8721_v9, 0.0  ;;  %v9463_v28 = vadd.f32 %v9462_v32, %v9461_v4  ;;  %v9580_v13 = vsel %vm766_vm0, %v8732_v46, 0.0  ;;  %v9849_v48 = vpack.c.bf16 %v9446_v37, %v9446_v37  ;;  %v8530_v32 = vpop.permute.xlu0 %8529 }
 0x72a   : > { %v9504_v54 = vrot.slane %v9503_v49, 4  ;;  %v8716_v8 = vmul.f32 %v8495_v20, %v7948_v0  ;;  %v9488_v29 = vadd.f32 %v9487_v11, %v9486_v43  ;;  %v9581_v36 = vrot.slane %v9580_v13, 4  ;;  %v17083_v43 = vpop.f32.mrf.mxu1  ;;  %v8565_v20 = vpop.permute.xlu1 %8564 }
 0x72b   : > { %v9510_v53 = vsel %vm766_vm0, %v8722_v10, 0.0  ;;  %v17079_v16 = vadd.f32 %v9452_v40, %v9451_v2  ;;  %v10223_v58 = vsel %vm4512_vm3, %v10108_v19, %v10222_v24  ;;  %v9457_v26 = vrot.slane %v9456_v35, 2  ;;  %18271 = vst [vmem:[#allocation13_spill] sm:$0xff] %v17083_v43  ;;  %v12102_v10 = vld [vmem:[%s12168_s7 + $0x1d8] sm:$0xff]  }
 0x72c   : > { %v9505_v7 = vadd.f32 %v9504_v54, %v9503_v49  ;;  %v9511_v22 = vrot.slane %v9510_v53, 4  ;;  %v9468_v15 = vsel %vm766_vm0, %v8716_v8, 0.0  ;;  %v9582_v1 = vadd.f32 %v9581_v36, %v9580_v13 }
 0x72d   : > { %v9469_v55 = vrot.slane %v9468_v15, 4  ;;  %v9494_v25 = vrot.slane %v9493_v21, 1  ;;  %v9499_v4 = vrot.slane %v9498_v6, 2  ;;  %v9464_v14 = vrot.slane %v9463_v28, 2 }
 0x72e   : > { %v9512_v37 = vadd.f32 %v9511_v22, %v9510_v53  ;;  %v9855_v11 = vpack.c.bf16 %v9488_v29, %v9488_v29  ;;  %v9506_v56 = vrot.slane %v9505_v7, 2  ;;  %v9583_v2 = vrot.slane %v9582_v1, 2  ;;  %v17090_v53 = vpop.f32.mrf.mxu1 }
 0x72f   : > { %v9470_v40 = vadd.f32 %v9469_v55, %v9468_v15  ;;  %v10109_v9 = vunpack.c.l.b16 %v9849_v48  ;;  %v7955_v19 = vunpack.c.h.bf16 %v12101_v50  ;;  %v9458_v46 = vadd.f32 %v9457_v26, %v9456_v35  ;;  %18272 = vst [vmem:[#allocation11_spill] sm:$0xff] %v17090_v53 }
 0x730   : > { %v9513_v24 = vrot.slane %v9512_v37, 2  ;;  %v9584_v0 = vadd.f32 %v9583_v2, %v9582_v1  ;;  %v7962_v54 = vunpack.c.l.bf16 %v12102_v10  ;;  %v17088_v13 = vadd.f32 %v9494_v25, %v9493_v21 }
 0x731   : > { %v9471_v49 = vrot.slane %v9470_v40, 2  ;;  %v9500_v8 = vadd.f32 %v9499_v4, %v9498_v6  ;;  %v9465_v29 = vadd.f32 %v9464_v14, %v9463_v28  ;;  %v8723_v36 = vmul.f32 %v8530_v32, %v7955_v19  ;;  %v17099_v14 = vpop.f32.mrf.mxu1  ;;  %v8570_v32 = vpop.permute.xlu1 %8569 }
 0x732   : > { %v9507_v22 = vadd.f32 %v9506_v56, %v9505_v7  ;;  %v9585_v48 = vrot.slane %v9584_v0, 1  ;;  %v8730_v55 = vmul.f32 %v8565_v20, %v7962_v54  ;;  %v17093_v60 = vsel %vm4514_vm4, %v10109_v9, %v10223_v58  ;;  %18273 = vst [vmem:[#allocation20_spill] sm:$0xff] %v17099_v14 }
 0x733   : > { %v9472_v15 = vadd.f32 %v9471_v49, %v9470_v40  ;;  %v10115_v50 = vunpack.c.l.b16 %v9855_v11  ;;  %v9514_v35 = vadd.f32 %v9513_v24, %v9512_v37  ;;  %v9517_v26 = vsel %vm766_vm0, %v8723_v36, 0.0  ;;  %v8610_v37 = vpop.permute.xlu0 %8609  ;;  %v17102_v14 = vpop.f32.mrf.mxu1 }
 0x734   : > { %v9459_v1 = vrot.slane %v9458_v46, 1  ;;  %v9586_v2 = vadd.f32 %v9585_v48, %v9584_v0  ;;  %v9518_v25 = vrot.slane %v9517_v26, 4  ;;  %v9856_v6 = vpack.c.bf16 %v17088_v13, %v17088_v13 }
 0x735   : > { %v9473_v21 = vrot.slane %v9472_v15, 1  ;;  %v9501_v28 = vrot.slane %v9500_v8, 1  ;;  %v9466_v4 = vrot.slane %v9465_v29, 1  ;;  %v9566_v7 = vsel %vm766_vm0, %v8730_v55, 0.0 }
 0x736   : > { %v9508_v56 = vrot.slane %v9507_v22, 1  ;;  %v9519_v40 = vadd.f32 %v9518_v25, %v9517_v26  ;;  %v9567_v11 = vrot.slane %v9566_v7, 4  ;;  %v9869_v9 = vpack.c.bf16 %v9586_v2, %v9586_v2 }
 0x737   : > { %v9474_v58 = vadd.f32 %v9473_v21, %v9472_v15  ;;  %v9515_v24 = vrot.slane %v9514_v35, 1  ;;  %v7971_v19 = vunpack.c.h.bf16 %v16976_v63  ;;  %v7963_v20 = vunpack.c.h.bf16 %v12102_v10 }
 0x738   : > { %v9460_v0 = vadd.f32 %v9459_v1, %v9458_v46  ;;  %v9520_v54 = vrot.slane %v9519_v40, 2  ;;  %v9568_v13 = vadd.f32 %v9567_v11, %v9566_v7  ;;  %v9502_v36 = vadd.f32 %v9501_v28, %v9500_v8 }
 0x739   : > { %v9853_v49 = vpack.c.bf16 %v9474_v58, %v9474_v58  ;;  %v9467_v48 = vadd.f32 %v9466_v4, %v9465_v29  ;;  %v8739_v55 = vmul.f32 %v8610_v37, %v7971_v19  ;;  %v8731_v51 = vmul.f32 %v8570_v32, %v7963_v20 }
 0x73a   : > { %v9509_v15 = vadd.f32 %v9508_v56, %v9507_v22  ;;  %v9521_v21 = vadd.f32 %v9520_v54, %v9519_v40  ;;  %v9569_v25 = vrot.slane %v9568_v13, 2  ;;  %v10129_v43 = vunpack.c.l.b16 %v9869_v9  ;;  %v11072_v22 = vpop.f32.mrf.mxu1 }
 0x73b   : > { %v10113_v26 = vunpack.c.l.b16 %v9853_v49  ;;  %v9516_v2 = vadd.f32 %v9515_v24, %v9514_v35  ;;  %v9629_v53 = vsel %vm766_vm0, %v8739_v55, 0.0  ;;  %v9573_v63 = vsel %vm766_vm0, %v8731_v51, 0.0 }
 0x73c   : > { %v9851_v46 = vpack.c.bf16 %v9460_v0, %v9460_v0  ;;  %v9522_v10 = vrot.slane %v9521_v21, 1  ;;  %v9570_v1 = vadd.f32 %v9569_v25, %v9568_v13  ;;  %v9630_v7 = vrot.slane %v9629_v53, 4 }
 0x73d   : > { %v9857_v8 = vpack.c.bf16 %v9502_v36, %v9502_v36  ;;  %v9852_v29 = vpack.c.bf16 %v9467_v48, %v9467_v48  ;;  %v10228_v28 = vsel %vm4508_vm1, %v17071_v62, %v10113_v26  ;;  %v9574_v4 = vrot.slane %v9573_v63, 4  ;;  %v10327_v36 = vpop.f32.mrf.mxu1 }
 0x73e   : > { %v9858_v56 = vpack.c.bf16 %v9509_v15, %v9509_v15  ;;  %v9523_v58 = vadd.f32 %v9522_v10, %v9521_v21  ;;  %v9571_v40 = vrot.slane %v9570_v1, 1  ;;  %v9631_v11 = vadd.f32 %v9630_v7, %v9629_v53 }
 0x73f   : > { %v18274_v35 = vpack.c.bf16 %v17079_v16, %v17079_v16  ;;  %v10242_v51 = vsel %vm4508_vm1, %v16946_v12, %v10129_v43  ;;  %v9859_v32 = vpack.c.bf16 %v9516_v2, %v9516_v2  ;;  %v9575_v9 = vadd.f32 %v9574_v4, %v9573_v63  ;;  %v11073_v10 = vpop.f32.mrf.mxu1 }
 0x740   : > { %v10229_v24 = vsel %vm4510_vm2, %v10115_v50, %v10228_v28  ;;  %v9860_v19 = vpack.c.bf16 %v9523_v58, %v9523_v58  ;;  %v9572_v20 = vadd.f32 %v9571_v40, %v9570_v1  ;;  %v9632_v62 = vrot.slane %v9631_v11, 2 }
 0x741   : > { %v10110_v37 = vunpack.c.l.b16 %v18274_v35  ;;  %v10116_v0 = vunpack.c.l.b16 %v9856_v6  ;;  %v10111_v49 = vunpack.c.l.b16 %v9851_v46  ;;  %v10117_v54 = vunpack.c.l.b16 %v9857_v8 }
 0x742   : > { %v9576_v13 = vrot.slane %v9575_v9, 2  ;;  %v10112_v53 = vunpack.c.l.b16 %v9852_v29  ;;  %v10118_v48 = vunpack.c.l.b16 %v9858_v56  ;;  %v10243_v16 = vsel %vm4510_vm2, %v17037_v38, %v10242_v51 }
 0x743   : > { %v9633_v55 = vadd.f32 %v9632_v62, %v9631_v11  ;;  %v10119_v15 = vunpack.c.l.b16 %v9859_v32  ;;  %v9867_v12 = vpack.c.bf16 %v9572_v20, %v9572_v20  ;;  %v10230_v26 = vsel %vm4512_vm3, %v10116_v0, %v10229_v24  ;;  %v10330_v32 = vpop.f32.mrf.mxu1 }
 0x744   : > { %v9577_v43 = vadd.f32 %v9576_v13, %v9575_v9  ;;  %v10120_v50 = vunpack.c.l.b16 %v9860_v19  ;;  %v10225_v6 = vsel %vm4516_vm5, %v10110_v37, %v17093_v60  ;;  %v10231_v25 = vsel %vm4514_vm4, %v10117_v54, %v10230_v26 }
 0x745   : > { %v9634_v21 = vrot.slane %v9633_v55, 1  ;;  %v10232_v63 = vsel %vm4516_vm5, %v10118_v48, %v10231_v25  ;;  %v10244_v46 = vsel %vm4512_vm3, %v17044_v17, %v10243_v16  ;;  %v10408_v38 = vmax.f32 %v11072_v22, 0.0 }
 0x746   : > { %v9578_v2 = vrot.slane %v9577_v43, 1  ;;  %v10226_v7 = vsel %vm4518_vm6, %v10111_v49, %v10225_v6  ;;  %v10233_v8 = vsel %vm4518_vm6, %v10119_v15, %v10232_v63  ;;  %v10245_v29 = vsel %vm4514_vm4, %v17053_v61, %v10244_v46 }
 0x747   : > { %v9635_v1 = vadd.f32 %v9634_v21, %v9633_v55  ;;  %v10127_v28 = vunpack.c.l.b16 %v9867_v12  ;;  %v10227_v4 = vsel %vm4520_vm7, %v10112_v53, %v10226_v7  ;;  %v10234_v56 = vsel %vm4520_vm7, %v10120_v50, %v10233_v8  ;;  %10442 = vrot.lane.b32.xlu1 %v10408_v38, %s12113_s26 }
 0x748   : > { %v9579_v60 = vadd.f32 %v9578_v2, %v9577_v43  ;;  %v10255_v22 = vpack.c.b16 %v10234_v56, %v10227_v4  ;;  %v10246_v58 = vsel %vm4516_vm5, %v17060_v47, %v10245_v29  ;;  %v10409_v40 = vmax.f32 %v11073_v10, 0.0 }
 0x749   : > { %v9876_v17 = vpack.c.bf16 %v9635_v1, %v9635_v1  ;;  %v10237_v11 = vsel %vm4512_vm3, %v16948_v52, %v16944_v57  ;;  %v18275_v61 = vpack.c.bf16 %v17051_v27, %v17051_v27  ;;  %v10406_v51 = vmax.f32 %v10327_v36, 0.0 }
 0x74a   : > { %v9868_v37 = vpack.c.bf16 %v9579_v60, %v9579_v60  ;;  %v10238_v9 = vsel %vm4514_vm4, %v17042_v44, %v10237_v11  ;;  %11082 = vmatprep.mubr.msk.bf16.mxu1 %vm766_vm0, %v10255_v22  ;;  %10444 = vrot.lane.b32.xlu0 %v10409_v40, %s12113_s26  ;;  %v10407_v20 = vmax.f32 %v10330_v32, 0.0  ;;  %v10392_v16 = vmax.f32 %v16917_v59, 0.0 }
 0x74b   : > { %v10135_v35 = vunpack.c.l.b16 %v18275_v61  ;;  %v10136_v24 = vunpack.c.l.b16 %v9876_v17  ;;  %v10239_v19 = vsel %vm4516_vm5, %v17049_v39, %v10238_v9  ;;  %10438 = vrot.lane.b32.xlu1 %v10406_v51, %s12113_s26  ;;  %v10393_v55 = vmax.f32 %v16955_v42, 0.0 }
 0x74c   : > { %v10128_v47 = vunpack.c.l.b16 %v9868_v37  ;;  %v10240_v52 = vsel %vm4518_vm6, %v10127_v28, %v10239_v19  ;;  %v10390_v12 = vmax.f32 %v16932_v34, 0.0  ;;  %v10391_v26 = vmax.f32 %v16983_v31, 0.0 }
 0x74d   : > { %v10247_v57 = vsel %vm4518_vm6, %v10135_v35, %v10246_v58  ;;  %v10396_v7 = vmax.f32 %v17009_v30, 0.0  ;;  %v10394_v28 = vmax.f32 %v17017_v33, 0.0  ;;  %v10397_v60 = vmax.f32 %v17022_v45, 0.0 }
 0x74e   : > { %v10248_v27 = vsel %vm4520_vm7, %v10136_v24, %v10247_v57  ;;  %v10241_v44 = vsel %vm4520_vm7, %v10128_v47, %v10240_v52  ;;  %10440 = vrot.lane.b32.xlu0 %v10407_v20, %s12113_s26  ;;  %v10395_v30 = vmax.f32 %v17032_v23, 0.0  ;;  %v10400_v32 = vmax.f32 %v17046_v3, 0.0 }
 0x74f   : > { %v10256_v62 = vpack.c.b16 %v10248_v27, %v10241_v44  ;;  %v10398_v47 = vmax.f32 %v17058_v5, 0.0  ;;  %v10401_v19 = vmax.f32 %v17068_v41, 0.0  ;;  %v10399_v3 = vmax.f32 %v17076_v18, 0.0  ;;  %v18276_v5 = vld [vmem:[#allocation11_spill] sm:$0xff] }
 0x750   : > { %v10402_v41 = vmax.f32 %v18276_v5, 0.0 }
 0x751   : > { %11083 = vmatmul.mubr.msk.bf16.gmra.mxu1 %vm766_vm0, %v10256_v62 }
 0x76b   : > { %v11076_v0 = vpop.f32.mrf.mxu1 }
 0x76c   : > { %v10412_v49 = vmax.f32 %v11076_v0, 0.0 }
 0x76d   : > { %v10343_v39 = vpop.f32.mrf.mxu1 }
 0x76e   : > { %10450 = vrot.lane.b32.xlu1 %v10412_v49, %s12113_s26  ;;  %v10410_v13 = vmax.f32 %v10343_v39, 0.0  ;;  %v18277_v39 = vld [vmem:[#allocation13_spill] sm:$0xff] }
 0x76f   : > { %v11077_v54 = vpop.f32.mrf.mxu1 }
 0x770   : > { %v10413_v36 = vmax.f32 %v11077_v54, 0.0  ;;  %v10404_v54 = vmax.f32 %v18277_v39, 0.0 }
 0x771   : > { %v10346_v53 = vpop.f32.mrf.mxu1 }
 0x772   : > { %10446 = vrot.lane.b32.xlu1 %v10410_v13, %s12113_s26  ;;  %10452 = vrot.lane.b32.xlu0 %v10413_v36, %s12113_s26  ;;  %v10411_v48 = vmax.f32 %v10346_v53, 0.0  ;;  %v10403_v13 = vmax.f32 %v17102_v14, 0.0 }
 0x776   : > { %10448 = vrot.lane.b32.xlu0 %v10411_v48, %s12113_s26 }
 0x7b9   : > { %v10443_v15 = vpop.permute.xlu1 %10442 }
 0x7ba   : > { %v10489_v43 = vsel %vm10486_vm9, %v10392_v16, %v10443_v15  ;;  %v18278_v16 = vld [vmem:[#allocation20_spill] sm:$0xff] }
 0x7bb   : > { %10505 = vst.msk [vmem:[%s17161_s29 + $0x10] sm:$0xff] %vm766_vm0, %v10489_v43 }
 0x7bc   : > { %v10445_v59 = vpop.permute.xlu0 %10444 }
 0x7bd   : > { %v10490_v50 = vsel %vm10486_vm9, %v10393_v55, %v10445_v59  ;;  %v10439_v21 = vpop.permute.xlu1 %10438  ;;  %v10405_v55 = vmax.f32 %v18278_v16, 0.0 }
 0x7be   : > { %10506 = vst.msk [vmem:[%s17161_s29 + $0x18] sm:$0xff] %vm766_vm0, %v10490_v50  ;;  %v10487_v6 = vsel %vm10486_vm9, %v10390_v12, %v10439_v21 }
 0x7bf   : > { %10503 = vst.msk [vmem:[%s17161_s29] sm:$0xff] %vm766_vm0, %v10487_v6 }
 0x7c0   : > { %v10441_v42 = vpop.permute.xlu0 %10440 }
 0x7c1   : > { %v10488_v25 = vsel %vm10486_vm9, %v10391_v26, %v10441_v42 }
 0x7c2   : > { %10504 = vst.msk [vmem:[%s17161_s29 + $0x8] sm:$0xff] %vm766_vm0, %v10488_v25 }
 0x7d1   : > { %v11080_v34 = vpop.f32.mrf.mxu1 }
 0x7d2   : > { %v10416_v2 = vmax.f32 %v11080_v34, 0.0 }
 0x7d3   : > { %v10359_v63 = vpop.f32.mrf.mxu1 }
 0x7d4   : > { %10458 = vrot.lane.b32.xlu1 %v10416_v2, %s12113_s26  ;;  %v10414_v46 = vmax.f32 %v10359_v63, 0.0 }
 0x7d5   : > { %v11081_v31 = vpop.f32.mrf.mxu1 }
 0x7d6   : > { %v10417_v38 = vmax.f32 %v11081_v31, 0.0 }
 0x7d7   : > { %v10362_v10 = vpop.f32.mrf.mxu1 }
 0x7d8   : > { %10454 = vrot.lane.b32.xlu1 %v10414_v46, %s12113_s26  ;;  %10460 = vrot.lane.b32.xlu0 %v10417_v38, %s12113_s26  ;;  %v10415_v1 = vmax.f32 %v10362_v10, 0.0 }
 0x7dc   : > { %10456 = vrot.lane.b32.xlu0 %v10415_v1, %s12113_s26 }
 0x7e0   : > { %v10451_v8 = vpop.permute.xlu1 %10450 }
 0x7e1   : > { %v10493_v29 = vsel %vm10486_vm9, %v10396_v7, %v10451_v8 }
 0x7e2   : > { %10509 = vst.msk [vmem:[%s17161_s29 + $0x30] sm:$0xff] %vm766_vm0, %v10493_v29 }
 0x7e4   : > { %v10453_v4 = vpop.permute.xlu0 %10452  ;;  %v10447_v56 = vpop.permute.xlu1 %10446 }
 0x7e5   : > { %v10494_v17 = vsel %vm10486_vm9, %v10397_v60, %v10453_v4  ;;  %v10491_v22 = vsel %vm10486_vm9, %v10394_v28, %v10447_v56 }
 0x7e6   : > { %10510 = vst.msk [vmem:[%s17161_s29 + $0x38] sm:$0xff] %vm766_vm0, %v10494_v17  ;;  %10507 = vst.msk [vmem:[%s17161_s29 + $0x20] sm:$0xff] %vm766_vm0, %v10491_v22 }
 0x7e8   : > { %v10449_v58 = vpop.permute.xlu0 %10448 }
 0x7e9   : > { %v10492_v40 = vsel %vm10486_vm9, %v10395_v30, %v10449_v58 }
 0x7ea   : > { %10508 = vst.msk [vmem:[%s17161_s29 + $0x28] sm:$0xff] %vm766_vm0, %v10492_v40 }
 0x811   : > { %v11084_v33 = vpop.f32.mrf.mxu1 }
 0x812   : > { %v10420_v37 = vmax.f32 %v11084_v33, 0.0 }
 0x813   : > { %v10375_v45 = vpop.f32.mrf.mxu1 }
 0x814   : > { %v10418_v11 = vmax.f32 %v10375_v45, 0.0 }
 0x815   : > { %v11085_v61 = vpop.f32.mrf.mxu1 }
 0x816   : > { %10462 = vrot.lane.b32.xlu1 %v10418_v11, %s12113_s26  ;;  %v10421_v23 = vmax.f32 %v11085_v61, 0.0 }
 0x817   : > { %v10378_v35 = vpop.f32.mrf.mxu1 }
 0x818   : > { %v10419_v51 = vmax.f32 %v10378_v35, 0.0 }
 0x81a   : > { %10466 = vrot.lane.b32.xlu1 %v10420_v37, %s12113_s26  ;;  %10464 = vrot.lane.b32.xlu0 %v10419_v51, %s12113_s26 }
 0x81e   : > { %10468 = vrot.lane.b32.xlu0 %v10421_v23, %s12113_s26 }
 0x846   : > { %v10459_v9 = vpop.permute.xlu1 %10458 }
 0x847   : > { %v10497_v24 = vsel %vm10486_vm9, %v10400_v32, %v10459_v9 }
 0x848   : > { %10513 = vst.msk [vmem:[%s17161_s29 + $0x50] sm:$0xff] %vm766_vm0, %v10497_v24 }
 0x84a   : > { %v10461_v57 = vpop.permute.xlu0 %10460  ;;  %v10455_v52 = vpop.permute.xlu1 %10454 }
 0x84b   : > { %v10498_v27 = vsel %vm10486_vm9, %v10401_v19, %v10461_v57  ;;  %v10495_v20 = vsel %vm10486_vm9, %v10398_v47, %v10455_v52 }
 0x84c   : > { %10514 = vst.msk [vmem:[%s17161_s29 + $0x58] sm:$0xff] %vm766_vm0, %v10498_v27  ;;  %10511 = vst.msk [vmem:[%s17161_s29 + $0x40] sm:$0xff] %vm766_vm0, %v10495_v20 }
 0x84e   : > { %v10457_v44 = vpop.permute.xlu0 %10456 }
 0x84f   : > { %v10496_v62 = vsel %vm10486_vm9, %v10399_v3, %v10457_v44 }
 0x850   : > { %10512 = vst.msk [vmem:[%s17161_s29 + $0x48] sm:$0xff] %vm766_vm0, %v10496_v62 }
 0x888   : > { %v10463_v0 = vpop.permute.xlu1 %10462 }
 0x889   : > { %v10499_v49 = vsel %vm10486_vm9, %v10402_v41, %v10463_v0 }
 0x88a   : > { %10515 = vst.msk [vmem:[%s17161_s29 + $0x60] sm:$0xff] %vm766_vm0, %v10499_v49 }
 0x88c   : > { %v10465_v36 = vpop.permute.xlu0 %10464  ;;  %v10467_v53 = vpop.permute.xlu1 %10466 }
 0x88d   : > { %v10500_v18 = vsel %vm10486_vm9, %v10403_v13, %v10465_v36  ;;  %v10501_v48 = vsel %vm10486_vm9, %v10404_v54, %v10467_v53 }
 0x88e   : > { %10516 = vst.msk [vmem:[%s17161_s29 + $0x68] sm:$0xff] %vm766_vm0, %v10500_v18  ;;  %10517 = vst.msk [vmem:[%s17161_s29 + $0x70] sm:$0xff] %vm766_vm0, %v10501_v48 }
 0x890   : > { %v10469_v15 = vpop.permute.xlu0 %10468 }
 0x891   : > { %v10502_v12 = vsel %vm10486_vm9, %v10405_v55, %v10469_v15 }
 0x892   : > { %10518 = vst.msk [vmem:[%s17161_s29 + $0x78] sm:$0xff] %vm766_vm0, %v10502_v12 }
 0x893 PF: > { %s16_s21 = sadd.s32 1, %s12109_s21  }
 0x894   : > { %p13_p5 = scmp.ge.s32.totalorder %s16_s21, 6  }
 0x896   :  { %15 = sbr.rel (!%p13_p5) target bundleno = 1 (0x1), region = 77 }

</bundles_post_ra>
